<compile_context>
chip_gen: v6e
topology: v6e:2x2x1
jax: 0.10.0
libtpu: 0.0.40
codegen_flags: <defaults>
</compile_context>

<pallas_src>
import jax
import jax.numpy as jnp
import numpy as np
from jax.experimental import pallas as pl
from jax.experimental.pallas import tpu as pltpu

N_EMBD = 384
BLOCK_SIZE = 8          # T (sequence length)
NUM_HEADS = 6
HEAD_SIZE = 64          # NUM_HEADS * HEAD_SIZE == N_EMBD


def mha_kernel(x_ref, wqkv_ref, wp_ref, bp_ref, attn_ref):
    Bt, T, C = x_ref.shape
    M = Bt * T

    # Fold (Bt, T) -> M rows so projections are full MXU passes.
    x = x_ref[...].reshape(M, C)
    xb = x.astype(jnp.bfloat16)

    # Fused Q/K/V projection: (M, C) @ (C, 3C), bf16 operands, f32 accumulation.
    qkv = jnp.dot(xb, wqkv_ref[...], preferred_element_type=jnp.float32)
    q = qkv[:, 0 * C:1 * C]          # lane-aligned slices (multiples of 128)
    k = qkv[:, 1 * C:2 * C]
    v = qkv[:, 2 * C:3 * C]

    scale = jnp.float32(C) ** 0.5    # C ** 0.5, exactly as in the source
    row = jax.lax.broadcasted_iota(jnp.int32, (T, T), 0)
    col = jax.lax.broadcasted_iota(jnp.int32, (T, T), 1)
    causal = (row >= col)[None, :, :]          # (1, T, T); hoisted out of head loop
    neg_inf = jnp.float32(-jnp.inf)

    # Output projection accumulated per head (no lane-unaligned concat).
    acc = jnp.zeros((M, C), dtype=jnp.float32)
    for h in range(NUM_HEADS):                 # static unroll over heads
        lo = h * HEAD_SIZE
        hi = lo + HEAD_SIZE
        qh = q[:, lo:hi].reshape(Bt, T, HEAD_SIZE)
        kh = k[:, lo:hi].reshape(Bt, T, HEAD_SIZE)
        vh = v[:, lo:hi].reshape(Bt, T, HEAD_SIZE)

        # Per-sequence scores; keep f32 (tiny matmuls, full precision).
        s = jnp.einsum("btd,bsd->bts", qh, kh,
                       preferred_element_type=jnp.float32) * scale
        s = jnp.where(causal, s, neg_inf)              # masked_fill(tril==0,-inf)
        s = s - jnp.max(s, axis=-1, keepdims=True)     # stable softmax
        e = jnp.exp(s)
        inv = pl.reciprocal(jnp.sum(e, axis=-1, keepdims=True), approx=True)
        p = e * inv
        # (attention-weight dropout: identity at inference)

        ctx = jnp.einsum("bts,bsd->btd", p, vh,
                         preferred_element_type=jnp.float32)   # (Bt, T, hs)
        acc = acc + jnp.dot(ctx.reshape(M, HEAD_SIZE).astype(jnp.bfloat16),
                            wp_ref[lo:hi, :],                  # sublane-aligned rows
                            preferred_element_type=jnp.float32)

    acc = acc + bp_ref[...].astype(jnp.float32)                # bias, added once
    attn_ref[...] = acc.reshape(Bt, T, C).astype(attn_ref.dtype)


def multiple_head_attention(x, wq, wk, wv, wp, bp, *, batch_tile=None):
    """x: (B, T, C) f32.  Linear weights pre-transposed to (in, out) so the
    kernel computes x @ W.  Returns (module_out, attn_out):
      module_out == dropout(x) == x at eval (the module's actual return value);
      attn_out   == proj(concat(heads(x))) computed by the Pallas kernel."""
    B, T, C = x.shape
    assert T == BLOCK_SIZE and C == N_EMBD and NUM_HEADS * HEAD_SIZE == C

    if batch_tile is None:
        divisors = [c for c in (64, 32, 16, 8, 4, 2, 1) if B % c == 0]
        # Prefer M = Bt*T >= 128 (full MXU rows) with >= 2 grid steps (megacore).
        batch_tile = next((c for c in divisors if c * T >= 128 and B // c >= 2),
                          divisors[0])
    Bt = batch_tile
    assert B % Bt == 0
    grid = (B // Bt,)

    # bf16 weights: halves weight HBM->VMEM traffic, enables bf16 MXU rate.
    wqkv_b = jnp.concatenate([wq, wk, wv], axis=1).astype(jnp.bfloat16)  # (C, 3C)
    wp_b = wp.astype(jnp.bfloat16)
    bp2 = bp.reshape(1, C).astype(jnp.float32)

    # Constant index maps -> weight blocks stay resident, not re-fetched per step.
    const = lambda shape: pl.BlockSpec(shape, lambda b: (0,) * len(shape))
    grid_spec = pltpu.PrefetchScalarGridSpec(
        num_scalar_prefetch=0,
        grid=grid,
        in_specs=[
            pl.BlockSpec((Bt, T, C), lambda b: (b, 0, 0)),   # x
            const((C, 3 * C)),                               # Wqkv (bf16, all heads)
            const((C, C)),                                   # Wproj (bf16)
            const((1, C)),                                   # bproj (f32)
        ],
        out_specs=pl.BlockSpec((Bt, T, C), lambda b: (b, 0, 0)),
    )

    attn_out = pl.pallas_call(
        mha_kernel,
        out_shape=jax.ShapeDtypeStruct((B, T, C), x.dtype),
        grid_spec=grid_spec,
        compiler_params=pltpu.CompilerParams(
            dimension_semantics=("parallel",)),
    )(x, wqkv_b, wp_b, bp2)

    # Module's actual return value: dropout(x) == x at inference.
    module_out = x
    return module_out, attn_out


def _reference(x, wqkv_b, wp_b, bp):
    """Pure-JAX reference with the same bf16 matmul casts as the kernel."""
    B, T, C = x.shape
    xb = x.reshape(B * T, C).astype(jnp.bfloat16)
    qkv = jnp.dot(xb, wqkv_b, preferred_element_type=jnp.float32)
    q = qkv[:, 0 * C:1 * C].reshape(B, T, C)
    k = qkv[:, 1 * C:2 * C].reshape(B, T, C)
    v = qkv[:, 2 * C:3 * C].reshape(B, T, C)
    scale = jnp.float32(C) ** 0.5
    mask = np.tril(np.ones((T, T), dtype=bool))
    outs = []
    for h in range(NUM_HEADS):
        lo, hi = h * HEAD_SIZE, (h + 1) * HEAD_SIZE
        wei = jnp.einsum("btd,bsd->bts", q[..., lo:hi], k[..., lo:hi],
                         preferred_element_type=jnp.float32) * scale
        wei = jnp.where(mask[None], wei, -jnp.inf)
        wei = jax.nn.softmax(wei, axis=-1)
        outs.append(jnp.einsum("bts,bsd->btd", wei, v[..., lo:hi],
                               preferred_element_type=jnp.float32))
    cat = jnp.concatenate(outs, axis=-1).reshape(B * T, C)
    proj = jnp.dot(cat.astype(jnp.bfloat16), wp_b,
                   preferred_element_type=jnp.float32) + bp
    return proj.reshape(B, T, C)


if __name__ == "__main__":
    key = jax.random.PRNGKey(0)
    kx, kq, kk, kv, kp, kb = jax.random.split(key, 6)

    B, T, C = 32, BLOCK_SIZE, N_EMBD
    x = jax.random.normal(kx, (B, T, C), dtype=jnp.float32)

    # Per-head nn.Linear(n_embd, head_size, bias=False) weights are (hs, C);
    # stack all heads and pre-transpose -> (C, NUM_HEADS*hs) so kernel does x @ W.
    def init_heads(k):
        w = 0.02 * jax.random.normal(k, (NUM_HEADS, HEAD_SIZE, N_EMBD), jnp.float32)
        return jnp.transpose(w, (2, 0, 1)).reshape(N_EMBD, NUM_HEADS * HEAD_SIZE)

    wq = init_heads(kq)
    wk = init_heads(kk)
    wv = init_heads(kv)
    # proj: nn.Linear(n_embd, n_embd) -> weight (C, C), bias (C,); pass W.T.
    wp = (0.02 * jax.random.normal(kp, (N_EMBD, N_EMBD), jnp.float32)).T
    bp = 0.02 * jax.random.normal(kb, (N_EMBD,), jnp.float32)

    module_out, attn_out = multiple_head_attention(x, wq, wk, wv, wp, bp)
    jax.block_until_ready((module_out, attn_out))

    # Module semantics: output == dropout(x) == x at inference.
    np.testing.assert_allclose(np.asarray(module_out), np.asarray(x), rtol=0, atol=0)

    # Kernel attention path vs. pure-JAX reference (same bf16 matmul casts;
    # tolerance covers bf16 rounding, accumulation order, approx reciprocal).
    wqkv_b = jnp.concatenate([wq, wk, wv], axis=1).astype(jnp.bfloat16)
    ref = _reference(x, wqkv_b, wp.astype(jnp.bfloat16), bp)
    np.testing.assert_allclose(np.asarray(attn_out), np.asarray(ref),
                               rtol=2e-2, atol=2e-2)
    print("KERNEL_OK")
</pallas_src>

<mosaic_0001>
module attributes {stable_mosaic.version = 11 : i64} {
  func.func @mha_kernel(%arg0: i32, %arg1: memref<16x8x384xf32, #tpu.memory_space<vmem>>, %arg2: memref<384x1152xbf16, #tpu.memory_space<vmem>>, %arg3: memref<384x384xbf16, #tpu.memory_space<vmem>>, %arg4: memref<1x384xf32, #tpu.memory_space<vmem>>, %arg5: memref<16x8x384xf32, #tpu.memory_space<vmem>>) attributes {dimension_semantics = [#tpu.dimension_semantics<parallel>], iteration_bounds = array<i64: 2>, scalar_prefetch = 0 : i64, scratch_operands = 0 : i64, tpu.core_type = #tpu.core_type<tc>, window_params = [{transform_indices = @transform_0, window_bounds = array<i64: 16, 8, 384>}, {pipeline_mode = #tpu.pipeline_mode<synchronous>, transform_indices = @transform_1, window_bounds = array<i64: 384, 1152>}, {pipeline_mode = #tpu.pipeline_mode<synchronous>, transform_indices = @transform_2, window_bounds = array<i64: 384, 384>}, {pipeline_mode = #tpu.pipeline_mode<synchronous>, transform_indices = @transform_3, window_bounds = array<i64: 1, 384>}, {transform_indices = @transform_4, window_bounds = array<i64: 16, 8, 384>}]} {
    %c0 = arith.constant 0 : index
    %c0_0 = arith.constant 0 : index
    %c0_1 = arith.constant 0 : index
    %0 = vector.load %arg1[%c0, %c0_0, %c0_1] : memref<16x8x384xf32, #tpu.memory_space<vmem>>, vector<16x8x384xf32>
    %1 = vector.shape_cast %0 : vector<16x8x384xf32> to vector<128x384xf32>
    %2 = arith.truncf %1 : vector<128x384xf32> to vector<128x384xbf16>
    %c0_2 = arith.constant 0 : index
    %c0_3 = arith.constant 0 : index
    %3 = vector.load %arg2[%c0_2, %c0_3] : memref<384x1152xbf16, #tpu.memory_space<vmem>>, vector<384x1152xbf16>
    %cst = arith.constant dense<0.000000e+00> : vector<128x1152xf32>
    %4 = tpu.matmul %2, %3, %cst {dimension_numbers = #tpu.dot_dimension_numbers<[1], [0], [0], [1], [0, 0, 1, 1], [], []>} : vector<128x384xbf16>, vector<384x1152xbf16>, vector<128x1152xf32> -> vector<128x1152xf32>
    %5 = vector.extract_strided_slice %4 {offsets = [0, 0], sizes = [128, 384], strides = [1, 1]} : vector<128x1152xf32> to vector<128x384xf32>
    %6 = vector.extract_strided_slice %4 {offsets = [0, 384], sizes = [128, 384], strides = [1, 1]} : vector<128x1152xf32> to vector<128x384xf32>
    %7 = vector.extract_strided_slice %4 {offsets = [0, 768], sizes = [128, 384], strides = [1, 1]} : vector<128x1152xf32> to vector<128x384xf32>
    %cst_4 = arith.constant 3.840000e+02 : f32
    %cst_5 = arith.constant 5.000000e-01 : f32
    %8 = math.powf %cst_4, %cst_5 : f32
    %9 = tpu.iota {dimensions = array<i32: 0>} : vector<8x8xi32>
    %10 = tpu.iota {dimensions = array<i32: 1>} : vector<8x8xi32>
    %11 = arith.cmpi sge, %9, %10 : vector<8x8xi32>
    %12 = vector.shape_cast %11 : vector<8x8xi1> to vector<1x8x8xi1>
    %cst_6 = arith.constant 0.000000e+00 : f32
    %13 = vector.broadcast %cst_6 : f32 to vector<128x384xf32>
    %14 = vector.extract_strided_slice %5 {offsets = [0, 0], sizes = [128, 64], strides = [1, 1]} : vector<128x384xf32> to vector<128x64xf32>
    %15 = vector.shape_cast %14 : vector<128x64xf32> to vector<16x8x64xf32>
    %16 = vector.extract_strided_slice %6 {offsets = [0, 0], sizes = [128, 64], strides = [1, 1]} : vector<128x384xf32> to vector<128x64xf32>
    %17 = vector.shape_cast %16 : vector<128x64xf32> to vector<16x8x64xf32>
    %18 = vector.extract_strided_slice %7 {offsets = [0, 0], sizes = [128, 64], strides = [1, 1]} : vector<128x384xf32> to vector<128x64xf32>
    %19 = vector.shape_cast %18 : vector<128x64xf32> to vector<16x8x64xf32>
    "tpu.trace_start"() <{level = 10 : i32, message = "btd,bsd->bts"}> : () -> ()
    %cst_7 = arith.constant dense<0.000000e+00> : vector<16x8x8xf32>
    %20 = tpu.matmul %15, %17, %cst_7 {dimension_numbers = #tpu.dot_dimension_numbers<[2], [2], [1], [1], [0, 0, 0, 1, 1, 1], [0], [0]>} : vector<16x8x64xf32>, vector<16x8x64xf32>, vector<16x8x8xf32> -> vector<16x8x8xf32>
    "tpu.trace_stop"() : () -> ()
    %21 = vector.broadcast %8 : f32 to vector<16x8x8xf32>
    %22 = arith.mulf %20, %21 : vector<16x8x8xf32>
    %cst_8 = arith.constant 0xFF800000 : f32
    %23 = vector.shape_cast %12 : vector<1x8x8xi1> to vector<1x8x8xi1>
    %24 = vector.broadcast %23 : vector<1x8x8xi1> to vector<16x8x8xi1>
    %25 = vector.broadcast %cst_8 : f32 to vector<16x8x8xf32>
    %26 = arith.select %24, %22, %25 : vector<16x8x8xi1>, vector<16x8x8xf32>
    %cst_9 = arith.constant dense<0xFF800000> : vector<16x8xf32>
    %27 = vector.multi_reduction <maximumf>, %26, %cst_9 [2] : vector<16x8x8xf32> to vector<16x8xf32>
    %28 = vector.shape_cast %27 : vector<16x8xf32> to vector<16x8x1xf32>
    %29 = vector.broadcast %28 : vector<16x8x1xf32> to vector<16x8x8xf32>
    %30 = arith.subf %26, %29 : vector<16x8x8xf32>
    %31 = math.exp %30 : vector<16x8x8xf32>
    %cst_10 = arith.constant dense<0.000000e+00> : vector<16x8xf32>
    %32 = vector.multi_reduction <add>, %31, %cst_10 [2] : vector<16x8x8xf32> to vector<16x8xf32>
    %33 = vector.shape_cast %32 : vector<16x8xf32> to vector<16x8x1xf32>
    %34 = tpu.reciprocal %33 {approx = true} : vector<16x8x1xf32> -> vector<16x8x1xf32>
    %35 = vector.broadcast %34 : vector<16x8x1xf32> to vector<16x8x8xf32>
    %36 = arith.mulf %31, %35 : vector<16x8x8xf32>
    "tpu.trace_start"() <{level = 10 : i32, message = "bts,bsd->btd"}> : () -> ()
    %cst_11 = arith.constant dense<0.000000e+00> : vector<16x8x64xf32>
    %37 = tpu.matmul %36, %19, %cst_11 {dimension_numbers = #tpu.dot_dimension_numbers<[2], [1], [1], [2], [0, 0, 0, 1, 1, 2], [0], [0]>} : vector<16x8x8xf32>, vector<16x8x64xf32>, vector<16x8x64xf32> -> vector<16x8x64xf32>
    "tpu.trace_stop"() : () -> ()
    %38 = vector.shape_cast %37 : vector<16x8x64xf32> to vector<128x64xf32>
    %39 = arith.truncf %38 : vector<128x64xf32> to vector<128x64xbf16>
    %c0_12 = arith.constant 0 : index
    %c0_13 = arith.constant 0 : index
    %40 = vector.load %arg3[%c0_12, %c0_13] : memref<384x384xbf16, #tpu.memory_space<vmem>>, vector<64x384xbf16>
    %cst_14 = arith.constant dense<0.000000e+00> : vector<128x384xf32>
    %41 = tpu.matmul %39, %40, %cst_14 {dimension_numbers = #tpu.dot_dimension_numbers<[1], [0], [0], [1], [0, 0, 1, 1], [], []>} : vector<128x64xbf16>, vector<64x384xbf16>, vector<128x384xf32> -> vector<128x384xf32>
    %42 = arith.addf %13, %41 : vector<128x384xf32>
    %43 = vector.extract_strided_slice %5 {offsets = [0, 64], sizes = [128, 64], strides = [1, 1]} : vector<128x384xf32> to vector<128x64xf32>
    %44 = vector.shape_cast %43 : vector<128x64xf32> to vector<16x8x64xf32>
    %45 = vector.extract_strided_slice %6 {offsets = [0, 64], sizes = [128, 64], strides = [1, 1]} : vector<128x384xf32> to vector<128x64xf32>
    %46 = vector.shape_cast %45 : vector<128x64xf32> to vector<16x8x64xf32>
    %47 = vector.extract_strided_slice %7 {offsets = [0, 64], sizes = [128, 64], strides = [1, 1]} : vector<128x384xf32> to vector<128x64xf32>
    %48 = vector.shape_cast %47 : vector<128x64xf32> to vector<16x8x64xf32>
    "tpu.trace_start"() <{level = 10 : i32, message = "btd,bsd->bts"}> : () -> ()
    %cst_15 = arith.constant dense<0.000000e+00> : vector<16x8x8xf32>
    %49 = tpu.matmul %44, %46, %cst_15 {dimension_numbers = #tpu.dot_dimension_numbers<[2], [2], [1], [1], [0, 0, 0, 1, 1, 1], [0], [0]>} : vector<16x8x64xf32>, vector<16x8x64xf32>, vector<16x8x8xf32> -> vector<16x8x8xf32>
    "tpu.trace_stop"() : () -> ()
    %50 = vector.broadcast %8 : f32 to vector<16x8x8xf32>
    %51 = arith.mulf %49, %50 : vector<16x8x8xf32>
    %cst_16 = arith.constant 0xFF800000 : f32
    %52 = vector.shape_cast %12 : vector<1x8x8xi1> to vector<1x8x8xi1>
    %53 = vector.broadcast %52 : vector<1x8x8xi1> to vector<16x8x8xi1>
    %54 = vector.broadcast %cst_16 : f32 to vector<16x8x8xf32>
    %55 = arith.select %53, %51, %54 : vector<16x8x8xi1>, vector<16x8x8xf32>
    %cst_17 = arith.constant dense<0xFF800000> : vector<16x8xf32>
    %56 = vector.multi_reduction <maximumf>, %55, %cst_17 [2] : vector<16x8x8xf32> to vector<16x8xf32>
    %57 = vector.shape_cast %56 : vector<16x8xf32> to vector<16x8x1xf32>
    %58 = vector.broadcast %57 : vector<16x8x1xf32> to vector<16x8x8xf32>
    %59 = arith.subf %55, %58 : vector<16x8x8xf32>
    %60 = math.exp %59 : vector<16x8x8xf32>
    %cst_18 = arith.constant dense<0.000000e+00> : vector<16x8xf32>
    %61 = vector.multi_reduction <add>, %60, %cst_18 [2] : vector<16x8x8xf32> to vector<16x8xf32>
    %62 = vector.shape_cast %61 : vector<16x8xf32> to vector<16x8x1xf32>
    %63 = tpu.reciprocal %62 {approx = true} : vector<16x8x1xf32> -> vector<16x8x1xf32>
    %64 = vector.broadcast %63 : vector<16x8x1xf32> to vector<16x8x8xf32>
    %65 = arith.mulf %60, %64 : vector<16x8x8xf32>
    "tpu.trace_start"() <{level = 10 : i32, message = "bts,bsd->btd"}> : () -> ()
    %cst_19 = arith.constant dense<0.000000e+00> : vector<16x8x64xf32>
    %66 = tpu.matmul %65, %48, %cst_19 {dimension_numbers = #tpu.dot_dimension_numbers<[2], [1], [1], [2], [0, 0, 0, 1, 1, 2], [0], [0]>} : vector<16x8x8xf32>, vector<16x8x64xf32>, vector<16x8x64xf32> -> vector<16x8x64xf32>
    "tpu.trace_stop"() : () -> ()
    %67 = vector.shape_cast %66 : vector<16x8x64xf32> to vector<128x64xf32>
    %68 = arith.truncf %67 : vector<128x64xf32> to vector<128x64xbf16>
    %c64 = arith.constant 64 : index
    %c0_20 = arith.constant 0 : index
    %69 = vector.load %arg3[%c64, %c0_20] : memref<384x384xbf16, #tpu.memory_space<vmem>>, vector<64x384xbf16>
    %cst_21 = arith.constant dense<0.000000e+00> : vector<128x384xf32>
    %70 = tpu.matmul %68, %69, %cst_21 {dimension_numbers = #tpu.dot_dimension_numbers<[1], [0], [0], [1], [0, 0, 1, 1], [], []>} : vector<128x64xbf16>, vector<64x384xbf16>, vector<128x384xf32> -> vector<128x384xf32>
    %71 = arith.addf %42, %70 : vector<128x384xf32>
    %72 = vector.extract_strided_slice %5 {offsets = [0, 128], sizes = [128, 64], strides = [1, 1]} : vector<128x384xf32> to vector<128x64xf32>
    %73 = vector.shape_cast %72 : vector<128x64xf32> to vector<16x8x64xf32>
    %74 = vector.extract_strided_slice %6 {offsets = [0, 128], sizes = [128, 64], strides = [1, 1]} : vector<128x384xf32> to vector<128x64xf32>
    %75 = vector.shape_cast %74 : vector<128x64xf32> to vector<16x8x64xf32>
    %76 = vector.extract_strided_slice %7 {offsets = [0, 128], sizes = [128, 64], strides = [1, 1]} : vector<128x384xf32> to vector<128x64xf32>
    %77 = vector.shape_cast %76 : vector<128x64xf32> to vector<16x8x64xf32>
    "tpu.trace_start"() <{level = 10 : i32, message = "btd,bsd->bts"}> : () -> ()
    %cst_22 = arith.constant dense<0.000000e+00> : vector<16x8x8xf32>
    %78 = tpu.matmul %73, %75, %cst_22 {dimension_numbers = #tpu.dot_dimension_numbers<[2], [2], [1], [1], [0, 0, 0, 1, 1, 1], [0], [0]>} : vector<16x8x64xf32>, vector<16x8x64xf32>, vector<16x8x8xf32> -> vector<16x8x8xf32>
    "tpu.trace_stop"() : () -> ()
    %79 = vector.broadcast %8 : f32 to vector<16x8x8xf32>
    %80 = arith.mulf %78, %79 : vector<16x8x8xf32>
    %cst_23 = arith.constant 0xFF800000 : f32
    %81 = vector.shape_cast %12 : vector<1x8x8xi1> to vector<1x8x8xi1>
    %82 = vector.broadcast %81 : vector<1x8x8xi1> to vector<16x8x8xi1>
    %83 = vector.broadcast %cst_23 : f32 to vector<16x8x8xf32>
    %84 = arith.select %82, %80, %83 : vector<16x8x8xi1>, vector<16x8x8xf32>
    %cst_24 = arith.constant dense<0xFF800000> : vector<16x8xf32>
    %85 = vector.multi_reduction <maximumf>, %84, %cst_24 [2] : vector<16x8x8xf32> to vector<16x8xf32>
    %86 = vector.shape_cast %85 : vector<16x8xf32> to vector<16x8x1xf32>
    %87 = vector.broadcast %86 : vector<16x8x1xf32> to vector<16x8x8xf32>
    %88 = arith.subf %84, %87 : vector<16x8x8xf32>
    %89 = math.exp %88 : vector<16x8x8xf32>
    %cst_25 = arith.constant dense<0.000000e+00> : vector<16x8xf32>
    %90 = vector.multi_reduction <add>, %89, %cst_25 [2] : vector<16x8x8xf32> to vector<16x8xf32>
    %91 = vector.shape_cast %90 : vector<16x8xf32> to vector<16x8x1xf32>
    %92 = tpu.reciprocal %91 {approx = true} : vector<16x8x1xf32> -> vector<16x8x1xf32>
    %93 = vector.broadcast %92 : vector<16x8x1xf32> to vector<16x8x8xf32>
    %94 = arith.mulf %89, %93 : vector<16x8x8xf32>
    "tpu.trace_start"() <{level = 10 : i32, message = "bts,bsd->btd"}> : () -> ()
    %cst_26 = arith.constant dense<0.000000e+00> : vector<16x8x64xf32>
    %95 = tpu.matmul %94, %77, %cst_26 {dimension_numbers = #tpu.dot_dimension_numbers<[2], [1], [1], [2], [0, 0, 0, 1, 1, 2], [0], [0]>} : vector<16x8x8xf32>, vector<16x8x64xf32>, vector<16x8x64xf32> -> vector<16x8x64xf32>
    "tpu.trace_stop"() : () -> ()
    %96 = vector.shape_cast %95 : vector<16x8x64xf32> to vector<128x64xf32>
    %97 = arith.truncf %96 : vector<128x64xf32> to vector<128x64xbf16>
    %c128 = arith.constant 128 : index
    %c0_27 = arith.constant 0 : index
    %98 = vector.load %arg3[%c128, %c0_27] : memref<384x384xbf16, #tpu.memory_space<vmem>>, vector<64x384xbf16>
    %cst_28 = arith.constant dense<0.000000e+00> : vector<128x384xf32>
    %99 = tpu.matmul %97, %98, %cst_28 {dimension_numbers = #tpu.dot_dimension_numbers<[1], [0], [0], [1], [0, 0, 1, 1], [], []>} : vector<128x64xbf16>, vector<64x384xbf16>, vector<128x384xf32> -> vector<128x384xf32>
    %100 = arith.addf %71, %99 : vector<128x384xf32>
    %101 = vector.extract_strided_slice %5 {offsets = [0, 192], sizes = [128, 64], strides = [1, 1]} : vector<128x384xf32> to vector<128x64xf32>
    %102 = vector.shape_cast %101 : vector<128x64xf32> to vector<16x8x64xf32>
    %103 = vector.extract_strided_slice %6 {offsets = [0, 192], sizes = [128, 64], strides = [1, 1]} : vector<128x384xf32> to vector<128x64xf32>
    %104 = vector.shape_cast %103 : vector<128x64xf32> to vector<16x8x64xf32>
    %105 = vector.extract_strided_slice %7 {offsets = [0, 192], sizes = [128, 64], strides = [1, 1]} : vector<128x384xf32> to vector<128x64xf32>
    %106 = vector.shape_cast %105 : vector<128x64xf32> to vector<16x8x64xf32>
    "tpu.trace_start"() <{level = 10 : i32, message = "btd,bsd->bts"}> : () -> ()
    %cst_29 = arith.constant dense<0.000000e+00> : vector<16x8x8xf32>
    %107 = tpu.matmul %102, %104, %cst_29 {dimension_numbers = #tpu.dot_dimension_numbers<[2], [2], [1], [1], [0, 0, 0, 1, 1, 1], [0], [0]>} : vector<16x8x64xf32>, vector<16x8x64xf32>, vector<16x8x8xf32> -> vector<16x8x8xf32>
    "tpu.trace_stop"() : () -> ()
    %108 = vector.broadcast %8 : f32 to vector<16x8x8xf32>
    %109 = arith.mulf %107, %108 : vector<16x8x8xf32>
    %cst_30 = arith.constant 0xFF800000 : f32
    %110 = vector.shape_cast %12 : vector<1x8x8xi1> to vector<1x8x8xi1>
    %111 = vector.broadcast %110 : vector<1x8x8xi1> to vector<16x8x8xi1>
    %112 = vector.broadcast %cst_30 : f32 to vector<16x8x8xf32>
    %113 = arith.select %111, %109, %112 : vector<16x8x8xi1>, vector<16x8x8xf32>
    %cst_31 = arith.constant dense<0xFF800000> : vector<16x8xf32>
    %114 = vector.multi_reduction <maximumf>, %113, %cst_31 [2] : vector<16x8x8xf32> to vector<16x8xf32>
    %115 = vector.shape_cast %114 : vector<16x8xf32> to vector<16x8x1xf32>
    %116 = vector.broadcast %115 : vector<16x8x1xf32> to vector<16x8x8xf32>
    %117 = arith.subf %113, %116 : vector<16x8x8xf32>
    %118 = math.exp %117 : vector<16x8x8xf32>
    %cst_32 = arith.constant dense<0.000000e+00> : vector<16x8xf32>
    %119 = vector.multi_reduction <add>, %118, %cst_32 [2] : vector<16x8x8xf32> to vector<16x8xf32>
    %120 = vector.shape_cast %119 : vector<16x8xf32> to vector<16x8x1xf32>
    %121 = tpu.reciprocal %120 {approx = true} : vector<16x8x1xf32> -> vector<16x8x1xf32>
    %122 = vector.broadcast %121 : vector<16x8x1xf32> to vector<16x8x8xf32>
    %123 = arith.mulf %118, %122 : vector<16x8x8xf32>
    "tpu.trace_start"() <{level = 10 : i32, message = "bts,bsd->btd"}> : () -> ()
    %cst_33 = arith.constant dense<0.000000e+00> : vector<16x8x64xf32>
    %124 = tpu.matmul %123, %106, %cst_33 {dimension_numbers = #tpu.dot_dimension_numbers<[2], [1], [1], [2], [0, 0, 0, 1, 1, 2], [0], [0]>} : vector<16x8x8xf32>, vector<16x8x64xf32>, vector<16x8x64xf32> -> vector<16x8x64xf32>
    "tpu.trace_stop"() : () -> ()
    %125 = vector.shape_cast %124 : vector<16x8x64xf32> to vector<128x64xf32>
    %126 = arith.truncf %125 : vector<128x64xf32> to vector<128x64xbf16>
    %c192 = arith.constant 192 : index
    %c0_34 = arith.constant 0 : index
    %127 = vector.load %arg3[%c192, %c0_34] : memref<384x384xbf16, #tpu.memory_space<vmem>>, vector<64x384xbf16>
    %cst_35 = arith.constant dense<0.000000e+00> : vector<128x384xf32>
    %128 = tpu.matmul %126, %127, %cst_35 {dimension_numbers = #tpu.dot_dimension_numbers<[1], [0], [0], [1], [0, 0, 1, 1], [], []>} : vector<128x64xbf16>, vector<64x384xbf16>, vector<128x384xf32> -> vector<128x384xf32>
    %129 = arith.addf %100, %128 : vector<128x384xf32>
    %130 = vector.extract_strided_slice %5 {offsets = [0, 256], sizes = [128, 64], strides = [1, 1]} : vector<128x384xf32> to vector<128x64xf32>
    %131 = vector.shape_cast %130 : vector<128x64xf32> to vector<16x8x64xf32>
    %132 = vector.extract_strided_slice %6 {offsets = [0, 256], sizes = [128, 64], strides = [1, 1]} : vector<128x384xf32> to vector<128x64xf32>
    %133 = vector.shape_cast %132 : vector<128x64xf32> to vector<16x8x64xf32>
    %134 = vector.extract_strided_slice %7 {offsets = [0, 256], sizes = [128, 64], strides = [1, 1]} : vector<128x384xf32> to vector<128x64xf32>
    %135 = vector.shape_cast %134 : vector<128x64xf32> to vector<16x8x64xf32>
    "tpu.trace_start"() <{level = 10 : i32, message = "btd,bsd->bts"}> : () -> ()
    %cst_36 = arith.constant dense<0.000000e+00> : vector<16x8x8xf32>
    %136 = tpu.matmul %131, %133, %cst_36 {dimension_numbers = #tpu.dot_dimension_numbers<[2], [2], [1], [1], [0, 0, 0, 1, 1, 1], [0], [0]>} : vector<16x8x64xf32>, vector<16x8x64xf32>, vector<16x8x8xf32> -> vector<16x8x8xf32>
    "tpu.trace_stop"() : () -> ()
    %137 = vector.broadcast %8 : f32 to vector<16x8x8xf32>
    %138 = arith.mulf %136, %137 : vector<16x8x8xf32>
    %cst_37 = arith.constant 0xFF800000 : f32
    %139 = vector.shape_cast %12 : vector<1x8x8xi1> to vector<1x8x8xi1>
    %140 = vector.broadcast %139 : vector<1x8x8xi1> to vector<16x8x8xi1>
    %141 = vector.broadcast %cst_37 : f32 to vector<16x8x8xf32>
    %142 = arith.select %140, %138, %141 : vector<16x8x8xi1>, vector<16x8x8xf32>
    %cst_38 = arith.constant dense<0xFF800000> : vector<16x8xf32>
    %143 = vector.multi_reduction <maximumf>, %142, %cst_38 [2] : vector<16x8x8xf32> to vector<16x8xf32>
    %144 = vector.shape_cast %143 : vector<16x8xf32> to vector<16x8x1xf32>
    %145 = vector.broadcast %144 : vector<16x8x1xf32> to vector<16x8x8xf32>
    %146 = arith.subf %142, %145 : vector<16x8x8xf32>
    %147 = math.exp %146 : vector<16x8x8xf32>
    %cst_39 = arith.constant dense<0.000000e+00> : vector<16x8xf32>
    %148 = vector.multi_reduction <add>, %147, %cst_39 [2] : vector<16x8x8xf32> to vector<16x8xf32>
    %149 = vector.shape_cast %148 : vector<16x8xf32> to vector<16x8x1xf32>
    %150 = tpu.reciprocal %149 {approx = true} : vector<16x8x1xf32> -> vector<16x8x1xf32>
    %151 = vector.broadcast %150 : vector<16x8x1xf32> to vector<16x8x8xf32>
    %152 = arith.mulf %147, %151 : vector<16x8x8xf32>
    "tpu.trace_start"() <{level = 10 : i32, message = "bts,bsd->btd"}> : () -> ()
    %cst_40 = arith.constant dense<0.000000e+00> : vector<16x8x64xf32>
    %153 = tpu.matmul %152, %135, %cst_40 {dimension_numbers = #tpu.dot_dimension_numbers<[2], [1], [1], [2], [0, 0, 0, 1, 1, 2], [0], [0]>} : vector<16x8x8xf32>, vector<16x8x64xf32>, vector<16x8x64xf32> -> vector<16x8x64xf32>
    "tpu.trace_stop"() : () -> ()
    %154 = vector.shape_cast %153 : vector<16x8x64xf32> to vector<128x64xf32>
    %155 = arith.truncf %154 : vector<128x64xf32> to vector<128x64xbf16>
    %c256 = arith.constant 256 : index
    %c0_41 = arith.constant 0 : index
    %156 = vector.load %arg3[%c256, %c0_41] : memref<384x384xbf16, #tpu.memory_space<vmem>>, vector<64x384xbf16>
    %cst_42 = arith.constant dense<0.000000e+00> : vector<128x384xf32>
    %157 = tpu.matmul %155, %156, %cst_42 {dimension_numbers = #tpu.dot_dimension_numbers<[1], [0], [0], [1], [0, 0, 1, 1], [], []>} : vector<128x64xbf16>, vector<64x384xbf16>, vector<128x384xf32> -> vector<128x384xf32>
    %158 = arith.addf %129, %157 : vector<128x384xf32>
    %159 = vector.extract_strided_slice %5 {offsets = [0, 320], sizes = [128, 64], strides = [1, 1]} : vector<128x384xf32> to vector<128x64xf32>
    %160 = vector.shape_cast %159 : vector<128x64xf32> to vector<16x8x64xf32>
    %161 = vector.extract_strided_slice %6 {offsets = [0, 320], sizes = [128, 64], strides = [1, 1]} : vector<128x384xf32> to vector<128x64xf32>
    %162 = vector.shape_cast %161 : vector<128x64xf32> to vector<16x8x64xf32>
    %163 = vector.extract_strided_slice %7 {offsets = [0, 320], sizes = [128, 64], strides = [1, 1]} : vector<128x384xf32> to vector<128x64xf32>
    %164 = vector.shape_cast %163 : vector<128x64xf32> to vector<16x8x64xf32>
    "tpu.trace_start"() <{level = 10 : i32, message = "btd,bsd->bts"}> : () -> ()
    %cst_43 = arith.constant dense<0.000000e+00> : vector<16x8x8xf32>
    %165 = tpu.matmul %160, %162, %cst_43 {dimension_numbers = #tpu.dot_dimension_numbers<[2], [2], [1], [1], [0, 0, 0, 1, 1, 1], [0], [0]>} : vector<16x8x64xf32>, vector<16x8x64xf32>, vector<16x8x8xf32> -> vector<16x8x8xf32>
    "tpu.trace_stop"() : () -> ()
    %166 = vector.broadcast %8 : f32 to vector<16x8x8xf32>
    %167 = arith.mulf %165, %166 : vector<16x8x8xf32>
    %cst_44 = arith.constant 0xFF800000 : f32
    %168 = vector.shape_cast %12 : vector<1x8x8xi1> to vector<1x8x8xi1>
    %169 = vector.broadcast %168 : vector<1x8x8xi1> to vector<16x8x8xi1>
    %170 = vector.broadcast %cst_44 : f32 to vector<16x8x8xf32>
    %171 = arith.select %169, %167, %170 : vector<16x8x8xi1>, vector<16x8x8xf32>
    %cst_45 = arith.constant dense<0xFF800000> : vector<16x8xf32>
    %172 = vector.multi_reduction <maximumf>, %171, %cst_45 [2] : vector<16x8x8xf32> to vector<16x8xf32>
    %173 = vector.shape_cast %172 : vector<16x8xf32> to vector<16x8x1xf32>
    %174 = vector.broadcast %173 : vector<16x8x1xf32> to vector<16x8x8xf32>
    %175 = arith.subf %171, %174 : vector<16x8x8xf32>
    %176 = math.exp %175 : vector<16x8x8xf32>
    %cst_46 = arith.constant dense<0.000000e+00> : vector<16x8xf32>
    %177 = vector.multi_reduction <add>, %176, %cst_46 [2] : vector<16x8x8xf32> to vector<16x8xf32>
    %178 = vector.shape_cast %177 : vector<16x8xf32> to vector<16x8x1xf32>
    %179 = tpu.reciprocal %178 {approx = true} : vector<16x8x1xf32> -> vector<16x8x1xf32>
    %180 = vector.broadcast %179 : vector<16x8x1xf32> to vector<16x8x8xf32>
    %181 = arith.mulf %176, %180 : vector<16x8x8xf32>
    "tpu.trace_start"() <{level = 10 : i32, message = "bts,bsd->btd"}> : () -> ()
    %cst_47 = arith.constant dense<0.000000e+00> : vector<16x8x64xf32>
    %182 = tpu.matmul %181, %164, %cst_47 {dimension_numbers = #tpu.dot_dimension_numbers<[2], [1], [1], [2], [0, 0, 0, 1, 1, 2], [0], [0]>} : vector<16x8x8xf32>, vector<16x8x64xf32>, vector<16x8x64xf32> -> vector<16x8x64xf32>
    "tpu.trace_stop"() : () -> ()
    %183 = vector.shape_cast %182 : vector<16x8x64xf32> to vector<128x64xf32>
    %184 = arith.truncf %183 : vector<128x64xf32> to vector<128x64xbf16>
    %c320 = arith.constant 320 : index
    %c0_48 = arith.constant 0 : index
    %185 = vector.load %arg3[%c320, %c0_48] : memref<384x384xbf16, #tpu.memory_space<vmem>>, vector<64x384xbf16>
    %cst_49 = arith.constant dense<0.000000e+00> : vector<128x384xf32>
    %186 = tpu.matmul %184, %185, %cst_49 {dimension_numbers = #tpu.dot_dimension_numbers<[1], [0], [0], [1], [0, 0, 1, 1], [], []>} : vector<128x64xbf16>, vector<64x384xbf16>, vector<128x384xf32> -> vector<128x384xf32>
    %187 = arith.addf %158, %186 : vector<128x384xf32>
    %c0_50 = arith.constant 0 : index
    %c0_51 = arith.constant 0 : index
    %188 = vector.load %arg4[%c0_50, %c0_51] : memref<1x384xf32, #tpu.memory_space<vmem>>, vector<1x384xf32>
    %189 = vector.broadcast %188 : vector<1x384xf32> to vector<128x384xf32>
    %190 = arith.addf %187, %189 : vector<128x384xf32>
    %191 = vector.shape_cast %190 : vector<128x384xf32> to vector<16x8x384xf32>
    %c0_52 = arith.constant 0 : index
    %c0_53 = arith.constant 0 : index
    %c0_54 = arith.constant 0 : index
    %192 = vector.load %arg5[%c0_52, %c0_53, %c0_54] : memref<16x8x384xf32, #tpu.memory_space<vmem>>, vector<16x8x384xf32>
    tpu.vector_store %arg5[%c0_52, %c0_53, %c0_54], %191 {strides = array<i32>} : memref<16x8x384xf32, #tpu.memory_space<vmem>>, vector<16x8x384xf32>,
    return
  }
  func.func @transform_0(%arg0: i32) -> (i32, i32, i32) {
    %c0_i32 = arith.constant 0 : i32
    %c0_i32_0 = arith.constant 0 : i32
    %c0_i32_1 = arith.constant 0 : i32
    return %arg0, %c0_i32, %c0_i32_0 : i32, i32, i32
  }
  func.func @transform_1(%arg0: i32) -> (i32, i32) {
    %c0_i32 = arith.constant 0 : i32
    %c0_i32_0 = arith.constant 0 : i32
    %c0_i32_1 = arith.constant 0 : i32
    return %c0_i32, %c0_i32_0 : i32, i32
  }
  func.func @transform_2(%arg0: i32) -> (i32, i32) {
    %c0_i32 = arith.constant 0 : i32
    %c0_i32_0 = arith.constant 0 : i32
    %c0_i32_1 = arith.constant 0 : i32
    return %c0_i32, %c0_i32_0 : i32, i32
  }
  func.func @transform_3(%arg0: i32) -> (i32, i32) {
    %c0_i32 = arith.constant 0 : i32
    %c0_i32_0 = arith.constant 0 : i32
    %c0_i32_1 = arith.constant 0 : i32
    return %c0_i32, %c0_i32_0 : i32, i32
  }
  func.func @transform_4(%arg0: i32) -> (i32, i32, i32) {
    %c0_i32 = arith.constant 0 : i32
    %c0_i32_0 = arith.constant 0 : i32
    %c0_i32_1 = arith.constant 0 : i32
    return %arg0, %c0_i32, %c0_i32_0 : i32, i32, i32
  }
}

</mosaic_0001>

<bundles_post_ra>
// kernel: tpu_custom_call.1
= control target key start
LH: loop header
LB: loop body
LE: loop exit
PB: predicated region body
PF: predicated region fallthrough
CT: control target
= control target key end

     0   :  { %9 = vsyncpa [#allocation3], 0  ;;  %s29257_s0 = inlined_call_operand.hbm [shape: f32[32,8,384], index: 0, kind: input, shape index: {}]   ;;  %s29258_s1 = inlined_call_operand.hbm [shape: bf16[384,1152], index: 1, kind: input, shape index: {}]   ;;  %s29259_s2 = inlined_call_operand.hbm [shape: bf16[384,384], index: 2, kind: input, shape index: {}]   ;;  %s29260_s3 = inlined_call_operand.vmem [shape: f32[1,384], index: 3, kind: input, shape index: {}]   ;;  %s29261_s4 = inlined_call_operand.hbm [shape: f32[32,8,384], index: 4, kind: output, shape index: {}]  }
   0x1   :  { %11 = vsyncpa [#allocation3 + $0x1], 0 }
   0x2   :  { %12 = vsyncpa [#allocation6], 0 }
   0x3   :  { %13 = vsyncpa [#allocation4], 0 }
   0x4   :  { %15 = vsyncpa [#allocation4 + $0x1], 0  ;;  %s24398_s15 = smov 0   ;;  %s24400_s16 = smov 0  }
   0x5   :  { %s24402_s17 = smov 0   ;;  %s24404_s18 = smov 0  }
   0x6 LB: > { %s24419_s19 = sadd.s32 4294967295, %s24355_s18   ;;  %s20956_s20 = sadd.s32 4294967294, %s24355_s18   ;;  %s24355_s18 = sphi %s24404_s18, %s30038_s18   ;;  %s24351_s17 = sphi %s24402_s17, %s30037_s17   ;;  %s24347_s16 = sphi %s24400_s16, %s30036_s16   ;;  %s24343_s15 = sphi %s24398_s15, %s30035_s15  }
   0x7   : > { %p41_p0 = scmp.ne.s32.totalorder %s24347_s16, %s24343_s15  ;;  %p29262_p1 = scmp.eq.s32.totalorder %s24419_s19, 0 }
   0x8   : > { %p134_p3 = scmp.eq.s32.totalorder %s20956_s20, 1  ;;  %p20957_p5 = scmp.ge.s32.totalorder %s24355_s18, 1 }
   0x9   : > { %p24428_p4 = por %p29262_p1, %p41_p0  ;;  %p141_p7 = scmp.lt.s32.totalorder %s24355_s18, 3 }
   0xa   : > { %p24433_p6 = por %p134_p3, %p41_p0  ;;  %s24357_s24 = smov [#allocation5]  }
   0xb   : > { %s29355_s21 = scalar_select %p24428_p4, 1, 0 }
   0xc   : > { %s29356_s22 = scalar_select %p24433_p6, 1, 0 }
   0xd   : > { %p24438_p8 = pnand %p20957_p5, %p141_p7  ;;  %s153_s25 = sshll.u32 %s24357_s24, 4  ;;  %s154_s25 = int_to_ptr.vmem [resolvable:$true] %s153_s25 }
   0xe   : > { %s24358_s27 = smov [#allocation7]   ;;  %s24218_s29 = scalar_lea.vmem %s154_s25, 27648 }
   0xf   : > { %s29357_s23 = scalar_select %p24438_p8, 1, 0 }
  0x10   : > { %p23348_p9 = pneg %p24438_p8  ;;  %s166_s28 = sshll.u32 %s24358_s27, 4  ;;  %s167_s28 = int_to_ptr.vmem [resolvable:$true] %s166_s28 }
  0x11   : > { %p24219_p13 = scmp.ne.s32.totalorder %s154_s25, %s24218_s29  ;;  %p24226_p5 = scmp.lt.s32.totalorder %s154_s25, %s154_s25 }
  0x12   : > { %p24447_p11 = pnand %p23348_p9, %p29262_p1  ;;  %p24227_p7 = scmp.lt.s32.totalorder %s24218_s29, %s24218_s29 }
  0x14   : > { %p24209_p12 = pneg %p24447_p11  ;;  %p24228_p10 = por %p24227_p7, %p24226_p5 }
  0x16   : > { %p24221_p0 = pnand %p24219_p13, %p24209_p12 }
  0x18   : > { %p24222_p3 = pneg %p24221_p0 }
  0x1a   : > { %p24229_p9 = pnand %p24228_p10, %p24222_p3 }
  0x1c   : > { %24232 = shalt.err (!%p24229_p9)
}
  0x1d   : > { %s24359_s30 = smov 576   ;;  %s24360_s5 = smov 36  }
  0x1e   : > { %23351 = dma.hbm_to_vmem [thread:$0]  (!%p24447_p11), %s29258_s1, 27648, %s154_s25, [#allocation6], %s24359_s30, %s24359_s30, %s24360_s5  }
  0x1f   : > { %s24244_s8 = scalar_lea.vmem %s167_s28, 9216  ;;  %p24252_p2 = scmp.lt.s32.totalorder %s167_s28, %s167_s28 }
  0x20   : > { %p24245_p1 = scmp.ne.s32.totalorder %s167_s28, %s24244_s8  ;;  %p24253_p6 = scmp.lt.s32.totalorder %s24244_s8, %s24244_s8 }
  0x22   : > { %p24247_p13 = pnand %p24245_p1, %p24209_p12  ;;  %p24254_p5 = por %p24253_p6, %p24252_p2 }
  0x24   : > { %p24248_p0 = pneg %p24247_p13 }
  0x26   : > { %p24255_p10 = pnand %p24254_p5, %p24248_p0 }
  0x28   : > { %24258 = shalt.err (!%p24255_p10)
}
  0x29   : > { %s24361_s9 = smov 192   ;;  %s24362_s10 = smov 12  }
  0x2a   : > { %23354 = dma.hbm_to_vmem [thread:$0]  (!%p24447_p11), %s29259_s2, 9216, %s167_s28, [#allocation6], %s24361_s9, %s24361_s9, %s24362_s10  }
  0x2b   : > { %s24470_s13 = sadd.s32 1, %s24355_s18   ;;  %s28_s20 = sadd.s32 1, %s24351_s17 }
  0x2c   : > { %s25_s14 = ssub.s32 %s24355_s18, %s24470_s13  ;;  %p35_p2 = scmp.ne.s32.totalorder %s24351_s17, %s24347_s16 }
  0x2d   : > { %p26_p1 = scmp.eq.s32.totalorder %s25_s14, 0  ;;  %p36_p6 = scmp.eq.s32.totalorder %s24355_s18, 0 }
  0x2e   : > { %p29359_p3 = scmp.eq.s32.totalorder %s24419_s19, 1  ;;  %p23365_p9 = scmp.lt.s32.totalorder %s24355_s18, 2 }
  0x2f   : > { %s24479_s24 = scalar_select %p26_p1, %s24351_s17, %s28_s20  }
  0x30   : > { %p37_p12 = por %p36_p6, %p35_p2  ;;  %p24483_p7 = por %p29359_p3, %p35_p2 }
  0x31   : > { %s183_s26 = sand.u32 1, %s24351_s17   ;;  %s23333_s28 = smul.u32 6144, %s24355_s18 }
  0x32   : > { %s29360_s25 = scalar_select %p24483_p7, 1, 0 }
  0x33   : > { %s23332_s27 = smul.u32 384, %s183_s26  ;;  %p24490_p11 = pnand %p23365_p9, %p37_p12 }
  0x34   : > { %s24497_s6 = scalar_lea.hbm %s29257_s0, %s23333_s28  ;;  %s24501_s9 = scalar_lea.sflag [#allocation3], %s183_s26 }
  0x35   : > { %s187_s7 = scalar_lea.vmem [#allocation2], %s23332_s27  ;;  %s24259_s10 = scalar_lea.hbm %s24497_s6, 6144 }
  0x36   : > { %s195_s8 = sshll.u32 %s187_s7, 4  ;;  %p24260_p13 = scmp.ne.s32.totalorder %s24497_s6, %s24259_s10  ;;  %s24499_s8 = int_to_ptr.vmem [resolvable:$true] %s195_s8 }
  0x37   : > { %p24261_p0 = pneg %p24490_p11  ;;  %s24264_s14 = scalar_lea.hbm %s29257_s0, 12288 }
  0x38   : > { %p24265_p1 = scmp.lt.s32.totalorder %s24497_s6, %s29257_s0  ;;  %p24266_p2 = scmp.lt.s32.totalorder %s24264_s14, %s24259_s10 }
  0x39   : > { %p24262_p5 = pnand %p24261_p0, %p24260_p13 }
  0x3a   : > { %p24267_p6 = por %p24266_p2, %p24265_p1 }
  0x3b   : > { %p24263_p10 = pneg %p24262_p5 }
  0x3d   : > { %p24268_p12 = pnand %p24267_p6, %p24263_p10 }
  0x3f   : > { %24271 = shalt.err (!%p24268_p12)
}
  0x40   : > { %s24272_s26 = scalar_lea.vmem %s24499_s8, 6144  ;;  %s24363_s27 = smov [#allocation2]  }
  0x41   : > { %p24273_p3 = scmp.ne.s32.totalorder %s24499_s8, %s24272_s26  ;;  %s24277_s30 = sshll.u32 %s24363_s27, 4  ;;  %s24278_s30 = int_to_ptr.vmem [resolvable:$false] %s24277_s30 }
  0x42   : > { %s24279_s5 = scalar_lea.vmem %s24278_s30, 12288  ;;  %p24280_p5 = scmp.lt.s32.totalorder %s24499_s8, %s24278_s30 }
  0x43   : > { %p24275_p9 = pnand %p24273_p3, %p24261_p0  ;;  %p24281_p7 = scmp.lt.s32.totalorder %s24279_s5, %s24272_s26 }
  0x45   : > { %p24276_p13 = pneg %p24275_p9  ;;  %p24282_p4 = por %p24281_p7, %p24280_p5 }
  0x47   : > { %p24283_p8 = pnand %p24282_p4, %p24276_p13 }
  0x49   : > { %24286 = shalt.err (!%p24283_p8)
}
  0x4a   : > { %s24364_s7 = smov 384   ;;  %s24365_s10 = smov 24  }
  0x4b   : > { %23358 = dma.hbm_to_vmem [thread:$0]  (!%p24490_p11), %s24497_s6, 6144, %s24499_s8, %s24501_s9, %s24364_s7, %s24364_s7, %s24365_s10  }
  0x4c   : > { %p29362_p0 = scmp.ne.s32.totalorder %s29357_s23, 0 }
  0x4e   : > { %207 = sbr.rel (%p29362_p0) target bundleno = 5388 (0x150c), region = 36 }
  0x53   : > { %s24525_s11 = sand.u32 1, %s24347_s16   ;;  %p29363_p4 = scmp.ne.s32.totalorder %s29355_s21, 0 }
  0x54   : > { %s23334_s12 = smul.u32 384, %s24525_s11  ;;  %s210_s14 = scalar_lea.sflag [#allocation3], %s24525_s11 }
  0x56   : > { %s24531_s20 = scalar_lea.vmem [#allocation2], %s23334_s12 }
  0x57   : > { %24330 = dma.done.wait (%p29363_p4), %s210_s14, 6144  }
  0x58   : > { %24332 = vsyncadd (%p29363_p4), %s210_s14, 4294961152  ;;  %p29364_p8 = scmp.eq.s32.totalorder %s24419_s19, 0 }
  0x5a   : > { %24334 = dma.done.wait (%p29364_p8), [#allocation6], 36864   ;;  %p29365_p7 = pmov %p29364_p8 }
  0x5b   : > { %v29266_v0 = vmov 0   ;;  %v23415_v1 = vld [vmem:[#allocation5 + $0x1fc] ss:$36 sps:$4 sm:$0xff]   ;;  %v23421_v5 = vld [vmem:[#allocation5 + $0x1b4] ss:$36 sps:$4 sm:$0xff]   ;;  %v254_v35 = vld [vmem:[%s24531_s20 + $0x28] sm:$0xff] }
  0x5c   : > { %24336 = vsyncadd (%p29365_p7), [#allocation6], 4294930432  ;;  %1810 = vmatprep.mubr.bf16.mxu1 %v29266_v0  ;;  %v23417_v2 = vld [vmem:[#allocation5 + $0x67c] ss:$36 sps:$4 sm:$0xff]   ;;  %1665 = vmatprep.subr.bf16.mxu0 %v23415_v1  ;;  %v23423_v6 = vld [vmem:[#allocation5 + $0x634] ss:$36 sps:$4 sm:$0xff]  }
  0x5d   : > { %v23419_v3 = vld [vmem:[#allocation5 + $0x1f8] ss:$36 sps:$4 sm:$0xff]   ;;  %1778 = vmatprep.subr.bf16.mxu1 %v23417_v2  ;;  %v23425_v7 = vld [vmem:[#allocation5 + $0x1b0] ss:$36 sps:$4 sm:$0xff]   ;;  %v23431_v11 = vld [vmem:[#allocation5 + $0x168] ss:$36 sps:$4 sm:$0xff]  }
  0x5e   : > { %v23420_v4 = vld [vmem:[#allocation5 + $0x678] ss:$36 sps:$4 sm:$0xff]   ;;  %1666 = vmatpush1.bf16.msra.mxu0 %v23419_v3  ;;  %v23426_v8 = vld [vmem:[#allocation5 + $0x630] ss:$36 sps:$4 sm:$0xff]   ;;  %v23432_v12 = vld [vmem:[#allocation5 + $0x5e8] ss:$36 sps:$4 sm:$0xff]  }
  0x5f   : > { %1779 = vmatpush1.bf16.msra.mxu1 %v23420_v4  ;;  %1667 = vmatprep.subr.bf16.mxu0 %v23421_v5  ;;  %v23427_v9 = vld [vmem:[#allocation5 + $0x16c] ss:$36 sps:$4 sm:$0xff]   ;;  %v23433_v13 = vld [vmem:[#allocation5 + $0x124] ss:$36 sps:$4 sm:$0xff]   ;;  %v23439_v17 = vld [vmem:[#allocation5 + $0xdc] ss:$36 sps:$4 sm:$0xff]  }
  0x60   : > { %1780 = vmatprep.subr.bf16.mxu1 %v23423_v6  ;;  %v23429_v10 = vld [vmem:[#allocation5 + $0x5ec] ss:$36 sps:$4 sm:$0xff]   ;;  %v23435_v14 = vld [vmem:[#allocation5 + $0x5a4] ss:$36 sps:$4 sm:$0xff]   ;;  %v23441_v18 = vld [vmem:[#allocation5 + $0x55c] ss:$36 sps:$4 sm:$0xff]  }
  0x61   : > { %v23437_v15 = vld [vmem:[#allocation5 + $0x120] ss:$36 sps:$4 sm:$0xff]   ;;  %v23443_v19 = vld [vmem:[#allocation5 + $0xd8] ss:$36 sps:$4 sm:$0xff]   ;;  %v23449_v23 = vld [vmem:[#allocation5 + $0x90] ss:$36 sps:$4 sm:$0xff]  }
  0x62   : > { %1668 = vmatpush1.bf16.msra.mxu0 %v23425_v7  ;;  %v23438_v16 = vld [vmem:[#allocation5 + $0x5a0] ss:$36 sps:$4 sm:$0xff]   ;;  %v23444_v20 = vld [vmem:[#allocation5 + $0x558] ss:$36 sps:$4 sm:$0xff]   ;;  %v23450_v24 = vld [vmem:[#allocation5 + $0x510] ss:$36 sps:$4 sm:$0xff]  }
  0x63   : > { %1781 = vmatpush1.bf16.msra.mxu1 %v23426_v8  ;;  %1669 = vmatprep.subr.bf16.mxu0 %v23427_v9  ;;  %v23445_v21 = vld [vmem:[#allocation5 + $0x94] ss:$36 sps:$4 sm:$0xff]   ;;  %v23451_v25 = vld [vmem:[#allocation5 + $0x4c] ss:$36 sps:$4 sm:$0xff]   ;;  %v23457_v29 = vld [vmem:[#allocation5 + $0x4] ss:$36 sps:$4 sm:$0xff]  }
  0x64   : > { %1782 = vmatprep.subr.bf16.mxu1 %v23429_v10  ;;  %v23447_v22 = vld [vmem:[#allocation5 + $0x514] ss:$36 sps:$4 sm:$0xff]   ;;  %v23453_v26 = vld [vmem:[#allocation5 + $0x4cc] ss:$36 sps:$4 sm:$0xff]   ;;  %v23459_v30 = vld [vmem:[#allocation5 + $0x484] ss:$36 sps:$4 sm:$0xff]  }
  0x65   : > { %v23455_v27 = vld [vmem:[#allocation5 + $0x48] ss:$36 sps:$4 sm:$0xff]   ;;  %v23461_v31 = vld [vmem:[#allocation5] ss:$36 sps:$4 sm:$0xff]   ;;  %v251_v34 = vld [vmem:[%s24531_s20 + $0x10] sm:$0xff]  ;;  %s24367_s21 = smov 64  }
  0x66   : > { %1670 = vmatpush1.bf16.msra.mxu0 %v23431_v11  ;;  %v23456_v28 = vld [vmem:[#allocation5 + $0x4c8] ss:$36 sps:$4 sm:$0xff]   ;;  %v23462_v32 = vld [vmem:[#allocation5 + $0x480] ss:$36 sps:$4 sm:$0xff]   ;;  %v24544_v37 = vpack.c.bf16 %v254_v35, %v251_v34  ;;  %v23468_v39 = vld [vmem:[#allocation5 + $0x438] ss:$36 sps:$4 sm:$0xff]  }
  0x67   : > { %1783 = vmatpush1.bf16.msra.mxu1 %v23432_v12  ;;  %1671 = vmatprep.subr.bf16.mxu0 %v23433_v13  ;;  %v23463_v33 = vld [vmem:[#allocation5 + $0x43c] ss:$36 sps:$4 sm:$0xff]   ;;  %v23467_v36 = vld [vmem:[#allocation5 + $0x204] ss:$36 sps:$4 sm:$0xff]   ;;  %v23469_v40 = vld [vmem:[#allocation5 + $0x3f4] ss:$36 sps:$4 sm:$0xff]  }
  0x68   : > { %1784 = vmatprep.subr.bf16.mxu1 %v23435_v14  ;;  %v23465_v38 = vld [vmem:[#allocation5 + $0x200] ss:$36 sps:$4 sm:$0xff]   ;;  %v23471_v42 = vld [vmem:[#allocation5 + $0x1b8] ss:$36 sps:$4 sm:$0xff]   ;;  %v23474_v43 = vld [vmem:[#allocation5 + $0x3f0] ss:$36 sps:$4 sm:$0xff]  }
  0x69   : > { %v23473_v41 = vld [vmem:[#allocation5 + $0x1bc] ss:$36 sps:$4 sm:$0xff]   ;;  %v23475_v44 = vld [vmem:[#allocation5 + $0x3ac] ss:$36 sps:$4 sm:$0xff]   ;;  %v23479_v47 = vld [vmem:[#allocation5 + $0x174] ss:$36 sps:$4 sm:$0xff]  }
  0x6a   : > { %1672 = vmatpush1.bf16.msra.mxu0 %v23437_v15  ;;  %v257_v45 = vld [vmem:[%s24531_s20 + $0x40] sm:$0xff]  ;;  %v260_v46 = vld [vmem:[%s24531_s20 + $0x58] sm:$0xff]  ;;  %v23477_v49 = vld [vmem:[#allocation5 + $0x170] ss:$36 sps:$4 sm:$0xff]   ;;  %vm2768_vm0 = vcmask 523264   ;;  %vm24369_vm1 = vmmov 0  }
  0x6b   : > { %1785 = vmatpush1.bf16.msra.mxu1 %v23438_v16  ;;  %1673 = vmatprep.subr.bf16.mxu0 %v23439_v17  ;;  %v24550_v48 = vpack.c.bf16 %v260_v46, %v257_v45  ;;  %v23480_v50 = vld [vmem:[#allocation5 + $0x3a8] ss:$36 sps:$4 sm:$0xff]   ;;  %v23486_v54 = vld [vmem:[#allocation5 + $0x360] ss:$36 sps:$4 sm:$0xff]   ;;  %v263_v56 = vld [vmem:[%s24531_s20 + $0x70] sm:$0xff]  ;;  %vm4019_vm3 = vcmask 64512  }
  0x6c   : > { %1786 = vmatprep.subr.bf16.mxu1 %v23441_v18  ;;  %v23481_v51 = vld [vmem:[#allocation5 + $0x364] ss:$36 sps:$4 sm:$0xff]   ;;  %v23485_v52 = vld [vmem:[#allocation5 + $0x12c] ss:$36 sps:$4 sm:$0xff]   ;;  %v23487_v55 = vld [vmem:[#allocation5 + $0x31c] ss:$36 sps:$4 sm:$0xff]  }
  0x6d   : > { %v23483_v53 = vld [vmem:[#allocation5 + $0x128] ss:$36 sps:$4 sm:$0xff]   ;;  %v253_v60 = vld [vmem:[%s24531_s20 + $0x20] sm:$0xff]  ;;  %v23492_v1 = vld [vmem:[#allocation5 + $0x318] ss:$36 sps:$4 sm:$0xff]   ;;  %s29019_s6 = scalar_lea.vmem [#allocation8], %s23334_s12 }
  0x6e   : > { %1674 = vmatpush1.bf16.msra.mxu0 %v23443_v19  ;;  %v266_v57 = vld [vmem:[%s24531_s20 + $0x88] sm:$0xff]  ;;  %v23489_v63 = vld [vmem:[#allocation5 + $0xe0] ss:$36 sps:$4 sm:$0xff]   ;;  %v23493_v2 = vld [vmem:[#allocation5 + $0x2d4] ss:$36 sps:$4 sm:$0xff]   ;;  %s23335_s8 = smul.u32 6144, %s24419_s19 }
  0x6f   : > { %1787 = vmatpush1.bf16.msra.mxu1 %v23444_v20  ;;  %1675 = vmatprep.subr.bf16.mxu0 %v23445_v21  ;;  %v23491_v58 = vld [vmem:[#allocation5 + $0xe4] ss:$36 sps:$4 sm:$0xff]   ;;  %v24560_v62 = vpack.c.bf16 %v266_v57, %v263_v56  ;;  %v23497_v3 = vld [vmem:[#allocation5 + $0x9c] ss:$36 sps:$4 sm:$0xff]   ;;  %v23498_v5 = vld [vmem:[#allocation5 + $0x2d0] ss:$36 sps:$4 sm:$0xff]  }
  0x70   : > { %1788 = vmatprep.subr.bf16.mxu1 %v23447_v22  ;;  %v250_v59 = vld [vmem:[%s24531_s20 + $0x8] sm:$0xff]  ;;  %v23495_v4 = vld [vmem:[#allocation5 + $0x98] ss:$36 sps:$4 sm:$0xff]   ;;  %v269_v7 = vld [vmem:[%s24531_s20 + $0xa0] sm:$0xff]  ;;  %s20864_s9 = sshll.u32 %s29019_s6, 4  ;;  %s29209_s26 = scalar_lea.hbm %s29261_s4, %s23335_s8  ;;  %s29211_s9 = int_to_ptr.vmem [resolvable:$true] %s20864_s9 }
  0x71   : > { %v24558_v61 = vpack.c.bf16 %v253_v60, %v250_v59  ;;  %v23499_v6 = vld [vmem:[#allocation5 + $0x28c] ss:$36 sps:$4 sm:$0xff]   ;;  %v272_v8 = vld [vmem:[%s24531_s20 + $0xb8] sm:$0xff]  ;;  %v23505_v13 = vld [vmem:[#allocation5 + $0x244] ss:$36 sps:$4 sm:$0xff]   ;;  %s20850_s27 = scalar_lea.sflag [#allocation4], %s24525_s11 }
  0x72   : > { %1676 = vmatpush1.bf16.msra.mxu0 %v23449_v23  ;;  %v23503_v9 = vld [vmem:[#allocation5 + $0x54] ss:$36 sps:$4 sm:$0xff]   ;;  %v24567_v10 = vpack.c.bf16 %v272_v8, %v269_v7  ;;  %v23504_v12 = vld [vmem:[#allocation5 + $0x288] ss:$36 sps:$4 sm:$0xff]   ;;  %v23510_v16 = vld [vmem:[#allocation5 + $0x240] ss:$36 sps:$4 sm:$0xff]  }
  0x73   : > { %1789 = vmatpush1.bf16.msra.mxu1 %v23450_v24  ;;  %1677 = vmatprep.subr.bf16.mxu0 %v23451_v25  ;;  %v23501_v11 = vld [vmem:[#allocation5 + $0x50] ss:$36 sps:$4 sm:$0xff]   ;;  %v23507_v15 = vld [vmem:[#allocation5 + $0x8] ss:$36 sps:$4 sm:$0xff]   ;;  %v249_v17 = vld [vmem:[%s24531_s20] sm:$0xff]  ;;  %s24287_s30 = scalar_lea.vmem %s29211_s9, 6144 }
  0x74   : > { %1790 = vmatprep.subr.bf16.mxu1 %v23453_v26  ;;  %1697 = vmatprep.mubr.bf16.mxu0 %v24558_v61  ;;  %v23509_v14 = vld [vmem:[#allocation5 + $0xc] ss:$36 sps:$4 sm:$0xff]   ;;  %v252_v18 = vld [vmem:[%s24531_s20 + $0x18] sm:$0xff]  ;;  %v23513_v21 = vld [vmem:[#allocation5 + $0x444] ss:$36 sps:$4 sm:$0xff]   ;;  %p24288_p11 = scmp.ne.s32.totalorder %s29211_s9, %s24287_s30  ;;  %p30032_p10 = scmp.ne.s32.totalorder %s29360_s25, 0 }
  0x75   : > { %v275_v19 = vld [vmem:[%s24531_s20 + $0xd0] sm:$0xff]  ;;  %v278_v20 = vld [vmem:[%s24531_s20 + $0xe8] sm:$0xff]  ;;  %v256_v23 = vld [vmem:[%s24531_s20 + $0x38] sm:$0xff]  ;;  %v24577_v25 = vpack.c.bf16 %v252_v18, %v249_v17  ;;  %s24370_s5 = smov [#allocation8]  }
  0x76   : > { %1678 = vmatpush1.bf16.msra.mxu0 %v23455_v27  ;;  %v23519_v22 = vld [vmem:[#allocation5 + $0x684] ss:$36 sps:$4 sm:$0xff]   ;;  %v259_v24 = vld [vmem:[%s24531_s20 + $0x50] sm:$0xff]  ;;  %v24579_v26 = vpack.c.bf16 %v278_v20, %v275_v19  ;;  %v23528_v35 = vld [vmem:[#allocation5 + $0x63c] ss:$36 sps:$4 sm:$0xff]   ;;  %p24289_p1 = pnand %p24288_p11, %p30032_p10  ;;  %s24291_s7 = sshll.u32 %s24370_s5, 4  ;;  %s24292_s7 = int_to_ptr.vmem [resolvable:$false] %s24291_s7 }
  0x77   : > { %1791 = vmatpush1.bf16.msra.mxu1 %v23456_v28  ;;  %1679 = vmatprep.subr.bf16.mxu0 %v23457_v29  ;;  %v23511_v27 = vld [vmem:[#allocation5 + $0x440] ss:$36 sps:$4 sm:$0xff]   ;;  %v23520_v45 = vld [vmem:[#allocation5 + $0x3b0] ss:$36 sps:$4 sm:$0xff]   ;;  %v268_v57 = vld [vmem:[%s24531_s20 + $0x98] sm:$0xff]  ;;  %s24293_s10 = scalar_lea.vmem %s24292_s7, 12288  ;;  %p24294_p6 = scmp.lt.s32.totalorder %s29211_s9, %s24292_s7 }
  0x78   : > { %1792 = vmatprep.subr.bf16.mxu1 %v23459_v30  ;;  %v23517_v28 = vld [vmem:[#allocation5 + $0x680] ss:$36 sps:$4 sm:$0xff]   ;;  %v24581_v30 = vpack.c.bf16 %v259_v24, %v256_v23  ;;  %v23546_v56 = vld [vmem:[#allocation5 + $0x5ac] ss:$36 sps:$4 sm:$0xff]   ;;  %v276_v23 = vld [vmem:[%s24531_s20 + $0xd8] sm:$0xff]  ;;  %p24290_p2 = pneg %p24289_p1  ;;  %p24295_p12 = scmp.lt.s32.totalorder %s24293_s10, %s24287_s30 }
  0x79   : > { %v23516_v29 = vld [vmem:[#allocation5 + $0x3fc] ss:$36 sps:$4 sm:$0xff]   ;;  %v23544_v59 = vld [vmem:[#allocation5 + $0x5a8] ss:$36 sps:$4 sm:$0xff]   ;;  %v23538_v18 = vld [vmem:[#allocation5 + $0x290] ss:$36 sps:$4 sm:$0xff]  }
  0x7a   : > { %1680 = vmatpush1.bf16.msra.mxu0 %v23461_v31  ;;  %v23514_v31 = vld [vmem:[#allocation5 + $0x3f8] ss:$36 sps:$4 sm:$0xff]   ;;  %v281_v34 = vld [vmem:[%s24531_s20 + $0x100] sm:$0xff]  ;;  %v23543_v20 = vld [vmem:[#allocation5 + $0x24c] ss:$36 sps:$4 sm:$0xff]   ;;  %p24296_p3 = por %p24295_p12, %p24294_p6 }
  0x7b   : > { %1793 = vmatpush1.bf16.msra.mxu1 %v23462_v32  ;;  %1681 = vmatprep.subr.bf16.mxu0 %v23463_v33  ;;  %v255_v32 = vld [vmem:[%s24531_s20 + $0x30] sm:$0xff]  ;;  %v258_v33 = vld [vmem:[%s24531_s20 + $0x48] sm:$0xff]  ;;  %v293_v7 = vld [vmem:[%s24531_s20 + $0x160] sm:$0xff] }
  0x7c   : > { %1891 = vmatprep.subr.bf16.mxu1 %v23467_v36  ;;  %v284_v36 = vld [vmem:[%s24531_s20 + $0x118] sm:$0xff]  ;;  %v23552_v8 = vld [vmem:[#allocation5 + $0x564] ss:$36 sps:$4 sm:$0xff]   ;;  %p24297_p9 = pnand %p24296_p3, %p24290_p2 }
  0x7d   : > { %v23559_v24 = vld [vmem:[#allocation5 + $0x518] ss:$36 sps:$4 sm:$0xff]  }
  0x7e   : > { %1811 = vmatmul.mubr.bf16.vlgmr.msra.gmra.mxu1 %v24544_v37  ;;  %1682 = vmatpush2.bf16.msra.mxu0 %v23468_v39  ;;  %v23526_v39 = vld [vmem:[#allocation5 + $0x638] ss:$36 sps:$4 sm:$0xff]  }
  0x7f   : > { %1892 = vmatpush1.bf16.msra.mxu1 %v23465_v38  ;;  %1683 = vmatprep.subr.bf16.mxu0 %v23469_v40  ;;  %v23522_v38 = vld [vmem:[#allocation5 + $0x3b4] ss:$36 sps:$4 sm:$0xff]   ;;  %v262_v40 = vld [vmem:[%s24531_s20 + $0x68] sm:$0xff] }
  0x80   : > { %1893 = vmatprep.subr.bf16.mxu1 %v23473_v41  ;;  %1820 = vmatprep.mubr.bf16.mxu1 %v29266_v0  ;;  %v265_v41 = vld [vmem:[%s24531_s20 + $0x80] sm:$0xff] }
  0x81   : > { %v24597_v46 = vpack.c.bf16 %v265_v41, %v262_v40  ;;  %v282_v40 = vld [vmem:[%s24531_s20 + $0x108] sm:$0xff] }
  0x82   : > { %1684 = vmatpush2.bf16.msra.mxu0 %v23474_v43  ;;  %v24593_v43 = vpack.c.bf16 %v258_v33, %v255_v32  ;;  %v23568_v32 = vld [vmem:[#allocation5 + $0x4d0] ss:$36 sps:$4 sm:$0xff]  }
  0x83   : > { %1894 = vmatpush1.bf16.msra.mxu1 %v23471_v42  ;;  %1685 = vmatprep.subr.bf16.mxu0 %v23475_v44  ;;  %v23537_v42 = vld [vmem:[#allocation5 + $0x5f4] ss:$36 sps:$4 sm:$0xff]   ;;  %v24595_v44 = vpack.c.bf16 %v284_v36, %v281_v34  ;;  %v23547_v34 = vld [vmem:[#allocation5 + $0x208] ss:$36 sps:$4 sm:$0xff]  }
  0x84   : > { %1895 = vmatprep.subr.bf16.mxu1 %v23479_v47  ;;  %v23525_v47 = vld [vmem:[#allocation5 + $0x36c] ss:$36 sps:$4 sm:$0xff]   ;;  %v23555_v36 = vld [vmem:[#allocation5 + $0x1c4] ss:$36 sps:$4 sm:$0xff]  }
  0x85   : > { %v23579_v41 = vld [vmem:[#allocation5 + $0x48c] ss:$36 sps:$4 sm:$0xff]  }
  0x86   : > { %1821 = vmatmul.mubr.bf16.gmra.mxu1 %v24550_v48  ;;  %1686 = vmatpush2.bf16.msra.mxu0 %v23480_v50  ;;  %v261_v50 = vld [vmem:[%s24531_s20 + $0x60] sm:$0xff] }
  0x87   : > { %1896 = vmatpush1.bf16.msra.mxu1 %v23477_v49  ;;  %1687 = vmatprep.subr.bf16.mxu0 %v23481_v51  ;;  %v23523_v49 = vld [vmem:[#allocation5 + $0x368] ss:$36 sps:$4 sm:$0xff]   ;;  %v264_v51 = vld [vmem:[%s24531_s20 + $0x78] sm:$0xff] }
  0x88   : > { %1897 = vmatprep.subr.bf16.mxu1 %v23485_v52  ;;  %1830 = vmatprep.mubr.bf16.mxu1 %v29266_v0  ;;  %v287_v52 = vld [vmem:[%s24531_s20 + $0x130] sm:$0xff]  ;;  %v24609_v60 = vpack.c.bf16 %v264_v51, %v261_v50  ;;  %v289_v50 = vld [vmem:[%s24531_s20 + $0x140] sm:$0xff] }
  0x8a   : > { %1688 = vmatpush2.bf16.msra.mxu0 %v23486_v54  ;;  %v290_v54 = vld [vmem:[%s24531_s20 + $0x148] sm:$0xff] }
  0x8b   : > { %1898 = vmatpush1.bf16.msra.mxu1 %v23483_v53  ;;  %1689 = vmatprep.subr.bf16.mxu0 %v23487_v55  ;;  %v23535_v53 = vld [vmem:[#allocation5 + $0x5f0] ss:$36 sps:$4 sm:$0xff]   ;;  %v23531_v55 = vld [vmem:[#allocation5 + $0x324] ss:$36 sps:$4 sm:$0xff]  }
  0x8c   : > { %1899 = vmatprep.subr.bf16.mxu1 %v23491_v58  ;;  %v271_v58 = vld [vmem:[%s24531_s20 + $0xb0] sm:$0xff] }
  0x8e   : > { %1831 = vmatmul.mubr.bf16.gmra.mxu1 %v24560_v62  ;;  %1690 = vmatpush2.bf16.msra.mxu0 %v23492_v1  ;;  %v23529_v1 = vld [vmem:[#allocation5 + $0x320] ss:$36 sps:$4 sm:$0xff]  }
  0x8f   : > { %1900 = vmatpush1.bf16.msra.mxu1 %v23489_v63  ;;  %1691 = vmatprep.subr.bf16.mxu0 %v23493_v2  ;;  %v24611_v63 = vpack.c.bf16 %v290_v54, %v287_v52  ;;  %v24613_v2 = vpack.c.bf16 %v271_v58, %v268_v57  ;;  %v23556_v52 = vld [vmem:[#allocation5 + $0x178] ss:$36 sps:$4 sm:$0xff]   ;;  %v23567_v58 = vld [vmem:[#allocation5 + $0xec] ss:$36 sps:$4 sm:$0xff]  }
  0x90   : > { %1901 = vmatprep.subr.bf16.mxu1 %v23497_v3  ;;  %1840 = vmatprep.mubr.bf16.mxu1 %v29266_v0  ;;  %v23534_v3 = vld [vmem:[#allocation5 + $0x2dc] ss:$36 sps:$4 sm:$0xff]   ;;  %v23564_v54 = vld [vmem:[#allocation5 + $0x134] ss:$36 sps:$4 sm:$0xff]  }
  0x91   : > { %v288_v57 = vld [vmem:[%s24531_s20 + $0x138] sm:$0xff] }
  0x92   : > { %1692 = vmatpush2.bf16.msra.mxu0 %v23498_v5  ;;  %v267_v5 = vld [vmem:[%s24531_s20 + $0x90] sm:$0xff] }
  0x93   : > { %1902 = vmatpush1.bf16.msra.mxu1 %v23495_v4  ;;  %1693 = vmatprep.subr.bf16.mxu0 %v23499_v6  ;;  %v23532_v4 = vld [vmem:[#allocation5 + $0x2d8] ss:$36 sps:$4 sm:$0xff]   ;;  %v270_v6 = vld [vmem:[%s24531_s20 + $0xa8] sm:$0xff] }
  0x94   : > { %1903 = vmatprep.subr.bf16.mxu1 %v23503_v9  ;;  %v296_v9 = vld [vmem:[%s24531_s20 + $0x178] sm:$0xff] }
  0x95   : > { %v24627_v17 = vpack.c.bf16 %v296_v9, %v293_v7  ;;  %v23571_v7 = vld [vmem:[#allocation5 + $0xa0] ss:$36 sps:$4 sm:$0xff]   ;;  %v294_v9 = vld [vmem:[%s24531_s20 + $0x168] sm:$0xff] }
  0x96   : > { %1841 = vmatmul.mubr.bf16.gmra.mxu1 %v24567_v10  ;;  %1694 = vmatpush2.bf16.msra.mxu0 %v23504_v12  ;;  %v23561_v12 = vld [vmem:[#allocation5 + $0x51c] ss:$36 sps:$4 sm:$0xff]  }
  0x97   : > { %1904 = vmatpush1.bf16.msra.mxu1 %v23501_v11  ;;  %1695 = vmatprep.subr.bf16.mxu0 %v23505_v13  ;;  %v23550_v11 = vld [vmem:[#allocation5 + $0x560] ss:$36 sps:$4 sm:$0xff]   ;;  %v23540_v13 = vld [vmem:[#allocation5 + $0x294] ss:$36 sps:$4 sm:$0xff]  }
  0x98   : > { %1905 = vmatprep.subr.bf16.mxu1 %v23509_v14  ;;  %1850 = vmatprep.mubr.bf16.mxu1 %v29266_v0  ;;  %v274_v14 = vld [vmem:[%s24531_s20 + $0xc8] sm:$0xff] }
  0x9a   : > { %1696 = vmatpush2.bf16.msra.mxu0 %v23510_v16  ;;  %v24625_v16 = vpack.c.bf16 %v270_v6, %v267_v5  ;;  %v23573_v6 = vld [vmem:[#allocation5 + $0xa4] ss:$36 sps:$4 sm:$0xff]  }
  0x9b   : > { %1906 = vmatpush1.bf16.msra.mxu1 %v23507_v15  ;;  %2004 = vmatprep.subr.bf16.mxu0 %v23519_v22  ;;  %v277_v15 = vld [vmem:[%s24531_s20 + $0xe0] sm:$0xff] }
  0x9c   : > { %1907 = vmatprep.subr.bf16.mxu1 %v23513_v21  ;;  %v24629_v19 = vpack.c.bf16 %v277_v15, %v274_v14  ;;  %v23541_v21 = vld [vmem:[#allocation5 + $0x248] ss:$36 sps:$4 sm:$0xff]   ;;  %v273_v22 = vld [vmem:[%s24531_s20 + $0xc0] sm:$0xff]  ;;  %v23582_v14 = vld [vmem:[#allocation5 + $0x14] ss:$36 sps:$4 sm:$0xff]  }
  0x9d   : > { %1698 = vmatmul.mubr.bf16.vlgmr.msra.gmra.mxu0 %v24577_v25  ;;  %v24639_v33 = vpack.c.bf16 %v276_v23, %v273_v22  ;;  %v23580_v15 = vld [vmem:[#allocation5 + $0x10] ss:$36 sps:$4 sm:$0xff]   ;;  %v23588_v22 = vld [vmem:[#allocation5 + $0x404] ss:$36 sps:$4 sm:$0xff]  }
  0x9e   : > { %1851 = vmatmul.mubr.bf16.gmra.mxu1 %v24579_v26  ;;  %2005 = vmatpush1.bf16.msra.mxu0 %v23517_v28  ;;  %v23570_v28 = vld [vmem:[#allocation5 + $0x4d4] ss:$36 sps:$4 sm:$0xff]   ;;  %v23600_v23 = vld [vmem:[#allocation5 + $0x644] ss:$36 sps:$4 sm:$0xff]  }
  0x9f   : > { %1908 = vmatpush2.bf16.msra.mxu1 %v23511_v27  ;;  %1707 = vmatprep.mubr.bf16.mxu0 %v24581_v30  ;;  %v23549_v27 = vld [vmem:[#allocation5 + $0x20c] ss:$36 sps:$4 sm:$0xff]  }
  0xa0   : > { %1909 = vmatprep.subr.bf16.mxu1 %v23516_v29  ;;  %1860 = vmatprep.mubr.bf16.mxu1 %v29266_v0  ;;  %v280_v29 = vld [vmem:[%s24531_s20 + $0xf8] sm:$0xff] }
  0xa1   : > { %2006 = vmatprep.subr.bf16.mxu0 %v23528_v35 }
  0xa2   : > { %2007 = vmatpush1.bf16.msra.mxu0 %v23526_v39  ;;  %v279_v39 = vld [vmem:[%s24531_s20 + $0xf0] sm:$0xff] }
  0xa3   : > { %1910 = vmatpush2.bf16.msra.mxu1 %v23514_v31  ;;  %2008 = vmatprep.subr.bf16.mxu0 %v23537_v42  ;;  %v283_v31 = vld [vmem:[%s24531_s20 + $0x110] sm:$0xff]  ;;  %v23558_v42 = vld [vmem:[#allocation5 + $0x17c] ss:$36 sps:$4 sm:$0xff]   ;;  %v24651_v51 = vpack.c.bf16 %v282_v40, %v279_v39 }
  0xa4   : > { %1911 = vmatprep.subr.bf16.mxu1 %v23522_v38  ;;  %v24641_v35 = vpack.c.bf16 %v283_v31, %v280_v29  ;;  %v23553_v38 = vld [vmem:[#allocation5 + $0x1c0] ss:$36 sps:$4 sm:$0xff]   ;;  %v23592_v31 = vld [vmem:[#allocation5 + $0x3b8] ss:$36 sps:$4 sm:$0xff]   ;;  %v23603_v39 = vld [vmem:[#allocation5 + $0x32c] ss:$36 sps:$4 sm:$0xff]  }
  0xa5   : > { %1708 = vmatmul.mubr.bf16.gmra.mxu0 %v24593_v43  ;;  %v23609_v29 = vld [vmem:[#allocation5 + $0x5fc] ss:$36 sps:$4 sm:$0xff]   ;;  %v23616_v40 = vld [vmem:[#allocation5 + $0x5b0] ss:$36 sps:$4 sm:$0xff]  }
  0xa6   : > { %1861 = vmatmul.mubr.bf16.gmra.mxu1 %v24595_v44  ;;  %1717 = vmatprep.mubr.bf16.mxu0 %v24597_v46 }
  0xa7   : > { %1912 = vmatpush2.bf16.msra.mxu1 %v23520_v45  ;;  %1870 = vmatprep.mubr.bf16.mxu1 %v29266_v0  ;;  %v286_v45 = vld [vmem:[%s24531_s20 + $0x128] sm:$0xff] }
  0xa8   : > { %1913 = vmatprep.subr.bf16.mxu1 %v23525_v47  ;;  %2009 = vmatpush1.bf16.msra.mxu0 %v23535_v53  ;;  %v23577_v47 = vld [vmem:[#allocation5 + $0x488] ss:$36 sps:$4 sm:$0xff]   ;;  %v24653_v53 = vpack.c.bf16 %v289_v50, %v286_v45  ;;  %v23604_v45 = vld [vmem:[#allocation5 + $0x2e0] ss:$36 sps:$4 sm:$0xff]  }
  0xa9   : > { %2010 = vmatprep.subr.bf16.mxu0 %v23546_v56  ;;  %v285_v56 = vld [vmem:[%s24531_s20 + $0x120] sm:$0xff] }
  0xaa   : > { %v23633_v50 = vld [vmem:[#allocation5 + $0x524] ss:$36 sps:$4 sm:$0xff]  }
  0xab   : > { %1914 = vmatpush2.bf16.msra.mxu1 %v23523_v49  ;;  %v23591_v49 = vld [vmem:[#allocation5 + $0x68c] ss:$36 sps:$4 sm:$0xff]  }
  0xac   : > { %1915 = vmatprep.subr.bf16.mxu1 %v23531_v55  ;;  %2011 = vmatpush1.bf16.msra.mxu0 %v23544_v59  ;;  %v23562_v55 = vld [vmem:[#allocation5 + $0x130] ss:$36 sps:$4 sm:$0xff]   ;;  %v292_v59 = vld [vmem:[%s24531_s20 + $0x158] sm:$0xff] }
  0xad   : > { %1718 = vmatmul.mubr.bf16.gmra.mxu0 %v24609_v60  ;;  %2012 = vmatprep.subr.bf16.mxu0 %v23552_v8  ;;  %v291_v8 = vld [vmem:[%s24531_s20 + $0x150] sm:$0xff] }
  0xae   : > { %1871 = vmatmul.mubr.bf16.gmra.mxu1 %v24611_v63  ;;  %1727 = vmatprep.mubr.bf16.mxu0 %v24613_v2 }
  0xaf   : > { %1916 = vmatpush2.bf16.msra.mxu1 %v23529_v1  ;;  %1880 = vmatprep.mubr.bf16.mxu1 %v29266_v0  ;;  %v295_v1 = vld [vmem:[%s24531_s20 + $0x170] sm:$0xff] }
  0xb0   : > { %1917 = vmatprep.subr.bf16.mxu1 %v23534_v3  ;;  %2013 = vmatpush1.bf16.msra.mxu0 %v23550_v11  ;;  %v24663_v3 = vpack.c.bf16 %v288_v57, %v285_v56  ;;  %v24665_v5 = vpack.c.bf16 %v295_v1, %v292_v59  ;;  %v23576_v11 = vld [vmem:[#allocation5 + $0x5c] ss:$36 sps:$4 sm:$0xff]   ;;  %v23621_v59 = vld [vmem:[#allocation5 + $0x214] ss:$36 sps:$4 sm:$0xff]  }
  0xb1   : > { %2014 = vmatprep.subr.bf16.mxu0 %v23561_v12  ;;  %v24673_v12 = vpack.c.bf16 %v294_v9, %v291_v8  ;;  %v23631_v56 = vld [vmem:[#allocation5 + $0x520] ss:$36 sps:$4 sm:$0xff]   ;;  %v23640_v1 = vld [vmem:[#allocation5 + $0x4d8] ss:$36 sps:$4 sm:$0xff]   ;;  %v23625_v8 = vld [vmem:[#allocation5 + $0x1c8] ss:$36 sps:$4 sm:$0xff]  }
  0xb2   : > { %v23642_v57 = vld [vmem:[#allocation5 + $0x4dc] ss:$36 sps:$4 sm:$0xff]   ;;  %v23651_v9 = vld [vmem:[#allocation5 + $0x494] ss:$36 sps:$4 sm:$0xff]  }
  0xb3   : > { %1918 = vmatpush2.bf16.msra.mxu1 %v23532_v4  ;;  %v23565_v4 = vld [vmem:[#allocation5 + $0xe8] ss:$36 sps:$4 sm:$0xff]  }
  0xb4   : > { %1919 = vmatprep.subr.bf16.mxu1 %v23540_v13  ;;  %2015 = vmatpush1.bf16.msra.mxu0 %v23559_v24  ;;  %v23574_v13 = vld [vmem:[#allocation5 + $0x58] ss:$36 sps:$4 sm:$0xff]   ;;  %v23586_v24 = vld [vmem:[#allocation5 + $0x400] ss:$36 sps:$4 sm:$0xff]  }
  0xb5   : > { %1728 = vmatmul.mubr.bf16.gmra.mxu0 %v24625_v16  ;;  %2016 = vmatprep.subr.bf16.mxu0 %v23570_v28  ;;  %v23598_v28 = vld [vmem:[#allocation5 + $0x640] ss:$36 sps:$4 sm:$0xff]  }
  0xb6   : > { %1881 = vmatmul.mubr.bf16.gmra.mxu1 %v24627_v17  ;;  %1737 = vmatprep.mubr.bf16.mxu0 %v24629_v19 }
  0xb7   : > { %1920 = vmatpush2.bf16.msra.mxu1 %v23538_v18  ;;  %1923 = vmatprep.mubr.bf16.mxu1 %v24558_v61  ;;  %v23585_v18 = vld [vmem:[#allocation5 + $0x44c] ss:$36 sps:$4 sm:$0xff]  }
  0xb8   : > { %1921 = vmatprep.subr.bf16.mxu1 %v23543_v20  ;;  %2017 = vmatpush1.bf16.msra.mxu0 %v23568_v32  ;;  %v23583_v20 = vld [vmem:[#allocation5 + $0x448] ss:$36 sps:$4 sm:$0xff]   ;;  %v23597_v32 = vld [vmem:[#allocation5 + $0x374] ss:$36 sps:$4 sm:$0xff]  }
  0xb9   : > { %2018 = vmatprep.subr.bf16.mxu0 %v23579_v41  ;;  %v23601_v41 = vld [vmem:[#allocation5 + $0x328] ss:$36 sps:$4 sm:$0xff]  }
  0xbb   : > { %1922 = vmatpush2.bf16.msra.mxu1 %v23541_v21  ;;  %v23589_v21 = vld [vmem:[#allocation5 + $0x688] ss:$36 sps:$4 sm:$0xff]  }
  0xbc   : > { %2117 = vmatprep.subr.bf16.mxu1 %v23549_v27  ;;  %2019 = vmatpush1.bf16.msra.mxu0 %v23577_v47  ;;  %v23594_v27 = vld [vmem:[#allocation5 + $0x3bc] ss:$36 sps:$4 sm:$0xff]   ;;  %v23624_v47 = vld [vmem:[#allocation5 + $0x56c] ss:$36 sps:$4 sm:$0xff]  }
  0xbd   : > { %1738 = vmatmul.mubr.bf16.gmra.mxu0 %v24639_v33  ;;  %2230 = vmatprep.subr.bf16.mxu0 %v23591_v49  ;;  %v23622_v49 = vld [vmem:[#allocation5 + $0x568] ss:$36 sps:$4 sm:$0xff]  }
  0xbe   : > { %1924 = vmatmul.mubr.bf16.vlgmr.msra.gmra.mxu1 %v24577_v25  ;;  %1747 = vmatprep.mubr.bf16.mxu0 %v24641_v35 }
  0xbf   : > { %2118 = vmatpush1.bf16.msra.mxu1 %v23547_v34  ;;  %1933 = vmatprep.mubr.bf16.mxu1 %v24581_v30  ;;  %v23607_v34 = vld [vmem:[#allocation5 + $0x5f8] ss:$36 sps:$4 sm:$0xff]  }
  0xc0   : > { %2119 = vmatprep.subr.bf16.mxu1 %v23555_v36  ;;  %v23618_v36 = vld [vmem:[#allocation5 + $0x5b4] ss:$36 sps:$4 sm:$0xff]  }
  0xc3   : > { %2120 = vmatpush1.bf16.msra.mxu1 %v23553_v38  ;;  %v23595_v38 = vld [vmem:[#allocation5 + $0x370] ss:$36 sps:$4 sm:$0xff]  }
  0xc4   : > { %2121 = vmatprep.subr.bf16.mxu1 %v23558_v42  ;;  %v23606_v42 = vld [vmem:[#allocation5 + $0x2e4] ss:$36 sps:$4 sm:$0xff]  }
  0xc5   : > { %1748 = vmatmul.mubr.bf16.gmra.mxu0 %v24651_v51 }
  0xc6   : > { %1934 = vmatmul.mubr.bf16.gmra.mxu1 %v24593_v43  ;;  %1757 = vmatprep.mubr.bf16.mxu0 %v24653_v53 }
  0xc7   : > { %2122 = vmatpush1.bf16.msra.mxu1 %v23556_v52  ;;  %1943 = vmatprep.mubr.bf16.mxu1 %v24597_v46  ;;  %v23612_v52 = vld [vmem:[#allocation5 + $0x29c] ss:$36 sps:$4 sm:$0xff]  }
  0xc8   : > { %2123 = vmatprep.subr.bf16.mxu1 %v23564_v54  ;;  %v23610_v54 = vld [vmem:[#allocation5 + $0x298] ss:$36 sps:$4 sm:$0xff]  }
  0xcb   : > { %2124 = vmatpush1.bf16.msra.mxu1 %v23562_v55  ;;  %v23615_v55 = vld [vmem:[#allocation5 + $0x254] ss:$36 sps:$4 sm:$0xff]  }
  0xcc   : > { %2125 = vmatprep.subr.bf16.mxu1 %v23567_v58  ;;  %v23613_v58 = vld [vmem:[#allocation5 + $0x250] ss:$36 sps:$4 sm:$0xff]  }
  0xcd   : > { %1758 = vmatmul.mubr.bf16.gmra.mxu0 %v24663_v3 }
  0xce   : > { %1944 = vmatmul.mubr.bf16.gmra.mxu1 %v24609_v60  ;;  %1767 = vmatprep.mubr.bf16.mxu0 %v24665_v5 }
  0xcf   : > { %2126 = vmatpush1.bf16.msra.mxu1 %v23565_v4  ;;  %1953 = vmatprep.mubr.bf16.mxu1 %v24613_v2  ;;  %v23619_v4 = vld [vmem:[#allocation5 + $0x210] ss:$36 sps:$4 sm:$0xff]  }
  0xd0   : > { %2127 = vmatprep.subr.bf16.mxu1 %v23573_v6  ;;  %v23627_v6 = vld [vmem:[#allocation5 + $0x1cc] ss:$36 sps:$4 sm:$0xff]  }
  0xd3   : > { %2128 = vmatpush1.bf16.msra.mxu1 %v23571_v7  ;;  %v23649_v7 = vld [vmem:[#allocation5 + $0x490] ss:$36 sps:$4 sm:$0xff]  }
  0xd4   : > { %2129 = vmatprep.subr.bf16.mxu1 %v23576_v11  ;;  %v23630_v11 = vld [vmem:[#allocation5 + $0x184] ss:$36 sps:$4 sm:$0xff]  }
  0xd5   : > { %1768 = vmatmul.mubr.bf16.gmra.mxu0 %v24673_v12 }
  0xd6   : > { %1954 = vmatmul.mubr.bf16.gmra.mxu1 %v24625_v16  ;;  %2036 = vmatprep.mubr.bf16.mxu0 %v29266_v0 }
  0xd7   : > { %2130 = vmatpush1.bf16.msra.mxu1 %v23574_v13  ;;  %1963 = vmatprep.mubr.bf16.mxu1 %v24629_v19  ;;  %v23663_v13 = vld [vmem:[#allocation5 + $0x694] ss:$36 sps:$4 sm:$0xff]  }
  0xd8   : > { %2131 = vmatprep.subr.bf16.mxu1 %v23582_v14  ;;  %v23628_v14 = vld [vmem:[#allocation5 + $0x180] ss:$36 sps:$4 sm:$0xff]  }
  0xdb   : > { %2132 = vmatpush1.bf16.msra.mxu1 %v23580_v15  ;;  %v23636_v15 = vld [vmem:[#allocation5 + $0x13c] ss:$36 sps:$4 sm:$0xff]  }
  0xdc   : > { %2133 = vmatprep.subr.bf16.mxu1 %v23585_v18  ;;  %v23634_v18 = vld [vmem:[#allocation5 + $0x138] ss:$36 sps:$4 sm:$0xff]  }
  0xdd   : > { %2037 = vmatmul.mubr.bf16.vlgmr.msra.gmra.mxu0 %v24544_v37 }
  0xde   : > { %1964 = vmatmul.mubr.bf16.gmra.mxu1 %v24639_v33  ;;  %2231 = vmatpush1.bf16.msra.mxu0 %v23589_v21  ;;  %v23637_v21 = vld [vmem:[#allocation5 + $0xf0] ss:$36 sps:$4 sm:$0xff]  }
  0xdf   : > { %2134 = vmatpush2.bf16.msra.mxu1 %v23583_v20  ;;  %1973 = vmatprep.mubr.bf16.mxu1 %v24641_v35  ;;  %v23639_v20 = vld [vmem:[#allocation5 + $0xf4] ss:$36 sps:$4 sm:$0xff]  }
  0xe0   : > { %2135 = vmatprep.subr.bf16.mxu1 %v23588_v22  ;;  %2046 = vmatprep.mubr.bf16.mxu0 %v29266_v0  ;;  %v23645_v22 = vld [vmem:[#allocation5 + $0xac] ss:$36 sps:$4 sm:$0xff]  }
  0xe1   : > { %2232 = vmatprep.subr.bf16.mxu0 %v23600_v23  ;;  %v23643_v23 = vld [vmem:[#allocation5 + $0xa8] ss:$36 sps:$4 sm:$0xff]  }
  0xe2   : > { %2233 = vmatpush1.bf16.msra.mxu0 %v23598_v28  ;;  %v23654_v28 = vld [vmem:[#allocation5 + $0x1c] ss:$36 sps:$4 sm:$0xff]  }
  0xe3   : > { %2136 = vmatpush2.bf16.msra.mxu1 %v23586_v24  ;;  %2234 = vmatprep.subr.bf16.mxu0 %v23609_v29  ;;  %v23648_v24 = vld [vmem:[#allocation5 + $0x64] ss:$36 sps:$4 sm:$0xff]   ;;  %v23652_v29 = vld [vmem:[#allocation5 + $0x18] ss:$36 sps:$4 sm:$0xff]  }
  0xe4   : > { %2137 = vmatprep.subr.bf16.mxu1 %v23594_v27  ;;  %v23646_v27 = vld [vmem:[#allocation5 + $0x60] ss:$36 sps:$4 sm:$0xff]  }
  0xe5   : > { %2047 = vmatmul.mubr.bf16.gmra.mxu0 %v24550_v48 }
  0xe6   : > { %1974 = vmatmul.mubr.bf16.gmra.mxu1 %v24651_v51  ;;  %2056 = vmatprep.mubr.bf16.mxu0 %v29266_v0 }
  0xe7   : > { %2138 = vmatpush2.bf16.msra.mxu1 %v23592_v31  ;;  %1983 = vmatprep.mubr.bf16.mxu1 %v24653_v53  ;;  %v23657_v31 = vld [vmem:[#allocation5 + $0x454] ss:$36 sps:$4 sm:$0xff]  }
  0xe8   : > { %2139 = vmatprep.subr.bf16.mxu1 %v23597_v32  ;;  %2235 = vmatpush1.bf16.msra.mxu0 %v23607_v34  ;;  %v23655_v32 = vld [vmem:[#allocation5 + $0x450] ss:$36 sps:$4 sm:$0xff]  }
  0xe9   : > { %2236 = vmatprep.subr.bf16.mxu0 %v23618_v36  ;;  %v23661_v34 = vld [vmem:[#allocation5 + $0x690] ss:$36 sps:$4 sm:$0xff]  }
  0xea   : > { %v23660_v36 = vld [vmem:[#allocation5 + $0x40c] ss:$36 sps:$4 sm:$0xff]  }
  0xeb   : > { %2140 = vmatpush2.bf16.msra.mxu1 %v23595_v38  ;;  %v23672_v38 = vld [vmem:[#allocation5 + $0x64c] ss:$36 sps:$4 sm:$0xff]  }
  0xec   : > { %2141 = vmatprep.subr.bf16.mxu1 %v23603_v39  ;;  %2237 = vmatpush1.bf16.msra.mxu0 %v23616_v40  ;;  %v23658_v39 = vld [vmem:[#allocation5 + $0x408] ss:$36 sps:$4 sm:$0xff]  }
  0xed   : > { %2057 = vmatmul.mubr.bf16.gmra.mxu0 %v24560_v62  ;;  %2238 = vmatprep.subr.bf16.mxu0 %v23624_v47  ;;  %v23670_v40 = vld [vmem:[#allocation5 + $0x648] ss:$36 sps:$4 sm:$0xff]   ;;  %v23669_v47 = vld [vmem:[#allocation5 + $0x37c] ss:$36 sps:$4 sm:$0xff]  }
  0xee   : > { %1984 = vmatmul.mubr.bf16.gmra.mxu1 %v24663_v3  ;;  %2066 = vmatprep.mubr.bf16.mxu0 %v29266_v0 }
  0xef   : > { %2142 = vmatpush2.bf16.msra.mxu1 %v23601_v41  ;;  %1993 = vmatprep.mubr.bf16.mxu1 %v24665_v5  ;;  %v23666_v41 = vld [vmem:[#allocation5 + $0x3c4] ss:$36 sps:$4 sm:$0xff]  }
  0xf0   : > { %2143 = vmatprep.subr.bf16.mxu1 %v23606_v42  ;;  %2239 = vmatpush1.bf16.msra.mxu0 %v23622_v49  ;;  %v23681_v42 = vld [vmem:[#allocation5 + $0x604] ss:$36 sps:$4 sm:$0xff]  }
  0xf1   : > { %2240 = vmatprep.subr.bf16.mxu0 %v23633_v50  ;;  %v23679_v49 = vld [vmem:[#allocation5 + $0x600] ss:$36 sps:$4 sm:$0xff]  }
  0xf2   : > { %v23690_v50 = vld [vmem:[#allocation5 + $0x5bc] ss:$36 sps:$4 sm:$0xff]  }
  0xf3   : > { %2144 = vmatpush2.bf16.msra.mxu1 %v23604_v45  ;;  %v23664_v45 = vld [vmem:[#allocation5 + $0x3c0] ss:$36 sps:$4 sm:$0xff]  }
  0xf4   : > { %2145 = vmatprep.subr.bf16.mxu1 %v23612_v52  ;;  %2241 = vmatpush1.bf16.msra.mxu0 %v23631_v56  ;;  %v23667_v52 = vld [vmem:[#allocation5 + $0x378] ss:$36 sps:$4 sm:$0xff]   ;;  %v23673_v56 = vld [vmem:[#allocation5 + $0x330] ss:$36 sps:$4 sm:$0xff]  }
  0xf5   : > { %2067 = vmatmul.mubr.bf16.gmra.mxu0 %v24567_v10  ;;  %2242 = vmatprep.subr.bf16.mxu0 %v23642_v57  ;;  %v23678_v57 = vld [vmem:[#allocation5 + $0x2ec] ss:$36 sps:$4 sm:$0xff]  }
  0xf6   : > { %1994 = vmatmul.mubr.bf16.gmra.mxu1 %v24673_v12  ;;  %2076 = vmatprep.mubr.bf16.mxu0 %v29266_v0 }
  0xf7   : > { %2146 = vmatpush2.bf16.msra.mxu1 %v23610_v54  ;;  %2149 = vmatprep.mubr.bf16.mxu1 %v24558_v61  ;;  %v23675_v54 = vld [vmem:[#allocation5 + $0x334] ss:$36 sps:$4 sm:$0xff]  }
  0xf8   : > { %2147 = vmatprep.subr.bf16.mxu1 %v23615_v55  ;;  %2243 = vmatpush1.bf16.msra.mxu0 %v23640_v1  ;;  %v23688_v55 = vld [vmem:[#allocation5 + $0x5b8] ss:$36 sps:$4 sm:$0xff]   ;;  %v23676_v1 = vld [vmem:[#allocation5 + $0x2e8] ss:$36 sps:$4 sm:$0xff]  }
  0xf9   : > { %2244 = vmatprep.subr.bf16.mxu0 %v23651_v9  ;;  %v23694_v9 = vld [vmem:[#allocation5 + $0x528] ss:$36 sps:$4 sm:$0xff]  }
  0xfb   : > { %2148 = vmatpush2.bf16.msra.mxu1 %v23613_v58  ;;  %v23693_v58 = vld [vmem:[#allocation5 + $0x574] ss:$36 sps:$4 sm:$0xff]  }
  0xfc   : > { %2343 = vmatprep.subr.bf16.mxu1 %v23621_v59  ;;  %2245 = vmatpush1.bf16.msra.mxu0 %v23649_v7  ;;  %v23691_v59 = vld [vmem:[#allocation5 + $0x570] ss:$36 sps:$4 sm:$0xff]   ;;  %v23682_v7 = vld [vmem:[#allocation5 + $0x2a0] ss:$36 sps:$4 sm:$0xff]  }
  0xfd   : > { %2077 = vmatmul.mubr.bf16.gmra.mxu0 %v24579_v26  ;;  %2456 = vmatprep.subr.bf16.mxu0 %v23663_v13  ;;  %v23685_v13 = vld [vmem:[#allocation5 + $0x258] ss:$36 sps:$4 sm:$0xff]  }
  0xfe   : > { %2150 = vmatmul.mubr.bf16.vlgmr.msra.gmra.mxu1 %v24577_v25  ;;  %2086 = vmatprep.mubr.bf16.mxu0 %v29266_v0 }
  0xff   : > { %2344 = vmatpush1.bf16.msra.mxu1 %v23619_v4  ;;  %2159 = vmatprep.mubr.bf16.mxu1 %v24581_v30  ;;  %v23696_v4 = vld [vmem:[#allocation5 + $0x52c] ss:$36 sps:$4 sm:$0xff]  }
 0x100   : > { %2345 = vmatprep.subr.bf16.mxu1 %v23627_v6  ;;  %v23684_v6 = vld [vmem:[#allocation5 + $0x2a4] ss:$36 sps:$4 sm:$0xff]  }
 0x103   : > { %2346 = vmatpush1.bf16.msra.mxu1 %v23625_v8  ;;  %v23687_v8 = vld [vmem:[#allocation5 + $0x25c] ss:$36 sps:$4 sm:$0xff]  }
 0x104   : > { %2347 = vmatprep.subr.bf16.mxu1 %v23630_v11  ;;  %v23699_v11 = vld [vmem:[#allocation5 + $0x4e4] ss:$36 sps:$4 sm:$0xff]  }
 0x105   : > { %2087 = vmatmul.mubr.bf16.gmra.mxu0 %v24595_v44 }
 0x106   : > { %2160 = vmatmul.mubr.bf16.gmra.mxu1 %v24593_v43  ;;  %2096 = vmatprep.mubr.bf16.mxu0 %v29266_v0 }
 0x107   : > { %2348 = vmatpush1.bf16.msra.mxu1 %v23628_v14  ;;  %2169 = vmatprep.mubr.bf16.mxu1 %v24597_v46  ;;  %v23700_v14 = vld [vmem:[#allocation5 + $0x458] ss:$36 sps:$4 sm:$0xff]  }
 0x108   : > { %2349 = vmatprep.subr.bf16.mxu1 %v23636_v15  ;;  %v23697_v15 = vld [vmem:[#allocation5 + $0x4e0] ss:$36 sps:$4 sm:$0xff]  }
 0x10b   : > { %2350 = vmatpush1.bf16.msra.mxu1 %v23634_v18  ;;  %v23701_v18 = vld [vmem:[#allocation5 + $0x218] ss:$36 sps:$4 sm:$0xff]  }
 0x10c   : > { %2351 = vmatprep.subr.bf16.mxu1 %v23639_v20  ;;  %v23704_v20 = vld [vmem:[#allocation5 + $0x49c] ss:$36 sps:$4 sm:$0xff]  }
 0x10d   : > { %2097 = vmatmul.mubr.bf16.gmra.mxu0 %v24611_v63 }
 0x10e   : > { %2170 = vmatmul.mubr.bf16.gmra.mxu1 %v24609_v60  ;;  %2106 = vmatprep.mubr.bf16.mxu0 %v29266_v0 }
 0x10f   : > { %2352 = vmatpush1.bf16.msra.mxu1 %v23637_v21  ;;  %2179 = vmatprep.mubr.bf16.mxu1 %v24613_v2  ;;  %v23702_v21 = vld [vmem:[#allocation5 + $0x498] ss:$36 sps:$4 sm:$0xff]  }
 0x110   : > { %2353 = vmatprep.subr.bf16.mxu1 %v23645_v22  ;;  %v23705_v22 = vld [vmem:[#allocation5 + $0x410] ss:$36 sps:$4 sm:$0xff]  }
 0x113   : > { %2354 = vmatpush1.bf16.msra.mxu1 %v23643_v23 }
 0x114   : > { %2355 = vmatprep.subr.bf16.mxu1 %v23648_v24  ;;  %v24731_v24 = vld [vmem:[#allocation5 + $0x698] ss:$36 sps:$4 sm:$0xff]  }
 0x115   : > { %2107 = vmatmul.mubr.bf16.gmra.mxu0 %v24627_v17 }
 0x116   : > { %2180 = vmatmul.mubr.bf16.gmra.mxu1 %v24625_v16  ;;  %2262 = vmatprep.mubr.bf16.mxu0 %v29266_v0 }
 0x117   : > { %2356 = vmatpush1.bf16.msra.mxu1 %v23646_v27  ;;  %2189 = vmatprep.mubr.bf16.mxu1 %v24629_v19 }
 0x118   : > { %2357 = vmatprep.subr.bf16.mxu1 %v23654_v28  ;;  %v23706_v28 = vld [vmem:[#allocation5 + $0x1d0] ss:$36 sps:$4 sm:$0xff]  }
 0x11b   : > { %2358 = vmatpush1.bf16.msra.mxu1 %v23652_v29  ;;  %v23708_v29 = vld [vmem:[#allocation5 + $0x3c8] ss:$36 sps:$4 sm:$0xff]  }
 0x11c   : > { %2359 = vmatprep.subr.bf16.mxu1 %v23657_v31 }
 0x11d   : > { %2263 = vmatmul.mubr.bf16.vlgmr.msra.gmra.mxu0 %v24544_v37 }
 0x11e   : > { %2190 = vmatmul.mubr.bf16.gmra.mxu1 %v24639_v33  ;;  %2457 = vmatpush1.bf16.msra.mxu0 %v23661_v34  ;;  %v23709_v34 = vld [vmem:[#allocation5 + $0x188] ss:$36 sps:$4 sm:$0xff]  }
 0x11f   : > { %2360 = vmatpush2.bf16.msra.mxu1 %v23655_v32  ;;  %2199 = vmatprep.mubr.bf16.mxu1 %v24641_v35 }
 0x120   : > { %2361 = vmatprep.subr.bf16.mxu1 %v23660_v36  ;;  %2272 = vmatprep.mubr.bf16.mxu0 %v29266_v0  ;;  %v23710_v36 = vld [vmem:[#allocation5 + $0x380] ss:$36 sps:$4 sm:$0xff]  }
 0x121   : > { %2458 = vmatprep.subr.bf16.mxu0 %v23672_v38 }
 0x122   : > { %2459 = vmatpush1.bf16.msra.mxu0 %v23670_v40  ;;  %v23712_v40 = vld [vmem:[#allocation5 + $0x140] ss:$36 sps:$4 sm:$0xff]  }
 0x123   : > { %2362 = vmatpush2.bf16.msra.mxu1 %v23658_v39  ;;  %2460 = vmatprep.subr.bf16.mxu0 %v23681_v42 }
 0x124   : > { %2363 = vmatprep.subr.bf16.mxu1 %v23666_v41  ;;  %v23713_v41 = vld [vmem:[#allocation5 + $0x338] ss:$36 sps:$4 sm:$0xff]  }
 0x125   : > { %2273 = vmatmul.mubr.bf16.gmra.mxu0 %v24550_v48 }
 0x126   : > { %2200 = vmatmul.mubr.bf16.gmra.mxu1 %v24651_v51  ;;  %2282 = vmatprep.mubr.bf16.mxu0 %v29266_v0 }
 0x127   : > { %2364 = vmatpush2.bf16.msra.mxu1 %v23664_v45  ;;  %2209 = vmatprep.mubr.bf16.mxu1 %v24653_v53 }
 0x128   : > { %2365 = vmatprep.subr.bf16.mxu1 %v23669_v47  ;;  %2461 = vmatpush1.bf16.msra.mxu0 %v23679_v49  ;;  %v23714_v47 = vld [vmem:[#allocation5 + $0xf8] ss:$36 sps:$4 sm:$0xff]   ;;  %v23715_v49 = vld [vmem:[#allocation5 + $0x2f0] ss:$36 sps:$4 sm:$0xff]  }
 0x129   : > { %2462 = vmatprep.subr.bf16.mxu0 %v23690_v50 }
 0x12b   : > { %2366 = vmatpush2.bf16.msra.mxu1 %v23667_v52 }
 0x12c   : > { %2367 = vmatprep.subr.bf16.mxu1 %v23675_v54  ;;  %2463 = vmatpush1.bf16.msra.mxu0 %v23688_v55  ;;  %v23717_v54 = vld [vmem:[#allocation5 + $0xb0] ss:$36 sps:$4 sm:$0xff]   ;;  %v23718_v55 = vld [vmem:[#allocation5 + $0x2a8] ss:$36 sps:$4 sm:$0xff]  }
 0x12d   : > { %2283 = vmatmul.mubr.bf16.gmra.mxu0 %v24560_v62  ;;  %2464 = vmatprep.subr.bf16.mxu0 %v23693_v58  ;;  %v23719_v58 = vld [vmem:[#allocation5 + $0x68] ss:$36 sps:$4 sm:$0xff]  }
 0x12e   : > { %2210 = vmatmul.mubr.bf16.gmra.mxu1 %v24663_v3  ;;  %2292 = vmatprep.mubr.bf16.mxu0 %v29266_v0 }
 0x12f   : > { %2368 = vmatpush2.bf16.msra.mxu1 %v23673_v56  ;;  %2219 = vmatprep.mubr.bf16.mxu1 %v24665_v5 }
 0x130   : > { %2369 = vmatprep.subr.bf16.mxu1 %v23678_v57  ;;  %2465 = vmatpush1.bf16.msra.mxu0 %v23691_v59  ;;  %v23720_v59 = vld [vmem:[#allocation5 + $0x260] ss:$36 sps:$4 sm:$0xff]  }
 0x131   : > { %2466 = vmatprep.subr.bf16.mxu0 %v23696_v4 }
 0x133   : > { %2370 = vmatpush2.bf16.msra.mxu1 %v23676_v1 }
 0x134   : > { %2371 = vmatprep.subr.bf16.mxu1 %v23684_v6  ;;  %2467 = vmatpush1.bf16.msra.mxu0 %v23694_v9  ;;  %v23722_v6 = vld [vmem:[#allocation5 + $0x20] ss:$36 sps:$4 sm:$0xff]   ;;  %v24778_v9 = vld [vmem:[#allocation5 + $0x650] ss:$36 sps:$4 sm:$0xff]  }
 0x135   : > { %2293 = vmatmul.mubr.bf16.gmra.mxu0 %v24567_v10  ;;  %2468 = vmatprep.subr.bf16.mxu0 %v23699_v11 }
 0x136   : > { %2220 = vmatmul.mubr.bf16.gmra.mxu1 %v24673_v12  ;;  %2302 = vmatprep.mubr.bf16.mxu0 %v29266_v0 }
 0x137   : > { %2372 = vmatpush2.bf16.msra.mxu1 %v23682_v7  ;;  %2375 = vmatprep.mubr.bf16.mxu1 %v24558_v61 }
 0x138   : > { %2373 = vmatprep.subr.bf16.mxu1 %v23687_v8  ;;  %2469 = vmatpush1.bf16.msra.mxu0 %v23697_v15 }
 0x139   : > { %2470 = vmatprep.subr.bf16.mxu0 %v23704_v20  ;;  %v24794_v20 = vld [vmem:[#allocation5 + $0x608] ss:$36 sps:$4 sm:$0xff]  }
 0x13b   : > { %2374 = vmatpush2.bf16.msra.mxu1 %v23685_v13 }
 0x13c   : > { %21644 = vmatprep.subr.bf16.mxu1 %v23700_v14  ;;  %2471 = vmatpush1.bf16.msra.mxu0 %v23702_v21 }
 0x13d   : > { %2303 = vmatmul.mubr.bf16.gmra.mxu0 %v24579_v26  ;;  %22180 = vmatprep.subr.bf16.mxu0 %v24731_v24 }
 0x13e   : > { %v24727_v23 = vpop.f32.mrf.mxu1  ;;  %2376 = vmatmul.mubr.bf16.vlgmr.msra.gmra.mxu1 %v24577_v25  ;;  %2312 = vmatprep.mubr.bf16.mxu0 %v29266_v0 }
 0x13f   : > { %2385 = vmatprep.mubr.bf16.mxu1 %v24581_v30  ;;  %21645 = vmatpush3.bf16.msra.mxu1 %v23701_v18 }
 0x140   : > { %v24735_v27 = vpop.f32.mrf.mxu1  ;;  %21646 = vmatprep.subr.bf16.mxu1 %v23705_v22 }
 0x142   : > { %v24737_v31 = vpop.f32.mrf.mxu1 }
 0x143   : > { %21647 = vmatpush3.bf16.msra.mxu1 %v23706_v28 }
 0x144   : > { %v24740_v32 = vpop.f32.mrf.mxu1  ;;  %21648 = vmatprep.subr.bf16.mxu1 %v23708_v29 }
 0x145   : > { %2313 = vmatmul.mubr.bf16.gmra.mxu0 %v24595_v44 }
 0x146   : > { %v24742_v38 = vpop.f32.mrf.mxu1  ;;  %2386 = vmatmul.mubr.bf16.gmra.mxu1 %v24593_v43  ;;  %2322 = vmatprep.mubr.bf16.mxu0 %v29266_v0 }
 0x147   : > { %2395 = vmatprep.mubr.bf16.mxu1 %v24597_v46  ;;  %21649 = vmatpush3.bf16.msra.mxu1 %v23709_v34 }
 0x148   : > { %v24748_v39 = vpop.f32.mrf.mxu1  ;;  %21650 = vmatprep.subr.bf16.mxu1 %v23710_v36  ;;  %v24815_v36 = vld [vmem:[#allocation5 + $0x5c0] ss:$36 sps:$4 sm:$0xff]  }
 0x14a   : > { %v24750_v42 = vpop.f32.mrf.mxu1 }
 0x14b   : > { %21651 = vmatpush3.bf16.msra.mxu1 %v23712_v40 }
 0x14c   : > { %v24752_v45 = vpop.f32.mrf.mxu1  ;;  %21652 = vmatprep.subr.bf16.mxu1 %v23713_v41 }
 0x14d   : > { %2323 = vmatmul.mubr.bf16.gmra.mxu0 %v24611_v63 }
 0x14e   : > { %v24754_v50 = vpop.f32.mrf.mxu1  ;;  %2396 = vmatmul.mubr.bf16.gmra.mxu1 %v24609_v60  ;;  %2332 = vmatprep.mubr.bf16.mxu0 %v29266_v0 }
 0x14f   : > { %2405 = vmatprep.mubr.bf16.mxu1 %v24613_v2  ;;  %21653 = vmatpush3.bf16.msra.mxu1 %v23714_v47 }
 0x150   : > { %v24760_v52 = vpop.f32.mrf.mxu1  ;;  %21654 = vmatprep.subr.bf16.mxu1 %v23715_v49 }
 0x152   : > { %v24762_v56 = vpop.f32.mrf.mxu1 }
 0x153   : > { %21655 = vmatpush3.bf16.msra.mxu1 %v23717_v54  ;;  %v24833_v54 = vld [vmem:[#allocation5 + $0x578] ss:$36 sps:$4 sm:$0xff]  }
 0x154   : > { %v24764_v57 = vpop.f32.mrf.mxu1  ;;  %21656 = vmatprep.subr.bf16.mxu1 %v23718_v55 }
 0x155   : > { %2333 = vmatmul.mubr.bf16.gmra.mxu0 %v24627_v17 }
 0x156   : > { %v24766_v1 = vpop.f32.mrf.mxu1  ;;  %2406 = vmatmul.mubr.bf16.gmra.mxu1 %v24625_v16  ;;  %2488 = vmatprep.mubr.bf16.mxu0 %v29266_v0 }
 0x157   : > { %2415 = vmatprep.mubr.bf16.mxu1 %v24629_v19  ;;  %21657 = vmatpush3.bf16.msra.mxu1 %v23719_v58 }
 0x158   : > { %v24772_v4 = vpop.f32.mrf.mxu1  ;;  %21658 = vmatprep.subr.bf16.mxu1 %v23720_v59 }
 0x15a   : > { %v24774_v7 = vpop.f32.mrf.mxu1 }
 0x15b   : > { %21659 = vmatpush3.bf16.msra.mxu1 %v23722_v6 }
 0x15c   : > { %v24776_v8 = vpop.f32.mrf.mxu1  ;;  %23316 = vmatprep.subr.bf16.mxu1 %v24731_v24 }
 0x15d   : > { %v1699_v11 = vpop.f32.mrf.mxu0  ;;  %2489 = vmatmul.mubr.bf16.vlgmr.msra.gmra.mxu0 %v24544_v37 }
 0x15e   : > { %v24781_v13 = vpop.f32.mrf.mxu1  ;;  %2416 = vmatmul.mubr.bf16.gmra.mxu1 %v24639_v33  ;;  %v24786_v14 = vadd.f32 %v24727_v23, %v1699_v11  ;;  %22181 = vmatpush3.bf16.msra.mxu0 %v24731_v24 }
 0x15f   : > { %2425 = vmatprep.mubr.bf16.mxu1 %v24641_v35  ;;  %v1701_v15 = vpop.f32.mrf.mxu0  ;;  %2498 = vmatprep.mubr.bf16.mxu0 %v29266_v0 }
 0x160   : > { %v24790_v18 = vpop.f32.mrf.mxu1  ;;  %22182 = vmatprep.subr.bf16.mxu0 %v24778_v9  ;;  %v24797_v21 = vadd.f32 %v24735_v27, %v1701_v15  ;;  %5388 = vrot.lane.b32.xlu1 %v24786_v14, %s24367_s21 }
 0x161   : > { %v1703_v22 = vpop.f32.mrf.mxu0 }
 0x162   : > { %29366 = vst [vmem:[#allocation12_spill] sm:$0xff] %v24797_v21  ;;  %v24801_v23 = vpop.f32.mrf.mxu1  ;;  %v24804_v28 = vadd.f32 %v24737_v31, %v1703_v22  ;;  %22183 = vmatpush3.bf16.msra.mxu0 %v24778_v9 }
 0x163   : > { %v1705_v29 = vpop.f32.mrf.mxu0  ;;  %22184 = vmatprep.subr.bf16.mxu0 %v24794_v20 }
 0x164   : > { %v24807_v34 = vpop.f32.mrf.mxu1  ;;  %v24811_v27 = vadd.f32 %v24740_v32, %v1705_v29  ;;  %5466 = vrot.lane.b32.xlu1 %v24804_v28, %s24367_s21 }
 0x165   : > { %v1709_v40 = vpop.f32.mrf.mxu0  ;;  %2499 = vmatmul.mubr.bf16.gmra.mxu0 %v24550_v48 }
 0x166   : > { %29367 = vst [vmem:[#allocation13_spill] sm:$0xff] %v24811_v27  ;;  %v24817_v41 = vpop.f32.mrf.mxu1  ;;  %2426 = vmatmul.mubr.bf16.gmra.mxu1 %v24651_v51  ;;  %v24822_v31 = vadd.f32 %v24742_v38, %v1709_v40  ;;  %2508 = vmatprep.mubr.bf16.mxu0 %v29266_v0 }
 0x167   : > { %2435 = vmatprep.mubr.bf16.mxu1 %v24653_v53  ;;  %v1711_v32 = vpop.f32.mrf.mxu0  ;;  %22185 = vmatpush3.bf16.msra.mxu0 %v24794_v20 }
 0x168   : > { %v24826_v47 = vpop.f32.mrf.mxu1  ;;  %v24830_v49 = vadd.f32 %v24748_v39, %v1711_v32  ;;  %22186 = vmatprep.subr.bf16.mxu0 %v24815_v36  ;;  %v24847_v39 = vld [vmem:[#allocation5 + $0x530] ss:$36 sps:$4 sm:$0xff]   ;;  %v24865_v32 = vld [vmem:[#allocation5 + $0x4e8] ss:$36 sps:$4 sm:$0xff]  }
 0x169   : > { %v1713_v55 = vpop.f32.mrf.mxu0 }
 0x16a   : > { %29368 = vst [vmem:[#allocation14_spill] sm:$0xff] %v24830_v49  ;;  %v24835_v58 = vpop.f32.mrf.mxu1  ;;  %v24838_v38 = vadd.f32 %v24750_v42, %v1713_v55 }
 0x16b   : > { %v1715_v59 = vpop.f32.mrf.mxu0  ;;  %22187 = vmatpush3.bf16.msra.mxu0 %v24815_v36 }
 0x16c   : > { %v24840_v6 = vpop.f32.mrf.mxu1  ;;  %v24844_v11 = vadd.f32 %v24752_v45, %v1715_v59  ;;  %22188 = vmatprep.subr.bf16.mxu0 %v24833_v54 }
 0x16d   : > { %v1719_v15 = vpop.f32.mrf.mxu0  ;;  %2509 = vmatmul.mubr.bf16.gmra.mxu0 %v24560_v62 }
 0x16e   : > { %29369 = vst [vmem:[#allocation15_spill] sm:$0xff] %v24844_v11  ;;  %v24849_v22 = vpop.f32.mrf.mxu1  ;;  %2436 = vmatmul.mubr.bf16.gmra.mxu1 %v24663_v3  ;;  %v24854_v42 = vadd.f32 %v24754_v50, %v1719_v15  ;;  %2518 = vmatprep.mubr.bf16.mxu0 %v29266_v0 }
 0x16f   : > { %2445 = vmatprep.mubr.bf16.mxu1 %v24665_v5  ;;  %v1721_v45 = vpop.f32.mrf.mxu0  ;;  %22189 = vmatpush3.bf16.msra.mxu0 %v24833_v54 }
 0x170   : > { %v24858_v29 = vpop.f32.mrf.mxu1  ;;  %v24862_v40 = vadd.f32 %v24760_v52, %v1721_v45  ;;  %22190 = vmatprep.subr.bf16.mxu0 %v24847_v39  ;;  %v24879_v52 = vld [vmem:[#allocation5 + $0x4a0] ss:$36 sps:$4 sm:$0xff]  }
 0x171   : > { %v1723_v55 = vpop.f32.mrf.mxu0 }
 0x172   : > { %29370 = vst [vmem:[#allocation16_spill] sm:$0xff] %v24862_v40  ;;  %v24867_v59 = vpop.f32.mrf.mxu1  ;;  %v24870_v50 = vadd.f32 %v24762_v56, %v1723_v55  ;;  %v29373_v55 = vmov 0  }
 0x173   : > { %v1725_v15 = vpop.f32.mrf.mxu0  ;;  %22191 = vmatpush3.bf16.msra.mxu0 %v24847_v39 }
 0x174   : > { %29371 = vst [vmem:[#allocation17_spill] sm:$0xff] %v24870_v50  ;;  %v24872_v0 = vpop.f32.mrf.mxu1  ;;  %v24876_v11 = vadd.f32 %v24764_v57, %v1725_v15  ;;  %22192 = vmatprep.subr.bf16.mxu0 %v24865_v32  ;;  %v29275_v50 = vmov 0.0  }
 0x175   : > { %v1729_v45 = vpop.f32.mrf.mxu0  ;;  %2519 = vmatmul.mubr.bf16.gmra.mxu0 %v24567_v10 }
 0x176   : > { %29372 = vst [vmem:[#allocation18_spill] sm:$0xff] %v24876_v11  ;;  %v24881_v27 = vpop.f32.mrf.mxu1  ;;  %2446 = vmatmul.mubr.bf16.gmra.mxu1 %v24673_v12  ;;  %v24886_v56 = vadd.f32 %v24766_v1, %v1729_v45  ;;  %2528 = vmatprep.mubr.bf16.mxu0 %v29373_v55 }
 0x177   : > { %2601 = vmatprep.mubr.bf16.mxu1 %v24558_v61  ;;  %v1731_v57 = vpop.f32.mrf.mxu0  ;;  %22193 = vmatpush3.bf16.msra.mxu0 %v24865_v32 }
 0x178   : > { %v24890_v15 = vpop.f32.mrf.mxu1  ;;  %v24894_v11 = vadd.f32 %v24772_v4, %v1731_v57  ;;  %22194 = vmatprep.subr.bf16.mxu0 %v24879_v52 }
 0x179   : > { %v1733_v40 = vpop.f32.mrf.mxu0 }
 0x17a   : > { %29374 = vst [vmem:[#allocation19_spill] sm:$0xff] %v24894_v11  ;;  %v24897_v49 = vpop.f32.mrf.mxu1  ;;  %v24900_v1 = vadd.f32 %v24774_v7, %v1733_v40 }
 0x17b   : > { %v1735_v45 = vpop.f32.mrf.mxu0  ;;  %22195 = vmatpush3.bf16.msra.mxu0 %v24879_v52 }
 0x17c   : > { %v24902_v21 = vpop.f32.mrf.mxu1  ;;  %v24906_v61 = vadd.f32 %v24776_v8, %v1735_v45  ;;  %22212 = vmatprep.subr.mxu0 %v29275_v50 }
 0x17d   : > { %v1739_v4 = vpop.f32.mrf.mxu0  ;;  %2529 = vmatmul.mubr.bf16.gmra.mxu0 %v24579_v26 }
 0x17e   : > { %29375 = vst [vmem:[#allocation20_spill] sm:$0xff] %v24906_v61  ;;  %v24909_v57 = vpop.f32.mrf.mxu1  ;;  %2602 = vmatmul.mubr.bf16.vlgmr.msra.gmra.mxu1 %v24577_v25  ;;  %v24914_v7 = vadd.f32 %v24781_v13, %v1739_v4  ;;  %2538 = vmatprep.mubr.bf16.mxu0 %v29373_v55 }
 0x17f   : > { %2609 = vmatprep.mubr.bf16.mxu1 %v24581_v30  ;;  %v1741_v40 = vpop.f32.mrf.mxu0  ;;  %23324 = vmatpush3.bf16.msra.mxu1 %v24731_v24 }
 0x180   : > { %v24918_v8 = vpop.f32.mrf.mxu1  ;;  %v24922_v45 = vadd.f32 %v24790_v18, %v1741_v40  ;;  %23317 = vmatprep.subr.bf16.mxu1 %v24778_v9 }
 0x181   : > { %v1743_v50 = vpop.f32.mrf.mxu0 }
 0x182   : > { %29376 = vst [vmem:[#allocation21_spill] sm:$0xff] %v24922_v45  ;;  %v24925_v61 = vpop.f32.mrf.mxu1  ;;  %v24928_v25 = vadd.f32 %v24801_v23, %v1743_v50 }
 0x183   : > { %v1745_v13 = vpop.f32.mrf.mxu0  ;;  %23325 = vmatpush3.bf16.msra.mxu1 %v24778_v9 }
 0x184   : > { %v24930_v4 = vpop.f32.mrf.mxu1  ;;  %v24934_v30 = vadd.f32 %v24807_v34, %v1745_v13  ;;  %23318 = vmatprep.subr.bf16.mxu1 %v24794_v20 }
 0x185   : > { %v1749_v24 = vpop.f32.mrf.mxu0  ;;  %2539 = vmatmul.mubr.bf16.gmra.mxu0 %v24595_v44 }
 0x186   : > { %29377 = vst [vmem:[#allocation22_spill] sm:$0xff] %v24934_v30  ;;  %v24937_v18 = vpop.f32.mrf.mxu1  ;;  %2610 = vmatmul.mubr.bf16.gmra.mxu1 %v24593_v43  ;;  %v24942_v23 = vadd.f32 %v24817_v41, %v1749_v24  ;;  %2548 = vmatprep.mubr.bf16.mxu0 %v29373_v55 }
 0x187   : > { %2617 = vmatprep.mubr.bf16.mxu1 %v24597_v46  ;;  %v1751_v9 = vpop.f32.mrf.mxu0  ;;  %23326 = vmatpush3.bf16.msra.mxu1 %v24794_v20 }
 0x188   : > { %v24946_v50 = vpop.f32.mrf.mxu1  ;;  %v24950_v34 = vadd.f32 %v24826_v47, %v1751_v9  ;;  %23319 = vmatprep.subr.bf16.mxu1 %v24815_v36 }
 0x189   : > { %v1753_v40 = vpop.f32.mrf.mxu0 }
 0x18a   : > { %29378 = vst [vmem:[#allocation23_spill] sm:$0xff] %v24950_v34  ;;  %v24953_v13 = vpop.f32.mrf.mxu1  ;;  %v24956_v43 = vadd.f32 %v24835_v58, %v1753_v40 }
 0x18b   : > { %v1755_v41 = vpop.f32.mrf.mxu0  ;;  %23327 = vmatpush3.bf16.msra.mxu1 %v24815_v36 }
 0x18c   : > { %v24958_v24 = vpop.f32.mrf.mxu1  ;;  %v24962_v46 = vadd.f32 %v24840_v6, %v1755_v41  ;;  %23320 = vmatprep.subr.bf16.mxu1 %v24833_v54 }
 0x18d   : > { %v1759_v20 = vpop.f32.mrf.mxu0  ;;  %2549 = vmatmul.mubr.bf16.gmra.mxu0 %v24611_v63 }
 0x18e   : > { %29379 = vst [vmem:[#allocation24_spill] sm:$0xff] %v24962_v46  ;;  %v24965_v47 = vpop.f32.mrf.mxu1  ;;  %2618 = vmatmul.mubr.bf16.gmra.mxu1 %v24609_v60  ;;  %v24970_v58 = vadd.f32 %v24849_v22, %v1759_v20  ;;  %2558 = vmatprep.mubr.bf16.mxu0 %v29373_v55 }
 0x18f   : > { %2625 = vmatprep.mubr.bf16.mxu1 %v24613_v2  ;;  %v1761_v36 = vpop.f32.mrf.mxu0  ;;  %23328 = vmatpush3.bf16.msra.mxu1 %v24833_v54 }
 0x190   : > { %v24974_v9 = vpop.f32.mrf.mxu1  ;;  %v24978_v6 = vadd.f32 %v24858_v29, %v1761_v36  ;;  %23321 = vmatprep.subr.bf16.mxu1 %v24847_v39 }
 0x191   : > { %v1763_v40 = vpop.f32.mrf.mxu0 }
 0x192   : > { %29380 = vst [vmem:[#allocation25_spill] sm:$0xff] %v24978_v6  ;;  %v24981_v41 = vpop.f32.mrf.mxu1  ;;  %v24984_v60 = vadd.f32 %v24867_v59, %v1763_v40 }
 0x193   : > { %v1765_v22 = vpop.f32.mrf.mxu0  ;;  %23329 = vmatpush3.bf16.msra.mxu1 %v24847_v39 }
 0x194   : > { %v24986_v20 = vpop.f32.mrf.mxu1  ;;  %v24990_v2 = vadd.f32 %v24872_v0, %v1765_v22  ;;  %23322 = vmatprep.subr.bf16.mxu1 %v24865_v32 }
 0x195   : > { %v1769_v54 = vpop.f32.mrf.mxu0  ;;  %2559 = vmatmul.mubr.bf16.gmra.mxu0 %v24627_v17 }
 0x196   : > { %29381 = vst [vmem:[#allocation26_spill] sm:$0xff] %v24990_v2  ;;  %v24993_v29 = vpop.f32.mrf.mxu1  ;;  %2626 = vmatmul.mubr.bf16.gmra.mxu1 %v24625_v16  ;;  %v24998_v59 = vadd.f32 %v24881_v27, %v1769_v54  ;;  %22196 = vmatprep.mubr.bf16.mxu0 %v24544_v37 }
 0x197   : > { %2633 = vmatprep.mubr.bf16.mxu1 %v24629_v19  ;;  %v1771_v39 = vpop.f32.mrf.mxu0  ;;  %23330 = vmatpush3.bf16.msra.mxu1 %v24865_v32  ;;  %v29384_v32 = vmov 0.0  }
 0x198   : > { %v25002_v36 = vpop.f32.mrf.mxu1  ;;  %v25006_v0 = vadd.f32 %v24890_v15, %v1771_v39  ;;  %23323 = vmatprep.subr.bf16.mxu1 %v24879_v52 }
 0x199   : > { %v1773_v40 = vpop.f32.mrf.mxu0 }
 0x19a   : > { %29382 = vst [vmem:[#allocation27_spill] sm:$0xff] %v25006_v0  ;;  %v25009_v22 = vpop.f32.mrf.mxu1  ;;  %v25012_v16 = vadd.f32 %v24897_v49, %v1773_v40 }
 0x19b   : > { %v1775_v27 = vpop.f32.mrf.mxu0  ;;  %23331 = vmatpush3.bf16.msra.mxu1 %v24879_v52 }
 0x19c   : > { %v25014_v19 = vpop.f32.mrf.mxu1  ;;  %v25018_v37 = vadd.f32 %v24902_v21, %v1775_v27  ;;  %22217 = vmatprep.subr.mxu1 %v29384_v32 }
 0x19d   : > { %v2038_v54 = vpop.f32.mrf.mxu0  ;;  %22197 = vmatmul.mubr.bf16.vlgmr.msra.gmra.mxu0 %v24550_v48 }
 0x19e   : > { %29383 = vst [vmem:[#allocation28_spill] sm:$0xff] %v25018_v37  ;;  %v25021_v15 = vpop.f32.mrf.mxu1  ;;  %2634 = vmatmul.mubr.bf16.gmra.mxu1 %v24639_v33  ;;  %v25026_v49 = vadd.f32 %v2038_v54, %v24909_v57  ;;  %22200 = vmatprep.mubr.bf16.mxu0 %v24560_v62 }
 0x19f   : > { %2641 = vmatprep.mubr.bf16.mxu1 %v24641_v35  ;;  %v2040_v21 = vpop.f32.mrf.mxu0 }
 0x1a0   : > { %29385 = vst [vmem:[#allocation29_spill] sm:$0xff] %v25026_v49  ;;  %v25030_v52 = vpop.f32.mrf.mxu1  ;;  %v2041_v39 = vadd.f32 %v2040_v21, %v24918_v8 }
 0x1a1   : > { %v2042_v27 = vpop.f32.mrf.mxu0 }
 0x1a2   : > { %v25033_v40 = vpop.f32.mrf.mxu1  ;;  %v25036_v33 = vadd.f32 %v2042_v27, %v24925_v61  ;;  %5390 = vrot.lane.b32.xlu0 %v2041_v39, %s24367_s21  ;;  %22213 = vmatpush3.xpose.msk.msra.mxu0 %vm2768_vm0, %v2041_v39 }
 0x1a3   : > { %v2044_v35 = vpop.f32.mrf.mxu0  ;;  %22222 = vmatprep.subr.mxu0 %v29384_v32 }
 0x1a4   : > { %29386 = vst [vmem:[#allocation30_spill] sm:$0xff] %v25036_v33  ;;  %v25040_v48 = vpop.f32.mrf.mxu1  ;;  %v25044_v62 = vadd.f32 %v2044_v35, %v24930_v4 }
 0x1a5   : > { %v2048_v8 = vpop.f32.mrf.mxu0  ;;  %22201 = vmatmul.mubr.bf16.gmra.mxu0 %v24567_v10 }
 0x1a6   : > { %v25046_v57 = vpop.f32.mrf.mxu1  ;;  %2642 = vmatmul.mubr.bf16.gmra.mxu1 %v24651_v51  ;;  %v25051_v61 = vadd.f32 %v2048_v8, %v24937_v18  ;;  %5468 = vrot.lane.b32.xlu1 %v25044_v62, %s24367_s21 }
 0x1a7   : > { %2649 = vmatprep.mubr.bf16.mxu1 %v24653_v53  ;;  %v2050_v21 = vpop.f32.mrf.mxu0  ;;  %22214 = vmatprep.mubr.msk.f32.mxu0 %vm24369_vm1, %v29384_v32 }
 0x1a8   : > { %29387 = vst [vmem:[#allocation31_spill] sm:$0xff] %v25051_v61  ;;  %v25056_v54 = vpop.f32.mrf.mxu1  ;;  %v2051_v4 = vadd.f32 %v2050_v21, %v24946_v50 }
 0x1a9   : > { %v2052_v10 = vpop.f32.mrf.mxu0 }
 0x1aa   : > { %v25061_v51 = vpop.f32.mrf.mxu1  ;;  %v25064_v18 = vadd.f32 %v2052_v10, %v24953_v13  ;;  %5546 = vrot.lane.b32.xlu0 %v2051_v4, %s24367_s21 }
 0x1ab   : > { %v2054_v53 = vpop.f32.mrf.mxu0 }
 0x1ac   : > { %29388 = vst [vmem:[#allocation32_spill] sm:$0xff] %v25064_v18  ;;  %v25067_v39 = vpop.f32.mrf.mxu1  ;;  %v25070_v27 = vadd.f32 %v2054_v53, %v24958_v24 }
 0x1ad   : > { %v2058_v8 = vpop.f32.mrf.mxu0  ;;  %22215 = vmatmul.mubr.msk.f32.vlgmr.msra.gmra.mxu0 %vm2768_vm0, %v24786_v14 }
 0x1ae   : > { %v25072_v35 = vpop.f32.mrf.mxu1  ;;  %2650 = vmatmul.mubr.bf16.gmra.mxu1 %v24663_v3  ;;  %v25078_v50 = vadd.f32 %v2058_v8, %v24965_v47  ;;  %22223 = vmatpush3.xpose.msk.msra.mxu0 %vm2768_vm0, %v2051_v4 }
 0x1af   : > { %5624 = vrot.lane.b32.xlu1 %v25070_v27, %s24367_s21  ;;  %v2060_v24 = vpop.f32.mrf.mxu0  ;;  %22224 = vmatprep.mubr.msk.f32.mxu0 %vm24369_vm1, %v29384_v32 }
 0x1b0   : > { %29389 = vst [vmem:[#allocation33_spill] sm:$0xff] %v25078_v50  ;;  %v25083_v13 = vpop.f32.mrf.mxu1  ;;  %22232 = vmatprep.subr.mxu0 %v29384_v32  ;;  %v25089_v3 = vadd.f32 %v2060_v24, %v24974_v9  ;;  %2657 = vmatprep.mubr.bf16.mxu1 %v24665_v5 }
 0x1b1   : > { %v2062_v47 = vpop.f32.mrf.mxu0  ;;  %22225 = vmatmul.mubr.msk.f32.vlgmr.msra.gmra.mxu0 %vm2768_vm0, %v24822_v31 }
 0x1b2   : > { %v25092_v14 = vpop.f32.mrf.mxu1  ;;  %v25097_v21 = vadd.f32 %v2062_v47, %v24981_v41  ;;  %22233 = vmatpush3.xpose.msk.msra.mxu0 %vm2768_vm0, %v25089_v3  ;;  %22234 = vmatprep.mubr.msk.f32.mxu0 %vm24369_vm1, %v29384_v32 }
 0x1b3   : > { %v25105_v9 = vpop.f32.mrf.mxu0  ;;  %22242 = vmatprep.subr.mxu0 %v29384_v32 }
 0x1b4   : > { %29390 = vst [vmem:[#allocation34_spill] sm:$0xff] %v25097_v21  ;;  %v25103_v4 = vpop.f32.mrf.mxu1 }
 0x1b5   : > { %v2068_v10 = vpop.f32.mrf.mxu0  ;;  %22235 = vmatmul.mubr.msk.f32.vlgmr.msra.gmra.mxu0 %vm2768_vm0, %v24854_v42 }
 0x1b6   : > { %v25108_v5 = vpop.f32.mrf.mxu1  ;;  %2658 = vmatmul.mubr.bf16.gmra.mxu1 %v24673_v12  ;;  %v25114_v41 = vadd.f32 %v2068_v10, %v24993_v29  ;;  %22244 = vmatprep.mubr.msk.f32.mxu0 %vm24369_vm1, %v29384_v32 }
 0x1b7   : > { %22204 = vmatprep.mubr.bf16.mxu1 %v24579_v26  ;;  %v2070_v8 = vpop.f32.mrf.mxu0 }
 0x1b8   : > { %29391 = vst [vmem:[#allocation35_spill] sm:$0xff] %v25114_v41  ;;  %v25119_v53 = vpop.f32.mrf.mxu1  ;;  %v25122_v24 = vadd.f32 %v2070_v8, %v25002_v36 }
 0x1b9   : > { %v2072_v12 = vpop.f32.mrf.mxu0 }
 0x1ba   : > { %v25124_v47 = vpop.f32.mrf.mxu1  ;;  %v25127_v21 = vadd.f32 %v2072_v12, %v25009_v22  ;;  %22243 = vmatpush3.xpose.msk.msra.mxu0 %vm2768_vm0, %v25122_v24 }
 0x1bb   : > { %v2074_v26 = vpop.f32.mrf.mxu0  ;;  %22252 = vmatprep.subr.mxu0 %v29384_v32 }
 0x1bc   : > { %29392 = vst [vmem:[#allocation36_spill] sm:$0xff] %v25127_v21  ;;  %v25131_v29 = vpop.f32.mrf.mxu1 }
 0x1bd   : > { %v2078_v10 = vpop.f32.mrf.mxu0  ;;  %22245 = vmatmul.mubr.msk.f32.vlgmr.msra.gmra.mxu0 %vm2768_vm0, %v24886_v56 }
 0x1be   : > { %v25134_v41 = vpop.f32.mrf.mxu1  ;;  %22205 = vmatmul.mubr.bf16.vlgmr.msra.gmra.mxu1 %v24595_v44  ;;  %v25140_v36 = vadd.f32 %v2078_v10, %v25021_v15  ;;  %22254 = vmatprep.mubr.msk.f32.mxu0 %vm24369_vm1, %v29384_v32 }
 0x1bf   : > { %22218 = vmatpush3.xpose.msk.msra.mxu1 %vm2768_vm0, %v25044_v62  ;;  %22208 = vmatprep.mubr.bf16.mxu1 %v24611_v63  ;;  %v2080_v22 = vpop.f32.mrf.mxu0 }
 0x1c0   : > { %29393 = vst [vmem:[#allocation37_spill] sm:$0xff] %v25140_v36  ;;  %v25145_v8 = vpop.f32.mrf.mxu1  ;;  %22227 = vmatprep.subr.mxu1 %v29384_v32  ;;  %v25151_v44 = vadd.f32 %v2080_v22, %v25030_v52 }
 0x1c1   : > { %29394 = vst [vmem:[#allocation38_spill] sm:$0xff] %v25145_v8  ;;  %v2082_v12 = vpop.f32.mrf.mxu0 }
 0x1c2   : > { %v25153_v21 = vpop.f32.mrf.mxu1  ;;  %v25156_v15 = vadd.f32 %v2082_v12, %v25033_v40  ;;  %22253 = vmatpush3.xpose.msk.msra.mxu0 %vm2768_vm0, %v25151_v44 }
 0x1c3   : > { %v2084_v63 = vpop.f32.mrf.mxu0  ;;  %22262 = vmatprep.subr.mxu0 %v29384_v32 }
 0x1c4   : > { %29395 = vst [vmem:[#allocation39_spill] sm:$0xff] %v25156_v15  ;;  %v25160_v62 = vpop.f32.mrf.mxu1 }
 0x1c5   : > { %29396 = vst [vmem:[#allocation40_spill] sm:$0xff] %v25160_v62  ;;  %v2088_v10 = vpop.f32.mrf.mxu0  ;;  %22255 = vmatmul.mubr.msk.f32.vlgmr.msra.gmra.mxu0 %vm2768_vm0, %v24914_v7 }
 0x1c6   : > { %v25163_v50 = vpop.f32.mrf.mxu1  ;;  %22209 = vmatmul.mubr.bf16.gmra.mxu1 %v24627_v17  ;;  %v25169_v52 = vadd.f32 %v2088_v10, %v25046_v57  ;;  %22264 = vmatprep.mubr.msk.f32.mxu0 %vm24369_vm1, %v29384_v32 }
 0x1c7   : > { %22219 = vmatprep.mubr.msk.f32.mxu1 %vm24369_vm1, %v29384_v32  ;;  %v2090_v40 = vpop.f32.mrf.mxu0 }
 0x1c8   : > { %29397 = vst [vmem:[#allocation41_spill] sm:$0xff] %v25169_v52  ;;  %v25175_v22 = vpop.f32.mrf.mxu1  ;;  %v25178_v12 = vadd.f32 %v2090_v40, %v25056_v54 }
 0x1c9   : > { %29398 = vst [vmem:[#allocation42_spill] sm:$0xff] %v25175_v22  ;;  %v2092_v15 = vpop.f32.mrf.mxu0 }
 0x1ca   : > { %v25180_v17 = vpop.f32.mrf.mxu1  ;;  %v25183_v18 = vadd.f32 %v2092_v15, %v25061_v51  ;;  %22263 = vmatpush3.xpose.msk.msra.mxu0 %vm2768_vm0, %v25178_v12 }
 0x1cb   : > { %v2094_v57 = vpop.f32.mrf.mxu0  ;;  %22272 = vmatprep.subr.mxu0 %v29384_v32 }
 0x1cc   : > { %29399 = vst [vmem:[#allocation43_spill] sm:$0xff] %v25183_v18  ;;  %v25187_v10 = vpop.f32.mrf.mxu1  ;;  %v25254_v18 = vadd.f32 %v2084_v63, %v25040_v48 }
 0x1cd   : > { %29400 = vst [vmem:[#allocation44_spill] sm:$0xff] %v25187_v10  ;;  %v2098_v61 = vpop.f32.mrf.mxu0  ;;  %22265 = vmatmul.mubr.msk.f32.vlgmr.msra.gmra.mxu0 %vm2768_vm0, %v24942_v23 }
 0x1ce   : > { %v25190_v52 = vpop.f32.mrf.mxu1  ;;  %22220 = vmatmul.mubr.msk.f32.vlgmr.msra.gmra.mxu1 %vm2768_vm0, %v24804_v28  ;;  %v25197_v54 = vadd.f32 %v2098_v61, %v25072_v35  ;;  %22274 = vmatprep.mubr.msk.f32.mxu0 %vm24369_vm1, %v29384_v32  ;;  %v25210_v28 = vadd.f32 %v25105_v9, %v24986_v20 }
 0x1cf   : > { %22228 = vmatpush3.xpose.msk.msra.mxu1 %vm2768_vm0, %v25070_v27  ;;  %22229 = vmatprep.mubr.msk.f32.mxu1 %vm24369_vm1, %v29384_v32  ;;  %v2100_v51 = vpop.f32.mrf.mxu0 }
 0x1d0   : > { %29401 = vst [vmem:[#allocation45_spill] sm:$0xff] %v25197_v54  ;;  %v25203_v15 = vpop.f32.mrf.mxu1  ;;  %22237 = vmatprep.subr.mxu1 %v29384_v32  ;;  %v25213_v61 = vadd.f32 %v2100_v51, %v25083_v13  ;;  %v25232_v13 = vadd.f32 %v2074_v26, %v25014_v19 }
 0x1d1   : > { %29402 = vst [vmem:[#allocation46_spill] sm:$0xff] %v25203_v15  ;;  %v2102_v35 = vpop.f32.mrf.mxu0 }
 0x1d2   : > { %v25215_v27 = vpop.f32.mrf.mxu1  ;;  %22230 = vmatmul.mubr.msk.f32.vlgmr.msra.gmra.mxu1 %vm2768_vm0, %v24838_v38  ;;  %v25220_v40 = vadd.f32 %v2102_v35, %v25092_v14  ;;  %22273 = vmatpush3.xpose.msk.msra.mxu0 %vm2768_vm0, %v25213_v61  ;;  %v29405_v35 = vld [vmem:[#allocation17_spill] sm:$0xff] }
 0x1d3   : > { %22238 = vmatpush3.xpose.msk.msra.mxu1 %vm2768_vm0, %v25210_v28  ;;  %v2104_v20 = vpop.f32.mrf.mxu0  ;;  %22239 = vmatprep.mubr.msk.f32.mxu1 %vm24369_vm1, %v29384_v32 }
 0x1d4   : > { %29403 = vst [vmem:[#allocation47_spill] sm:$0xff] %v25220_v40  ;;  %v25226_v9 = vpop.f32.mrf.mxu1  ;;  %22247 = vmatprep.subr.mxu1 %v29384_v32  ;;  %22282 = vmatprep.subr.mxu0 %v29384_v32 }
 0x1d5   : > { %29404 = vst [vmem:[#allocation48_spill] sm:$0xff] %v25226_v9  ;;  %v2108_v14 = vpop.f32.mrf.mxu0  ;;  %22275 = vmatmul.mubr.msk.f32.vlgmr.msra.gmra.mxu0 %vm2768_vm0, %v24970_v58 }
 0x1d6   : > { %v25235_v51 = vpop.f32.mrf.mxu1  ;;  %22240 = vmatmul.mubr.msk.f32.vlgmr.msra.gmra.mxu1 %vm2768_vm0, %v29405_v35  ;;  %v25242_v40 = vadd.f32 %v2108_v14, %v25108_v5  ;;  %22284 = vmatprep.mubr.msk.f32.mxu0 %vm24369_vm1, %v29384_v32 }
 0x1d7   : > { %22248 = vmatpush3.xpose.msk.msra.mxu1 %vm2768_vm0, %v25232_v13  ;;  %22249 = vmatprep.mubr.msk.f32.mxu1 %vm24369_vm1, %v29384_v32  ;;  %v2110_v19 = vpop.f32.mrf.mxu0 }
 0x1d8   : > { %29406 = vst [vmem:[#allocation17_spill] sm:$0xff] %v25242_v40  ;;  %v25248_v26 = vpop.f32.mrf.mxu1  ;;  %22257 = vmatprep.subr.mxu1 %v29384_v32  ;;  %v25257_v5 = vadd.f32 %v2110_v19, %v25119_v53  ;;  %v25276_v53 = vadd.f32 %v2094_v57, %v25067_v39 }
 0x1d9   : > { %29407 = vst [vmem:[#allocation49_spill] sm:$0xff] %v25248_v26  ;;  %v2112_v14 = vpop.f32.mrf.mxu0 }
 0x1da   : > { %v25259_v9 = vpop.f32.mrf.mxu1  ;;  %22250 = vmatmul.mubr.msk.f32.vlgmr.msra.gmra.mxu1 %vm2768_vm0, %v24900_v1  ;;  %v25264_v40 = vadd.f32 %v2112_v14, %v25124_v47  ;;  %22283 = vmatpush3.xpose.msk.msra.mxu0 %vm2768_vm0, %v25257_v5 }
 0x1db   : > { %22258 = vmatpush3.xpose.msk.msra.mxu1 %vm2768_vm0, %v25254_v18  ;;  %v2114_v48 = vpop.f32.mrf.mxu0  ;;  %22259 = vmatprep.mubr.msk.f32.mxu1 %vm24369_vm1, %v29384_v32 }
 0x1dc   : > { %29408 = vst [vmem:[#allocation50_spill] sm:$0xff] %v25264_v40  ;;  %v25270_v63 = vpop.f32.mrf.mxu1  ;;  %22267 = vmatprep.subr.mxu1 %v29384_v32  ;;  %22292 = vmatprep.subr.mxu0 %v29384_v32  ;;  %v25298_v40 = vadd.f32 %v2104_v20, %v25103_v4  ;;  %v25315_v4 = vadd.f32 %v2114_v48, %v25131_v29 }
 0x1dd   : > { %29409 = vst [vmem:[#allocation51_spill] sm:$0xff] %v25270_v63  ;;  %v2264_v19 = vpop.f32.mrf.mxu0  ;;  %22285 = vmatmul.mubr.msk.f32.vlgmr.msra.gmra.mxu0 %vm2768_vm0, %v24998_v59 }
 0x1de   : > { %v2191_v47 = vpop.f32.mrf.mxu1  ;;  %22260 = vmatmul.mubr.msk.f32.vlgmr.msra.gmra.mxu1 %vm2768_vm0, %v24928_v25  ;;  %v25284_v14 = vadd.f32 %v2264_v19, %v25134_v41  ;;  %22294 = vmatprep.mubr.msk.f32.mxu0 %vm24369_vm1, %v29384_v32 }
 0x1df   : > { %22268 = vmatpush3.xpose.msk.msra.mxu1 %vm2768_vm0, %v25276_v53  ;;  %22269 = vmatprep.mubr.msk.f32.mxu1 %vm24369_vm1, %v29384_v32  ;;  %v25292_v57 = vpop.f32.mrf.mxu0 }
 0x1e0   : > { %29410 = vst [vmem:[#allocation52_spill] sm:$0xff] %v25284_v14  ;;  %v25290_v39 = vpop.f32.mrf.mxu1  ;;  %29412 = vst [vmem:[#allocation54_spill] sm:$0xff] %v25292_v57  ;;  %22277 = vmatprep.subr.mxu1 %v29384_v32 }
 0x1e1   : > { %29411 = vst [vmem:[#allocation53_spill] sm:$0xff] %v25290_v39  ;;  %v2268_v19 = vpop.f32.mrf.mxu0 }
 0x1e2   : > { %v2195_v41 = vpop.f32.mrf.mxu1  ;;  %22270 = vmatmul.mubr.msk.f32.vlgmr.msra.gmra.mxu1 %vm2768_vm0, %v24956_v43  ;;  %v25303_v63 = vadd.f32 %v2268_v19, %v25153_v21 }
 0x1e3   : > { %22278 = vmatpush3.xpose.msk.msra.mxu1 %vm2768_vm0, %v25298_v40  ;;  %22279 = vmatprep.mubr.msk.f32.mxu1 %vm24369_vm1, %v29384_v32  ;;  %v25311_v15 = vpop.f32.mrf.mxu0 }
 0x1e4   : > { %29413 = vst [vmem:[#allocation55_spill] sm:$0xff] %v25303_v63  ;;  %v25309_v26 = vpop.f32.mrf.mxu1  ;;  %29415 = vst [vmem:[#allocation57_spill] sm:$0xff] %v25311_v15  ;;  %22287 = vmatprep.subr.mxu1 %v29384_v32 }
 0x1e5   : > { %29414 = vst [vmem:[#allocation56_spill] sm:$0xff] %v25309_v26  ;;  %v2274_v54 = vpop.f32.mrf.mxu0 }
 0x1e6   : > { %v2201_v20 = vpop.f32.mrf.mxu1  ;;  %22280 = vmatmul.mubr.msk.f32.vlgmr.msra.gmra.mxu1 %vm2768_vm0, %v24984_v60  ;;  %v25320_v21 = vadd.f32 %v2274_v54, %v25163_v50 }
 0x1e7   : > { %22288 = vmatpush3.xpose.msk.msra.mxu1 %vm2768_vm0, %v25315_v4  ;;  %22289 = vmatprep.mubr.msk.f32.mxu1 %vm24369_vm1, %v29384_v32  ;;  %v25328_v26 = vpop.f32.mrf.mxu0 }
 0x1e8   : > { %29416 = vst [vmem:[#allocation58_spill] sm:$0xff] %v25320_v21  ;;  %v25326_v19 = vpop.f32.mrf.mxu1  ;;  %29418 = vst [vmem:[#allocation60_spill] sm:$0xff] %v25328_v26  ;;  %22297 = vmatprep.subr.mxu1 %v29384_v32 }
 0x1e9   : > { %29417 = vst [vmem:[#allocation59_spill] sm:$0xff] %v25326_v19  ;;  %v2278_v48 = vpop.f32.mrf.mxu0 }
 0x1ea   : > { %v2205_v29 = vpop.f32.mrf.mxu1  ;;  %22290 = vmatmul.mubr.msk.f32.vlgmr.msra.gmra.mxu1 %vm2768_vm0, %v25012_v16  ;;  %v25334_v50 = vadd.f32 %v2278_v48, %v25180_v17 }
 0x1eb   : > { %22299 = vmatprep.mubr.msk.f32.mxu1 %vm24369_vm1, %v29384_v32  ;;  %v25340_v10 = vpop.f32.mrf.mxu0 }
 0x1ec   : > { %29419 = vst [vmem:[#allocation61_spill] sm:$0xff] %v25334_v50  ;;  %v25338_v54 = vpop.f32.mrf.mxu1  ;;  %29421 = vst [vmem:[#allocation63_spill] sm:$0xff] %v25340_v10 }
 0x1ed   : > { %29420 = vst [vmem:[#allocation62_spill] sm:$0xff] %v25338_v54  ;;  %v2284_v22 = vpop.f32.mrf.mxu0 }
 0x1ee   : > { %v2211_v33 = vpop.f32.mrf.mxu1  ;;  %v25343_v26 = vadd.f32 %v2284_v22, %v25190_v52 }
 0x1ef   : > { %v25347_v49 = vpop.f32.mrf.mxu0 }
 0x1f0   : > { %29422 = vst [vmem:[#allocation64_spill] sm:$0xff] %v25343_v26  ;;  %v25345_v36 = vpop.f32.mrf.mxu1  ;;  %29424 = vst [vmem:[#allocation66_spill] sm:$0xff] %v25347_v49 }
 0x1f1   : > { %29423 = vst [vmem:[#allocation65_spill] sm:$0xff] %v25345_v36  ;;  %v2288_v15 = vpop.f32.mrf.mxu0 }
 0x1f2   : > { %v2215_v19 = vpop.f32.mrf.mxu1  ;;  %v25350_v17 = vadd.f32 %v2288_v15, %v25215_v27 }
 0x1f3   : > { %v25354_v62 = vpop.f32.mrf.mxu0 }
 0x1f4   : > { %29425 = vst [vmem:[#allocation67_spill] sm:$0xff] %v25350_v17  ;;  %v25352_v48 = vpop.f32.mrf.mxu1  ;;  %29427 = vst [vmem:[#allocation69_spill] sm:$0xff] %v25354_v62 }
 0x1f5   : > { %29426 = vst [vmem:[#allocation68_spill] sm:$0xff] %v25352_v48  ;;  %v2294_v10 = vpop.f32.mrf.mxu0 }
 0x1f6   : > { %v2221_v54 = vpop.f32.mrf.mxu1  ;;  %v25357_v57 = vadd.f32 %v2294_v10, %v25235_v51 }
 0x1f7   : > { %v25361_v22 = vpop.f32.mrf.mxu0 }
 0x1f8   : > { %29428 = vst [vmem:[#allocation70_spill] sm:$0xff] %v25357_v57  ;;  %v25359_v52 = vpop.f32.mrf.mxu1  ;;  %29430 = vst [vmem:[#allocation72_spill] sm:$0xff] %v25361_v22 }
 0x1f9   : > { %29429 = vst [vmem:[#allocation71_spill] sm:$0xff] %v25359_v52  ;;  %v2298_v49 = vpop.f32.mrf.mxu0 }
 0x1fa   : > { %v2225_v36 = vpop.f32.mrf.mxu1  ;;  %v25364_v8 = vadd.f32 %v2298_v49, %v25259_v9 }
 0x1fb   : > { %v25368_v27 = vpop.f32.mrf.mxu0 }
 0x1fc   : > { %29431 = vst [vmem:[#allocation73_spill] sm:$0xff] %v25364_v8  ;;  %v25366_v15 = vpop.f32.mrf.mxu1  ;;  %29433 = vst [vmem:[#allocation75_spill] sm:$0xff] %v25368_v27 }
 0x1fd   : > { %29432 = vst [vmem:[#allocation74_spill] sm:$0xff] %v25366_v15  ;;  %v2304_v48 = vpop.f32.mrf.mxu0 }
 0x1fe   : > { %v2377_v62 = vpop.f32.mrf.mxu1  ;;  %v25370_v39 = vadd.f32 %v2304_v48, %v2191_v47 }
 0x1ff   : > { %v25372_v37 = vpop.f32.mrf.mxu0 }
 0x200   : > { %29434 = vst [vmem:[#allocation76_spill] sm:$0xff] %v25370_v39  ;;  %29435 = vst [vmem:[#allocation77_spill] sm:$0xff] %v25372_v37  ;;  %v25374_v10 = vpop.f32.mrf.mxu1 }
 0x201   : > { %29436 = vst [vmem:[#allocation78_spill] sm:$0xff] %v25374_v10  ;;  %v2308_v51 = vpop.f32.mrf.mxu0 }
 0x202   : > { %v2381_v52 = vpop.f32.mrf.mxu1  ;;  %v25376_v22 = vadd.f32 %v2308_v51, %v2195_v41 }
 0x203   : > { %v25378_v2 = vpop.f32.mrf.mxu0 }
 0x204   : > { %29437 = vst [vmem:[#allocation79_spill] sm:$0xff] %v25376_v22  ;;  %29438 = vst [vmem:[#allocation80_spill] sm:$0xff] %v25378_v2  ;;  %v25380_v49 = vpop.f32.mrf.mxu1 }
 0x205   : > { %29439 = vst [vmem:[#allocation81_spill] sm:$0xff] %v25380_v49  ;;  %v2314_v9 = vpop.f32.mrf.mxu0 }
 0x206   : > { %v2387_v15 = vpop.f32.mrf.mxu1  ;;  %v25382_v46 = vadd.f32 %v2314_v9, %v2201_v20 }
 0x207   : > { %v25384_v27 = vpop.f32.mrf.mxu0 }
 0x208   : > { %29440 = vst [vmem:[#allocation82_spill] sm:$0xff] %v25382_v46  ;;  %29441 = vst [vmem:[#allocation83_spill] sm:$0xff] %v25384_v27  ;;  %v25386_v47 = vpop.f32.mrf.mxu1 }
 0x209   : > { %29442 = vst [vmem:[#allocation84_spill] sm:$0xff] %v25386_v47  ;;  %v2318_v48 = vpop.f32.mrf.mxu0 }
 0x20a   : > { %v2391_v37 = vpop.f32.mrf.mxu1  ;;  %v25388_v30 = vadd.f32 %v2318_v48, %v2205_v29 }
 0x20b   : > { %v25390_v8 = vpop.f32.mrf.mxu0 }
 0x20c   : > { %29443 = vst [vmem:[#allocation85_spill] sm:$0xff] %v25388_v30  ;;  %29444 = vst [vmem:[#allocation86_spill] sm:$0xff] %v25390_v8  ;;  %v25392_v41 = vpop.f32.mrf.mxu1 }
 0x20d   : > { %29445 = vst [vmem:[#allocation87_spill] sm:$0xff] %v25392_v41  ;;  %v2324_v51 = vpop.f32.mrf.mxu0 }
 0x20e   : > { %v2397_v2 = vpop.f32.mrf.mxu1  ;;  %v25394_v22 = vadd.f32 %v2324_v51, %v2211_v33 }
 0x20f   : > { %v25396_v49 = vpop.f32.mrf.mxu0 }
 0x210   : > { %29446 = vst [vmem:[#allocation88_spill] sm:$0xff] %v25394_v22  ;;  %29447 = vst [vmem:[#allocation89_spill] sm:$0xff] %v25396_v49  ;;  %v25398_v20 = vpop.f32.mrf.mxu1 }
 0x211   : > { %29448 = vst [vmem:[#allocation90_spill] sm:$0xff] %v25398_v20  ;;  %v2328_v9 = vpop.f32.mrf.mxu0 }
 0x212   : > { %v2401_v27 = vpop.f32.mrf.mxu1  ;;  %v25400_v17 = vadd.f32 %v2328_v9, %v2215_v19 }
 0x213   : > { %v25402_v47 = vpop.f32.mrf.mxu0 }
 0x214   : > { %29449 = vst [vmem:[#allocation91_spill] sm:$0xff] %v25400_v17  ;;  %29450 = vst [vmem:[#allocation92_spill] sm:$0xff] %v25402_v47  ;;  %v25404_v29 = vpop.f32.mrf.mxu1 }
 0x215   : > { %29451 = vst [vmem:[#allocation93_spill] sm:$0xff] %v25404_v29  ;;  %v2334_v48 = vpop.f32.mrf.mxu0 }
 0x216   : > { %v2407_v8 = vpop.f32.mrf.mxu1  ;;  %v25406_v30 = vadd.f32 %v2334_v48, %v2221_v54 }
 0x217   : > { %v25408_v41 = vpop.f32.mrf.mxu0 }
 0x218   : > { %29452 = vst [vmem:[#allocation94_spill] sm:$0xff] %v25406_v30  ;;  %29453 = vst [vmem:[#allocation95_spill] sm:$0xff] %v25408_v41  ;;  %v25410_v33 = vpop.f32.mrf.mxu1 }
 0x219   : > { %29454 = vst [vmem:[#allocation96_spill] sm:$0xff] %v25410_v33  ;;  %v2338_v51 = vpop.f32.mrf.mxu0 }
 0x21a   : > { %v2411_v49 = vpop.f32.mrf.mxu1  ;;  %v25412_v0 = vadd.f32 %v2338_v51, %v2225_v36 }
 0x21b   : > { %v25414_v20 = vpop.f32.mrf.mxu0 }
 0x21c   : > { %29455 = vst [vmem:[#allocation97_spill] sm:$0xff] %v25412_v0  ;;  %29456 = vst [vmem:[#allocation98_spill] sm:$0xff] %v25414_v20  ;;  %v25416_v19 = vpop.f32.mrf.mxu1 }
 0x21d   : > { %29457 = vst [vmem:[#allocation99_spill] sm:$0xff] %v25416_v19  ;;  %v2490_v47 = vpop.f32.mrf.mxu0 }
 0x21e   : > { %v2417_v9 = vpop.f32.mrf.mxu1  ;;  %v25418_v17 = vadd.f32 %v2490_v47, %v2377_v62 }
 0x21f   : > { %v25422_v54 = vpop.f32.mrf.mxu0 }
 0x220   : > { %v25420_v29 = vpop.f32.mrf.mxu1  ;;  %29459 = vst [vmem:[#allocation101_spill] sm:$0xff] %v25422_v54  ;;  %22293 = vmatpush3.msra.mxu0 %v25418_v17 }
 0x221   : > { %29458 = vst [vmem:[#allocation100_spill] sm:$0xff] %v25420_v29  ;;  %v2494_v41 = vpop.f32.mrf.mxu0  ;;  %22302 = vmatprep.subr.mxu0 %v29384_v32 }
 0x222   : > { %v2421_v48 = vpop.f32.mrf.mxu1  ;;  %v25426_v36 = vadd.f32 %v2494_v41, %v2381_v52 }
 0x223   : > { %v25430_v20 = vpop.f32.mrf.mxu0 }
 0x224   : > { %v25428_v51 = vpop.f32.mrf.mxu1  ;;  %29461 = vst [vmem:[#allocation103_spill] sm:$0xff] %v25430_v20  ;;  %22298 = vmatpush3.msra.mxu1 %v25426_v36 }
 0x225   : > { %29460 = vst [vmem:[#allocation102_spill] sm:$0xff] %v25428_v51  ;;  %v2500_v47 = vpop.f32.mrf.mxu0  ;;  %22307 = vmatprep.subr.mxu1 %v29384_v32 }
 0x226   : > { %v2427_v62 = vpop.f32.mrf.mxu1  ;;  %v25434_v19 = vadd.f32 %v2500_v47, %v2387_v15 }
 0x227   : > { %v25438_v33 = vpop.f32.mrf.mxu0 }
 0x228   : > { %v25436_v29 = vpop.f32.mrf.mxu1  ;;  %29463 = vst [vmem:[#allocation105_spill] sm:$0xff] %v25438_v33 }
 0x229   : > { %29462 = vst [vmem:[#allocation104_spill] sm:$0xff] %v25436_v29  ;;  %v2504_v54 = vpop.f32.mrf.mxu0 }
 0x22a   : > { %v2431_v0 = vpop.f32.mrf.mxu1  ;;  %v25440_v52 = vadd.f32 %v2504_v54, %v2391_v37 }
 0x22b   : > { %v25444_v51 = vpop.f32.mrf.mxu0 }
 0x22c   : > { %v25442_v41 = vpop.f32.mrf.mxu1  ;;  %29465 = vst [vmem:[#allocation107_spill] sm:$0xff] %v25444_v51 }
 0x22d   : > { %29464 = vst [vmem:[#allocation106_spill] sm:$0xff] %v25442_v41  ;;  %v2510_v10 = vpop.f32.mrf.mxu0 }
 0x22e   : > { %v2437_v20 = vpop.f32.mrf.mxu1  ;;  %v25446_v30 = vadd.f32 %v2510_v10, %v2397_v2 }
 0x22f   : > { %v25448_v6 = vpop.f32.mrf.mxu0 }
 0x230   : > { %v2439_v50 = vpop.f32.mrf.mxu1  ;;  %29466 = vst [vmem:[#allocation108_spill] sm:$0xff] %v25448_v6 }
 0x231   : > { %v2514_v47 = vpop.f32.mrf.mxu0 }
 0x232   : > { %v2441_v15 = vpop.f32.mrf.mxu1  ;;  %v25450_v29 = vadd.f32 %v2514_v47, %v2401_v27 }
 0x233   : > { %v25454_v22 = vpop.f32.mrf.mxu0 }
 0x234   : > { %v25452_v33 = vpop.f32.mrf.mxu1  ;;  %29468 = vst [vmem:[#allocation110_spill] sm:$0xff] %v25454_v22 }
 0x235   : > { %29467 = vst [vmem:[#allocation109_spill] sm:$0xff] %v25452_v33  ;;  %v2520_v54 = vpop.f32.mrf.mxu0 }
 0x236   : > { %v2447_v37 = vpop.f32.mrf.mxu1  ;;  %v25456_v41 = vadd.f32 %v2520_v54, %v2407_v8 }
 0x237   : > { %v25458_v34 = vpop.f32.mrf.mxu0 }
 0x238   : > { %v2449_v51 = vpop.f32.mrf.mxu1  ;;  %29469 = vst [vmem:[#allocation111_spill] sm:$0xff] %v25458_v34 }
 0x239   : > { %v2524_v10 = vpop.f32.mrf.mxu0 }
 0x23a   : > { %v2451_v2 = vpop.f32.mrf.mxu1  ;;  %v25460_v46 = vadd.f32 %v2524_v10, %v2411_v49 }
 0x23b   : > { %v25464_v45 = vpop.f32.mrf.mxu0 }
 0x23c   : > { %v25462_v6 = vpop.f32.mrf.mxu1  ;;  %29471 = vst [vmem:[#allocation113_spill] sm:$0xff] %v25464_v45 }
 0x23d   : > { %29470 = vst [vmem:[#allocation112_spill] sm:$0xff] %v25462_v6  ;;  %v2530_v27 = vpop.f32.mrf.mxu0 }
 0x23e   : > { %v21660_v47 = vpop.f32.mrf.mxu1  ;;  %v25466_v33 = vadd.f32 %v2530_v27, %v2417_v9 }
 0x23f   : > { %v25468_v22 = vpop.f32.mrf.mxu0 }
 0x240   : > { %29472 = vst [vmem:[#allocation114_spill] sm:$0xff] %v25468_v22  ;;  %v21661_v39 = vpop.f32.mrf.mxu1 }
 0x241   : > { %v21662_v8 = vadd.f32 %v21661_v39, %v21660_v47  ;;  %v2534_v54 = vpop.f32.mrf.mxu0 }
 0x242   : > { %v25470_v11 = vpop.f32.mrf.mxu1  ;;  %v25472_v34 = vadd.f32 %v2534_v54, %v2421_v48 }
 0x243   : > { %29473 = vst [vmem:[#allocation115_spill] sm:$0xff] %v25470_v11  ;;  %v25474_v57 = vpop.f32.mrf.mxu0 }
 0x244   : > { %29474 = vst [vmem:[#allocation116_spill] sm:$0xff] %v25474_v57  ;;  %v25476_v49 = vpop.f32.mrf.mxu1 }
 0x245   : > { %29475 = vst [vmem:[#allocation117_spill] sm:$0xff] %v25476_v49  ;;  %v2540_v10 = vpop.f32.mrf.mxu0 }
 0x246   : > { %v21666_v6 = vpop.f32.mrf.mxu1  ;;  %v25478_v45 = vadd.f32 %v2540_v10, %v2427_v62 }
 0x247   : > { %v25480_v26 = vpop.f32.mrf.mxu0 }
 0x248   : > { %29476 = vst [vmem:[#allocation118_spill] sm:$0xff] %v25480_v26  ;;  %v21667_v9 = vpop.f32.mrf.mxu1 }
 0x249   : > { %v21668_v27 = vadd.f32 %v21667_v9, %v21666_v6  ;;  %v2544_v22 = vpop.f32.mrf.mxu0 }
 0x24a   : > { %v21669_v21 = vpop.f32.mrf.mxu1  ;;  %v25482_v39 = vadd.f32 %v2544_v22, %v2431_v0 }
 0x24b   : > { %v25484_v47 = vpop.f32.mrf.mxu0 }
 0x24c   : > { %29477 = vst [vmem:[#allocation119_spill] sm:$0xff] %v25482_v39  ;;  %29478 = vst [vmem:[#allocation120_spill] sm:$0xff] %v25484_v47  ;;  %v21670_v48 = vpop.f32.mrf.mxu1 }
 0x24d   : > { %v2550_v54 = vpop.f32.mrf.mxu0 }
 0x24e   : > { %v21672_v11 = vpop.f32.mrf.mxu1  ;;  %v25486_v57 = vadd.f32 %v2550_v54, %v2437_v20 }
 0x24f   : > { %v2552_v49 = vpop.f32.mrf.mxu0 }
 0x250   : > { %29479 = vst [vmem:[#allocation121_spill] sm:$0xff] %v25486_v57  ;;  %v21673_v14 = vpop.f32.mrf.mxu1  ;;  %v25488_v63 = vadd.f32 %v2552_v49, %v2439_v50 }
 0x251   : > { %v21674_v62 = vadd.f32 %v21673_v14, %v21672_v11  ;;  %v2554_v10 = vpop.f32.mrf.mxu0 }
 0x252   : > { %29480 = vst [vmem:[#allocation122_spill] sm:$0xff] %v25488_v63  ;;  %v25490_v26 = vpop.f32.mrf.mxu1  ;;  %v25492_v6 = vadd.f32 %v2554_v10, %v2441_v15 }
 0x253   : > { %29481 = vst [vmem:[#allocation123_spill] sm:$0xff] %v25490_v26  ;;  %v25494_v9 = vpop.f32.mrf.mxu0 }
 0x254   : > { %29482 = vst [vmem:[#allocation124_spill] sm:$0xff] %v25492_v6  ;;  %29483 = vst [vmem:[#allocation125_spill] sm:$0xff] %v25494_v9  ;;  %v25496_v0 = vpop.f32.mrf.mxu1 }
 0x255   : > { %29484 = vst [vmem:[#allocation126_spill] sm:$0xff] %v25496_v0  ;;  %v2560_v22 = vpop.f32.mrf.mxu0 }
 0x256   : > { %v21678_v47 = vpop.f32.mrf.mxu1  ;;  %v25498_v55 = vadd.f32 %v2560_v22, %v2447_v37  ;;  %v21671_v37 = vadd.f32 %v21670_v48, %v21669_v21 }
 0x257   : > { %v2562_v20 = vpop.f32.mrf.mxu0 }
 0x258   : > { %29485 = vst [vmem:[#allocation127_spill] sm:$0xff] %v25498_v55  ;;  %v21679_v54 = vpop.f32.mrf.mxu1  ;;  %v25500_v57 = vadd.f32 %v2562_v20, %v2449_v51 }
 0x259   : > { %v21680_v50 = vadd.f32 %v21679_v54, %v21678_v47  ;;  %v2564_v49 = vpop.f32.mrf.mxu0 }
 0x25a   : > { %29486 = vst [vmem:[#allocation128_spill] sm:$0xff] %v25500_v57  ;;  %v21681_v11 = vpop.f32.mrf.mxu1  ;;  %v25502_v14 = vadd.f32 %v2564_v49, %v2451_v2 }
 0x25b   : > { %v25504_v26 = vpop.f32.mrf.mxu0 }
 0x25c   : > { %29487 = vst [vmem:[#allocation129_spill] sm:$0xff] %v25502_v14  ;;  %29488 = vst [vmem:[#allocation130_spill] sm:$0xff] %v25504_v26  ;;  %v21682_v15 = vpop.f32.mrf.mxu1  ;;  %v2763_v26 = vlaneseq }
 0x25d   : > { %v22198_v63 = vpop.f32.mrf.mxu0 }
 0x25e   : > { %v21684_v10 = vpop.f32.mrf.mxu1  ;;  %v25506_v9 = vadd.f32 %v22198_v63, %v21668_v27  ;;  %v21683_v63 = vadd.f32 %v21682_v15, %v21681_v11 }
 0x25f   : > { %v2700_v6 = vpop.f32.mrf.mxu0 }
 0x260   : > { %29489 = vst [vmem:[#allocation131_spill] sm:$0xff] %v25506_v9  ;;  %v21685_v0 = vpop.f32.mrf.mxu1  ;;  %v25508_v55 = vadd.f32 %v21662_v8, %v2700_v6 }
 0x261   : > { %v21686_v22 = vadd.f32 %v21685_v0, %v21684_v10  ;;  %v22199_v47 = vpop.f32.mrf.mxu0  ;;  %v25522_v10 = vshrl.u32 %v2763_v26, 7 }
 0x262   : > { %29490 = vst [vmem:[#allocation132_spill] sm:$0xff] %v25508_v55  ;;  %v25510_v51 = vpop.f32.mrf.mxu1  ;;  %v25512_v20 = vadd.f32 %v22199_v47, %v21671_v37  ;;  %v2766_v37 = vand.u32 127, %v2763_v26 }
 0x263   : > { %29491 = vst [vmem:[#allocation133_spill] sm:$0xff] %v25510_v51  ;;  %v25516_v54 = vpop.f32.mrf.mxu0  ;;  %29497 = vst [vmem:[#allocation139_spill] sm:$0xff] %v25522_v10 }
 0x264   : > { %29492 = vst [vmem:[#allocation134_spill] sm:$0xff] %v25512_v20  ;;  %v25514_v2 = vpop.f32.mrf.mxu1  ;;  %29494 = vst [vmem:[#allocation136_spill] sm:$0xff] %v25516_v54  ;;  %vm25529_vm2 = vcmp.ge.s32.totalorder %v25522_v10, %v2766_v37 }
 0x265   : > { %29493 = vst [vmem:[#allocation135_spill] sm:$0xff] %v25514_v2  ;;  %v22202_v57 = vpop.f32.mrf.mxu0 }
 0x266   : > { %v21690_v49 = vpop.f32.mrf.mxu1  ;;  %v25518_v27 = vadd.f32 %v22202_v57, %v21680_v50  ;;  %v29500_v57 = vmov 0 }
 0x267   : > { %v2716_v21 = vpop.f32.mrf.mxu0  ;;  %v29501_v57 = vsel %vm25529_vm2, 4294967295, %v29500_v57 }
 0x268   : > { %29495 = vst [vmem:[#allocation137_spill] sm:$0xff] %v25518_v27  ;;  %v21691_v9 = vpop.f32.mrf.mxu1  ;;  %v25520_v8 = vadd.f32 %v21674_v62, %v2716_v21  ;;  %29502 = vst [vmem:[#allocation142_spill] sm:$0xff] %v29501_v57 }
 0x269   : > { %v21692_v48 = vadd.f32 %v21691_v9, %v21690_v49  ;;  %v22203_v0 = vpop.f32.mrf.mxu0 }
 0x26a   : > { %29496 = vst [vmem:[#allocation138_spill] sm:$0xff] %v25520_v8  ;;  %v21693_v6 = vpop.f32.mrf.mxu1  ;;  %v25524_v47 = vadd.f32 %v22203_v0, %v21683_v63 }
 0x26b   : > { %v25526_v51 = vpop.f32.mrf.mxu0 }
 0x26c   : > { %29498 = vst [vmem:[#allocation140_spill] sm:$0xff] %v25524_v47  ;;  %v21694_v2 = vpop.f32.mrf.mxu1  ;;  %29499 = vst [vmem:[#allocation141_spill] sm:$0xff] %v25526_v51 }
 0x26d   : > { %v2841_v54 = vpop.f32.mrf.mxu0  ;;  %v21695_v55 = vadd.f32 %v21694_v2, %v21693_v6 }
 0x26e   : > { %v21696_v20 = vpop.f32.mrf.mxu1  ;;  %v3985_v9 = vmul.f32 19.595919, %v2841_v54 }
 0x26f   : > { %v22216_v50 = vpop.f32.mrf.mxu0 }
 0x270   : > { %v21697_v62 = vpop.f32.mrf.mxu1  ;;  %v25535_v26 = vsel %vm25529_vm2, %v3985_v9, -inf }
 0x271   : > { %v21698_v11 = vadd.f32 %v21697_v62, %v21696_v20  ;;  %v2993_v49 = vpop.f32.mrf.mxu0  ;;  %v4020_v63 = vsel %vm4019_vm3, %v25535_v26, -inf }
 0x272   : > { %v25537_v15 = vpop.f32.mrf.mxu1  ;;  %v3987_v21 = vmul.f32 19.595919, %v2993_v49  ;;  %4021 = vmax.xlane.f32.xlu0 %v4020_v63 }
 0x273   : > { %29503 = vst [vmem:[#allocation143_spill] sm:$0xff] %v25537_v15  ;;  %v22226_v37 = vpop.f32.mrf.mxu0 }
 0x274   : > { %v25541_v0 = vpop.f32.mrf.mxu1  ;;  %v25545_v54 = vsel %vm25529_vm2, %v3987_v21, -inf }
 0x275   : > { %29504 = vst [vmem:[#allocation144_spill] sm:$0xff] %v25541_v0  ;;  %v3145_v62 = vpop.f32.mrf.mxu0  ;;  %v4026_v9 = vsel %vm4019_vm3, %v25545_v54, -inf }
 0x276   : > { %v21702_v20 = vpop.f32.mrf.mxu1  ;;  %v3989_v50 = vmul.f32 19.595919, %v3145_v62  ;;  %4027 = vmax.xlane.f32.xlu1 %v4026_v9 }
 0x277   : > { %v22236_v15 = vpop.f32.mrf.mxu0 }
 0x278   : > { %v21703_v10 = vpop.f32.mrf.mxu1  ;;  %v25551_v49 = vsel %vm25529_vm2, %v3989_v50, -inf }
 0x279   : > { %v21704_v47 = vadd.f32 %v21703_v10, %v21702_v20  ;;  %v4032_v37 = vsel %vm4019_vm3, %v25551_v49, -inf }
 0x27a   : > { %v21705_v63 = vpop.f32.mrf.mxu1  ;;  %4033 = vmax.xlane.f32.xlu0 %v4032_v37 }
 0x27c   : > { %v21706_v21 = vpop.f32.mrf.mxu1 }
 0x27d   : > { %v3297_v51 = vpop.f32.mrf.mxu0 }
 0x27e   : > { %v22206_v0 = vpop.f32.mrf.mxu1  ;;  %v3991_v8 = vmul.f32 19.595919, %v3297_v51 }
 0x27f   : > { %v25555_v27 = vadd.f32 %v22206_v0, %v21692_v48  ;;  %v22246_v9 = vpop.f32.mrf.mxu0  ;;  %v21707_v0 = vadd.f32 %v21706_v21, %v21705_v63 }
 0x280   : > { %v2732_v62 = vpop.f32.mrf.mxu1  ;;  %v25561_v10 = vsel %vm25529_vm2, %v3991_v8, -inf }
 0x281   : > { %29505 = vst [vmem:[#allocation145_spill] sm:$0xff] %v25555_v27  ;;  %v25557_v15 = vadd.f32 %v21686_v22, %v2732_v62  ;;  %v4038_v50 = vsel %vm4019_vm3, %v25561_v10, -inf }
 0x282   : > { %v22207_v20 = vpop.f32.mrf.mxu1  ;;  %4039 = vmax.xlane.f32.xlu0 %v4038_v50 }
 0x283   : > { %29506 = vst [vmem:[#allocation146_spill] sm:$0xff] %v25557_v15  ;;  %v25565_v37 = vadd.f32 %v22207_v20, %v21695_v55 }
 0x284   : > { %v25567_v14 = vpop.f32.mrf.mxu1 }
 0x285   : > { %29507 = vst [vmem:[#allocation147_spill] sm:$0xff] %v25565_v37  ;;  %29508 = vst [vmem:[#allocation148_spill] sm:$0xff] %v25567_v14  ;;  %v3449_v51 = vpop.f32.mrf.mxu0 }
 0x286   : > { %v22210_v48 = vpop.f32.mrf.mxu1  ;;  %v3993_v22 = vmul.f32 19.595919, %v3449_v51 }
 0x287   : > { %v25569_v9 = vadd.f32 %v22210_v48, %v21704_v47  ;;  %5622 = vrot.lane.b32.xlu1 %v24838_v38, %s24367_s21  ;;  %v22256_v8 = vpop.f32.mrf.mxu0 }
 0x288   : > { %v2748_v2 = vpop.f32.mrf.mxu1  ;;  %v25577_v55 = vsel %vm25529_vm2, %v3993_v22, -inf }
 0x289   : > { %29509 = vst [vmem:[#allocation149_spill] sm:$0xff] %v25569_v9  ;;  %v25573_v6 = vadd.f32 %v21698_v11, %v2748_v2  ;;  %v4044_v20 = vsel %vm4019_vm3, %v25577_v55, -inf }
 0x28a   : > { %v22211_v62 = vpop.f32.mrf.mxu1  ;;  %4045 = vmax.xlane.f32.xlu0 %v4044_v20 }
 0x28b   : > { %29510 = vst [vmem:[#allocation150_spill] sm:$0xff] %v25573_v6  ;;  %v25581_v50 = vadd.f32 %v22211_v62, %v21707_v0 }
 0x28c   : > { %v25583_v47 = vpop.f32.mrf.mxu1 }
 0x28d   : > { %29511 = vst [vmem:[#allocation151_spill] sm:$0xff] %v25581_v50  ;;  %29512 = vst [vmem:[#allocation152_spill] sm:$0xff] %v25583_v47  ;;  %v3601_v21 = vpop.f32.mrf.mxu0 }
 0x28e   : > { %v2917_v63 = vpop.f32.mrf.mxu1 }
 0x28f   : > { %v3986_v48 = vmul.f32 19.595919, %v2917_v63  ;;  %v22266_v51 = vpop.f32.mrf.mxu0 }
 0x290   : > { %v22221_v38 = vpop.f32.mrf.mxu1 }
 0x291   : > { %v25587_v11 = vsel %vm25529_vm2, %v3986_v48, -inf }
 0x292   : > { %v3069_v22 = vpop.f32.mrf.mxu1  ;;  %v4023_v2 = vsel %vm4019_vm3, %v25587_v11, -inf }
 0x293   : > { %4024 = vmax.xlane.f32.xlu0 %v4023_v2  ;;  %v3988_v27 = vmul.f32 19.595919, %v3069_v22 }
 0x294   : > { %v22231_v8 = vpop.f32.mrf.mxu1 }
 0x295   : > { %v3753_v62 = vpop.f32.mrf.mxu0  ;;  %v25593_v2 = vsel %vm25529_vm2, %v3988_v27, -inf }
 0x296   : > { %v3221_v0 = vpop.f32.mrf.mxu1 }
 0x297   : > { %v22276_v50 = vpop.f32.mrf.mxu0  ;;  %v3990_v15 = vmul.f32 19.595919, %v3221_v0 }
 0x298   : > { %v22241_v20 = vpop.f32.mrf.mxu1 }
 0x299   : > { %v25601_v22 = vsel %vm25529_vm2, %v3990_v15, -inf }
 0x29a   : > { %v3373_v9 = vpop.f32.mrf.mxu1 }
 0x29b   : > { %v3992_v8 = vmul.f32 19.595919, %v3373_v9 }
 0x29c   : > { %v22251_v47 = vpop.f32.mrf.mxu1 }
 0x29d   : > { %v3905_v63 = vpop.f32.mrf.mxu0  ;;  %v4029_v47 = vsel %vm4019_vm3, %v25593_v2, -inf  ;;  %v25607_v27 = vsel %vm25529_vm2, %v3992_v8, -inf }
 0x29e   : > { %v3525_v37 = vpop.f32.mrf.mxu1 }
 0x29f   : > { %v22286_v51 = vpop.f32.mrf.mxu0  ;;  %v3994_v0 = vmul.f32 19.595919, %v3525_v37 }
 0x2a0   : > { %v22261_v38 = vpop.f32.mrf.mxu1  ;;  %v3997_v51 = vmul.f32 19.595919, %v3753_v62 }
 0x2a1   : > { %v25613_v9 = vsel %vm25529_vm2, %v3994_v0, -inf  ;;  %v3995_v38 = vmul.f32 19.595919, %v3601_v21  ;;  %v25647_v0 = vpop.permute.xlu1 %5388 }
 0x2a2   : > { %v3677_v6 = vpop.f32.mrf.mxu1  ;;  %v4047_v15 = vsel %vm4019_vm3, %v25613_v9, -inf  ;;  %v25625_v8 = vsel %vm25529_vm2, %v3997_v51, -inf }
 0x2a3   : > { %v25619_v37 = vsel %vm25529_vm2, %v3995_v38, -inf  ;;  %v4056_v21 = vsel %vm4019_vm3, %v25625_v8, -inf }
 0x2a4   : > { %v22271_v48 = vpop.f32.mrf.mxu1 }
 0x2a5   : > { %v4050_v48 = vsel %vm4019_vm3, %v25619_v37, -inf }
 0x2a6   : > { %v3829_v14 = vpop.f32.mrf.mxu1 }
 0x2a8   : > { %v22281_v39 = vpop.f32.mrf.mxu1 }
 0x2a9   : > { %5544 = vrot.lane.b32.xlu0 %v24822_v31, %s24367_s21  ;;  %v4035_v39 = vsel %vm4019_vm3, %v25601_v22, -inf  ;;  %v4041_v31 = vsel %vm4019_vm3, %v25607_v27, -inf }
 0x2aa   : > { %v3981_v50 = vpop.f32.mrf.mxu1 }
 0x2ab   : > { %4030 = vmax.xlane.f32.xlu1 %v4029_v47  ;;  %v3999_v47 = vmul.f32 19.595919, %v3905_v63 }
 0x2ac   : > { %v22291_v20 = vpop.f32.mrf.mxu1 }
 0x2ad   : > { %v25633_v62 = vsel %vm25529_vm2, %v3999_v47, -inf  ;;  %v3996_v20 = vmul.f32 19.595919, %v3677_v6 }
 0x2ae   : > { %v4062_v63 = vsel %vm4019_vm3, %v25633_v62, -inf }
 0x2af   : > { %4036 = vmax.xlane.f32.xlu1 %v4035_v39  ;;  %v25645_v39 = vsel %vm25529_vm2, %v3996_v20, -inf }
 0x2b3   : > { %4042 = vmax.xlane.f32.xlu1 %v4041_v31  ;;  %v4000_v31 = vmul.f32 19.595919, %v3981_v50 }
 0x2b7   : > { %4048 = vmax.xlane.f32.xlu1 %v4047_v15 }
 0x2c8   : > { %4051 = vmax.xlane.f32.xlu0 %v4050_v48  ;;  %5780 = vrot.lane.b32.xlu1 %v25210_v28, %s24367_s21  ;;  %v3998_v28 = vmul.f32 19.595919, %v3829_v14  ;;  %v25659_v14 = vpop.permute.xlu0 %5390 }
 0x2cc   : > { %4057 = vmax.xlane.f32.xlu0 %v4056_v21  ;;  %5778 = vrot.lane.b32.xlu1 %v29405_v35, %s24367_s21  ;;  %v4053_v35 = vsel %vm4019_vm3, %v25645_v39, -inf  ;;  %v25669_v50 = vpop.permute.xlu0 %5546 }
 0x2d0   : > { %4063 = vmax.xlane.f32.xlu0 %v4062_v63 }
 0x2e6   : > { %5702 = vrot.lane.b32.xlu0 %v25089_v3, %s24367_s21  ;;  %v25655_v3 = vsel %vm25529_vm2, %v3998_v28, -inf }
 0x2e7   : > { %v4059_v6 = vsel %vm4019_vm3, %v25655_v3, -inf }
 0x2ea   : > { %5700 = vrot.lane.b32.xlu0 %v24854_v42, %s24367_s21  ;;  %v25657_v42 = vpop.permute.xlu1 %5466 }
 0x2ee   : > { %5858 = vrot.lane.b32.xlu0 %v25122_v24, %s24367_s21  ;;  %v25665_v24 = vsel %vm25529_vm2, %v4000_v31, -inf  ;;  %v25667_v15 = vpop.permute.xlu1 %5468 }
 0x2ef   : > { %v4065_v38 = vsel %vm4019_vm3, %v25665_v24, -inf }
 0x2f0   : > { %4054 = vmax.xlane.f32.xlu1 %v4053_v35 }
 0x2f2   : > { %v25673_v51 = vpop.permute.xlu1 %5624 }
 0x2f3   : > { %29513 = vst [vmem:[#allocation153_spill] sm:$0xff] %v25673_v51 }
 0x2f4   : > { %4060 = vmax.xlane.f32.xlu1 %v4059_v6 }
 0x2f8   : > { %4066 = vmax.xlane.f32.xlu1 %v4065_v38 }
 0x2fb   : > { %v4022_v48 = vpop.xlane.xlu0 %4021 }
 0x2fc   : > { %v4068_v47 = vsub.f32 %v25535_v26, %v4022_v48 }
 0x2fe   : > { %v4084_v21 = vmul.f32 1.442695, %v4068_v47 }
 0x2ff   : > { %v4028_v63 = vpop.xlane.xlu1 %4027 }
 0x300   : > { %23823 = vpow2.f32 %v4084_v21  ;;  %v4070_v20 = vsub.f32 %v25545_v54, %v4028_v63 }
 0x302   : > { %v4088_v28 = vmul.f32 1.442695, %v4070_v20 }
 0x303   : > { %v4034_v35 = vpop.xlane.xlu0 %4033 }
 0x304   : > { %23825 = vpow2.f32 %v4088_v28  ;;  %v4072_v31 = vsub.f32 %v25551_v49, %v4034_v35 }
 0x306   : > { %v4092_v6 = vmul.f32 1.442695, %v4072_v31 }
 0x308   : > { %23827 = vpow2.f32 %v4092_v6 }
 0x309   : > { %5936 = vrot.lane.b32.xlu1 %v25232_v13, %s24367_s21 }
 0x30b   : > { %v4040_v38 = vpop.xlane.xlu0 %4039 }
 0x30c   : > { %v4074_v57 = vsub.f32 %v25561_v10, %v4040_v38 }
 0x30d   : > { %v25681_v51 = vpop.eup %23823 }
 0x30e   : > { %v4096_v26 = vmul.f32 1.442695, %v4074_v57  ;;  %v4116_v48 = vsel %vm4019_vm3, %v25681_v51, 0.0 }
 0x30f   : > { %4117 = vadd.xlane.f32.xlu0 %v4116_v48 }
 0x310   : > { %23829 = vpow2.f32 %v4096_v26 }
 0x311   : > { %v25685_v54 = vpop.eup %23825 }
 0x312   : > { %v4122_v49 = vsel %vm4019_vm3, %v25685_v54, 0.0 }
 0x313   : > { %v4046_v47 = vpop.xlane.xlu0 %4045  ;;  %4123 = vadd.xlane.f32.xlu0 %v4122_v49 }
 0x314   : > { %v4076_v13 = vsub.f32 %v25577_v55, %v4046_v47 }
 0x315   : > { %v25690_v21 = vpop.eup %23827 }
 0x316   : > { %v4100_v10 = vmul.f32 1.442695, %v4076_v13  ;;  %v4128_v57 = vsel %vm4019_vm3, %v25690_v21, 0.0 }
 0x317   : > { %4129 = vadd.xlane.f32.xlu0 %v4128_v57 }
 0x318   : > { %23831 = vpow2.f32 %v4100_v10 }
 0x31c   : > { %v4025_v63 = vpop.xlane.xlu0 %4024 }
 0x31d   : > { %v4069_v20 = vsub.f32 %v25587_v11, %v4025_v63  ;;  %v25695_v28 = vpop.eup %23829  ;;  %v25707_v11 = vpop.permute.xlu1 %5622 }
 0x31e   : > { %v4134_v31 = vsel %vm4019_vm3, %v25695_v28, 0.0  ;;  %29514 = vst [vmem:[#allocation154_spill] sm:$0xff] %v25707_v11 }
 0x31f   : > { %v4086_v35 = vmul.f32 1.442695, %v4069_v20  ;;  %4135 = vadd.xlane.f32.xlu0 %v4134_v31 }
 0x321   : > { %23833 = vpow2.f32 %v4086_v35 }
 0x325   : > { %v25699_v55 = vpop.eup %23831 }
 0x326   : > { %v4140_v6 = vsel %vm4019_vm3, %v25699_v55, 0.0 }
 0x327   : > { %4141 = vadd.xlane.f32.xlu0 %v4140_v6 }
 0x32e   : > { %v25703_v38 = vpop.eup %23833 }
 0x32f   : > { %v4119_v26 = vsel %vm4019_vm3, %v25703_v38, 0.0 }
 0x330   : > { %4120 = vadd.xlane.f32.xlu1 %v4119_v26 }
 0x334   : > { %v4031_v48 = vpop.xlane.xlu1 %4030 }
 0x335   : > { %v4071_v49 = vsub.f32 %v25593_v2, %v4031_v48 }
 0x337   : > { %v4090_v47 = vmul.f32 1.442695, %v4071_v49  ;;  %v25721_v49 = vpop.permute.xlu0 %5544 }
 0x338   : > { %v4037_v13 = vpop.xlane.xlu1 %4036 }
 0x339   : > { %23835 = vpow2.f32 %v4090_v47  ;;  %v4073_v10 = vsub.f32 %v25601_v22, %v4037_v13 }
 0x33b   : > { %v4094_v57 = vmul.f32 1.442695, %v4073_v10 }
 0x33c   : > { %v4043_v63 = vpop.xlane.xlu1 %4042 }
 0x33d   : > { %23837 = vpow2.f32 %v4094_v57  ;;  %v4075_v20 = vsub.f32 %v25607_v27, %v4043_v63 }
 0x33f   : > { %v4098_v35 = vmul.f32 1.442695, %v4075_v20 }
 0x340   : > { %v4049_v31 = vpop.xlane.xlu1 %4048 }
 0x341   : > { %23839 = vpow2.f32 %v4098_v35  ;;  %v4077_v6 = vsub.f32 %v25613_v9, %v4049_v31 }
 0x343   : > { %v4102_v26 = vmul.f32 1.442695, %v4077_v6 }
 0x345   : > { %23841 = vpow2.f32 %v4102_v26 }
 0x346   : > { %v25713_v11 = vpop.eup %23835 }
 0x347   : > { %v4125_v2 = vsel %vm4019_vm3, %v25713_v11, 0.0 }
 0x348   : > { %4126 = vadd.xlane.f32.xlu1 %v4125_v2 }
 0x34a   : > { %v25717_v48 = vpop.eup %23837 }
 0x34b   : > { %v4131_v22 = vsel %vm4019_vm3, %v25717_v48, 0.0 }
 0x34c   : > { %4132 = vadd.xlane.f32.xlu1 %v4131_v22 }
 0x34e   : > { %v25723_v27 = vpop.eup %23839 }
 0x34f   : > { %v4137_v9 = vsel %vm4019_vm3, %v25723_v27, 0.0 }
 0x350   : > { %4138 = vadd.xlane.f32.xlu1 %v4137_v9 }
 0x351   : > { %v4052_v47 = vpop.xlane.xlu0 %4051 }
 0x352   : > { %v4078_v13 = vsub.f32 %v25619_v37, %v4052_v47  ;;  %v25728_v10 = vpop.eup %23841 }
 0x353   : > { %v4143_v63 = vsel %vm4019_vm3, %v25728_v10, 0.0 }
 0x354   : > { %v4104_v57 = vmul.f32 1.442695, %v4078_v13  ;;  %4144 = vadd.xlane.f32.xlu1 %v4143_v63  ;;  %v25750_v13 = vpop.permute.xlu1 %5780 }
 0x355   : > { %v4058_v20 = vpop.xlane.xlu0 %4057 }
 0x356   : > { %23843 = vpow2.f32 %v4104_v57  ;;  %v4080_v35 = vsub.f32 %v25625_v8, %v4058_v20 }
 0x358   : > { %v4108_v31 = vmul.f32 1.442695, %v4080_v35  ;;  %v25752_v57 = vpop.permute.xlu1 %5778 }
 0x359   : > { %v4064_v6 = vpop.xlane.xlu0 %4063 }
 0x35a   : > { %23845 = vpow2.f32 %v4108_v31  ;;  %v4082_v26 = vsub.f32 %v25633_v62, %v4064_v6 }
 0x35c   : > { %v4112_v2 = vmul.f32 1.442695, %v4082_v26 }
 0x35e   : > { %23847 = vpow2.f32 %v4112_v2 }
 0x363   : > { %v25734_v22 = vpop.eup %23843 }
 0x364   : > { %v4146_v37 = vsel %vm4019_vm3, %v25734_v22, 0.0 }
 0x365   : > { %4147 = vadd.xlane.f32.xlu0 %v4146_v37  ;;  %5934 = vrot.lane.b32.xlu1 %v24900_v1, %s24367_s21  ;;  %v25761_v37 = vpop.permute.xlu0 %5702 }
 0x367   : > { %v25740_v9 = vpop.eup %23845 }
 0x368   : > { %v4152_v8 = vsel %vm4019_vm3, %v25740_v9, 0.0 }
 0x369   : > { %4153 = vadd.xlane.f32.xlu0 %v4152_v8  ;;  %6092 = vrot.lane.b32.xlu1 %v25254_v18, %s24367_s21 }
 0x36b   : > { %v25746_v62 = vpop.eup %23847 }
 0x36c   : > { %v4158_v47 = vsel %vm4019_vm3, %v25746_v62, 0.0 }
 0x36d   : > { %4159 = vadd.xlane.f32.xlu0 %v4158_v47 }
 0x379   : > { %v4055_v1 = vpop.xlane.xlu1 %4054 }
 0x37a   : > { %v4079_v63 = vsub.f32 %v25645_v39, %v4055_v1 }
 0x37c   : > { %v4106_v20 = vmul.f32 1.442695, %v4079_v63 }
 0x37d   : > { %v4061_v35 = vpop.xlane.xlu1 %4060 }
 0x37e   : > { %23849 = vpow2.f32 %v4106_v20  ;;  %v4081_v31 = vsub.f32 %v25655_v3, %v4061_v35  ;;  %v29515_v35 = vld [vmem:[#allocation119_spill] sm:$0xff] }
 0x380   : > { %v4110_v6 = vmul.f32 1.442695, %v4081_v31 }
 0x381   : > { %v4067_v18 = vpop.xlane.xlu1 %4066 }
 0x382   : > { %23851 = vpow2.f32 %v4110_v6  ;;  %v4083_v26 = vsub.f32 %v25665_v24, %v4067_v18  ;;  %v25769_v24 = vpop.permute.xlu0 %5700 }
 0x383   : > { %5856 = vrot.lane.b32.xlu0 %v24886_v56, %s24367_s21 }
 0x384   : > { %v4114_v2 = vmul.f32 1.442695, %v4083_v26 }
 0x386   : > { %23853 = vpow2.f32 %v4114_v2  ;;  %v25781_v8 = vpop.permute.xlu0 %5858 }
 0x387   : > { %6014 = vrot.lane.b32.xlu0 %v25151_v44, %s24367_s21 }
 0x38b   : > { %6012 = vrot.lane.b32.xlu0 %v24914_v7, %s24367_s21  ;;  %v25765_v39 = vpop.eup %23849 }
 0x38c   : > { %v4149_v3 = vsel %vm4019_vm3, %v25765_v39, 0.0 }
 0x38d   : > { %4150 = vadd.xlane.f32.xlu1 %v4149_v3  ;;  %v29516_v3 = vld [vmem:[#allocation121_spill] sm:$0xff] }
 0x38f   : > { %6170 = vrot.lane.b32.xlu0 %v25178_v12, %s24367_s21  ;;  %v25773_v56 = vpop.eup %23851 }
 0x390   : > { %v4155_v44 = vsel %vm4019_vm3, %v25773_v56, 0.0 }
 0x391   : > { %4156 = vadd.xlane.f32.xlu1 %v4155_v44 }
 0x393   : > { %6168 = vrot.lane.b32.xlu0 %v24942_v23, %s24367_s21  ;;  %v25779_v7 = vpop.eup %23853 }
 0x394   : > { %v4161_v47 = vsel %vm4019_vm3, %v25779_v7, 0.0 }
 0x395   : > { %4162 = vadd.xlane.f32.xlu1 %v4161_v47 }
 0x397   : > { %6326 = vrot.lane.b32.xlu0 %v25213_v61, %s24367_s21 }
 0x398   : > { %v4118_v12 = vpop.xlane.xlu0 %4117 }
 0x399   : > { %23855 = vrcp.f32 %v4118_v12 }
 0x39b   : > { %6324 = vrot.lane.b32.xlu0 %v24970_v58, %s24367_s21 }
 0x39c   : > { %v4124_v1 = vpop.xlane.xlu0 %4123 }
 0x39d   : > { %23857 = vrcp.f32 %v4124_v1  ;;  %v29517_v1 = vld [vmem:[#allocation127_spill] sm:$0xff] }
 0x39f   : > { %6482 = vrot.lane.b32.xlu0 %v25257_v5, %s24367_s21 }
 0x3a0   : > { %v4130_v23 = vpop.xlane.xlu0 %4129 }
 0x3a1   : > { %23859 = vrcp.f32 %v4130_v23 }
 0x3a3   : > { %6480 = vrot.lane.b32.xlu0 %v24998_v59, %s24367_s21 }
 0x3a6   : > { %v23856_v63 = vpop.eup %23855  ;;  %6090 = vrot.lane.b32.xlu1 %v24928_v25, %s24367_s21 }
 0x3a7   : > { %6845 = vrot.lane.b32.xlu0 %v25418_v17, %s24367_s21  ;;  %v4180_v61 = vmul.f32 %v23856_v63, %v25681_v51 }
 0x3a8   : > { %v4136_v58 = vpop.xlane.xlu0 %4135 }
 0x3a9   : > { %23861 = vrcp.f32 %v4136_v58  ;;  %22295 = vmatmul.mubr.msk.f32.vlgmr.msra.gmra.mxu0 %vm4019_vm3, %v4180_v61 }
 0x3aa   : > { %v23858_v20 = vpop.eup %23857  ;;  %22303 = vmatpush3.msra.mxu0 %v25434_v19  ;;  %6248 = vrot.lane.b32.xlu1 %v25276_v53, %s24367_s21 }
 0x3ab   : > { %v4182_v59 = vmul.f32 %v23858_v20, %v25685_v54  ;;  %6999 = vrot.lane.b32.xlu0 %v25434_v19, %s24367_s21  ;;  %22304 = vmatprep.mubr.msk.f32.mxu0 %vm24369_vm1, %v29384_v32 }
 0x3ac   : > { %22312 = vmatprep.subr.mxu0 %v29384_v32 }
 0x3ad   : > { %22305 = vmatmul.mubr.msk.f32.vlgmr.msra.gmra.mxu0 %vm4019_vm3, %v4182_v59 }
 0x3ae   : > { %v23860_v25 = vpop.eup %23859  ;;  %22313 = vmatpush3.msra.mxu0 %v25446_v30  ;;  %6246 = vrot.lane.b32.xlu1 %v24956_v43, %s24367_s21  ;;  %v25825_v43 = vpop.permute.xlu1 %5936 }
 0x3af   : > { %v4184_v5 = vmul.f32 %v23860_v25, %v25690_v21  ;;  %7307 = vrot.lane.b32.xlu0 %v25456_v41, %s24367_s21  ;;  %22314 = vmatprep.mubr.msk.f32.mxu0 %vm24369_vm1, %v29384_v32 }
 0x3b0   : > { %22322 = vmatprep.subr.mxu0 %v29384_v32  ;;  %v4142_v53 = vpop.xlane.xlu0 %4141 }
 0x3b1   : > { %23863 = vrcp.f32 %v4142_v53  ;;  %22315 = vmatmul.mubr.msk.f32.vlgmr.msra.gmra.mxu0 %vm4019_vm3, %v4184_v5  ;;  %v29518_v5 = vld [vmem:[#allocation124_spill] sm:$0xff] }
 0x3b2   : > { %22323 = vmatpush3.msra.mxu0 %v25456_v41  ;;  %6404 = vrot.lane.b32.xlu1 %v25298_v40, %s24367_s21 }
 0x3b3   : > { %22324 = vmatprep.mubr.msk.f32.mxu0 %vm24369_vm1, %v29384_v32  ;;  %22332 = vmatprep.subr.mxu0 %v29384_v32 }
 0x3b6   : > { %v23862_v17 = vpop.eup %23861  ;;  %6402 = vrot.lane.b32.xlu1 %v24984_v60, %s24367_s21 }
 0x3b7   : > { %v4186_v19 = vmul.f32 %v23862_v17, %v25695_v28 }
 0x3b9   : > { %v4121_v51 = vpop.xlane.xlu1 %4120  ;;  %22325 = vmatmul.mubr.msk.f32.vlgmr.msra.gmra.mxu0 %vm4019_vm3, %v4186_v19  ;;  %v29519_v19 = vld [vmem:[#allocation129_spill] sm:$0xff] }
 0x3ba   : > { %23865 = vrcp.f32 %v4121_v51  ;;  %22333 = vmatpush3.msra.mxu0 %v25466_v33  ;;  %6560 = vrot.lane.b32.xlu1 %v25315_v4, %s24367_s21 }
 0x3bb   : > { %22334 = vmatprep.mubr.msk.f32.mxu0 %vm24369_vm1, %v29384_v32  ;;  %22342 = vmatprep.subr.mxu0 %v29384_v32 }
 0x3be   : > { %v23864_v40 = vpop.eup %23863  ;;  %6558 = vrot.lane.b32.xlu1 %v25012_v16, %s24367_s21 }
 0x3bf   : > { %v4188_v60 = vmul.f32 %v23864_v40, %v25699_v55  ;;  %v29520_v40 = vld [vmem:[#allocation153_spill] sm:$0xff] }
 0x3c1   : > { %22335 = vmatmul.mubr.msk.f32.vlgmr.msra.gmra.mxu0 %vm4019_vm3, %v4188_v60  ;;  %v29521_v60 = vld [vmem:[#allocation154_spill] sm:$0xff] }
 0x3c2   : > { %22343 = vmatpush3.msra.mxu0 %v25478_v45  ;;  %6922 = vrot.lane.b32.xlu1 %v25426_v36, %s24367_s21 }
 0x3c3   : > { %22344 = vmatprep.mubr.msk.f32.mxu0 %vm24369_vm1, %v29384_v32  ;;  %22352 = vmatprep.subr.mxu0 %v29384_v32 }
 0x3c6   : > { %7076 = vrot.lane.b32.xlu1 %v25440_v52, %s24367_s21 }
 0x3c7   : > { %v23866_v4 = vpop.eup %23865 }
 0x3c8   : > { %v4181_v16 = vmul.f32 %v23866_v4, %v25703_v38 }
 0x3ca   : > { %22300 = vmatmul.mubr.msk.f32.vlgmr.msra.gmra.mxu1 %vm4019_vm3, %v4181_v16  ;;  %7153 = vrot.lane.b32.xlu1 %v25446_v30, %s24367_s21 }
 0x3cb   : > { %22308 = vmatpush3.msra.mxu1 %v25440_v52  ;;  %22309 = vmatprep.mubr.msk.f32.mxu1 %vm24369_vm1, %v29384_v32 }
 0x3cc   : > { %22317 = vmatprep.subr.mxu1 %v29384_v32 }
 0x3ce   : > { %7230 = vrot.lane.b32.xlu1 %v25450_v29, %s24367_s21 }
 0x3d1   : > { %v4127_v36 = vpop.xlane.xlu1 %4126 }
 0x3d2   : > { %23867 = vrcp.f32 %v4127_v36  ;;  %7384 = vrot.lane.b32.xlu1 %v25460_v46, %s24367_s21 }
 0x3d5   : > { %v4133_v41 = vpop.xlane.xlu1 %4132 }
 0x3d6   : > { %23869 = vrcp.f32 %v4133_v41 }
 0x3d9   : > { %v4139_v54 = vpop.xlane.xlu1 %4138 }
 0x3da   : > { %23871 = vrcp.f32 %v4139_v54 }
 0x3dd   : > { %v4145_v52 = vpop.xlane.xlu1 %4144 }
 0x3de   : > { %23873 = vrcp.f32 %v4145_v52 }
 0x3df   : > { %v23868_v30 = vpop.eup %23867 }
 0x3e0   : > { %v4183_v21 = vmul.f32 %v23868_v30, %v25713_v11 }
 0x3e2   : > { %22310 = vmatmul.mubr.msk.f32.vlgmr.msra.gmra.mxu1 %vm4019_vm3, %v4183_v21 }
 0x3e3   : > { %v23870_v28 = vpop.eup %23869  ;;  %22318 = vmatpush3.msra.mxu1 %v25450_v29  ;;  %22319 = vmatprep.mubr.msk.f32.mxu1 %vm24369_vm1, %v29384_v32 }
 0x3e4   : > { %v4185_v55 = vmul.f32 %v23870_v28, %v25717_v48  ;;  %22327 = vmatprep.subr.mxu1 %v29384_v32 }
 0x3e6   : > { %22320 = vmatmul.mubr.msk.f32.vlgmr.msra.gmra.mxu1 %vm4019_vm3, %v4185_v55 }
 0x3e7   : > { %v23872_v38 = vpop.eup %23871  ;;  %22328 = vmatpush3.msra.mxu1 %v25460_v46  ;;  %22329 = vmatprep.mubr.msk.f32.mxu1 %vm24369_vm1, %v29384_v32 }
 0x3e8   : > { %v4187_v11 = vmul.f32 %v23872_v38, %v25723_v27  ;;  %22337 = vmatprep.subr.mxu1 %v29384_v32 }
 0x3ea   : > { %22330 = vmatmul.mubr.msk.f32.vlgmr.msra.gmra.mxu1 %vm4019_vm3, %v4187_v11 }
 0x3eb   : > { %v23874_v29 = vpop.eup %23873  ;;  %22338 = vmatpush3.msra.mxu1 %v25472_v34  ;;  %22339 = vmatprep.mubr.msk.f32.mxu1 %vm24369_vm1, %v29384_v32 }
 0x3ec   : > { %v4189_v48 = vmul.f32 %v23874_v29, %v25728_v10  ;;  %22347 = vmatprep.subr.mxu1 %v29384_v32 }
 0x3ee   : > { %v4148_v46 = vpop.xlane.xlu0 %4147  ;;  %22340 = vmatmul.mubr.msk.f32.vlgmr.msra.gmra.mxu1 %vm4019_vm3, %v4189_v48 }
 0x3ef   : > { %23875 = vrcp.f32 %v4148_v46  ;;  %22348 = vmatpush3.msra.mxu1 %v29515_v35  ;;  %22349 = vmatprep.mubr.msk.f32.mxu1 %vm24369_vm1, %v29384_v32 }
 0x3f0   : > { %22357 = vmatprep.subr.mxu1 %v29384_v32 }
 0x3f2   : > { %v4154_v27 = vpop.xlane.xlu0 %4153 }
 0x3f3   : > { %23877 = vrcp.f32 %v4154_v27 }
 0x3f6   : > { %v4160_v31 = vpop.xlane.xlu0 %4159 }
 0x3f7   : > { %23879 = vrcp.f32 %v4160_v31 }
 0x3fa   : > { %v5857_v6 = vpop.permute.xlu0 %5856 }
 0x3fc   : > { %v23876_v18 = vpop.eup %23875 }
 0x3fd   : > { %v4190_v10 = vmul.f32 %v23876_v18, %v25734_v22 }
 0x3fe   : > { %v6015_v26 = vpop.permute.xlu0 %6014 }
 0x3ff   : > { %22345 = vmatmul.mubr.msk.f32.vlgmr.msra.gmra.mxu0 %vm4019_vm3, %v4190_v10 }
 0x400   : > { %v23878_v2 = vpop.eup %23877  ;;  %22353 = vmatpush3.msra.mxu0 %v29516_v3  ;;  %22354 = vmatprep.mubr.msk.f32.mxu0 %vm24369_vm1, %v29384_v32 }
 0x401   : > { %v4192_v44 = vmul.f32 %v23878_v2, %v25740_v9  ;;  %22362 = vmatprep.subr.mxu0 %v29384_v32 }
 0x402   : > { %v6013_v47 = vpop.permute.xlu0 %6012 }
 0x403   : > { %22355 = vmatmul.mubr.msk.f32.vlgmr.msra.gmra.mxu0 %vm4019_vm3, %v4192_v44 }
 0x404   : > { %v23880_v12 = vpop.eup %23879  ;;  %22363 = vmatpush3.msra.mxu0 %v29517_v1  ;;  %22364 = vmatprep.mubr.msk.f32.mxu0 %vm24369_vm1, %v29384_v32 }
 0x405   : > { %v4194_v22 = vmul.f32 %v23880_v12, %v25746_v62  ;;  %22372 = vmatprep.subr.mxu0 %v29384_v32  ;;  %v25910_v62 = vpop.permute.xlu1 %5934 }
 0x406   : > { %v6171_v23 = vpop.permute.xlu0 %6170 }
 0x407   : > { %22365 = vmatmul.mubr.msk.f32.vlgmr.msra.gmra.mxu0 %vm4019_vm3, %v4194_v22 }
 0x408   : > { %22373 = vmatpush3.xpose.msk.msra.mxu0 %vm2768_vm0, %v25659_v14  ;;  %22374 = vmatprep.mubr.msk.f32.mxu0 %vm24369_vm1, %v29384_v32 }
 0x409   : > { %22382 = vmatprep.subr.mxu0 %v29384_v32 }
 0x40a   : > { %v6169_v9 = vpop.permute.xlu0 %6168 }
 0x40b   : > { %22375 = vmatmul.mubr.msk.f32.vlgmr.msra.gmra.mxu0 %vm2768_vm0, %v25647_v0  ;;  %v25920_v0 = vpop.permute.xlu1 %6092 }
 0x40c   : > { %22383 = vmatpush3.xpose.msk.msra.mxu0 %vm2768_vm0, %v25669_v50  ;;  %22384 = vmatprep.mubr.msk.f32.mxu0 %vm24369_vm1, %v29384_v32 }
 0x40d   : > { %22392 = vmatprep.subr.mxu0 %v29384_v32 }
 0x40e   : > { %v6327_v14 = vpop.permute.xlu0 %6326 }
 0x40f   : > { %22385 = vmatmul.mubr.msk.f32.vlgmr.msra.gmra.mxu0 %vm2768_vm0, %v25721_v49 }
 0x410   : > { %22393 = vmatpush3.xpose.msk.msra.mxu0 %vm2768_vm0, %v25761_v37  ;;  %22394 = vmatprep.mubr.msk.f32.mxu0 %vm24369_vm1, %v29384_v32 }
 0x411   : > { %22402 = vmatprep.subr.mxu0 %v29384_v32 }
 0x412   : > { %v6325_v50 = vpop.permute.xlu0 %6324 }
 0x413   : > { %22395 = vmatmul.mubr.msk.f32.vlgmr.msra.gmra.mxu0 %vm2768_vm0, %v25769_v24 }
 0x414   : > { %22403 = vmatpush3.xpose.msk.msra.mxu0 %vm2768_vm0, %v25781_v8  ;;  %22404 = vmatprep.mubr.msk.f32.mxu0 %vm24369_vm1, %v29384_v32 }
 0x415   : > { %22412 = vmatprep.subr.mxu0 %v29384_v32 }
 0x416   : > { %v4151_v49 = vpop.xlane.xlu1 %4150  ;;  %v6483_v37 = vpop.permute.xlu0 %6482 }
 0x417   : > { %22405 = vmatmul.mubr.msk.f32.vlgmr.msra.gmra.mxu0 %vm2768_vm0, %v5857_v6  ;;  %23881 = vrcp.f32 %v4151_v49 }
 0x418   : > { %22413 = vmatpush3.xpose.msk.msra.mxu0 %vm2768_vm0, %v6015_v26  ;;  %22414 = vmatprep.mubr.msk.f32.mxu0 %vm24369_vm1, %v29384_v32 }
 0x419   : > { %22422 = vmatprep.subr.mxu0 %v29384_v32 }
 0x41a   : > { %v4157_v24 = vpop.xlane.xlu1 %4156  ;;  %v6481_v63 = vpop.permute.xlu0 %6480 }
 0x41b   : > { %22415 = vmatmul.mubr.msk.f32.vlgmr.msra.gmra.mxu0 %vm2768_vm0, %v6013_v47  ;;  %23883 = vrcp.f32 %v4157_v24 }
 0x41c   : > { %22423 = vmatpush3.xpose.msk.msra.mxu0 %vm2768_vm0, %v6171_v23  ;;  %22424 = vmatprep.mubr.msk.f32.mxu0 %vm24369_vm1, %v29384_v32 }
 0x41d   : > { %22432 = vmatprep.subr.mxu0 %v29384_v32 }
 0x41e   : > { %v4163_v8 = vpop.xlane.xlu1 %4162  ;;  %v6846_v59 = vpop.permute.xlu0 %6845 }
 0x41f   : > { %22425 = vmatmul.mubr.msk.f32.vlgmr.msra.gmra.mxu0 %vm2768_vm0, %v6169_v9  ;;  %23885 = vrcp.f32 %v4163_v8 }
 0x420   : > { %22433 = vmatpush3.xpose.msk.msra.mxu0 %vm2768_vm0, %v6327_v14  ;;  %22434 = vmatprep.mubr.msk.f32.mxu0 %vm24369_vm1, %v29384_v32 }
 0x421   : > { %22442 = vmatprep.subr.mxu0 %v29384_v32 }
 0x422   : > { %v6091_v20 = vpop.permute.xlu1 %6090 }
 0x423   : > { %22435 = vmatmul.mubr.msk.f32.vlgmr.msra.gmra.mxu0 %vm2768_vm0, %v6325_v50 }
 0x424   : > { %22443 = vmatpush3.xpose.msk.msra.mxu0 %vm2768_vm0, %v6483_v37  ;;  %22444 = vmatprep.mubr.msk.f32.mxu0 %vm24369_vm1, %v29384_v32  ;;  %v23882_v61 = vpop.eup %23881 }
 0x425   : > { %22452 = vmatprep.subr.mxu0 %v29384_v32  ;;  %v4191_v58 = vmul.f32 %v23882_v61, %v25765_v39 }
 0x426   : > { %v6249_v39 = vpop.permute.xlu1 %6248 }
 0x427   : > { %22445 = vmatmul.mubr.msk.f32.vlgmr.msra.gmra.mxu0 %vm2768_vm0, %v6481_v63  ;;  %22350 = vmatmul.mubr.msk.f32.vlgmr.msra.gmra.mxu1 %vm4019_vm3, %v4191_v58 }
 0x428   : > { %22453 = vmatpush3.msra.mxu0 %v6846_v59  ;;  %v23884_v25 = vpop.eup %23883  ;;  %22358 = vmatpush3.msra.mxu1 %v29518_v5 }
 0x429   : > { %22359 = vmatprep.mubr.msk.f32.mxu1 %vm24369_vm1, %v29384_v32  ;;  %v4193_v53 = vmul.f32 %v23884_v25, %v25773_v56  ;;  %22367 = vmatprep.subr.mxu1 %v29384_v32 }
 0x42a   : > { %22454 = vmatprep.mubr.msk.f32.mxu0 %vm24369_vm1, %v29384_v32  ;;  %22462 = vmatprep.subr.mxu0 %v29384_v32  ;;  %v6247_v56 = vpop.permute.xlu1 %6246 }
 0x42b   : > { %22360 = vmatmul.mubr.msk.f32.vlgmr.msra.gmra.mxu1 %vm4019_vm3, %v4193_v53 }
 0x42c   : > { %v23886_v17 = vpop.eup %23885  ;;  %22368 = vmatpush3.msra.mxu1 %v29519_v19  ;;  %22369 = vmatprep.mubr.msk.f32.mxu1 %vm24369_vm1, %v29384_v32 }
 0x42d   : > { %v4195_v51 = vmul.f32 %v23886_v17, %v25779_v7  ;;  %22377 = vmatprep.subr.mxu1 %v29384_v32 }
 0x42e   : > { %v6405_v7 = vpop.permute.xlu1 %6404 }
 0x42f   : > { %22370 = vmatmul.mubr.msk.f32.vlgmr.msra.gmra.mxu1 %vm4019_vm3, %v4195_v51 }
 0x430   : > { %22378 = vmatpush3.xpose.msk.msra.mxu1 %vm2768_vm0, %v25667_v15  ;;  %22379 = vmatprep.mubr.msk.f32.mxu1 %vm24369_vm1, %v29384_v32 }
 0x431   : > { %22387 = vmatprep.subr.mxu1 %v29384_v32 }
 0x433   : > { %22380 = vmatmul.mubr.msk.f32.vlgmr.msra.gmra.mxu1 %vm2768_vm0, %v25657_v42  ;;  %v6403_v42 = vpop.permute.xlu1 %6402 }
 0x434   : > { %22388 = vmatpush3.xpose.msk.msra.mxu1 %vm2768_vm0, %v29520_v40  ;;  %22389 = vmatprep.mubr.msk.f32.mxu1 %vm24369_vm1, %v29384_v32 }
 0x435   : > { %22397 = vmatprep.subr.mxu1 %v29384_v32 }
 0x437   : > { %22390 = vmatmul.mubr.msk.f32.vlgmr.msra.gmra.mxu1 %vm2768_vm0, %v29521_v60  ;;  %v6561_v15 = vpop.permute.xlu1 %6560 }
 0x438   : > { %22398 = vmatpush3.xpose.msk.msra.mxu1 %vm2768_vm0, %v25750_v13  ;;  %22399 = vmatprep.mubr.msk.f32.mxu1 %vm24369_vm1, %v29384_v32 }
 0x439   : > { %22407 = vmatprep.subr.mxu1 %v29384_v32 }
 0x43b   : > { %22400 = vmatmul.mubr.msk.f32.vlgmr.msra.gmra.mxu1 %vm2768_vm0, %v25752_v57  ;;  %v6559_v13 = vpop.permute.xlu1 %6558 }
 0x43c   : > { %22408 = vmatpush3.xpose.msk.msra.mxu1 %vm2768_vm0, %v25825_v43  ;;  %22409 = vmatprep.mubr.msk.f32.mxu1 %vm24369_vm1, %v29384_v32 }
 0x43d   : > { %22417 = vmatprep.subr.mxu1 %v29384_v32 }
 0x43f   : > { %22410 = vmatmul.mubr.msk.f32.vlgmr.msra.gmra.mxu1 %vm2768_vm0, %v25910_v62  ;;  %v6923_v57 = vpop.permute.xlu1 %6922 }
 0x440   : > { %22418 = vmatpush3.xpose.msk.msra.mxu1 %vm2768_vm0, %v25920_v0  ;;  %22419 = vmatprep.mubr.msk.f32.mxu1 %vm24369_vm1, %v29384_v32 }
 0x441   : > { %22427 = vmatprep.subr.mxu1 %v29384_v32 }
 0x443   : > { %22420 = vmatmul.mubr.msk.f32.vlgmr.msra.gmra.mxu1 %vm2768_vm0, %v6091_v20 }
 0x444   : > { %22428 = vmatpush3.xpose.msk.msra.mxu1 %vm2768_vm0, %v6249_v39  ;;  %22429 = vmatprep.mubr.msk.f32.mxu1 %vm24369_vm1, %v29384_v32 }
 0x445   : > { %22437 = vmatprep.subr.mxu1 %v29384_v32 }
 0x447   : > { %22430 = vmatmul.mubr.msk.f32.vlgmr.msra.gmra.mxu1 %vm2768_vm0, %v6247_v56 }
 0x448   : > { %22438 = vmatpush3.xpose.msk.msra.mxu1 %vm2768_vm0, %v6405_v7  ;;  %22439 = vmatprep.mubr.msk.f32.mxu1 %vm24369_vm1, %v29384_v32 }
 0x449   : > { %22447 = vmatprep.subr.mxu1 %v29384_v32 }
 0x44b   : > { %22440 = vmatmul.mubr.msk.f32.vlgmr.msra.gmra.mxu1 %vm2768_vm0, %v6403_v42 }
 0x44c   : > { %22448 = vmatpush3.xpose.msk.msra.mxu1 %vm2768_vm0, %v6561_v15  ;;  %22449 = vmatprep.mubr.msk.f32.mxu1 %vm24369_vm1, %v29384_v32 }
 0x44d   : > { %22457 = vmatprep.subr.mxu1 %v29384_v32 }
 0x44f   : > { %22450 = vmatmul.mubr.msk.f32.vlgmr.msra.gmra.mxu1 %vm2768_vm0, %v6559_v13 }
 0x450   : > { %22458 = vmatpush3.msra.mxu1 %v6923_v57  ;;  %22459 = vmatprep.mubr.msk.f32.mxu1 %vm24369_vm1, %v29384_v32 }
 0x451   : > { %22467 = vmatprep.subr.mxu1 %v29384_v32 }
 0x469   : > { %v4265_v43 = vpop.f32.mrf.mxu0 }
 0x46b   : > { %v22296_v4 = vpop.f32.mrf.mxu0 }
 0x46d   : > { %v4411_v16 = vpop.f32.mrf.mxu0 }
 0x46f   : > { %v22306_v36 = vpop.f32.mrf.mxu0 }
 0x471   : > { %v4557_v41 = vpop.f32.mrf.mxu0 }
 0x473   : > { %v22316_v54 = vpop.f32.mrf.mxu0 }
 0x479   : > { %v4703_v52 = vpop.f32.mrf.mxu0 }
 0x47b   : > { %v22326_v30 = vpop.f32.mrf.mxu0 }
 0x481   : > { %v4849_v21 = vpop.f32.mrf.mxu0 }
 0x483   : > { %v22336_v28 = vpop.f32.mrf.mxu0 }
 0x48a   : > { %v4338_v55 = vpop.f32.mrf.mxu1 }
 0x48b   : > { %v26019_v38 = vpack.c.bf16 %v4338_v55, %v4265_v43 }
 0x48c   : > { %v22301_v11 = vpop.f32.mrf.mxu1 }
 0x4a2   : > { %v4484_v29 = vpop.f32.mrf.mxu1 }
 0x4a3   : > { %v26021_v48 = vpack.c.bf16 %v4484_v29, %v4411_v16 }
 0x4a4   : > { %v22311_v46 = vpop.f32.mrf.mxu1 }
 0x4a6   : > { %v4630_v27 = vpop.f32.mrf.mxu1 }
 0x4a7   : > { %v26023_v31 = vpack.c.bf16 %v4630_v27, %v4557_v41 }
 0x4a8   : > { %v22321_v6 = vpop.f32.mrf.mxu1 }
 0x4aa   : > { %v4776_v18 = vpop.f32.mrf.mxu1 }
 0x4ab   : > { %v26025_v10 = vpack.c.bf16 %v4776_v18, %v4703_v52 }
 0x4ac   : > { %v22331_v26 = vpop.f32.mrf.mxu1 }
 0x4ae   : > { %v4922_v2 = vpop.f32.mrf.mxu1 }
 0x4af   : > { %v26027_v44 = vpack.c.bf16 %v4922_v2, %v4849_v21 }
 0x4b0   : > { %v22341_v47 = vpop.f32.mrf.mxu1 }
 0x4bf   : > { %v4995_v12 = vpop.f32.mrf.mxu0 }
 0x4c1   : > { %v22346_v22 = vpop.f32.mrf.mxu0 }
 0x4c3   : > { %v5141_v23 = vpop.f32.mrf.mxu0 }
 0x4c5   : > { %v22356_v9 = vpop.f32.mrf.mxu0 }
 0x4c7   : > { %v5287_v62 = vpop.f32.mrf.mxu0 }
 0x4c9   : > { %v22366_v14 = vpop.f32.mrf.mxu0 }
 0x4cb   : > { %v5462_v0 = vpop.f32.mrf.mxu0 }
 0x4cc   : > { %v6636_v50 = vmul.f32 19.595919, %v5462_v0 }
 0x4cd   : > { %v22376_v49 = vpop.f32.mrf.mxu0 }
 0x4ce   : > { %v26031_v24 = vsel %vm25529_vm2, %v6636_v50, -inf }
 0x4cf   : > { %v5618_v8 = vpop.f32.mrf.mxu0  ;;  %v6668_v63 = vsel %vm4019_vm3, %v26031_v24, -inf }
 0x4d0   : > { %v6638_v61 = vmul.f32 19.595919, %v5618_v8  ;;  %6669 = vmax.xlane.f32.xlu0 %v6668_v63 }
 0x4d1   : > { %v22386_v58 = vpop.f32.mrf.mxu0 }
 0x4d2   : > { %v26037_v20 = vsel %vm25529_vm2, %v6638_v61, -inf }
 0x4d3   : > { %v5774_v59 = vpop.f32.mrf.mxu0  ;;  %v6674_v25 = vsel %vm4019_vm3, %v26037_v20, -inf }
 0x4d4   : > { %v6640_v53 = vmul.f32 19.595919, %v5774_v59  ;;  %6675 = vmax.xlane.f32.xlu0 %v6674_v25 }
 0x4d5   : > { %v22396_v39 = vpop.f32.mrf.mxu0 }
 0x4d6   : > { %v26043_v17 = vsel %vm25529_vm2, %v6640_v53, -inf }
 0x4d7   : > { %v5930_v51 = vpop.f32.mrf.mxu0  ;;  %v6680_v56 = vsel %vm4019_vm3, %v26043_v17, -inf }
 0x4d8   : > { %v6642_v40 = vmul.f32 19.595919, %v5930_v51  ;;  %6681 = vmax.xlane.f32.xlu0 %v6680_v56 }
 0x4d9   : > { %v22406_v7 = vpop.f32.mrf.mxu0 }
 0x4da   : > { %v26049_v60 = vsel %vm25529_vm2, %v6642_v40, -inf }
 0x4db   : > { %v6086_v42 = vpop.f32.mrf.mxu0  ;;  %v6686_v15 = vsel %vm4019_vm3, %v26049_v60, -inf }
 0x4dc   : > { %6687 = vmax.xlane.f32.xlu0 %v6686_v15  ;;  %v6644_v51 = vmul.f32 19.595919, %v6086_v42 }
 0x4dd   : > { %v22416_v13 = vpop.f32.mrf.mxu0 }
 0x4df   : > { %v6242_v57 = vpop.f32.mrf.mxu0 }
 0x4e0   : > { %v6646_v15 = vmul.f32 19.595919, %v6242_v57 }
 0x4e1   : > { %v22426_v43 = vpop.f32.mrf.mxu0 }
 0x4e3   : > { %v6398_v4 = vpop.f32.mrf.mxu0 }
 0x4e5   : > { %v22436_v16 = vpop.f32.mrf.mxu0 }
 0x4e6   : > { %v6648_v16 = vmul.f32 19.595919, %v6398_v4 }
 0x4e7   : > { %v6554_v36 = vpop.f32.mrf.mxu0  ;;  %v5068_v41 = vpop.f32.mrf.mxu1 }
 0x4e8   : > { %v26053_v54 = vpack.c.bf16 %v5068_v41, %v4995_v12  ;;  %v26099_v41 = vsel %vm25529_vm2, %v6646_v15, -inf  ;;  %v26107_v4 = vsel %vm25529_vm2, %v6648_v16, -inf }
 0x4e9   : > { %v22446_v52 = vpop.f32.mrf.mxu0  ;;  %v22351_v30 = vpop.f32.mrf.mxu1 }
 0x4ea   : > { %v6698_v30 = vsel %vm4019_vm3, %v26099_v41, -inf }
 0x4eb   : > { %v5214_v21 = vpop.f32.mrf.mxu1 }
 0x4ec   : > { %v26055_v28 = vpack.c.bf16 %v5214_v21, %v5141_v23  ;;  %v6650_v21 = vmul.f32 19.595919, %v6554_v36  ;;  %v26119_v36 = vpop.permute.xlu0 %6999 }
 0x4ed   : > { %v22361_v55 = vpop.f32.mrf.mxu1 }
 0x4ee   : > { %v6704_v55 = vsel %vm4019_vm3, %v26107_v4, -inf }
 0x4ef   : > { %v5360_v11 = vpop.f32.mrf.mxu1 }
 0x4f0   : > { %v26057_v29 = vpack.c.bf16 %v5360_v11, %v5287_v62  ;;  %v26113_v11 = vsel %vm25529_vm2, %v6650_v21, -inf }
 0x4f1   : > { %v22371_v46 = vpop.f32.mrf.mxu1 }
 0x4f2   : > { %v6710_v46 = vsel %vm4019_vm3, %v26113_v11, -inf }
 0x4f3   : > { %v5540_v27 = vpop.f32.mrf.mxu1 }
 0x4f4   : > { %v6637_v6 = vmul.f32 19.595919, %v5540_v27  ;;  %v26123_v27 = vpop.permute.xlu0 %7307 }
 0x4f5   : > { %v22381_v18 = vpop.f32.mrf.mxu1 }
 0x4f6   : > { %v26061_v26 = vsel %vm25529_vm2, %v6637_v6, -inf }
 0x4f7   : > { %v5696_v2 = vpop.f32.mrf.mxu1  ;;  %v6671_v47 = vsel %vm4019_vm3, %v26061_v26, -inf }
 0x4f8   : > { %v6639_v12 = vmul.f32 19.595919, %v5696_v2  ;;  %6672 = vmax.xlane.f32.xlu1 %v6671_v47 }
 0x4f9   : > { %v22391_v22 = vpop.f32.mrf.mxu1 }
 0x4fa   : > { %v26067_v23 = vsel %vm25529_vm2, %v6639_v12, -inf }
 0x4fb   : > { %v5852_v9 = vpop.f32.mrf.mxu1  ;;  %v6677_v62 = vsel %vm4019_vm3, %v26067_v23, -inf }
 0x4fc   : > { %6678 = vmax.xlane.f32.xlu0 %v6677_v62  ;;  %v6641_v39 = vmul.f32 19.595919, %v5852_v9 }
 0x4fd   : > { %v22401_v14 = vpop.f32.mrf.mxu1 }
 0x4fe   : > { %v26077_v40 = vsel %vm25529_vm2, %v6641_v39, -inf }
 0x4ff   : > { %v6008_v0 = vpop.f32.mrf.mxu1  ;;  %v6683_v7 = vsel %vm4019_vm3, %v26077_v40, -inf }
 0x500   : > { %v6643_v56 = vmul.f32 19.595919, %v6008_v0 }
 0x501   : > { %v22411_v50 = vpop.f32.mrf.mxu1 }
 0x502   : > { %v26083_v13 = vsel %vm25529_vm2, %v6643_v56, -inf }
 0x503   : > { %v6164_v49 = vpop.f32.mrf.mxu1  ;;  %v6689_v42 = vsel %vm4019_vm3, %v26083_v13, -inf }
 0x505   : > { %v22421_v8 = vpop.f32.mrf.mxu1 }
 0x507   : > { %v6320_v63 = vpop.f32.mrf.mxu1 }
 0x508   : > { %v6647_v9 = vmul.f32 19.595919, %v6320_v63 }
 0x509   : > { %7538 = vrot.lane.b32.xlu1 %v25472_v34, %s24367_s21  ;;  %v22431_v61 = vpop.f32.mrf.mxu1  ;;  %v6645_v34 = vmul.f32 19.595919, %v6164_v49 }
 0x50a   : > { %v26132_v0 = vsel %vm25529_vm2, %v6647_v9, -inf }
 0x50b   : > { %v6476_v58 = vpop.f32.mrf.mxu1  ;;  %v26095_v57 = vsel %vm25529_vm2, %v6645_v34, -inf }
 0x50c   : > { %v6695_v52 = vsel %vm4019_vm3, %v26095_v57, -inf  ;;  %v6649_v14 = vmul.f32 19.595919, %v6476_v58  ;;  %v26151_v58 = vpop.permute.xlu1 %7076 }
 0x50d   : > { %v22441_v59 = vpop.f32.mrf.mxu1 }
 0x50f   : > { %v6632_v25 = vpop.f32.mrf.mxu1 }
 0x510   : > { %v6651_v49 = vmul.f32 19.595919, %v6632_v25 }
 0x511   : > { %v22451_v53 = vpop.f32.mrf.mxu1 }
 0x512   : > { %7461 = vrot.lane.b32.xlu0 %v25466_v33, %s24367_s21  ;;  %v26087_v33 = vsel %vm25529_vm2, %v6644_v51, -inf  ;;  %v26145_v63 = vsel %vm25529_vm2, %v6651_v49, -inf  ;;  %v26161_v51 = vpop.permute.xlu1 %7153 }
 0x513   : > { %v6692_v43 = vsel %vm4019_vm3, %v26087_v33, -inf }
 0x516   : > { %v26167_v15 = vpop.permute.xlu1 %7230 }
 0x52d   : > { %6684 = vmax.xlane.f32.xlu1 %v6683_v7 }
 0x531   : > { %6690 = vmax.xlane.f32.xlu1 %v6689_v42  ;;  %6693 = vmax.xlane.f32.xlu0 %v6692_v43  ;;  %v26173_v42 = vpop.permute.xlu1 %7384 }
 0x535   : > { %6696 = vmax.xlane.f32.xlu1 %v6695_v52  ;;  %6699 = vmax.xlane.f32.xlu0 %v6698_v30 }
 0x539   : > { %6705 = vmax.xlane.f32.xlu0 %v6704_v55 }
 0x53d   : > { %6711 = vmax.xlane.f32.xlu0 %v6710_v46 }
 0x546   : > { %7692 = vrot.lane.b32.xlu1 %v29515_v35, %s24367_s21 }
 0x553   : > { %7615 = vrot.lane.b32.xlu0 %v25478_v45, %s24367_s21 }
 0x557   : > { %7769 = vrot.lane.b32.xlu0 %v29516_v3, %s24367_s21 }
 0x559   : > { %v6670_v6 = vpop.xlane.xlu0 %6669 }
 0x55a   : > { %v6716_v2 = vsub.f32 %v26031_v24, %v6670_v6  ;;  %v6701_v24 = vsel %vm4019_vm3, %v26132_v0, -inf }
 0x55c   : > { %v6732_v12 = vmul.f32 1.442695, %v6716_v2 }
 0x55d   : > { %v6676_v18 = vpop.xlane.xlu0 %6675 }
 0x55e   : > { %v6718_v22 = vsub.f32 %v26037_v20, %v6676_v18  ;;  %23887 = vpow2.f32 %v6732_v12  ;;  %v26139_v20 = vsel %vm25529_vm2, %v6649_v14, -inf }
 0x55f   : > { %v6707_v8 = vsel %vm4019_vm3, %v26139_v20, -inf }
 0x560   : > { %v6736_v35 = vmul.f32 1.442695, %v6718_v22 }
 0x561   : > { %v6682_v47 = vpop.xlane.xlu0 %6681 }
 0x562   : > { %v6720_v62 = vsub.f32 %v26043_v17, %v6682_v47  ;;  %23889 = vpow2.f32 %v6736_v35 }
 0x564   : > { %v6740_v3 = vmul.f32 1.442695, %v6720_v62 }
 0x565   : > { %v6688_v45 = vpop.xlane.xlu0 %6687 }
 0x566   : > { %v6722_v50 = vsub.f32 %v26049_v60, %v6688_v45  ;;  %23891 = vpow2.f32 %v6740_v3  ;;  %v6713_v60 = vsel %vm4019_vm3, %v26145_v63, -inf }
 0x568   : > { %v6744_v17 = vmul.f32 1.442695, %v6722_v50 }
 0x56a   : > { %6702 = vmax.xlane.f32.xlu1 %v6701_v24  ;;  %23893 = vpow2.f32 %v6744_v17 }
 0x56b   : > { %v26149_v61 = vpop.eup %23887 }
 0x56c   : > { %v6764_v59 = vsel %vm4019_vm3, %v26149_v61, 0.0 }
 0x56e   : > { %6708 = vmax.xlane.f32.xlu1 %v6707_v8 }
 0x56f   : > { %v26155_v25 = vpop.eup %23889 }
 0x570   : > { %v6770_v53 = vsel %vm4019_vm3, %v26155_v25, 0.0 }
 0x572   : > { %6714 = vmax.xlane.f32.xlu1 %v6713_v60 }
 0x573   : > { %v26159_v39 = vpop.eup %23891 }
 0x574   : > { %v6776_v56 = vsel %vm4019_vm3, %v26159_v39, 0.0 }
 0x576   : > { %6765 = vadd.xlane.f32.xlu0 %v6764_v59 }
 0x577   : > { %v26165_v7 = vpop.eup %23893 }
 0x578   : > { %v6782_v34 = vsel %vm4019_vm3, %v26165_v7, 0.0 }
 0x57a   : > { %6771 = vadd.xlane.f32.xlu0 %v6770_v53 }
 0x57e   : > { %6777 = vadd.xlane.f32.xlu0 %v6776_v56 }
 0x581   : > { %v6673_v43 = vpop.xlane.xlu1 %6672 }
 0x582   : > { %6783 = vadd.xlane.f32.xlu0 %v6782_v34  ;;  %v6717_v16 = vsub.f32 %v26061_v26, %v6673_v43 }
 0x583   : > { %7846 = vrot.lane.b32.xlu1 %v29518_v5, %s24367_s21 }
 0x584   : > { %v6734_v30 = vmul.f32 1.442695, %v6717_v16 }
 0x585   : > { %v6679_v52 = vpop.xlane.xlu0 %6678  ;;  %v26185_v26 = vpop.permute.xlu1 %7538 }
 0x586   : > { %v6719_v21 = vsub.f32 %v26067_v23, %v6679_v52  ;;  %23895 = vpow2.f32 %v6734_v30 }
 0x588   : > { %v6738_v55 = vmul.f32 1.442695, %v6719_v21 }
 0x589   : > { %v26187_v2 = vpop.permute.xlu0 %7461 }
 0x58a   : > { %23897 = vpow2.f32 %v6738_v55 }
 0x593   : > { %v26177_v46 = vpop.eup %23895 }
 0x594   : > { %v6767_v6 = vsel %vm4019_vm3, %v26177_v46, 0.0 }
 0x597   : > { %v26181_v18 = vpop.eup %23897 }
 0x598   : > { %v6773_v5 = vsel %vm4019_vm3, %v26181_v18, 0.0 }
 0x5a7   : > { %6768 = vadd.xlane.f32.xlu1 %v6767_v6 }
 0x5ab   : > { %6774 = vadd.xlane.f32.xlu1 %v6773_v5 }
 0x5b6   : > { %v6685_v23 = vpop.xlane.xlu1 %6684 }
 0x5b7   : > { %v6721_v47 = vsub.f32 %v26077_v40, %v6685_v23 }
 0x5b9   : > { %v6742_v12 = vmul.f32 1.442695, %v6721_v47 }
 0x5ba   : > { %v6691_v22 = vpop.xlane.xlu1 %6690  ;;  %v6694_v9 = vpop.xlane.xlu0 %6693 }
 0x5bb   : > { %23899 = vpow2.f32 %v6742_v12  ;;  %v6723_v35 = vsub.f32 %v26083_v13, %v6691_v22  ;;  %v6724_v62 = vsub.f32 %v26087_v33, %v6694_v9 }
 0x5bd   : > { %v6746_v14 = vmul.f32 1.442695, %v6723_v35  ;;  %v6748_v45 = vmul.f32 1.442695, %v6724_v62 }
 0x5be   : > { %v6697_v3 = vpop.xlane.xlu1 %6696  ;;  %v6700_v50 = vpop.xlane.xlu0 %6699 }
 0x5bf   : > { %23901 = vpow2.f32 %v6746_v14  ;;  %v6725_v24 = vsub.f32 %v26095_v57, %v6697_v3  ;;  %v6726_v49 = vsub.f32 %v26099_v41, %v6700_v50 }
 0x5c0   : > { %23903 = vpow2.f32 %v6748_v45 }
 0x5c1   : > { %v6750_v17 = vmul.f32 1.442695, %v6725_v24  ;;  %v6752_v40 = vmul.f32 1.442695, %v6726_v49 }
 0x5c2   : > { %v6706_v8 = vpop.xlane.xlu0 %6705  ;;  %v26224_v23 = vpop.permute.xlu1 %7692 }
 0x5c3   : > { %23905 = vpow2.f32 %v6750_v17  ;;  %v6728_v60 = vsub.f32 %v26107_v4, %v6706_v8 }
 0x5c4   : > { %23907 = vpow2.f32 %v6752_v40 }
 0x5c5   : > { %v6756_v13 = vmul.f32 1.442695, %v6728_v60 }
 0x5c6   : > { %v6712_v59 = vpop.xlane.xlu0 %6711 }
 0x5c7   : > { %23909 = vpow2.f32 %v6756_v13  ;;  %v6730_v33 = vsub.f32 %v26113_v11, %v6712_v59 }
 0x5c8   : > { %v26196_v53 = vpop.eup %23899 }
 0x5c9   : > { %v6760_v56 = vmul.f32 1.442695, %v6730_v33  ;;  %v6779_v57 = vsel %vm4019_vm3, %v26196_v53, 0.0 }
 0x5ca   : > { %6780 = vadd.xlane.f32.xlu1 %v6779_v57  ;;  %v26227_v22 = vpop.permute.xlu0 %7615 }
 0x5cb   : > { %23911 = vpow2.f32 %v6760_v56 }
 0x5cc   : > { %v26200_v41 = vpop.eup %23901 }
 0x5cd   : > { %v26202_v34 = vpop.eup %23903  ;;  %v6785_v4 = vsel %vm4019_vm3, %v26200_v41, 0.0 }
 0x5ce   : > { %6786 = vadd.xlane.f32.xlu1 %v6785_v4  ;;  %v6788_v43 = vsel %vm4019_vm3, %v26202_v34, 0.0  ;;  %v26230_v45 = vpop.permute.xlu0 %7769 }
 0x5cf   : > { %6789 = vadd.xlane.f32.xlu0 %v6788_v43 }
 0x5d0   : > { %v26208_v11 = vpop.eup %23905 }
 0x5d1   : > { %v26210_v16 = vpop.eup %23907  ;;  %v6791_v52 = vsel %vm4019_vm3, %v26208_v11, 0.0 }
 0x5d2   : > { %6792 = vadd.xlane.f32.xlu1 %v6791_v52  ;;  %v6794_v30 = vsel %vm4019_vm3, %v26210_v16, 0.0 }
 0x5d3   : > { %6795 = vadd.xlane.f32.xlu0 %v6794_v30 }
 0x5d4   : > { %v26216_v21 = vpop.eup %23909 }
 0x5d5   : > { %v6800_v55 = vsel %vm4019_vm3, %v26216_v21, 0.0 }
 0x5d7   : > { %6801 = vadd.xlane.f32.xlu0 %v6800_v55 }
 0x5d8   : > { %v26220_v6 = vpop.eup %23911 }
 0x5d9   : > { %v6806_v5 = vsel %vm4019_vm3, %v26220_v6, 0.0 }
 0x5da   : > { %6807 = vadd.xlane.f32.xlu1 %v6806_v5 }
 0x5f3   : > { %v6703_v47 = vpop.xlane.xlu1 %6702 }
 0x5f4   : > { %v6727_v12 = vsub.f32 %v26132_v0, %v6703_v47 }
 0x5f6   : > { %v6754_v9 = vmul.f32 1.442695, %v6727_v12 }
 0x5f7   : > { %v6709_v35 = vpop.xlane.xlu1 %6708 }
 0x5f8   : > { %23913 = vpow2.f32 %v6754_v9  ;;  %v6729_v62 = vsub.f32 %v26139_v20, %v6709_v35 }
 0x5fa   : > { %v6758_v14 = vmul.f32 1.442695, %v6729_v62 }
 0x5fb   : > { %v6715_v3 = vpop.xlane.xlu1 %6714 }
 0x5fc   : > { %23915 = vpow2.f32 %v6758_v14  ;;  %v6731_v50 = vsub.f32 %v26145_v63, %v6715_v3  ;;  %v23729_v14 = vld [vmem:[#allocation7 + $0xac] ss:$12 sps:$4 sm:$0xff]  }
 0x5fe   : > { %v6762_v24 = vmul.f32 1.442695, %v6731_v50 }
 0x5ff   : > { %v6766_v49 = vpop.xlane.xlu0 %6765 }
 0x600   : > { %23917 = vpow2.f32 %v6762_v24  ;;  %v23732_v24 = vld [vmem:[#allocation7 + $0x94] ss:$12 sps:$4 sm:$0xff]  }
 0x601   : > { %23919 = vrcp.f32 %v6766_v49 }
 0x603   : > { %v6772_v17 = vpop.xlane.xlu0 %6771 }
 0x604   : > { %23921 = vrcp.f32 %v6772_v17 }
 0x605   : > { %v26233_v0 = vpop.eup %23913 }
 0x606   : > { %v6797_v40 = vsel %vm4019_vm3, %v26233_v0, 0.0 }
 0x607   : > { %6798 = vadd.xlane.f32.xlu1 %v6797_v40  ;;  %v6778_v20 = vpop.xlane.xlu0 %6777  ;;  %v23730_v40 = vld [vmem:[#allocation7 + $0x90] ss:$12 sps:$4 sm:$0xff]  }
 0x608   : > { %23923 = vrcp.f32 %v6778_v20  ;;  %v29523_v20 = vmov 0  }
 0x609   : > { %v26237_v8 = vpop.eup %23915 }
 0x60a   : > { %v6803_v60 = vsel %vm4019_vm3, %v26237_v8, 0.0 }
 0x60b   : > { %6804 = vadd.xlane.f32.xlu1 %v6803_v60  ;;  %v6784_v63 = vpop.xlane.xlu0 %6783  ;;  %v23736_v60 = vld [vmem:[#allocation7 + $0x7c] ss:$12 sps:$4 sm:$0xff]  }
 0x60c   : > { %23925 = vrcp.f32 %v6784_v63 }
 0x60d   : > { %v26241_v13 = vpop.eup %23917 }
 0x60e   : > { %v23920_v59 = vpop.eup %23919  ;;  %v6809_v33 = vsel %vm4019_vm3, %v26241_v13, 0.0 }
 0x60f   : > { %v6828_v56 = vmul.f32 %v23920_v59, %v26149_v61  ;;  %6810 = vadd.xlane.f32.xlu0 %v6809_v33  ;;  %v23733_v59 = vld [vmem:[#allocation7 + $0xb0] ss:$12 sps:$4 sm:$0xff]  }
 0x610   : > { %v23740_v33 = vld [vmem:[#allocation7 + $0x64] ss:$12 sps:$4 sm:$0xff]  }
 0x611   : > { %v23922_v57 = vpop.eup %23921  ;;  %22455 = vmatmul.mubr.msk.f32.vlgmr.msra.gmra.mxu0 %vm4019_vm3, %v6828_v56 }
 0x612   : > { %v6830_v4 = vmul.f32 %v23922_v57, %v26155_v25  ;;  %22463 = vmatpush3.msra.mxu0 %v26119_v36  ;;  %22464 = vmatprep.mubr.msk.f32.mxu0 %vm24369_vm1, %v29384_v32 }
 0x613   : > { %22472 = vmatprep.subr.mxu0 %v29384_v32 }
 0x615   : > { %v23924_v43 = vpop.eup %23923  ;;  %22465 = vmatmul.mubr.msk.f32.vlgmr.msra.gmra.mxu0 %vm4019_vm3, %v6830_v4 }
 0x616   : > { %v6832_v52 = vmul.f32 %v23924_v43, %v26159_v39  ;;  %22473 = vmatpush3.msra.mxu0 %v26161_v51  ;;  %22474 = vmatprep.mubr.msk.f32.mxu0 %vm24369_vm1, %v29384_v32  ;;  %v23737_v43 = vld [vmem:[#allocation7 + $0x98] ss:$12 sps:$4 sm:$0xff]  }
 0x617   : > { %22482 = vmatprep.subr.mxu0 %v29384_v32 }
 0x619   : > { %v23926_v61 = vpop.eup %23925  ;;  %22475 = vmatmul.mubr.msk.f32.vlgmr.msra.gmra.mxu0 %vm4019_vm3, %v6832_v52  ;;  %v23741_v52 = vld [vmem:[#allocation7 + $0x80] ss:$12 sps:$4 sm:$0xff]  }
 0x61a   : > { %v6834_v36 = vmul.f32 %v23926_v61, %v26165_v7  ;;  %22483 = vmatpush3.msra.mxu0 %v26123_v27  ;;  %22484 = vmatprep.mubr.msk.f32.mxu0 %vm24369_vm1, %v29384_v32  ;;  %v26273_v27 = vpop.permute.xlu1 %7846  ;;  %v23742_v61 = vld [vmem:[#allocation7 + $0x68] ss:$12 sps:$4 sm:$0xff]  }
 0x61b   : > { %22492 = vmatprep.subr.mxu0 %v29384_v32 }
 0x61c   : > { %8000 = vrot.lane.b32.xlu1 %v29519_v19, %s24367_s21 }
 0x61d   : > { %22485 = vmatmul.mubr.msk.f32.vlgmr.msra.gmra.mxu0 %vm4019_vm3, %v6834_v36  ;;  %v23743_v36 = vld [vmem:[#allocation7 + $0x50] ss:$12 sps:$4 sm:$0xff]  }
 0x61e   : > { %22493 = vmatpush3.msra.mxu0 %v26187_v2  ;;  %22494 = vmatprep.mubr.msk.f32.mxu0 %vm24369_vm1, %v29384_v32 }
 0x61f   : > { %22502 = vmatprep.subr.mxu0 %v29384_v32 }
 0x625   : > { %7923 = vrot.lane.b32.xlu0 %v29517_v1, %s24367_s21 }
 0x630   : > { %v6769_v25 = vpop.xlane.xlu1 %6768 }
 0x631   : > { %23927 = vrcp.f32 %v6769_v25 }
 0x634   : > { %v6775_v39 = vpop.xlane.xlu1 %6774 }
 0x635   : > { %23929 = vrcp.f32 %v6775_v39 }
 0x63e   : > { %v23928_v51 = vpop.eup %23927 }
 0x63f   : > { %v6829_v19 = vmul.f32 %v23928_v51, %v26177_v46 }
 0x641   : > { %22460 = vmatmul.mubr.msk.f32.vlgmr.msra.gmra.mxu1 %vm4019_vm3, %v6829_v19 }
 0x642   : > { %v23930_v7 = vpop.eup %23929  ;;  %22468 = vmatpush3.msra.mxu1 %v26151_v58  ;;  %22469 = vmatprep.mubr.msk.f32.mxu1 %vm24369_vm1, %v29384_v32 }
 0x643   : > { %v6831_v2 = vmul.f32 %v23930_v7, %v26181_v18  ;;  %22477 = vmatprep.subr.mxu1 %v29384_v32 }
 0x645   : > { %22470 = vmatmul.mubr.msk.f32.vlgmr.msra.gmra.mxu1 %vm4019_vm3, %v6831_v2 }
 0x646   : > { %22478 = vmatpush3.msra.mxu1 %v26167_v15  ;;  %22479 = vmatprep.mubr.msk.f32.mxu1 %vm24369_vm1, %v29384_v32 }
 0x647   : > { %22487 = vmatprep.subr.mxu1 %v29384_v32 }
 0x653   : > { %v6781_v1 = vpop.xlane.xlu1 %6780 }
 0x654   : > { %23931 = vrcp.f32 %v6781_v1 }
 0x657   : > { %v6787_v46 = vpop.xlane.xlu1 %6786 }
 0x658   : > { %23933 = vrcp.f32 %v6787_v46  ;;  %v6790_v58 = vpop.xlane.xlu0 %6789 }
 0x659   : > { %23935 = vrcp.f32 %v6790_v58 }
 0x65b   : > { %v6793_v30 = vpop.xlane.xlu1 %6792 }
 0x65c   : > { %23937 = vrcp.f32 %v6793_v30  ;;  %v6796_v18 = vpop.xlane.xlu0 %6795  ;;  %v23750_v30 = vld [vmem:[#allocation7 + $0x38] ss:$12 sps:$4 sm:$0xff]  }
 0x65d   : > { %23939 = vrcp.f32 %v6796_v18 }
 0x660   : > { %v6802_v55 = vpop.xlane.xlu0 %6801 }
 0x661   : > { %v23932_v5 = vpop.eup %23931  ;;  %23941 = vrcp.f32 %v6802_v55 }
 0x662   : > { %v6833_v15 = vmul.f32 %v23932_v5, %v26196_v53  ;;  %v23744_v5 = vld [vmem:[#allocation7 + $0x48] ss:$12 sps:$4 sm:$0xff]  }
 0x664   : > { %22480 = vmatmul.mubr.msk.f32.vlgmr.msra.gmra.mxu1 %vm4019_vm3, %v6833_v15 }
 0x665   : > { %v23934_v47 = vpop.eup %23933  ;;  %22488 = vmatpush3.msra.mxu1 %v26173_v42  ;;  %22489 = vmatprep.mubr.msk.f32.mxu1 %vm24369_vm1, %v29384_v32 }
 0x666   : > { %v23936_v12 = vpop.eup %23935  ;;  %v6835_v9 = vmul.f32 %v23934_v47, %v26200_v41  ;;  %22497 = vmatprep.subr.mxu1 %v29384_v32  ;;  %v23749_v47 = vld [vmem:[#allocation7 + $0x34] ss:$12 sps:$4 sm:$0xff]  }
 0x667   : > { %v6836_v35 = vmul.f32 %v23936_v12, %v26202_v34  ;;  %v23757_v12 = vld [vmem:[#allocation7 + $0x20] ss:$12 sps:$4 sm:$0xff]  }
 0x668   : > { %22490 = vmatmul.mubr.msk.f32.vlgmr.msra.gmra.mxu1 %vm4019_vm3, %v6835_v9 }
 0x669   : > { %v23938_v62 = vpop.eup %23937  ;;  %22495 = vmatmul.mubr.msk.f32.vlgmr.msra.gmra.mxu0 %vm4019_vm3, %v6836_v35  ;;  %22498 = vmatpush3.msra.mxu1 %v26185_v26  ;;  %v23747_v35 = vld [vmem:[#allocation7 + $0x30] ss:$12 sps:$4 sm:$0xff]  }
 0x66a   : > { %v23940_v53 = vpop.eup %23939  ;;  %v6837_v42 = vmul.f32 %v23938_v62, %v26208_v11  ;;  %22503 = vmatpush3.msra.mxu0 %v26227_v22  ;;  %22499 = vmatprep.mubr.msk.f32.mxu1 %vm24369_vm1, %v29384_v32  ;;  %v6808_v11 = vpop.xlane.xlu1 %6807  ;;  %v23753_v62 = vld [vmem:[#allocation7 + $0x1c] ss:$12 sps:$4 sm:$0xff]  }
 0x66b   : > { %v6838_v41 = vmul.f32 %v23940_v53, %v26210_v16  ;;  %22504 = vmatprep.mubr.msk.f32.mxu0 %vm24369_vm1, %v29384_v32  ;;  %22507 = vmatprep.subr.mxu1 %v29384_v32  ;;  %23943 = vrcp.f32 %v6808_v11  ;;  %v23758_v53 = vld [vmem:[#allocation7 + $0x8] ss:$12 sps:$4 sm:$0xff]  }
 0x66c   : > { %22512 = vmatprep.subr.mxu0 %v29384_v32  ;;  %22500 = vmatmul.mubr.msk.f32.vlgmr.msra.gmra.mxu1 %vm4019_vm3, %v6837_v42  ;;  %v23751_v42 = vld [vmem:[#allocation7 + $0x18] ss:$12 sps:$4 sm:$0xff]  }
 0x66d   : > { %22505 = vmatmul.mubr.msk.f32.vlgmr.msra.gmra.mxu0 %vm4019_vm3, %v6838_v41  ;;  %22508 = vmatpush3.msra.mxu1 %v26224_v23  ;;  %v23756_v41 = vld [vmem:[#allocation7 + $0x4] ss:$12 sps:$4 sm:$0xff]  }
 0x66e   : > { %v23942_v26 = vpop.eup %23941  ;;  %22513 = vmatpush3.msra.mxu0 %v26230_v45  ;;  %22514 = vmatprep.mubr.msk.f32.mxu0 %vm24369_vm1, %v29384_v32  ;;  %v23727_v45 = vld [vmem:[#allocation7 + $0xa8] ss:$12 sps:$4 sm:$0xff]  }
 0x66f   : > { %v6840_v34 = vmul.f32 %v23942_v26, %v26216_v21  ;;  %22522 = vmatprep.subr.mxu0 %v29384_v32  ;;  %22509 = vmatprep.mubr.msk.f32.mxu1 %vm24369_vm1, %v29384_v32  ;;  %v23754_v26 = vld [vmem:[#allocation7] ss:$12 sps:$4 sm:$0xff]  }
 0x670   : > { %22517 = vmatprep.subr.mxu1 %v29384_v32 }
 0x671   : > { %22515 = vmatmul.mubr.msk.f32.vlgmr.msra.gmra.mxu0 %vm4019_vm3, %v6840_v34 }
 0x672   : > { %22524 = vmatprep.mubr.msk.f32.mxu0 %vm24369_vm1, %v29384_v32 }
 0x678   : > { %v23944_v21 = vpop.eup %23943 }
 0x679   : > { %v6842_v3 = vmul.f32 %v23944_v21, %v26220_v6 }
 0x690   : > { %v6799_v16 = vpop.xlane.xlu1 %6798 }
 0x691   : > { %23945 = vrcp.f32 %v6799_v16 }
 0x694   : > { %v6805_v23 = vpop.xlane.xlu1 %6804 }
 0x695   : > { %23947 = vrcp.f32 %v6805_v23 }
 0x698   : > { %v6811_v22 = vpop.xlane.xlu0 %6810  ;;  %v8001_v56 = vpop.permute.xlu1 %8000 }
 0x699   : > { %23949 = vrcp.f32 %v6811_v22 }
 0x69c   : > { %v7924_v50 = vpop.permute.xlu0 %7923 }
 0x69d   : > { %22523 = vmatpush3.msra.mxu0 %v7924_v50 }
 0x69e   : > { %v23946_v49 = vpop.eup %23945  ;;  %22525 = vmatmul.mubr.msk.f32.vlgmr.msra.gmra.mxu0 %vm4019_vm3, %v6842_v3  ;;  %8196 = vmatprep.subr.bf16.mxu0 %v23729_v14 }
 0x69f   : > { %v6839_v17 = vmul.f32 %v23946_v49, %v26233_v0  ;;  %8197 = vmatpush1.bf16.msra.mxu0 %v23727_v45  ;;  %8220 = vmatprep.mubr.bf16.mxu0 %v29523_v20  ;;  %v23734_v0 = vld [vmem:[#allocation7 + $0x78] ss:$12 sps:$4 sm:$0xff]  }
 0x6a0   : > { %8198 = vmatprep.subr.bf16.mxu0 %v23732_v24 }
 0x6a1   : > { %22510 = vmatmul.mubr.msk.f32.vlgmr.msra.gmra.mxu1 %vm4019_vm3, %v6839_v17 }
 0x6a2   : > { %v23948_v63 = vpop.eup %23947  ;;  %22518 = vmatpush3.msra.mxu1 %v26273_v27  ;;  %22519 = vmatprep.mubr.msk.f32.mxu1 %vm24369_vm1, %v29384_v32  ;;  %v23746_v27 = vld [vmem:[#allocation7 + $0x4c] ss:$12 sps:$4 sm:$0xff]  }
 0x6a3   : > { %v6841_v6 = vmul.f32 %v23948_v63, %v26237_v8  ;;  %22527 = vmatprep.subr.mxu1 %v29384_v32  ;;  %8199 = vmatpush1.bf16.msra.mxu0 %v23730_v40  ;;  %v23738_v8 = vld [vmem:[#allocation7 + $0x60] ss:$12 sps:$4 sm:$0xff]  }
 0x6a4   : > { %8200 = vmatprep.subr.bf16.mxu0 %v23736_v60 }
 0x6a5   : > { %22520 = vmatmul.mubr.msk.f32.vlgmr.msra.gmra.mxu1 %vm4019_vm3, %v6841_v6 }
 0x6a6   : > { %v23950_v57 = vpop.eup %23949  ;;  %22528 = vmatpush3.msra.mxu1 %v8001_v56  ;;  %22529 = vmatprep.mubr.msk.f32.mxu1 %vm24369_vm1, %v29384_v32 }
 0x6a7   : > { %v6843_v4 = vmul.f32 %v23950_v57, %v26241_v13  ;;  %22532 = vmatprep.subr.bf16.mxu1 %v23733_v59  ;;  %8201 = vmatpush1.bf16.msra.mxu0 %v23734_v0 }
 0x6a8   : > { %8202 = vmatprep.subr.bf16.mxu0 %v23740_v33 }
 0x6a9   : > { %22530 = vmatmul.mubr.msk.f32.vlgmr.msra.gmra.mxu1 %vm4019_vm3, %v6843_v4 }
 0x6aa   : > { %22533 = vmatpush3.bf16.msra.mxu1 %v23733_v59 }
 0x6ab   : > { %22534 = vmatprep.subr.bf16.mxu1 %v23737_v43  ;;  %8203 = vmatpush1.bf16.msra.mxu0 %v23738_v8 }
 0x6ac   : > { %22556 = vmatprep.subr.bf16.mxu0 %v23743_v36 }
 0x6ae   : > { %22535 = vmatpush3.bf16.msra.mxu1 %v23737_v43 }
 0x6af   : > { %22536 = vmatprep.subr.bf16.mxu1 %v23741_v52 }
 0x6b2   : > { %22537 = vmatpush3.bf16.msra.mxu1 %v23741_v52 }
 0x6b3   : > { %22538 = vmatprep.subr.bf16.mxu1 %v23742_v61 }
 0x6b6   : > { %22539 = vmatpush3.bf16.msra.mxu1 %v23742_v61  ;;  %v29524_v61 = vld [vmem:[#allocation55_spill] sm:$0xff] }
 0x6b7   : > { %8494 = vmatprep.subr.bf16.mxu1 %v23746_v27  ;;  %v29532_v27 = vld [vmem:[#allocation19_spill] sm:$0xff] }
 0x6d1   : > { %v6917_v13 = vpop.f32.mrf.mxu0 }
 0x6d3   : > { %v22456_v25 = vpop.f32.mrf.mxu0 }
 0x6d4   : > { %v29535_v25 = vld [vmem:[#allocation82_spill] sm:$0xff] }
 0x6d5   : > { %v7071_v39 = vpop.f32.mrf.mxu0 }
 0x6d7   : > { %v22466_v51 = vpop.f32.mrf.mxu0 }
 0x6d8   : > { %v29537_v51 = vld [vmem:[#allocation88_spill] sm:$0xff] }
 0x6d9   : > { %v7225_v19 = vpop.f32.mrf.mxu0 }
 0x6db   : > { %v22476_v7 = vpop.f32.mrf.mxu0 }
 0x6dc   : > { %v29540_v7 = vld [vmem:[#allocation61_spill] sm:$0xff] }
 0x6dd   : > { %v7379_v2 = vpop.f32.mrf.mxu0 }
 0x6df   : > { %v22486_v1 = vpop.f32.mrf.mxu0 }
 0x6e0   : > { %v29542_v1 = vld [vmem:[#allocation78_spill] sm:$0xff] }
 0x701   : > { %v6994_v46 = vpop.f32.mrf.mxu1 }
 0x702   : > { %v8076_v58 = vpack.c.bf16 %v6994_v46, %v6917_v13  ;;  %v29533_v13 = vld [vmem:[#allocation76_spill] sm:$0xff]  ;;  %v29543_v46 = vld [vmem:[#allocation101_spill] sm:$0xff] }
 0x703   : > { %v22461_v18 = vpop.f32.mrf.mxu1 }
 0x704   : > { %21291 = vmatmul.mubr.msk.bf16.vlgmr.msra.gmra.mxu0 %vm2768_vm0, %v8076_v58  ;;  %22540 = vmatprep.mubr.msk.bf16.mxu1 %vm2768_vm0, %v8076_v58  ;;  %v26466_v58 = vadd.f32 %v29543_v46, %v29542_v1  ;;  %v29545_v18 = vld [vmem:[#allocation27_spill] sm:$0xff] }
 0x705   : > { %v7148_v55 = vpop.f32.mrf.mxu1  ;;  %8230 = vmatprep.mubr.bf16.mxu0 %v29523_v20  ;;  %22557 = vmatpush3.bf16.msra.mxu0 %v23743_v36  ;;  %v29525_v36 = vld [vmem:[#allocation52_spill] sm:$0xff] }
 0x706   : > { %v8077_v15 = vpack.c.bf16 %v7148_v55, %v7071_v39  ;;  %22558 = vmatprep.subr.bf16.mxu0 %v23750_v30  ;;  %v29536_v39 = vld [vmem:[#allocation23_spill] sm:$0xff] }
 0x707   : > { %v22471_v9 = vpop.f32.mrf.mxu1  ;;  %v29546_v55 = vld [vmem:[#allocation67_spill] sm:$0xff] }
 0x708   : > { %22541 = vmatmul.mubr.msk.bf16.vlgmr.msra.gmra.mxu1 %vm2768_vm0, %v8077_v15  ;;  %v29551_v9 = vld [vmem:[#allocation22_spill] sm:$0xff] }
 0x709   : > { %8495 = vmatpush1.bf16.msra.mxu1 %v23744_v5  ;;  %22559 = vmatpush3.bf16.msra.mxu0 %v23750_v30  ;;  %v29544_v30 = vld [vmem:[#allocation15_spill] sm:$0xff]  ;;  %v29547_v5 = vld [vmem:[#allocation18_spill] sm:$0xff] }
 0x70a   : > { %8496 = vmatprep.subr.bf16.mxu1 %v23749_v47  ;;  %22560 = vmatprep.subr.bf16.mxu0 %v23757_v12  ;;  %v29549_v47 = vld [vmem:[#allocation20_spill] sm:$0xff] }
 0x70c   : > { %21292 = vmatmul.mubr.msk.bf16.gmra.mxu0 %vm2768_vm0, %v8077_v15  ;;  %v29548_v15 = vld [vmem:[#allocation73_spill] sm:$0xff] }
 0x70d   : > { %8240 = vmatprep.mubr.bf16.mxu0 %v29523_v20  ;;  %8497 = vmatpush1.bf16.msra.mxu1 %v23747_v35  ;;  %v29552_v35 = vld [vmem:[#allocation85_spill] sm:$0xff] }
 0x70e   : > { %8498 = vmatprep.subr.bf16.mxu1 %v23753_v62  ;;  %22561 = vmatpush3.bf16.msra.mxu0 %v23757_v12  ;;  %v29550_v12 = vld [vmem:[#allocation79_spill] sm:$0xff]  ;;  %v29553_v62 = vld [vmem:[#allocation24_spill] sm:$0xff] }
 0x70f   : > { %22562 = vmatprep.subr.bf16.mxu0 %v23758_v53 }
 0x711   : > { %8499 = vmatpush1.bf16.msra.mxu1 %v23751_v42  ;;  %v29555_v42 = vld [vmem:[#allocation26_spill] sm:$0xff] }
 0x712   : > { %8500 = vmatprep.subr.bf16.mxu1 %v23756_v41  ;;  %22563 = vmatpush3.bf16.msra.mxu0 %v23758_v53  ;;  %v29554_v53 = vld [vmem:[#allocation91_spill] sm:$0xff]  ;;  %v29556_v41 = vld [vmem:[#allocation97_spill] sm:$0xff] }
 0x713   : > { %22580 = vmatprep.subr.mxu0 %v29384_v32 }
 0x715   : > { %8501 = vmatpush1.bf16.msra.mxu1 %v23754_v26  ;;  %v29557_v26 = vld [vmem:[#allocation81_spill] sm:$0xff] }
 0x716   : > { %22585 = vmatprep.subr.mxu1 %v29384_v32 }
 0x724   : > { %v7302_v34 = vpop.f32.mrf.mxu1 }
 0x725   : > { %v8078_v11 = vpack.c.bf16 %v7302_v34, %v7225_v19  ;;  %v29539_v19 = vld [vmem:[#allocation25_spill] sm:$0xff]  ;;  %v29558_v34 = vld [vmem:[#allocation103_spill] sm:$0xff] }
 0x726   : > { %v22481_v16 = vpop.f32.mrf.mxu1 }
 0x727   : > { %21293 = vmatmul.mubr.msk.bf16.gmra.mxu0 %vm2768_vm0, %v8078_v11  ;;  %22544 = vmatprep.mubr.msk.bf16.mxu1 %vm2768_vm0, %v8078_v11  ;;  %v26521_v11 = vadd.f32 %v29558_v34, %v29557_v26  ;;  %v29559_v16 = vld [vmem:[#allocation28_spill] sm:$0xff] }
 0x728   : > { %v7456_v23 = vpop.f32.mrf.mxu1  ;;  %8250 = vmatprep.mubr.bf16.mxu0 %v29523_v20 }
 0x729   : > { %v8079_v22 = vpack.c.bf16 %v7456_v23, %v7379_v2  ;;  %v7533_v21 = vpop.f32.mrf.mxu0  ;;  %v29541_v2 = vld [vmem:[#allocation94_spill] sm:$0xff] }
 0x72a   : > { %v22491_v14 = vpop.f32.mrf.mxu1 }
 0x72b   : > { %v22496_v45 = vpop.f32.mrf.mxu0  ;;  %22545 = vmatmul.mubr.msk.bf16.gmra.mxu1 %vm2768_vm0, %v8079_v22 }
 0x72c   : > { %v7610_v3 = vpop.f32.mrf.mxu1 }
 0x72d   : > { %v8080_v50 = vpack.c.bf16 %v7610_v3, %v7533_v21  ;;  %v7687_v24 = vpop.f32.mrf.mxu0 }
 0x72e   : > { %v22501_v49 = vpop.f32.mrf.mxu1 }
 0x72f   : > { %v22506_v17 = vpop.f32.mrf.mxu0  ;;  %21294 = vmatmul.mubr.msk.bf16.gmra.mxu0 %vm2768_vm0, %v8079_v22  ;;  %22548 = vmatprep.mubr.msk.bf16.mxu1 %vm2768_vm0, %v8080_v50 }
 0x730   : > { %8260 = vmatprep.mubr.bf16.mxu0 %v29523_v20 }
 0x731   : > { %v7841_v40 = vpop.f32.mrf.mxu0 }
 0x733   : > { %v22516_v60 = vpop.f32.mrf.mxu0 }
 0x737   : > { %21295 = vmatmul.mubr.msk.bf16.gmra.mxu0 %vm2768_vm0, %v8080_v50 }
 0x738   : > { %8270 = vmatprep.mubr.bf16.mxu0 %v29523_v20 }
 0x75e   : > { %v7995_v63 = vpop.f32.mrf.mxu0 }
 0x760   : > { %v22526_v6 = vpop.f32.mrf.mxu0 }
 0x761   : > { %v7764_v59 = vpop.f32.mrf.mxu1 }
 0x762   : > { %v8081_v0 = vpack.c.bf16 %v7764_v59, %v7687_v24 }
 0x763   : > { %v22511_v33 = vpop.f32.mrf.mxu1 }
 0x764   : > { %21296 = vmatmul.mubr.msk.bf16.gmra.mxu0 %vm2768_vm0, %v8081_v0  ;;  %22549 = vmatmul.mubr.msk.bf16.gmra.mxu1 %vm2768_vm0, %v8081_v0 }
 0x765   : > { %v7918_v56 = vpop.f32.mrf.mxu1  ;;  %8280 = vmatprep.mubr.bf16.mxu0 %v29523_v20 }
 0x766   : > { %v8082_v57 = vpack.c.bf16 %v7918_v56, %v7841_v40 }
 0x767   : > { %v22521_v4 = vpop.f32.mrf.mxu1 }
 0x768   : > { %22552 = vmatprep.mubr.msk.bf16.mxu1 %vm2768_vm0, %v8082_v57 }
 0x769   : > { %v8072_v43 = vpop.f32.mrf.mxu1 }
 0x76a   : > { %v8083_v8 = vpack.c.bf16 %v8072_v43, %v7995_v63 }
 0x76b   : > { %v22531_v52 = vpop.f32.mrf.mxu1 }
 0x76c   : > { %21297 = vmatmul.mubr.msk.bf16.gmra.mxu0 %vm2768_vm0, %v8082_v57  ;;  %22553 = vmatmul.mubr.msk.bf16.gmra.mxu1 %vm2768_vm0, %v8083_v8 }
 0x76d   : > { %8290 = vmatprep.mubr.bf16.mxu0 %v29523_v20  ;;  %8518 = vmatprep.mubr.bf16.mxu1 %v29523_v20 }
 0x774   : > { %21298 = vmatmul.mubr.msk.bf16.gmra.mxu0 %vm2768_vm0, %v8083_v8  ;;  %21319 = vmatmul.mubr.msk.bf16.vlgmr.msra.gmra.mxu1 %vm2768_vm0, %v26019_v38 }
 0x775   : > { %22586 = vmatpush3.xpose.msk.msra.mxu1 %vm2768_vm0, %v29524_v61  ;;  %22564 = vmatprep.mubr.msk.bf16.mxu0 %vm2768_vm0, %v26019_v38  ;;  %v29526_v38 = vld [vmem:[#allocation12_spill] sm:$0xff] }
 0x776   : > { %8528 = vmatprep.mubr.bf16.mxu1 %v29523_v20  ;;  %22595 = vmatprep.subr.mxu1 %v29384_v32 }
 0x77c   : > { %21320 = vmatmul.mubr.msk.bf16.gmra.mxu1 %vm2768_vm0, %v26021_v48  ;;  %22565 = vmatmul.mubr.msk.bf16.vlgmr.msra.gmra.mxu0 %vm2768_vm0, %v26021_v48  ;;  %v29527_v48 = vld [vmem:[#allocation58_spill] sm:$0xff] }
 0x77d   : > { %22581 = vmatpush3.xpose.msk.msra.mxu0 %vm2768_vm0, %v29525_v36  ;;  %22568 = vmatprep.mubr.msk.bf16.mxu0 %vm2768_vm0, %v26023_v31 }
 0x77e   : > { %8538 = vmatprep.mubr.bf16.mxu1 %v29523_v20  ;;  %22590 = vmatprep.subr.mxu0 %v29384_v32 }
 0x784   : > { %21321 = vmatmul.mubr.msk.bf16.gmra.mxu1 %vm2768_vm0, %v26023_v31  ;;  %22569 = vmatmul.mubr.msk.bf16.gmra.mxu0 %vm2768_vm0, %v26025_v10  ;;  %v29528_v31 = vld [vmem:[#allocation14_spill] sm:$0xff] }
 0x785   : > { %22572 = vmatprep.mubr.msk.bf16.mxu0 %vm2768_vm0, %v26027_v44  ;;  %8548 = vmatprep.mubr.bf16.mxu1 %v29523_v20 }
 0x78c   : > { %21322 = vmatmul.mubr.msk.bf16.gmra.mxu1 %vm2768_vm0, %v26025_v10  ;;  %22573 = vmatmul.mubr.msk.bf16.gmra.mxu0 %vm2768_vm0, %v26053_v54  ;;  %v29529_v10 = vld [vmem:[#allocation64_spill] sm:$0xff] }
 0x78d   : > { %22576 = vmatprep.mubr.msk.bf16.mxu0 %vm2768_vm0, %v26055_v28  ;;  %8558 = vmatprep.mubr.bf16.mxu1 %v29523_v20 }
 0x794   : > { %21323 = vmatmul.mubr.msk.bf16.gmra.mxu1 %vm2768_vm0, %v26027_v44  ;;  %22577 = vmatmul.mubr.msk.bf16.gmra.mxu0 %vm2768_vm0, %v26057_v29  ;;  %v29530_v44 = vld [vmem:[#allocation16_spill] sm:$0xff] }
 0x795   : > { %8568 = vmatprep.mubr.bf16.mxu1 %v29523_v20  ;;  %22582 = vmatprep.mubr.msk.f32.mxu0 %vm24369_vm1, %v29384_v32 }
 0x79c   : > { %21324 = vmatmul.mubr.msk.bf16.gmra.mxu1 %vm2768_vm0, %v26053_v54  ;;  %22583 = vmatmul.mubr.msk.f32.vlgmr.msra.gmra.mxu0 %vm2768_vm0, %v29526_v38  ;;  %v29531_v54 = vld [vmem:[#allocation70_spill] sm:$0xff] }
 0x79d   : > { %22591 = vmatpush3.xpose.msk.msra.mxu0 %vm2768_vm0, %v29527_v48  ;;  %22592 = vmatprep.mubr.msk.f32.mxu0 %vm24369_vm1, %v29384_v32 }
 0x79e   : > { %22600 = vmatprep.subr.mxu0 %v29384_v32  ;;  %8578 = vmatprep.mubr.bf16.mxu1 %v29523_v20 }
 0x7a0   : > { %22593 = vmatmul.mubr.msk.f32.vlgmr.msra.gmra.mxu0 %vm2768_vm0, %v29528_v31 }
 0x7a1   : > { %22601 = vmatpush3.xpose.msk.msra.mxu0 %vm2768_vm0, %v29529_v10  ;;  %22602 = vmatprep.mubr.msk.f32.mxu0 %vm24369_vm1, %v29384_v32 }
 0x7a2   : > { %22610 = vmatprep.subr.mxu0 %v29384_v32 }
 0x7a4   : > { %21325 = vmatmul.mubr.msk.bf16.gmra.mxu1 %vm2768_vm0, %v26055_v28  ;;  %22603 = vmatmul.mubr.msk.f32.vlgmr.msra.gmra.mxu0 %vm2768_vm0, %v29530_v44  ;;  %v29534_v28 = vld [vmem:[#allocation21_spill] sm:$0xff] }
 0x7a5   : > { %22611 = vmatpush3.xpose.msk.msra.mxu0 %vm2768_vm0, %v29531_v54  ;;  %22612 = vmatprep.mubr.msk.f32.mxu0 %vm24369_vm1, %v29384_v32 }
 0x7a6   : > { %22620 = vmatprep.subr.mxu0 %v29384_v32  ;;  %8588 = vmatprep.mubr.bf16.mxu1 %v29523_v20 }
 0x7a8   : > { %22613 = vmatmul.mubr.msk.f32.vlgmr.msra.gmra.mxu0 %vm2768_vm0, %v29532_v27 }
 0x7a9   : > { %22621 = vmatpush3.xpose.msk.msra.mxu0 %vm2768_vm0, %v29533_v13  ;;  %22622 = vmatprep.mubr.msk.f32.mxu0 %vm24369_vm1, %v29384_v32 }
 0x7aa   : > { %22630 = vmatprep.subr.mxu0 %v29384_v32 }
 0x7ac   : > { %21326 = vmatmul.mubr.msk.bf16.gmra.mxu1 %vm2768_vm0, %v26057_v29  ;;  %22623 = vmatmul.mubr.msk.f32.vlgmr.msra.gmra.mxu0 %vm2768_vm0, %v29534_v28  ;;  %v29538_v29 = vld [vmem:[#allocation13_spill] sm:$0xff] }
 0x7ad   : > { %22631 = vmatpush3.xpose.msk.msra.mxu0 %vm2768_vm0, %v29535_v25  ;;  %22632 = vmatprep.mubr.msk.f32.mxu0 %vm24369_vm1, %v29384_v32 }
 0x7ae   : > { %22640 = vmatprep.subr.mxu0 %v29384_v32  ;;  %22587 = vmatprep.mubr.msk.f32.mxu1 %vm24369_vm1, %v29384_v32 }
 0x7b0   : > { %22633 = vmatmul.mubr.msk.f32.vlgmr.msra.gmra.mxu0 %vm2768_vm0, %v29536_v39 }
 0x7b1   : > { %22641 = vmatpush3.xpose.msk.msra.mxu0 %vm2768_vm0, %v29537_v51  ;;  %22642 = vmatprep.mubr.msk.f32.mxu0 %vm24369_vm1, %v29384_v32 }
 0x7b2   : > { %22650 = vmatprep.subr.mxu0 %v29384_v32 }
 0x7b4   : > { %22588 = vmatmul.mubr.msk.f32.vlgmr.msra.gmra.mxu1 %vm2768_vm0, %v29538_v29  ;;  %22643 = vmatmul.mubr.msk.f32.vlgmr.msra.gmra.mxu0 %vm2768_vm0, %v29539_v19 }
 0x7b5   : > { %22596 = vmatpush3.xpose.msk.msra.mxu1 %vm2768_vm0, %v29540_v7  ;;  %22651 = vmatpush3.xpose.msk.msra.mxu0 %vm2768_vm0, %v29541_v2 }
 0x7b6   : > { %22597 = vmatprep.mubr.msk.f32.mxu1 %vm24369_vm1, %v29384_v32  ;;  %22605 = vmatprep.subr.mxu1 %v29384_v32 }
 0x7b7   : > { %22652 = vmatprep.mubr.msk.f32.mxu0 %vm24369_vm1, %v29384_v32  ;;  %22660 = vmatprep.subr.mxu0 %v29384_v32 }
 0x7b8   : > { %22598 = vmatmul.mubr.msk.f32.vlgmr.msra.gmra.mxu1 %vm2768_vm0, %v29544_v30  ;;  %22653 = vmatmul.mubr.msk.f32.vlgmr.msra.gmra.mxu0 %vm2768_vm0, %v29545_v18 }
 0x7b9   : > { %22606 = vmatpush3.xpose.msk.msra.mxu1 %vm2768_vm0, %v29546_v55  ;;  %22661 = vmatpush3.msra.mxu0 %v26466_v58 }
 0x7ba   : > { %22607 = vmatprep.mubr.msk.f32.mxu1 %vm24369_vm1, %v29384_v32  ;;  %22615 = vmatprep.subr.mxu1 %v29384_v32 }
 0x7bb   : > { %22662 = vmatprep.mubr.msk.f32.mxu0 %vm24369_vm1, %v29384_v32  ;;  %22670 = vmatprep.subr.mxu0 %v29384_v32 }
 0x7bc   : > { %22608 = vmatmul.mubr.msk.f32.vlgmr.msra.gmra.mxu1 %vm2768_vm0, %v29547_v5 }
 0x7bd   : > { %22616 = vmatpush3.xpose.msk.msra.mxu1 %vm2768_vm0, %v29548_v15  ;;  %22617 = vmatprep.mubr.msk.f32.mxu1 %vm24369_vm1, %v29384_v32 }
 0x7be   : > { %22625 = vmatprep.subr.mxu1 %v29384_v32 }
 0x7c0   : > { %22618 = vmatmul.mubr.msk.f32.vlgmr.msra.gmra.mxu1 %vm2768_vm0, %v29549_v47 }
 0x7c1   : > { %22626 = vmatpush3.xpose.msk.msra.mxu1 %vm2768_vm0, %v29550_v12  ;;  %22627 = vmatprep.mubr.msk.f32.mxu1 %vm24369_vm1, %v29384_v32 }
 0x7c2   : > { %22635 = vmatprep.subr.mxu1 %v29384_v32 }
 0x7c4   : > { %22628 = vmatmul.mubr.msk.f32.vlgmr.msra.gmra.mxu1 %vm2768_vm0, %v29551_v9  ;;  %v26529_v23 = vpop.f32.mrf.mxu0 }
 0x7c5   : > { %22636 = vmatpush3.xpose.msk.msra.mxu1 %vm2768_vm0, %v29552_v35  ;;  %22637 = vmatprep.mubr.msk.f32.mxu1 %vm24369_vm1, %v29384_v32  ;;  %29560 = vst [vmem:[#allocation119_spill] sm:$0xff] %v26529_v23 }
 0x7c6   : > { %22645 = vmatprep.subr.mxu1 %v29384_v32  ;;  %v26531_v22 = vpop.f32.mrf.mxu0 }
 0x7c7   : > { %29561 = vst [vmem:[#allocation121_spill] sm:$0xff] %v26531_v22 }
 0x7c8   : > { %22638 = vmatmul.mubr.msk.f32.vlgmr.msra.gmra.mxu1 %vm2768_vm0, %v29553_v62  ;;  %v26533_v21 = vpop.f32.mrf.mxu0  ;;  %v26555_v6 = vpop.f32.mrf.mxu1 }
 0x7c9   : > { %22646 = vmatpush3.xpose.msk.msra.mxu1 %vm2768_vm0, %v29554_v53  ;;  %22647 = vmatprep.mubr.msk.f32.mxu1 %vm24369_vm1, %v29384_v32  ;;  %29562 = vst [vmem:[#allocation127_spill] sm:$0xff] %v26533_v21  ;;  %29573 = vst [vmem:[#allocation16_spill] sm:$0xff] %v26555_v6 }
 0x7ca   : > { %22655 = vmatprep.subr.mxu1 %v29384_v32  ;;  %v26535_v14 = vpop.f32.mrf.mxu0  ;;  %v26559_v0 = vpop.f32.mrf.mxu1 }
 0x7cb   : > { %29563 = vst [vmem:[#allocation124_spill] sm:$0xff] %v26535_v14  ;;  %29575 = vst [vmem:[#allocation19_spill] sm:$0xff] %v26559_v0 }
 0x7cc   : > { %22648 = vmatmul.mubr.msk.f32.vlgmr.msra.gmra.mxu1 %vm2768_vm0, %v29555_v42  ;;  %v26537_v45 = vpop.f32.mrf.mxu0  ;;  %v26563_v56 = vpop.f32.mrf.mxu1 }
 0x7cd   : > { %22656 = vmatpush3.xpose.msk.msra.mxu1 %vm2768_vm0, %v29556_v41  ;;  %22657 = vmatprep.mubr.msk.f32.mxu1 %vm24369_vm1, %v29384_v32  ;;  %29564 = vst [vmem:[#allocation129_spill] sm:$0xff] %v26537_v45  ;;  %29577 = vst [vmem:[#allocation21_spill] sm:$0xff] %v26563_v56 }
 0x7ce   : > { %22665 = vmatprep.subr.mxu1 %v29384_v32  ;;  %v26539_v3 = vpop.f32.mrf.mxu0  ;;  %v26567_v4 = vpop.f32.mrf.mxu1 }
 0x7cf   : > { %29565 = vst [vmem:[#allocation153_spill] sm:$0xff] %v26539_v3  ;;  %29579 = vst [vmem:[#allocation23_spill] sm:$0xff] %v26567_v4 }
 0x7d0   : > { %22658 = vmatmul.mubr.msk.f32.vlgmr.msra.gmra.mxu1 %vm2768_vm0, %v29559_v16  ;;  %v26541_v50 = vpop.f32.mrf.mxu0 }
 0x7d1   : > { %22666 = vmatpush3.msra.mxu1 %v26521_v11  ;;  %22667 = vmatprep.mubr.msk.f32.mxu1 %vm24369_vm1, %v29384_v32  ;;  %29566 = vst [vmem:[#allocation154_spill] sm:$0xff] %v26541_v50 }
 0x7d2   : > { %22675 = vmatprep.subr.mxu1 %v29384_v32  ;;  %v26543_v24 = vpop.f32.mrf.mxu0 }
 0x7d3   : > { %29567 = vst [vmem:[#allocation55_spill] sm:$0xff] %v26543_v24 }
 0x7e7   : > { %v26545_v49 = vpop.f32.mrf.mxu0 }
 0x7e8   : > { %29568 = vst [vmem:[#allocation52_spill] sm:$0xff] %v26545_v49 }
 0x7e9   : > { %v26547_v17 = vpop.f32.mrf.mxu0 }
 0x7ea   : > { %29569 = vst [vmem:[#allocation12_spill] sm:$0xff] %v26547_v17 }
 0x7eb   : > { %v26549_v40 = vpop.f32.mrf.mxu0  ;;  %v26569_v43 = vpop.f32.mrf.mxu1 }
 0x7ec   : > { %29570 = vst [vmem:[#allocation58_spill] sm:$0xff] %v26549_v40  ;;  %29580 = vst [vmem:[#allocation88_spill] sm:$0xff] %v26569_v43 }
 0x7ed   : > { %v26551_v60 = vpop.f32.mrf.mxu0  ;;  %v26573_v52 = vpop.f32.mrf.mxu1 }
 0x7ee   : > { %29571 = vst [vmem:[#allocation14_spill] sm:$0xff] %v26551_v60  ;;  %29582 = vst [vmem:[#allocation25_spill] sm:$0xff] %v26573_v52 }
 0x7ef   : > { %v26553_v63 = vpop.f32.mrf.mxu0  ;;  %v26577_v46 = vpop.f32.mrf.mxu1 }
 0x7f0   : > { %29572 = vst [vmem:[#allocation64_spill] sm:$0xff] %v26553_v63  ;;  %29584 = vst [vmem:[#allocation94_spill] sm:$0xff] %v26577_v46 }
 0x7f1   : > { %v26557_v59 = vpop.f32.mrf.mxu0  ;;  %v26581_v34 = vpop.f32.mrf.mxu1 }
 0x7f2   : > { %29574 = vst [vmem:[#allocation70_spill] sm:$0xff] %v26557_v59  ;;  %29586 = vst [vmem:[#allocation101_spill] sm:$0xff] %v26581_v34 }
 0x7f3   : > { %v26561_v33 = vpop.f32.mrf.mxu0 }
 0x7f4   : > { %29576 = vst [vmem:[#allocation76_spill] sm:$0xff] %v26561_v33 }
 0x7f5   : > { %v26565_v57 = vpop.f32.mrf.mxu0 }
 0x7f6   : > { %29578 = vst [vmem:[#allocation82_spill] sm:$0xff] %v26565_v57 }
 0x7f7   : > { %v26571_v8 = vpop.f32.mrf.mxu0 }
 0x7f8   : > { %29581 = vst [vmem:[#allocation13_spill] sm:$0xff] %v26571_v8 }
 0x7f9   : > { %v26575_v1 = vpop.f32.mrf.mxu0 }
 0x7fa   : > { %29583 = vst [vmem:[#allocation61_spill] sm:$0xff] %v26575_v1 }
 0x7fb   : > { %v26579_v26 = vpop.f32.mrf.mxu0 }
 0x7fc   : > { %29585 = vst [vmem:[#allocation78_spill] sm:$0xff] %v26579_v26 }
 0x7fd   : > { %v26583_v60 = vpop.f32.mrf.mxu0 }
 0x7fe   : > { %29587 = vst [vmem:[#allocation15_spill] sm:$0xff] %v26583_v60 }
 0x824   : > { %v8272_v24 = vpop.f32.mrf.mxu0  ;;  %v22550_v57 = vpop.f32.mrf.mxu1 }
 0x826   : > { %v26585_v14 = vpop.f32.mrf.mxu0  ;;  %v26587_v4 = vpop.f32.mrf.mxu1 }
 0x827   : > { %29588 = vst [vmem:[#allocation27_spill] sm:$0xff] %v26585_v14  ;;  %29589 = vst [vmem:[#allocation67_spill] sm:$0xff] %v26587_v4 }
 0x828   : > { %v26589_v3 = vpop.f32.mrf.mxu0  ;;  %v22551_v22 = vpop.f32.mrf.mxu1 }
 0x82a   : > { %v26591_v8 = vpop.f32.mrf.mxu0  ;;  %v26593_v1 = vpop.f32.mrf.mxu1 }
 0x82b   : > { %29590 = vst [vmem:[#allocation18_spill] sm:$0xff] %v26591_v8  ;;  %29591 = vst [vmem:[#allocation73_spill] sm:$0xff] %v26593_v1 }
 0x82c   : > { %v26595_v33 = vpop.f32.mrf.mxu0  ;;  %v22554_v26 = vpop.f32.mrf.mxu1 }
 0x82e   : > { %v26597_v59 = vpop.f32.mrf.mxu0  ;;  %v26599_v34 = vpop.f32.mrf.mxu1 }
 0x82f   : > { %29592 = vst [vmem:[#allocation20_spill] sm:$0xff] %v26597_v59  ;;  %29593 = vst [vmem:[#allocation79_spill] sm:$0xff] %v26599_v34 }
 0x830   : > { %v26601_v60 = vpop.f32.mrf.mxu0  ;;  %v22555_v63 = vpop.f32.mrf.mxu1 }
 0x832   : > { %v26603_v14 = vpop.f32.mrf.mxu0  ;;  %v26605_v4 = vpop.f32.mrf.mxu1 }
 0x833   : > { %29594 = vst [vmem:[#allocation22_spill] sm:$0xff] %v26603_v14  ;;  %29595 = vst [vmem:[#allocation85_spill] sm:$0xff] %v26605_v4 }
 0x834   : > { %v26607_v40 = vpop.f32.mrf.mxu0  ;;  %v26609_v17 = vpop.f32.mrf.mxu1 }
 0x835   : > { %29596 = vst [vmem:[#allocation24_spill] sm:$0xff] %v26609_v17 }
 0x836   : > { %v26611_v8 = vpop.f32.mrf.mxu0  ;;  %v26613_v1 = vpop.f32.mrf.mxu1 }
 0x837   : > { %29597 = vst [vmem:[#allocation91_spill] sm:$0xff] %v26611_v8  ;;  %29598 = vst [vmem:[#allocation26_spill] sm:$0xff] %v26613_v1 }
 0x838   : > { %v26615_v46 = vpop.f32.mrf.mxu0  ;;  %v26617_v59 = vpop.f32.mrf.mxu1 }
 0x839   : > { %29599 = vst [vmem:[#allocation97_spill] sm:$0xff] %v26617_v59 }
 0x83a   : > { %v26619_v34 = vpop.f32.mrf.mxu0  ;;  %v26621_v49 = vpop.f32.mrf.mxu1 }
 0x83b   : > { %29600 = vst [vmem:[#allocation81_spill] sm:$0xff] %v26619_v34  ;;  %29601 = vst [vmem:[#allocation103_spill] sm:$0xff] %v26621_v49 }
 0x83c   : > { %v26623_v52 = vpop.f32.mrf.mxu1  ;;  %v26625_v14 = vpop.f32.mrf.mxu0 }
 0x83d   : > { %29602 = vst [vmem:[#allocation28_spill] sm:$0xff] %v26623_v52  ;;  %29603 = vst [vmem:[#allocation155_spill] sm:$0xff] %v26625_v14 }
 0x83e   : > { %v26627_v4 = vpop.f32.mrf.mxu1  ;;  %v26629_v43 = vpop.f32.mrf.mxu0 }
 0x83f   : > { %29604 = vst [vmem:[#allocation156_spill] sm:$0xff] %v26627_v4  ;;  %29605 = vst [vmem:[#allocation157_spill] sm:$0xff] %v26629_v43 }
 0x840   : > { %v26631_v50 = vpop.f32.mrf.mxu1  ;;  %v26633_v8 = vpop.f32.mrf.mxu0 }
 0x841   : > { %29606 = vst [vmem:[#allocation158_spill] sm:$0xff] %v26631_v50  ;;  %29607 = vst [vmem:[#allocation159_spill] sm:$0xff] %v26633_v8 }
 0x842   : > { %v26635_v1 = vpop.f32.mrf.mxu1  ;;  %v26637_v56 = vpop.f32.mrf.mxu0 }
 0x843   : > { %29608 = vst [vmem:[#allocation160_spill] sm:$0xff] %v26635_v1  ;;  %29609 = vst [vmem:[#allocation161_spill] sm:$0xff] %v26637_v56 }
 0x844   : > { %v26639_v45 = vpop.f32.mrf.mxu1  ;;  %v26641_v34 = vpop.f32.mrf.mxu0 }
 0x845   : > { %29610 = vst [vmem:[#allocation162_spill] sm:$0xff] %v26639_v45  ;;  %29611 = vst [vmem:[#allocation163_spill] sm:$0xff] %v26641_v34 }
 0x846   : > { %v26643_v49 = vpop.f32.mrf.mxu1  ;;  %v26645_v52 = vpop.f32.mrf.mxu0 }
 0x847   : > { %29612 = vst [vmem:[#allocation164_spill] sm:$0xff] %v26643_v49  ;;  %29613 = vst [vmem:[#allocation165_spill] sm:$0xff] %v26645_v52 }
 0x848   : > { %v26647_v0 = vpop.f32.mrf.mxu1  ;;  %v26649_v4 = vpop.f32.mrf.mxu0 }
 0x849   : > { %29614 = vst [vmem:[#allocation166_spill] sm:$0xff] %v26647_v0  ;;  %29615 = vst [vmem:[#allocation167_spill] sm:$0xff] %v26649_v4 }
 0x84a   : > { %v26651_v43 = vpop.f32.mrf.mxu1  ;;  %v26653_v50 = vpop.f32.mrf.mxu0 }
 0x84b   : > { %29616 = vst [vmem:[#allocation168_spill] sm:$0xff] %v26651_v43  ;;  %29617 = vst [vmem:[#allocation169_spill] sm:$0xff] %v26653_v50 }
 0x84c   : > { %v26655_v8 = vpop.f32.mrf.mxu1  ;;  %v22574_v1 = vpop.f32.mrf.mxu0 }
 0x84d   : > { %29618 = vst [vmem:[#allocation170_spill] sm:$0xff] %v26655_v8  ;;  %v26657_v56 = vadd.f32 %v22574_v1, %v22550_v57 }
 0x84e   : > { %v26659_v45 = vpop.f32.mrf.mxu1  ;;  %v26661_v34 = vpop.f32.mrf.mxu0 }
 0x84f   : > { %29619 = vst [vmem:[#allocation171_spill] sm:$0xff] %v26657_v56  ;;  %29620 = vst [vmem:[#allocation172_spill] sm:$0xff] %v26659_v45 }
 0x850   : > { %29621 = vst [vmem:[#allocation173_spill] sm:$0xff] %v26661_v34  ;;  %v26663_v49 = vpop.f32.mrf.mxu1  ;;  %v22575_v52 = vpop.f32.mrf.mxu0 }
 0x851   : > { %29622 = vst [vmem:[#allocation174_spill] sm:$0xff] %v26663_v49  ;;  %v26665_v14 = vadd.f32 %v22575_v52, %v22551_v22 }
 0x852   : > { %v26667_v0 = vpop.f32.mrf.mxu1  ;;  %v26669_v4 = vpop.f32.mrf.mxu0 }
 0x853   : > { %29623 = vst [vmem:[#allocation175_spill] sm:$0xff] %v26665_v14  ;;  %29624 = vst [vmem:[#allocation176_spill] sm:$0xff] %v26667_v0 }
 0x854   : > { %29625 = vst [vmem:[#allocation177_spill] sm:$0xff] %v26669_v4  ;;  %v26671_v43 = vpop.f32.mrf.mxu1  ;;  %v22578_v50 = vpop.f32.mrf.mxu0 }
 0x855   : > { %29626 = vst [vmem:[#allocation178_spill] sm:$0xff] %v26671_v43  ;;  %v26673_v8 = vadd.f32 %v22578_v50, %v22554_v26 }
 0x856   : > { %v26675_v57 = vpop.f32.mrf.mxu1  ;;  %v26677_v1 = vpop.f32.mrf.mxu0 }
 0x857   : > { %29627 = vst [vmem:[#allocation179_spill] sm:$0xff] %v26673_v8  ;;  %29628 = vst [vmem:[#allocation180_spill] sm:$0xff] %v26675_v57 }
 0x858   : > { %29629 = vst [vmem:[#allocation181_spill] sm:$0xff] %v26677_v1  ;;  %v26679_v45 = vpop.f32.mrf.mxu1  ;;  %v22579_v56 = vpop.f32.mrf.mxu0 }
 0x859   : > { %29630 = vst [vmem:[#allocation182_spill] sm:$0xff] %v26679_v45  ;;  %v26681_v49 = vadd.f32 %v22579_v56, %v22555_v63 }
 0x85a   : > { %v26683_v22 = vpop.f32.mrf.mxu1  ;;  %v26685_v52 = vpop.f32.mrf.mxu0 }
 0x85b   : > { %29631 = vst [vmem:[#allocation183_spill] sm:$0xff] %v26681_v49  ;;  %29632 = vst [vmem:[#allocation184_spill] sm:$0xff] %v26683_v22 }
 0x85c   : > { %29633 = vst [vmem:[#allocation185_spill] sm:$0xff] %v26685_v52  ;;  %v8570_v0 = vpop.f32.mrf.mxu1  ;;  %v8768_v4 = vpop.f32.mrf.mxu0 }
 0x85d   : > { %v26687_v14 = vadd.f32 %v8570_v0, %v8272_v24  ;;  %v9912_v43 = vmul.f32 19.595919, %v8768_v4 }
 0x85e   : > { %v26689_v50 = vpop.f32.mrf.mxu1  ;;  %v22584_v26 = vpop.f32.mrf.mxu0 }
 0x85f   : > { %29634 = vst [vmem:[#allocation186_spill] sm:$0xff] %v26687_v14  ;;  %29635 = vst [vmem:[#allocation187_spill] sm:$0xff] %v26689_v50  ;;  %v26693_v57 = vsel %vm25529_vm2, %v9912_v43, -inf }
 0x860   : > { %v8574_v45 = vpop.f32.mrf.mxu1  ;;  %v8920_v8 = vpop.f32.mrf.mxu0  ;;  %v9944_v63 = vsel %vm4019_vm3, %v26693_v57, -inf }
 0x861   : > { %v26698_v56 = vadd.f32 %v8574_v45, %v26589_v3  ;;  %v9914_v52 = vmul.f32 19.595919, %v8920_v8  ;;  %9945 = vmax.xlane.f32.xlu0 %v9944_v63 }
 0x862   : > { %v26700_v24 = vpop.f32.mrf.mxu1  ;;  %v22594_v0 = vpop.f32.mrf.mxu0 }
 0x863   : > { %29636 = vst [vmem:[#allocation188_spill] sm:$0xff] %v26698_v56  ;;  %29637 = vst [vmem:[#allocation189_spill] sm:$0xff] %v26700_v24  ;;  %v26704_v4 = vsel %vm25529_vm2, %v9914_v52, -inf }
 0x864   : > { %v8580_v26 = vpop.f32.mrf.mxu1  ;;  %v9072_v43 = vpop.f32.mrf.mxu0  ;;  %v9950_v22 = vsel %vm4019_vm3, %v26704_v4, -inf }
 0x865   : > { %v26709_v14 = vadd.f32 %v8580_v26, %v26595_v33  ;;  %9951 = vmax.xlane.f32.xlu0 %v9950_v22 }
 0x866   : > { %v26711_v45 = vpop.f32.mrf.mxu1  ;;  %v22604_v3 = vpop.f32.mrf.mxu0 }
 0x867   : > { %29638 = vst [vmem:[#allocation190_spill] sm:$0xff] %v26709_v14  ;;  %29639 = vst [vmem:[#allocation191_spill] sm:$0xff] %v26711_v45 }
 0x868   : > { %v8584_v8 = vpop.f32.mrf.mxu1  ;;  %v9224_v63 = vpop.f32.mrf.mxu0 }
 0x869   : > { %v26714_v0 = vadd.f32 %v8584_v8, %v26601_v60 }
 0x86a   : > { %v26716_v24 = vpop.f32.mrf.mxu1  ;;  %v22614_v52 = vpop.f32.mrf.mxu0 }
 0x86b   : > { %29640 = vst [vmem:[#allocation192_spill] sm:$0xff] %v26714_v0  ;;  %29641 = vst [vmem:[#allocation193_spill] sm:$0xff] %v26716_v24 }
 0x86c   : > { %v8590_v56 = vpop.f32.mrf.mxu1  ;;  %v9376_v50 = vpop.f32.mrf.mxu0 }
 0x86d   : > { %v26719_v49 = vadd.f32 %v8590_v56, %v26607_v40 }
 0x86e   : > { %v26721_v1 = vpop.f32.mrf.mxu1  ;;  %v22624_v33 = vpop.f32.mrf.mxu0 }
 0x86f   : > { %29642 = vst [vmem:[#allocation194_spill] sm:$0xff] %v26719_v49  ;;  %29643 = vst [vmem:[#allocation195_spill] sm:$0xff] %v26721_v1  ;;  %v9916_v1 = vmul.f32 19.595919, %v9072_v43 }
 0x870   : > { %v8594_v22 = vpop.f32.mrf.mxu1  ;;  %v9528_v26 = vpop.f32.mrf.mxu0 }
 0x871   : > { %v26724_v3 = vadd.f32 %v8594_v22, %v26615_v46 }
 0x872   : > { %v26726_v14 = vpop.f32.mrf.mxu1  ;;  %v22634_v60 = vpop.f32.mrf.mxu0 }
 0x873   : > { %29644 = vst [vmem:[#allocation196_spill] sm:$0xff] %v26724_v3  ;;  %29645 = vst [vmem:[#allocation197_spill] sm:$0xff] %v26726_v14 }
 0x874   : > { %v8844_v8 = vpop.f32.mrf.mxu1  ;;  %v9680_v0 = vpop.f32.mrf.mxu0 }
 0x875   : > { %v9913_v24 = vmul.f32 19.595919, %v8844_v8 }
 0x876   : > { %v22589_v52 = vpop.f32.mrf.mxu1  ;;  %v22644_v45 = vpop.f32.mrf.mxu0 }
 0x877   : > { %v26730_v40 = vsel %vm25529_vm2, %v9913_v24, -inf  ;;  %v26742_v24 = vsel %vm25529_vm2, %v9916_v1, -inf  ;;  %v9918_v52 = vmul.f32 19.595919, %v9224_v63  ;;  %v9920_v1 = vmul.f32 19.595919, %v9376_v50 }
 0x878   : > { %v8996_v56 = vpop.f32.mrf.mxu1  ;;  %v9832_v49 = vpop.f32.mrf.mxu0  ;;  %v9947_v33 = vsel %vm4019_vm3, %v26730_v40, -inf  ;;  %v9922_v50 = vmul.f32 19.595919, %v9528_v26  ;;  %v9924_v26 = vmul.f32 19.595919, %v9680_v0 }
 0x879   : > { %v9915_v46 = vmul.f32 19.595919, %v8996_v56  ;;  %9948 = vmax.xlane.f32.xlu1 %v9947_v33  ;;  %v9926_v0 = vmul.f32 19.595919, %v9832_v49 }
 0x87a   : > { %v22599_v22 = vpop.f32.mrf.mxu1  ;;  %v22654_v14 = vpop.f32.mrf.mxu0 }
 0x87b   : > { %v26736_v60 = vsel %vm25529_vm2, %v9915_v46, -inf  ;;  %v9956_v46 = vsel %vm4019_vm3, %v26742_v24, -inf  ;;  %v26754_v22 = vsel %vm25529_vm2, %v9918_v52, -inf  ;;  %v26766_v52 = vsel %vm25529_vm2, %v9920_v1, -inf }
 0x87c   : > { %v9148_v8 = vpop.f32.mrf.mxu1  ;;  %v9953_v45 = vsel %vm4019_vm3, %v26736_v60, -inf  ;;  %v9962_v34 = vsel %vm4019_vm3, %v26754_v22, -inf  ;;  %v9968_v6 = vsel %vm4019_vm3, %v26766_v52, -inf  ;;  %v26778_v1 = vsel %vm25529_vm2, %v9922_v50, -inf }
 0x87d   : > { %v9917_v3 = vmul.f32 19.595919, %v9148_v8  ;;  %9954 = vmax.xlane.f32.xlu0 %v9953_v45  ;;  %v9974_v59 = vsel %vm4019_vm3, %v26778_v1, -inf  ;;  %v26790_v50 = vsel %vm25529_vm2, %v9924_v26, -inf  ;;  %v26802_v26 = vsel %vm25529_vm2, %v9926_v0, -inf }
 0x87e   : > { %v22609_v43 = vpop.f32.mrf.mxu1  ;;  %v9980_v21 = vsel %vm4019_vm3, %v26790_v50, -inf }
 0x87f   : > { %v26746_v56 = vsel %vm25529_vm2, %v9917_v3, -inf }
 0x880   : > { %v9300_v14 = vpop.f32.mrf.mxu1  ;;  %v9959_v33 = vsel %vm4019_vm3, %v26746_v56, -inf }
 0x881   : > { %v9919_v63 = vmul.f32 19.595919, %v9300_v14  ;;  %9960 = vmax.xlane.f32.xlu1 %v9959_v33  ;;  %9957 = vmax.xlane.f32.xlu0 %v9956_v46 }
 0x882   : > { %v22619_v8 = vpop.f32.mrf.mxu1 }
 0x883   : > { %v26758_v3 = vsel %vm25529_vm2, %v9919_v63, -inf }
 0x884   : > { %v9452_v45 = vpop.f32.mrf.mxu1  ;;  %v9965_v43 = vsel %vm4019_vm3, %v26758_v3, -inf }
 0x885   : > { %v9921_v14 = vmul.f32 19.595919, %v9452_v45  ;;  %9966 = vmax.xlane.f32.xlu1 %v9965_v43  ;;  %9963 = vmax.xlane.f32.xlu0 %v9962_v34 }
 0x886   : > { %v22629_v33 = vpop.f32.mrf.mxu1 }
 0x887   : > { %v26770_v46 = vsel %vm25529_vm2, %v9921_v14, -inf }
 0x888   : > { %v9604_v63 = vpop.f32.mrf.mxu1  ;;  %v9971_v8 = vsel %vm4019_vm3, %v26770_v46, -inf }
 0x889   : > { %v9923_v45 = vmul.f32 19.595919, %v9604_v63  ;;  %9972 = vmax.xlane.f32.xlu1 %v9971_v8  ;;  %9969 = vmax.xlane.f32.xlu0 %v9968_v6 }
 0x88a   : > { %v22639_v34 = vpop.f32.mrf.mxu1 }
 0x88b   : > { %v26782_v43 = vsel %vm25529_vm2, %v9923_v45, -inf }
 0x88c   : > { %v9756_v14 = vpop.f32.mrf.mxu1  ;;  %v9977_v33 = vsel %vm4019_vm3, %v26782_v43, -inf }
 0x88d   : > { %v9925_v63 = vmul.f32 19.595919, %v9756_v14  ;;  %9978 = vmax.xlane.f32.xlu1 %v9977_v33  ;;  %9975 = vmax.xlane.f32.xlu0 %v9974_v59  ;;  %v9986_v33 = vsel %vm4019_vm3, %v26802_v26, -inf }
 0x88e   : > { %v22649_v6 = vpop.f32.mrf.mxu1 }
 0x88f   : > { %v26794_v8 = vsel %vm25529_vm2, %v9925_v63, -inf }
 0x890   : > { %v9908_v45 = vpop.f32.mrf.mxu1  ;;  %v9983_v34 = vsel %vm4019_vm3, %v26794_v8, -inf }
 0x891   : > { %v9927_v49 = vmul.f32 19.595919, %v9908_v45  ;;  %9984 = vmax.xlane.f32.xlu1 %v9983_v34  ;;  %9981 = vmax.xlane.f32.xlu0 %v9980_v21 }
 0x892   : > { %v22659_v59 = vpop.f32.mrf.mxu1 }
 0x893   : > { %v26806_v14 = vsel %vm25529_vm2, %v9927_v49, -inf }
 0x894   : > { %v9989_v63 = vsel %vm4019_vm3, %v26806_v14, -inf }
 0x895   : > { %9987 = vmax.xlane.f32.xlu0 %v9986_v33  ;;  %9990 = vmax.xlane.f32.xlu1 %v9989_v63 }
 0x8ea   : > { %v9946_v6 = vpop.xlane.xlu0 %9945 }
 0x8eb   : > { %v9992_v0 = vsub.f32 %v26693_v57, %v9946_v6 }
 0x8ed   : > { %v10008_v17 = vmul.f32 1.442695, %v9992_v0 }
 0x8ee   : > { %v9952_v45 = vpop.xlane.xlu0 %9951 }
 0x8ef   : > { %23951 = vpow2.f32 %v10008_v17  ;;  %v9994_v21 = vsub.f32 %v26704_v4, %v9952_v45 }
 0x8f1   : > { %v10012_v34 = vmul.f32 1.442695, %v9994_v21 }
 0x8f3   : > { %23953 = vpow2.f32 %v10012_v34 }
 0x8fc   : > { %v26814_v49 = vpop.eup %23951 }
 0x8fd   : > { %v10040_v59 = vsel %vm4019_vm3, %v26814_v49, 0.0 }
 0x8fe   : > { %10041 = vadd.xlane.f32.xlu0 %v10040_v59 }
 0x900   : > { %v26818_v37 = vpop.eup %23953 }
 0x901   : > { %29646 = vst [vmem:[#allocation198_spill] sm:$0xff] %v26818_v37  ;;  %v10046_v33 = vsel %vm4019_vm3, %v26818_v37, 0.0 }
 0x902   : > { %v9949_v63 = vpop.xlane.xlu1 %9948  ;;  %10047 = vadd.xlane.f32.xlu0 %v10046_v33 }
 0x903   : > { %v9993_v57 = vsub.f32 %v26730_v40, %v9949_v63 }
 0x905   : > { %v10010_v17 = vmul.f32 1.442695, %v9993_v57 }
 0x906   : > { %v9955_v6 = vpop.xlane.xlu0 %9954 }
 0x907   : > { %23955 = vpow2.f32 %v10010_v17  ;;  %v9995_v4 = vsub.f32 %v26736_v60, %v9955_v6 }
 0x909   : > { %v10014_v0 = vmul.f32 1.442695, %v9995_v4 }
 0x90a   : > { %v9961_v45 = vpop.xlane.xlu1 %9960  ;;  %v9958_v21 = vpop.xlane.xlu0 %9957 }
 0x90b   : > { %23957 = vpow2.f32 %v10014_v0  ;;  %v9997_v34 = vsub.f32 %v26746_v56, %v9961_v45  ;;  %v9996_v59 = vsub.f32 %v26742_v24, %v9958_v21 }
 0x90d   : > { %v10018_v23 = vmul.f32 1.442695, %v9997_v34  ;;  %v10016_v20 = vmul.f32 1.442695, %v9996_v59 }
 0x90e   : > { %v9967_v37 = vpop.xlane.xlu1 %9966  ;;  %v9964_v32 = vpop.xlane.xlu0 %9963 }
 0x90f   : > { %23959 = vpow2.f32 %v10018_v23  ;;  %v9999_v40 = vsub.f32 %v26758_v3, %v9967_v37  ;;  %v9998_v33 = vsub.f32 %v26754_v22, %v9964_v32 }
 0x910   : > { %23961 = vpow2.f32 %v10016_v20 }
 0x911   : > { %v10022_v63 = vmul.f32 1.442695, %v9999_v40  ;;  %v10020_v60 = vmul.f32 1.442695, %v9998_v33 }
 0x912   : > { %v9973_v57 = vpop.xlane.xlu1 %9972  ;;  %v9970_v17 = vpop.xlane.xlu0 %9969 }
 0x913   : > { %23963 = vpow2.f32 %v10022_v63  ;;  %v10001_v6 = vsub.f32 %v26770_v46, %v9973_v57  ;;  %v10000_v56 = vsub.f32 %v26766_v52, %v9970_v17 }
 0x914   : > { %v26830_v24 = vpop.eup %23955  ;;  %23965 = vpow2.f32 %v10020_v60 }
 0x915   : > { %v10026_v4 = vmul.f32 1.442695, %v10001_v6  ;;  %v10024_v0 = vmul.f32 1.442695, %v10000_v56  ;;  %v10043_v37 = vsel %vm4019_vm3, %v26830_v24, 0.0 }
 0x916   : > { %v9979_v23 = vpop.xlane.xlu1 %9978  ;;  %v9976_v32 = vpop.xlane.xlu0 %9975  ;;  %10044 = vadd.xlane.f32.xlu1 %v10043_v37 }
 0x917   : > { %23967 = vpow2.f32 %v10026_v4  ;;  %v10003_v20 = vsub.f32 %v26782_v43, %v9979_v23  ;;  %v10002_v22 = vsub.f32 %v26778_v1, %v9976_v32 }
 0x918   : > { %v26836_v3 = vpop.eup %23957  ;;  %23969 = vpow2.f32 %v10024_v0 }
 0x919   : > { %v10030_v52 = vmul.f32 1.442695, %v10003_v20  ;;  %v10028_v46 = vmul.f32 1.442695, %v10002_v22  ;;  %v10049_v45 = vsel %vm4019_vm3, %v26836_v3, 0.0 }
 0x91a   : > { %v9985_v21 = vpop.xlane.xlu1 %9984  ;;  %v9982_v34 = vpop.xlane.xlu0 %9981  ;;  %10050 = vadd.xlane.f32.xlu1 %v10049_v45 }
 0x91b   : > { %23971 = vpow2.f32 %v10030_v52  ;;  %v10005_v59 = vsub.f32 %v26794_v8, %v9985_v21  ;;  %v10004_v40 = vsub.f32 %v26790_v50, %v9982_v34 }
 0x91c   : > { %v26842_v33 = vpop.eup %23959  ;;  %23973 = vpow2.f32 %v10028_v46 }
 0x91d   : > { %v26844_v1 = vpop.eup %23961  ;;  %v10034_v43 = vmul.f32 1.442695, %v10005_v59  ;;  %v10032_v63 = vmul.f32 1.442695, %v10004_v40  ;;  %v10055_v60 = vsel %vm4019_vm3, %v26842_v33, 0.0 }
 0x91e   : > { %v10052_v57 = vsel %vm4019_vm3, %v26844_v1, 0.0  ;;  %v9988_v17 = vpop.xlane.xlu0 %9987  ;;  %10056 = vadd.xlane.f32.xlu1 %v10055_v60  ;;  %v9991_v6 = vpop.xlane.xlu1 %9990 }
 0x91f   : > { %23975 = vpow2.f32 %v10034_v43  ;;  %10053 = vadd.xlane.f32.xlu0 %v10052_v57  ;;  %v10006_v50 = vsub.f32 %v26802_v26, %v9988_v17  ;;  %v10007_v8 = vsub.f32 %v26806_v14, %v9991_v6 }
 0x920   : > { %v26852_v56 = vpop.eup %23963  ;;  %23977 = vpow2.f32 %v10032_v63 }
 0x921   : > { %v26854_v4 = vpop.eup %23965  ;;  %v10036_v0 = vmul.f32 1.442695, %v10006_v50  ;;  %v10038_v37 = vmul.f32 1.442695, %v10007_v8  ;;  %v10061_v23 = vsel %vm4019_vm3, %v26852_v56, 0.0 }
 0x922   : > { %v10058_v32 = vsel %vm4019_vm3, %v26854_v4, 0.0  ;;  %10062 = vadd.xlane.f32.xlu1 %v10061_v23 }
 0x923   : > { %23979 = vpow2.f32 %v10036_v0  ;;  %10059 = vadd.xlane.f32.xlu0 %v10058_v32 }
 0x924   : > { %v26860_v20 = vpop.eup %23967  ;;  %23981 = vpow2.f32 %v10038_v37 }
 0x925   : > { %v26862_v26 = vpop.eup %23969  ;;  %v10067_v14 = vsel %vm4019_vm3, %v26860_v20, 0.0 }
 0x926   : > { %v10064_v22 = vsel %vm4019_vm3, %v26862_v26, 0.0  ;;  %10068 = vadd.xlane.f32.xlu1 %v10067_v14 }
 0x927   : > { %10065 = vadd.xlane.f32.xlu0 %v10064_v22 }
 0x928   : > { %v26868_v52 = vpop.eup %23971 }
 0x929   : > { %v26870_v46 = vpop.eup %23973  ;;  %v10073_v45 = vsel %vm4019_vm3, %v26868_v52, 0.0 }
 0x92a   : > { %v10070_v21 = vsel %vm4019_vm3, %v26870_v46, 0.0  ;;  %10074 = vadd.xlane.f32.xlu1 %v10073_v45 }
 0x92b   : > { %10071 = vadd.xlane.f32.xlu0 %v10070_v21 }
 0x92c   : > { %v26876_v34 = vpop.eup %23975 }
 0x92d   : > { %v26878_v59 = vpop.eup %23977  ;;  %v10079_v40 = vsel %vm4019_vm3, %v26876_v34, 0.0 }
 0x92e   : > { %v10076_v43 = vsel %vm4019_vm3, %v26878_v59, 0.0  ;;  %10080 = vadd.xlane.f32.xlu1 %v10079_v40 }
 0x92f   : > { %10077 = vadd.xlane.f32.xlu0 %v10076_v43 }
 0x930   : > { %v26884_v63 = vpop.eup %23979 }
 0x931   : > { %v26886_v60 = vpop.eup %23981  ;;  %v10082_v57 = vsel %vm4019_vm3, %v26884_v63, 0.0 }
 0x932   : > { %v10085_v17 = vsel %vm4019_vm3, %v26886_v60, 0.0 }
 0x933   : > { %10083 = vadd.xlane.f32.xlu0 %v10082_v57  ;;  %10086 = vadd.xlane.f32.xlu1 %v10085_v17 }
 0x944   : > { %11658 = vrot.lane.b32.xlu1 %v29526_v38, %s24367_s21 }
 0x948   : > { %11738 = vrot.lane.b32.xlu1 %v29524_v61, %s24367_s21  ;;  %v29647_v61 = vld [vmem:[#allocation84_spill] sm:$0xff] }
 0x949   : > { %11660 = vrot.lane.b32.xlu0 %v29525_v36, %s24367_s21  ;;  %v29648_v36 = vld [vmem:[#allocation105_spill] sm:$0xff] }
 0x94a   : > { %v2503_v38 = vadd.f32 %v29648_v36, %v29647_v61 }
 0x94c   : > { %11736 = vrot.lane.b32.xlu1 %v29538_v29, %s24367_s21  ;;  %v29655_v29 = vld [vmem:[#allocation100_spill] sm:$0xff] }
 0x94d   : > { %11816 = vrot.lane.b32.xlu0 %v29527_v48, %s24367_s21 }
 0x950   : > { %11814 = vrot.lane.b32.xlu1 %v29528_v31, %s24367_s21  ;;  %v29649_v31 = vld [vmem:[#allocation87_spill] sm:$0xff] }
 0x951   : > { %11894 = vrot.lane.b32.xlu0 %v29540_v7, %s24367_s21 }
 0x954   : > { %11892 = vrot.lane.b32.xlu1 %v29544_v30, %s24367_s21 }
 0x955   : > { %11972 = vrot.lane.b32.xlu0 %v29529_v10, %s24367_s21  ;;  %v29650_v10 = vld [vmem:[#allocation107_spill] sm:$0xff] }
 0x958   : > { %11970 = vrot.lane.b32.xlu1 %v29530_v44, %s24367_s21  ;;  %v2507_v44 = vadd.f32 %v29650_v10, %v29649_v31  ;;  %v29665_v10 = vld [vmem:[#allocation106_spill] sm:$0xff] }
 0x959   : > { %12050 = vrot.lane.b32.xlu0 %v29546_v55, %s24367_s21  ;;  %v29659_v55 = vld [vmem:[#allocation99_spill] sm:$0xff] }
 0x95c   : > { %12048 = vrot.lane.b32.xlu1 %v29547_v5, %s24367_s21  ;;  %v29660_v5 = vld [vmem:[#allocation113_spill] sm:$0xff] }
 0x95d   : > { %12128 = vrot.lane.b32.xlu0 %v29531_v54, %s24367_s21  ;;  %v29651_v54 = vld [vmem:[#allocation96_spill] sm:$0xff] }
 0x960   : > { %12126 = vrot.lane.b32.xlu1 %v29532_v27, %s24367_s21  ;;  %v29652_v27 = vld [vmem:[#allocation111_spill] sm:$0xff] }
 0x961   : > { %12206 = vrot.lane.b32.xlu0 %v29548_v15, %s24367_s21  ;;  %v2527_v15 = vadd.f32 %v29660_v5, %v29659_v55 }
 0x964   : > { %12204 = vrot.lane.b32.xlu1 %v29549_v47, %s24367_s21 }
 0x965   : > { %12284 = vrot.lane.b32.xlu0 %v29533_v13, %s24367_s21  ;;  %v26967_v13 = vadd.f32 %v29652_v27, %v29651_v54 }
 0x968   : > { %12362 = vrot.lane.b32.xlu1 %v29550_v12, %s24367_s21 }
 0x969   : > { %12282 = vrot.lane.b32.xlu0 %v29534_v28, %s24367_s21 }
 0x96c   : > { %12360 = vrot.lane.b32.xlu1 %v29551_v9, %s24367_s21  ;;  %v29661_v9 = vmov 0.0  }
 0x96d   : > { %12440 = vrot.lane.b32.xlu0 %v29535_v25, %s24367_s21  ;;  %v29653_v25 = vld [vmem:[#allocation90_spill] sm:$0xff] }
 0x970   : > { %12518 = vrot.lane.b32.xlu1 %v29552_v35, %s24367_s21  ;;  %v29662_v35 = vld [vmem:[#allocation102_spill] sm:$0xff] }
 0x971   : > { %12438 = vrot.lane.b32.xlu0 %v29536_v39, %s24367_s21  ;;  %v29654_v39 = vld [vmem:[#allocation108_spill] sm:$0xff] }
 0x974   : > { %12516 = vrot.lane.b32.xlu1 %v29553_v62, %s24367_s21  ;;  %v29663_v62 = vld [vmem:[#allocation116_spill] sm:$0xff] }
 0x975   : > { %12596 = vrot.lane.b32.xlu0 %v29537_v51, %s24367_s21  ;;  %v2513_v51 = vadd.f32 %v29654_v39, %v29653_v25 }
 0x978   : > { %12674 = vrot.lane.b32.xlu1 %v29554_v53, %s24367_s21  ;;  %v26993_v53 = vadd.f32 %v29663_v62, %v29662_v35  ;;  %v29675_v35 = vmov 0   ;;  %v23759_v62 = vld [vmem:[#allocation7 + $0x108] ss:$12 sps:$4 sm:$0xff]  }
 0x979   : > { %12594 = vrot.lane.b32.xlu0 %v29539_v19, %s24367_s21  ;;  %v29656_v19 = vld [vmem:[#allocation114_spill] sm:$0xff] }
 0x97a   : > { %v26976_v7 = vadd.f32 %v29656_v19, %v29655_v29  ;;  %v29670_v29 = vld [vmem:[#allocation125_spill] sm:$0xff] }
 0x97c   : > { %12672 = vrot.lane.b32.xlu1 %v29555_v42, %s24367_s21  ;;  %v29664_v42 = vld [vmem:[#allocation198_spill] sm:$0xff] }
 0x97d   : > { %12752 = vrot.lane.b32.xlu0 %v29541_v2, %s24367_s21  ;;  %v29657_v2 = vld [vmem:[#allocation93_spill] sm:$0xff] }
 0x980   : > { %12830 = vrot.lane.b32.xlu1 %v29556_v41, %s24367_s21 }
 0x981   : > { %12750 = vrot.lane.b32.xlu0 %v29545_v18, %s24367_s21 }
 0x984   : > { %12828 = vrot.lane.b32.xlu1 %v29559_v16, %s24367_s21 }
 0x985   : > { %13115 = vrot.lane.b32.xlu0 %v26466_v58, %s24367_s21  ;;  %v29658_v58 = vld [vmem:[#allocation110_spill] sm:$0xff] }
 0x986   : > { %v2517_v30 = vadd.f32 %v29658_v58, %v29657_v2 }
 0x987   : > { %v10042_v48 = vpop.xlane.xlu0 %10041 }
 0x988   : > { %23983 = vrcp.f32 %v10042_v48  ;;  %13192 = vrot.lane.b32.xlu1 %v26521_v11, %s24367_s21 }
 0x989   : > { %13269 = vrot.lane.b32.xlu0 %v2503_v38, %s24367_s21 }
 0x98b   : > { %v10048_v28 = vpop.xlane.xlu0 %10047 }
 0x98c   : > { %23985 = vrcp.f32 %v10048_v28  ;;  %13346 = vrot.lane.b32.xlu1 %v2507_v44, %s24367_s21  ;;  %v29668_v28 = vld [vmem:[#allocation118_spill] sm:$0xff] }
 0x98d   : > { %13577 = vrot.lane.b32.xlu0 %v26967_v13, %s24367_s21 }
 0x990   : > { %13423 = vrot.lane.b32.xlu1 %v2513_v51, %s24367_s21 }
 0x991   : > { %13731 = vrot.lane.b32.xlu0 %v26976_v7, %s24367_s21 }
 0x994   : > { %13500 = vrot.lane.b32.xlu1 %v2517_v30, %s24367_s21 }
 0x995   : > { %v23984_v18 = vpop.eup %23983 }
 0x996   : > { %v10104_v47 = vmul.f32 %v23984_v18, %v26814_v49  ;;  %v29673_v18 = vld [vmem:[#allocation130_spill] sm:$0xff] }
 0x998   : > { %13654 = vrot.lane.b32.xlu1 %v2527_v15, %s24367_s21  ;;  %22663 = vmatmul.mubr.msk.f32.vlgmr.msra.gmra.mxu0 %vm4019_vm3, %v10104_v47 }
 0x999   : > { %v23986_v12 = vpop.eup %23985  ;;  %22671 = vmatpush3.msra.mxu0 %v2503_v38  ;;  %22672 = vmatprep.mubr.msk.f32.mxu0 %vm24369_vm1, %v29661_v9 }
 0x99a   : > { %v10106_v41 = vmul.f32 %v23986_v12, %v29664_v42  ;;  %22680 = vmatprep.subr.mxu0 %v29661_v9  ;;  %v23764_v42 = vld [vmem:[#allocation7 + $0xf4] ss:$12 sps:$4 sm:$0xff]  }
 0x99c   : > { %13808 = vrot.lane.b32.xlu1 %v26993_v53, %s24367_s21  ;;  %22673 = vmatmul.mubr.msk.f32.vlgmr.msra.gmra.mxu0 %vm4019_vm3, %v10106_v41  ;;  %v23765_v41 = vld [vmem:[#allocation7 + $0x110] ss:$12 sps:$4 sm:$0xff]  }
 0x99d   : > { %22681 = vmatpush3.msra.mxu0 %v2513_v51  ;;  %22682 = vmatprep.mubr.msk.f32.mxu0 %vm24369_vm1, %v29661_v9  ;;  %v29669_v51 = vld [vmem:[#allocation109_spill] sm:$0xff] }
 0x99e   : > { %22690 = vmatprep.subr.mxu0 %v29661_v9  ;;  %v27055_v19 = vadd.f32 %v29670_v29, %v29669_v51 }
 0x99f   : > { %v10045_v11 = vpop.xlane.xlu1 %10044 }
 0x9a0   : > { %23987 = vrcp.f32 %v10045_v11  ;;  %v23769_v11 = vld [vmem:[#allocation7 + $0xf8] ss:$12 sps:$4 sm:$0xff]  }
 0x9a3   : > { %v10051_v16 = vpop.xlane.xlu1 %10050 }
 0x9a4   : > { %23989 = vrcp.f32 %v10051_v16  ;;  %v23762_v16 = vld [vmem:[#allocation7 + $0xf0] ss:$12 sps:$4 sm:$0xff]  }
 0x9a7   : > { %v10057_v49 = vpop.xlane.xlu1 %10056 }
 0x9a8   : > { %v10054_v6 = vpop.xlane.xlu0 %10053  ;;  %23991 = vrcp.f32 %v10057_v49  ;;  %v23766_v49 = vld [vmem:[#allocation7 + $0xd8] ss:$12 sps:$4 sm:$0xff]  }
 0x9a9   : > { %23993 = vrcp.f32 %v10054_v6  ;;  %v23772_v6 = vld [vmem:[#allocation7 + $0xc4] ss:$12 sps:$4 sm:$0xff]  }
 0x9ab   : > { %v10063_v50 = vpop.xlane.xlu1 %10062 }
 0x9ac   : > { %v10060_v8 = vpop.xlane.xlu0 %10059  ;;  %23995 = vrcp.f32 %v10063_v50  ;;  %v23770_v50 = vld [vmem:[#allocation7 + $0xc0] ss:$12 sps:$4 sm:$0xff]  }
 0x9ad   : > { %v23988_v0 = vpop.eup %23987  ;;  %23997 = vrcp.f32 %v10060_v8  ;;  %v23774_v8 = vld [vmem:[#allocation7 + $0xc8] ss:$12 sps:$4 sm:$0xff]  }
 0x9ae   : > { %v10105_v37 = vmul.f32 %v23988_v0, %v26830_v24 }
 0x9af   : > { %v10069_v23 = vpop.xlane.xlu1 %10068 }
 0x9b0   : > { %v10066_v32 = vpop.xlane.xlu0 %10065  ;;  %23999 = vrcp.f32 %v10069_v23  ;;  %22668 = vmatmul.mubr.msk.f32.vlgmr.msra.gmra.mxu1 %vm4019_vm3, %v10105_v37 }
 0x9b1   : > { %v23990_v14 = vpop.eup %23989  ;;  %24001 = vrcp.f32 %v10066_v32  ;;  %22676 = vmatpush3.msra.mxu1 %v2507_v44  ;;  %22677 = vmatprep.mubr.msk.f32.mxu1 %vm24369_vm1, %v29661_v9  ;;  %v29666_v44 = vld [vmem:[#allocation120_spill] sm:$0xff] }
 0x9b2   : > { %v10107_v22 = vmul.f32 %v23990_v14, %v26836_v3  ;;  %22685 = vmatprep.subr.mxu1 %v29661_v9  ;;  %v27035_v54 = vadd.f32 %v29666_v44, %v29665_v10 }
 0x9b3   : > { %v10075_v45 = vpop.xlane.xlu1 %10074 }
 0x9b4   : > { %v10072_v21 = vpop.xlane.xlu0 %10071  ;;  %24003 = vrcp.f32 %v10075_v45  ;;  %22678 = vmatmul.mubr.msk.f32.vlgmr.msra.gmra.mxu1 %vm4019_vm3, %v10107_v22 }
 0x9b5   : > { %v23992_v24 = vpop.eup %23991  ;;  %24005 = vrcp.f32 %v10072_v21  ;;  %22686 = vmatpush3.msra.mxu1 %v2517_v30  ;;  %22687 = vmatprep.mubr.msk.f32.mxu1 %vm24369_vm1, %v29661_v9  ;;  %v29671_v30 = vld [vmem:[#allocation122_spill] sm:$0xff] }
 0x9b6   : > { %v23994_v40 = vpop.eup %23993  ;;  %v10109_v43 = vmul.f32 %v23992_v24, %v26842_v33  ;;  %22695 = vmatprep.subr.mxu1 %v29661_v9 }
 0x9b7   : > { %v10108_v3 = vmul.f32 %v23994_v40, %v26844_v1  ;;  %v10081_v57 = vpop.xlane.xlu1 %10080 }
 0x9b8   : > { %v10078_v17 = vpop.xlane.xlu0 %10077  ;;  %24007 = vrcp.f32 %v10081_v57  ;;  %22688 = vmatmul.mubr.msk.f32.vlgmr.msra.gmra.mxu1 %vm4019_vm3, %v10109_v43 }
 0x9b9   : > { %v23996_v61 = vpop.eup %23995  ;;  %24009 = vrcp.f32 %v10078_v17  ;;  %22683 = vmatmul.mubr.msk.f32.vlgmr.msra.gmra.mxu0 %vm4019_vm3, %v10108_v3  ;;  %22696 = vmatpush3.msra.mxu1 %v2527_v15  ;;  %v29674_v15 = vld [vmem:[#allocation128_spill] sm:$0xff] }
 0x9ba   : > { %v23998_v36 = vpop.eup %23997  ;;  %v10111_v38 = vmul.f32 %v23996_v61, %v26852_v56  ;;  %22691 = vmatpush3.msra.mxu0 %v26967_v13  ;;  %22692 = vmatprep.mubr.msk.f32.mxu0 %vm24369_vm1, %v29661_v9  ;;  %v29667_v13 = vld [vmem:[#allocation104_spill] sm:$0xff] }
 0x9bb   : > { %v10110_v33 = vmul.f32 %v23998_v36, %v26854_v4  ;;  %22700 = vmatprep.subr.mxu0 %v29661_v9  ;;  %22697 = vmatprep.mubr.msk.f32.mxu1 %vm24369_vm1, %v29661_v9 }
 0x9bc   : > { %v10084_v1 = vpop.xlane.xlu0 %10083  ;;  %22705 = vmatprep.subr.mxu1 %v29661_v9  ;;  %v10087_v48 = vpop.xlane.xlu1 %10086  ;;  %22698 = vmatmul.mubr.msk.f32.vlgmr.msra.gmra.mxu1 %vm4019_vm3, %v10111_v38 }
 0x9bd   : > { %v24000_v31 = vpop.eup %23999  ;;  %24011 = vrcp.f32 %v10084_v1  ;;  %22693 = vmatmul.mubr.msk.f32.vlgmr.msra.gmra.mxu0 %vm4019_vm3, %v10110_v33  ;;  %22706 = vmatpush3.msra.mxu1 %v26993_v53  ;;  %v23761_v53 = vld [vmem:[#allocation7 + $0x10c] ss:$12 sps:$4 sm:$0xff]  }
 0x9be   : > { %v24002_v56 = vpop.eup %24001  ;;  %v10113_v4 = vmul.f32 %v24000_v31, %v26860_v20  ;;  %24013 = vrcp.f32 %v10087_v48  ;;  %22701 = vmatpush3.msra.mxu0 %v26976_v7  ;;  %22702 = vmatprep.mubr.msk.f32.mxu0 %vm24369_vm1, %v29661_v9  ;;  %v27043_v20 = vadd.f32 %v29668_v28, %v29667_v13 }
 0x9bf   : > { %v10112_v27 = vmul.f32 %v24002_v56, %v26862_v26  ;;  %22710 = vmatprep.subr.mxu0 %v29661_v9  ;;  %22707 = vmatprep.mubr.msk.f32.mxu1 %vm24369_vm1, %v29661_v9 }
 0x9c0   : > { %22715 = vmatprep.subr.mxu1 %v29661_v9  ;;  %22708 = vmatmul.mubr.msk.f32.vlgmr.msra.gmra.mxu1 %vm4019_vm3, %v10113_v4  ;;  %v11661_v0 = vpop.permute.xlu0 %11660  ;;  %v27099_v24 = vpop.permute.xlu1 %11658 }
 0x9c1   : > { %v24004_v25 = vpop.eup %24003  ;;  %22703 = vmatmul.mubr.msk.f32.vlgmr.msra.gmra.mxu0 %vm4019_vm3, %v10112_v27  ;;  %22716 = vmatpush3.msra.mxu1 %v27035_v54 }
 0x9c2   : > { %v24006_v39 = vpop.eup %24005  ;;  %v10115_v26 = vmul.f32 %v24004_v25, %v26868_v52  ;;  %22711 = vmatpush3.msra.mxu0 %v27043_v20  ;;  %22712 = vmatprep.mubr.msk.f32.mxu0 %vm24369_vm1, %v29661_v9 }
 0x9c3   : > { %v10114_v7 = vmul.f32 %v24006_v39, %v26870_v46  ;;  %22720 = vmatprep.subr.mxu0 %v29661_v9  ;;  %22717 = vmatprep.mubr.msk.f32.mxu1 %vm24369_vm1, %v29661_v9  ;;  %v29672_v46 = vld [vmem:[#allocation112_spill] sm:$0xff] }
 0x9c4   : > { %22725 = vmatprep.subr.mxu1 %v29661_v9  ;;  %22718 = vmatmul.mubr.msk.f32.vlgmr.msra.gmra.mxu1 %vm4019_vm3, %v10115_v26  ;;  %v27071_v55 = vadd.f32 %v29673_v18, %v29672_v46  ;;  %v27093_v37 = vpop.permute.xlu0 %11816  ;;  %v27103_v43 = vpop.permute.xlu1 %11738 }
 0x9c5   : > { %v24008_v52 = vpop.eup %24007  ;;  %22713 = vmatmul.mubr.msk.f32.vlgmr.msra.gmra.mxu0 %vm4019_vm3, %v10114_v7  ;;  %22726 = vmatpush3.msra.mxu1 %v27055_v19 }
 0x9c6   : > { %v24010_v2 = vpop.eup %24009  ;;  %v10117_v58 = vmul.f32 %v24008_v52, %v26876_v34  ;;  %22721 = vmatpush3.msra.mxu0 %v29671_v30  ;;  %22722 = vmatprep.mubr.msk.f32.mxu0 %vm24369_vm1, %v29661_v9 }
 0x9c7   : > { %v10116_v5 = vmul.f32 %v24010_v2, %v26878_v59  ;;  %22730 = vmatprep.subr.mxu0 %v29661_v9  ;;  %22727 = vmatprep.mubr.msk.f32.mxu1 %vm24369_vm1, %v29661_v9 }
 0x9c8   : > { %22735 = vmatprep.subr.mxu1 %v29661_v9  ;;  %22728 = vmatmul.mubr.msk.f32.vlgmr.msra.gmra.mxu1 %vm4019_vm3, %v10117_v58  ;;  %v27095_v23 = vpop.permute.xlu0 %11894  ;;  %v27107_v57 = vpop.permute.xlu1 %11736 }
 0x9c9   : > { %22723 = vmatmul.mubr.msk.f32.vlgmr.msra.gmra.mxu0 %vm4019_vm3, %v10116_v5  ;;  %22736 = vmatpush3.msra.mxu1 %v27071_v55 }
 0x9ca   : > { %v24012_v34 = vpop.eup %24011  ;;  %22731 = vmatpush3.msra.mxu0 %v29674_v15  ;;  %22732 = vmatprep.mubr.msk.f32.mxu0 %vm24369_vm1, %v29661_v9 }
 0x9cb   : > { %v24014_v59 = vpop.eup %24013  ;;  %v10118_v47 = vmul.f32 %v24012_v34, %v26884_v63  ;;  %22737 = vmatprep.mubr.msk.f32.mxu1 %vm24369_vm1, %v29661_v9  ;;  %11408 = vmatprep.subr.bf16.mxu0 %v23761_v53  ;;  %v23768_v63 = vld [vmem:[#allocation7 + $0xdc] ss:$12 sps:$4 sm:$0xff]  }
 0x9cc   : > { %v10119_v12 = vmul.f32 %v24014_v59, %v26886_v60  ;;  %22740 = vmatprep.subr.bf16.mxu1 %v23765_v41  ;;  %v23773_v60 = vld [vmem:[#allocation7 + $0xe0] ss:$12 sps:$4 sm:$0xff]   ;;  %v27097_v22 = vpop.permute.xlu0 %11972  ;;  %v27111_v36 = vpop.permute.xlu1 %11814 }
 0x9cd   : > { %22733 = vmatmul.mubr.msk.f32.vlgmr.msra.gmra.mxu0 %vm4019_vm3, %v10118_v47 }
 0x9ce   : > { %22738 = vmatmul.mubr.msk.f32.vlgmr.msra.gmra.mxu1 %vm4019_vm3, %v10119_v12  ;;  %11432 = vmatprep.mubr.bf16.mxu0 %v29675_v35 }
 0x9cf   : > { %11409 = vmatpush1.bf16.msra.mxu0 %v23759_v62  ;;  %22741 = vmatpush3.bf16.msra.mxu1 %v23765_v41 }
 0x9d0   : > { %11410 = vmatprep.subr.bf16.mxu0 %v23764_v42  ;;  %22742 = vmatprep.subr.bf16.mxu1 %v23769_v11  ;;  %v27101_v40 = vpop.permute.xlu0 %12050  ;;  %v27118_v4 = vpop.permute.xlu1 %11892 }
 0x9d3   : > { %11411 = vmatpush1.bf16.msra.mxu0 %v23762_v16  ;;  %22743 = vmatpush3.bf16.msra.mxu1 %v23769_v11 }
 0x9d4   : > { %11412 = vmatprep.subr.bf16.mxu0 %v23768_v63  ;;  %22744 = vmatprep.subr.bf16.mxu1 %v23773_v60  ;;  %v27105_v3 = vpop.permute.xlu0 %12128  ;;  %v27126_v39 = vpop.permute.xlu1 %11970 }
 0x9d7   : > { %11413 = vmatpush1.bf16.msra.mxu0 %v23766_v49  ;;  %22745 = vmatpush3.bf16.msra.mxu1 %v23773_v60 }
 0x9d8   : > { %11414 = vmatprep.subr.bf16.mxu0 %v23772_v6  ;;  %22746 = vmatprep.subr.bf16.mxu1 %v23774_v8  ;;  %v27109_v17 = vpop.permute.xlu0 %12206  ;;  %v27129_v18 = vpop.permute.xlu1 %12048 }
 0x9db   : > { %11415 = vmatpush1.bf16.msra.mxu0 %v23770_v50  ;;  %22747 = vmatpush3.bf16.msra.mxu1 %v23774_v8 }
 0x9dc   : > { %22804 = vmatprep.subr.mxu0 %v29661_v9  ;;  %22764 = vmatprep.subr.mxu1 %v29661_v9  ;;  %v12285_v1 = vpop.permute.xlu0 %12284  ;;  %v12127_v42 = vpop.permute.xlu1 %12126 }
 0x9e0   : > { %v12205_v6 = vpop.permute.xlu1 %12204 }
 0xa58   : > { %v10189_v32 = vpop.f32.mrf.mxu0 }
 0xa5a   : > { %v22664_v14 = vpop.f32.mrf.mxu0 }
 0xa5b   : > { %v12363_v14 = vpop.permute.xlu1 %12362 }
 0xa5c   : > { %v10335_v45 = vpop.f32.mrf.mxu0 }
 0xa5e   : > { %v22674_v21 = vpop.f32.mrf.mxu0 }
 0xa5f   : > { %v12361_v21 = vpop.permute.xlu1 %12360 }
 0xa70   : > { %v10262_v61 = vpop.f32.mrf.mxu1 }
 0xa71   : > { %v11288_v38 = vpack.c.bf16 %v10262_v61, %v10189_v32  ;;  %v12283_v32 = vpop.permute.xlu0 %12282 }
 0xa72   : > { %v22669_v33 = vpop.f32.mrf.mxu1 }
 0xa73   : > { %21395 = vmatmul.mubr.msk.bf16.vlgmr.msra.gmra.mxu0 %vm2768_vm0, %v11288_v38  ;;  %22748 = vmatprep.mubr.msk.bf16.mxu1 %vm2768_vm0, %v11288_v38 }
 0xa74   : > { %22805 = vmatpush3.xpose.msk.msra.mxu0 %vm2768_vm0, %v12285_v1  ;;  %v10408_v48 = vpop.f32.mrf.mxu1  ;;  %11442 = vmatprep.mubr.bf16.mxu0 %v29675_v35  ;;  %v29676_v1 = vld [vmem:[#allocation119_spill] sm:$0xff] }
 0xa75   : > { %v11289_v31 = vpack.c.bf16 %v10408_v48, %v10335_v45  ;;  %22814 = vmatprep.subr.mxu0 %v29661_v9  ;;  %v12441_v45 = vpop.permute.xlu0 %12440  ;;  %v29677_v48 = vld [vmem:[#allocation24_spill] sm:$0xff] }
 0xa76   : > { %v22679_v56 = vpop.f32.mrf.mxu1 }
 0xa77   : > { %22749 = vmatmul.mubr.msk.bf16.vlgmr.msra.gmra.mxu1 %vm2768_vm0, %v11289_v31 }
 0xa78   : > { %22765 = vmatpush3.xpose.msk.msra.mxu1 %vm2768_vm0, %v11661_v0  ;;  %v10554_v10 = vpop.f32.mrf.mxu1 }
 0xa79   : > { %v10481_v44 = vpop.f32.mrf.mxu0  ;;  %22769 = vmatprep.subr.mxu1 %v29661_v9 }
 0xa7a   : > { %v11290_v27 = vpack.c.bf16 %v10554_v10, %v10481_v44  ;;  %v22689_v13 = vpop.f32.mrf.mxu1  ;;  %v29678_v44 = vld [vmem:[#allocation127_spill] sm:$0xff] }
 0xa7b   : > { %v22684_v28 = vpop.f32.mrf.mxu0  ;;  %21396 = vmatmul.mubr.msk.bf16.gmra.mxu0 %vm2768_vm0, %v11289_v31  ;;  %v8521_v31 = vadd.f32 %v29677_v48, %v29676_v1  ;;  %v29701_v48 = vld [vmem:[#allocation12_spill] sm:$0xff] }
 0xa7c   : > { %22752 = vmatprep.mubr.msk.bf16.mxu1 %vm2768_vm0, %v11290_v27  ;;  %v10700_v25 = vpop.f32.mrf.mxu1  ;;  %11452 = vmatprep.mubr.bf16.mxu0 %v29675_v35  ;;  %v29680_v28 = vld [vmem:[#allocation16_spill] sm:$0xff] }
 0xa7d   : > { %v10627_v26 = vpop.f32.mrf.mxu0 }
 0xa7e   : > { %v11291_v51 = vpack.c.bf16 %v10700_v25, %v10627_v26  ;;  %v22699_v29 = vpop.f32.mrf.mxu1  ;;  %v29681_v25 = vld [vmem:[#allocation155_spill] sm:$0xff] }
 0xa7f   : > { %v22694_v7 = vpop.f32.mrf.mxu0  ;;  %v29682_v29 = vld [vmem:[#allocation19_spill] sm:$0xff] }
 0xa80   : > { %22753 = vmatmul.mubr.msk.bf16.gmra.mxu1 %vm2768_vm0, %v11291_v51  ;;  %v10846_v52 = vpop.f32.mrf.mxu1  ;;  %v29683_v7 = vld [vmem:[#allocation157_spill] sm:$0xff] }
 0xa81   : > { %v10773_v2 = vpop.f32.mrf.mxu0 }
 0xa82   : > { %v11292_v58 = vpack.c.bf16 %v10846_v52, %v10773_v2  ;;  %v22709_v46 = vpop.f32.mrf.mxu1  ;;  %v8634_v52 = vadd.f32 %v29683_v7, %v29682_v29 }
 0xa83   : > { %v22704_v5 = vpop.f32.mrf.mxu0  ;;  %21397 = vmatmul.mubr.msk.bf16.gmra.mxu0 %vm2768_vm0, %v11290_v27  ;;  %v29679_v27 = vld [vmem:[#allocation97_spill] sm:$0xff] }
 0xa84   : > { %22756 = vmatprep.mubr.msk.bf16.mxu1 %vm2768_vm0, %v11292_v58  ;;  %v10992_v34 = vpop.f32.mrf.mxu1  ;;  %11462 = vmatprep.mubr.bf16.mxu0 %v29675_v35  ;;  %v8525_v13 = vadd.f32 %v29679_v27, %v29678_v44  ;;  %v29685_v5 = vld [vmem:[#allocation129_spill] sm:$0xff] }
 0xa85   : > { %v10919_v59 = vpop.f32.mrf.mxu0 }
 0xa86   : > { %v11293_v47 = vpack.c.bf16 %v10992_v34, %v10919_v59  ;;  %v22719_v12 = vpop.f32.mrf.mxu1  ;;  %v29686_v34 = vld [vmem:[#allocation28_spill] sm:$0xff] }
 0xa87   : > { %v22714_v62 = vpop.f32.mrf.mxu0  ;;  %v8531_v59 = vadd.f32 %v29686_v34, %v29685_v5  ;;  %v29688_v12 = vld [vmem:[#allocation159_spill] sm:$0xff]  ;;  %v29707_v34 = vld [vmem:[#allocation173_spill] sm:$0xff] }
 0xa88   : > { %22757 = vmatmul.mubr.msk.bf16.gmra.mxu1 %vm2768_vm0, %v11293_v47  ;;  %v11138_v53 = vpop.f32.mrf.mxu1  ;;  %v29706_v5 = vld [vmem:[#allocation67_spill] sm:$0xff] }
 0xa89   : > { %v11065_v41 = vpop.f32.mrf.mxu0 }
 0xa8a   : > { %v11294_v11 = vpack.c.bf16 %v11138_v53, %v11065_v41  ;;  %v22729_v16 = vpop.f32.mrf.mxu1 }
 0xa8b   : > { %v22724_v63 = vpop.f32.mrf.mxu0  ;;  %21398 = vmatmul.mubr.msk.bf16.gmra.mxu0 %vm2768_vm0, %v11291_v51 }
 0xa8c   : > { %22760 = vmatprep.mubr.msk.bf16.mxu1 %vm2768_vm0, %v11294_v11  ;;  %11472 = vmatprep.mubr.bf16.mxu0 %v29675_v35 }
 0xa8d   : > { %v11211_v60 = vpop.f32.mrf.mxu0 }
 0xa8e   : > { %v11284_v49 = vpop.f32.mrf.mxu1 }
 0xa8f   : > { %v11295_v50 = vpack.c.bf16 %v11284_v49, %v11211_v60  ;;  %v22734_v8 = vpop.f32.mrf.mxu0  ;;  %v29690_v49 = vld [vmem:[#allocation154_spill] sm:$0xff] }
 0xa90   : > { %v22739_v0 = vpop.f32.mrf.mxu1  ;;  %v29692_v8 = vld [vmem:[#allocation88_spill] sm:$0xff] }
 0xa91   : > { %22761 = vmatmul.mubr.msk.bf16.gmra.mxu1 %vm2768_vm0, %v11295_v50  ;;  %v29693_v0 = vld [vmem:[#allocation163_spill] sm:$0xff] }
 0xa92   : > { %22766 = vmatprep.mubr.msk.f32.mxu1 %vm24369_vm1, %v29661_v9 }
 0xa93   : > { %21399 = vmatmul.mubr.msk.bf16.gmra.mxu0 %vm2768_vm0, %v11292_v58 }
 0xa94   : > { %11482 = vmatprep.mubr.bf16.mxu0 %v29675_v35 }
 0xa99   : > { %22767 = vmatmul.mubr.msk.f32.vlgmr.msra.gmra.mxu1 %vm2768_vm0, %v27099_v24  ;;  %v12439_v24 = vpop.permute.xlu0 %12438 }
 0xa9a   : > { %22770 = vmatpush3.xpose.msk.msra.mxu1 %vm2768_vm0, %v27103_v43  ;;  %22771 = vmatprep.mubr.msk.f32.mxu1 %vm24369_vm1, %v29661_v9  ;;  %v12519_v43 = vpop.permute.xlu1 %12518 }
 0xa9b   : > { %22774 = vmatprep.subr.mxu1 %v29661_v9  ;;  %21400 = vmatmul.mubr.msk.bf16.gmra.mxu0 %vm2768_vm0, %v11293_v47  ;;  %v29687_v47 = vld [vmem:[#allocation21_spill] sm:$0xff] }
 0xa9c   : > { %11492 = vmatprep.mubr.bf16.mxu0 %v29675_v35  ;;  %v8645_v62 = vadd.f32 %v29688_v12, %v29687_v47  ;;  %v29708_v47 = vld [vmem:[#allocation171_spill] sm:$0xff] }
 0xa9d   : > { %22772 = vmatmul.mubr.msk.f32.vlgmr.msra.gmra.mxu1 %vm2768_vm0, %v27107_v57 }
 0xa9e   : > { %22775 = vmatpush3.xpose.msk.msra.mxu1 %vm2768_vm0, %v27093_v37  ;;  %22776 = vmatprep.mubr.msk.f32.mxu1 %vm24369_vm1, %v29661_v9  ;;  %v12597_v37 = vpop.permute.xlu0 %12596 }
 0xa9f   : > { %22779 = vmatprep.subr.mxu1 %v29661_v9 }
 0xaa1   : > { %22777 = vmatmul.mubr.msk.f32.vlgmr.msra.gmra.mxu1 %vm2768_vm0, %v27111_v36 }
 0xaa2   : > { %22780 = vmatpush3.xpose.msk.msra.mxu1 %vm2768_vm0, %v27095_v23  ;;  %22781 = vmatprep.mubr.msk.f32.mxu1 %vm24369_vm1, %v29661_v9  ;;  %v12517_v23 = vpop.permute.xlu1 %12516 }
 0xaa3   : > { %22784 = vmatprep.subr.mxu1 %v29661_v9  ;;  %21401 = vmatmul.mubr.msk.bf16.gmra.mxu0 %vm2768_vm0, %v11294_v11 }
 0xaa4   : > { %11502 = vmatprep.mubr.bf16.mxu0 %v29675_v35 }
 0xaa5   : > { %22782 = vmatmul.mubr.msk.f32.vlgmr.msra.gmra.mxu1 %vm2768_vm0, %v27118_v4 }
 0xaa6   : > { %22785 = vmatpush3.xpose.msk.msra.mxu1 %vm2768_vm0, %v27097_v22  ;;  %22786 = vmatprep.mubr.msk.f32.mxu1 %vm24369_vm1, %v29661_v9  ;;  %v12595_v22 = vpop.permute.xlu0 %12594  ;;  %v12675_v57 = vpop.permute.xlu1 %12674 }
 0xaa7   : > { %22789 = vmatprep.subr.mxu1 %v29661_v9 }
 0xaa9   : > { %22787 = vmatmul.mubr.msk.f32.vlgmr.msra.gmra.mxu1 %vm2768_vm0, %v27126_v39  ;;  %v8642_v39 = vadd.f32 %v29681_v25, %v29680_v28  ;;  %v29703_v25 = vld [vmem:[#allocation58_spill] sm:$0xff] }
 0xaaa   : > { %22790 = vmatpush3.xpose.msk.msra.mxu1 %vm2768_vm0, %v27101_v40  ;;  %22791 = vmatprep.mubr.msk.f32.mxu1 %vm24369_vm1, %v29661_v9  ;;  %v12753_v40 = vpop.permute.xlu0 %12752  ;;  %v12673_v61 = vpop.permute.xlu1 %12672 }
 0xaab   : > { %22794 = vmatprep.subr.mxu1 %v29661_v9  ;;  %21402 = vmatmul.mubr.msk.bf16.gmra.mxu0 %vm2768_vm0, %v11295_v50 }
 0xaac   : > { %22806 = vmatprep.mubr.msk.f32.mxu0 %vm24369_vm1, %v29661_v9 }
 0xaad   : > { %22792 = vmatmul.mubr.msk.f32.vlgmr.msra.gmra.mxu1 %vm2768_vm0, %v27129_v18 }
 0xaae   : > { %22795 = vmatpush3.xpose.msk.msra.mxu1 %vm2768_vm0, %v27105_v3  ;;  %22796 = vmatprep.mubr.msk.f32.mxu1 %vm24369_vm1, %v29661_v9  ;;  %v12751_v3 = vpop.permute.xlu0 %12750 }
 0xaaf   : > { %22799 = vmatprep.subr.mxu1 %v29661_v9 }
 0xab1   : > { %22797 = vmatmul.mubr.msk.f32.vlgmr.msra.gmra.mxu1 %vm2768_vm0, %v12127_v42 }
 0xab2   : > { %22800 = vmatpush3.xpose.msk.msra.mxu1 %vm2768_vm0, %v27109_v17  ;;  %22801 = vmatprep.mubr.msk.f32.mxu1 %vm24369_vm1, %v29661_v9  ;;  %v12831_v17 = vpop.permute.xlu1 %12830  ;;  %v13116_v36 = vpop.permute.xlu0 %13115 }
 0xab3   : > { %22809 = vmatprep.subr.mxu1 %v29661_v9  ;;  %22807 = vmatmul.mubr.msk.f32.vlgmr.msra.gmra.mxu0 %vm2768_vm0, %v12283_v32  ;;  %v8658_v32 = vadd.f32 %v29693_v0, %v29692_v8  ;;  %v29712_v0 = vld [vmem:[#allocation70_spill] sm:$0xff] }
 0xab4   : > { %22815 = vmatpush3.xpose.msk.msra.mxu0 %vm2768_vm0, %v12441_v45  ;;  %22816 = vmatprep.mubr.msk.f32.mxu0 %vm24369_vm1, %v29661_v9 }
 0xab5   : > { %22802 = vmatmul.mubr.msk.f32.vlgmr.msra.gmra.mxu1 %vm2768_vm0, %v12205_v6  ;;  %22824 = vmatprep.subr.mxu0 %v29661_v9  ;;  %v29691_v6 = vld [vmem:[#allocation158_spill] sm:$0xff] }
 0xab6   : > { %22810 = vmatpush3.xpose.msk.msra.mxu1 %vm2768_vm0, %v12363_v14  ;;  %22811 = vmatprep.mubr.msk.f32.mxu1 %vm24369_vm1, %v29661_v9  ;;  %v12829_v38 = vpop.permute.xlu1 %12828  ;;  %v8535_v50 = vadd.f32 %v29691_v6, %v29690_v49 }
 0xab7   : > { %22819 = vmatprep.subr.mxu1 %v29661_v9  ;;  %22817 = vmatmul.mubr.msk.f32.vlgmr.msra.gmra.mxu0 %vm2768_vm0, %v12439_v24  ;;  %v29694_v24 = vld [vmem:[#allocation25_spill] sm:$0xff] }
 0xab8   : > { %22825 = vmatpush3.xpose.msk.msra.mxu0 %vm2768_vm0, %v12597_v37  ;;  %22826 = vmatprep.mubr.msk.f32.mxu0 %vm24369_vm1, %v29661_v9 }
 0xab9   : > { %22812 = vmatmul.mubr.msk.f32.vlgmr.msra.gmra.mxu1 %vm2768_vm0, %v12361_v21  ;;  %22834 = vmatprep.subr.mxu0 %v29661_v9 }
 0xaba   : > { %22820 = vmatpush3.xpose.msk.msra.mxu1 %vm2768_vm0, %v12519_v43  ;;  %22821 = vmatprep.mubr.msk.f32.mxu1 %vm24369_vm1, %v29661_v9  ;;  %v13193_v33 = vpop.permute.xlu1 %13192  ;;  %v29695_v43 = vld [vmem:[#allocation165_spill] sm:$0xff] }
 0xabb   : > { %22829 = vmatprep.subr.mxu1 %v29661_v9  ;;  %22827 = vmatmul.mubr.msk.f32.vlgmr.msra.gmra.mxu0 %vm2768_vm0, %v12595_v22  ;;  %v8650_v37 = vadd.f32 %v29695_v43, %v29694_v24  ;;  %v29714_v43 = vld [vmem:[#allocation175_spill] sm:$0xff] }
 0xabc   : > { %22835 = vmatpush3.xpose.msk.msra.mxu0 %vm2768_vm0, %v12753_v40  ;;  %22836 = vmatprep.mubr.msk.f32.mxu0 %vm24369_vm1, %v29661_v9  ;;  %v29698_v40 = vld [vmem:[#allocation162_spill] sm:$0xff] }
 0xabd   : > { %22822 = vmatmul.mubr.msk.f32.vlgmr.msra.gmra.mxu1 %vm2768_vm0, %v12517_v23  ;;  %22844 = vmatprep.subr.mxu0 %v29661_v9 }
 0xabe   : > { %22830 = vmatpush3.xpose.msk.msra.mxu1 %vm2768_vm0, %v12675_v57  ;;  %22831 = vmatprep.mubr.msk.f32.mxu1 %vm24369_vm1, %v29661_v9  ;;  %v29697_v57 = vld [vmem:[#allocation52_spill] sm:$0xff] }
 0xabf   : > { %22839 = vmatprep.subr.mxu1 %v29661_v9  ;;  %22837 = vmatmul.mubr.msk.f32.vlgmr.msra.gmra.mxu0 %vm2768_vm0, %v12751_v3 }
 0xac0   : > { %22845 = vmatpush3.msra.mxu0 %v13116_v36  ;;  %22846 = vmatprep.mubr.msk.f32.mxu0 %vm24369_vm1, %v29661_v9  ;;  %v29700_v36 = vld [vmem:[#allocation167_spill] sm:$0xff] }
 0xac1   : > { %22832 = vmatmul.mubr.msk.f32.vlgmr.msra.gmra.mxu1 %vm2768_vm0, %v12673_v61  ;;  %22854 = vmatprep.subr.mxu0 %v29661_v9  ;;  %v8541_v61 = vadd.f32 %v29698_v40, %v29697_v57  ;;  %v29716_v40 = vld [vmem:[#allocation76_spill] sm:$0xff] }
 0xac2   : > { %22840 = vmatpush3.xpose.msk.msra.mxu1 %vm2768_vm0, %v12831_v17  ;;  %22841 = vmatprep.mubr.msk.f32.mxu1 %vm24369_vm1, %v29661_v9  ;;  %v29699_v17 = vld [vmem:[#allocation94_spill] sm:$0xff] }
 0xac3   : > { %22849 = vmatprep.subr.mxu1 %v29661_v9 }
 0xac5   : > { %22842 = vmatmul.mubr.msk.f32.vlgmr.msra.gmra.mxu1 %vm2768_vm0, %v12829_v38  ;;  %v8661_v38 = vadd.f32 %v29700_v36, %v29699_v17 }
 0xac6   : > { %22850 = vmatpush3.msra.mxu1 %v13193_v33  ;;  %22851 = vmatprep.mubr.msk.f32.mxu1 %vm24369_vm1, %v29661_v9 }
 0xac7   : > { %22859 = vmatprep.subr.mxu1 %v29661_v9 }
 0xb33   : > { %v11434_v56 = vpop.f32.mrf.mxu0 }
 0xb34   : > { %v27243_v4 = vadd.f32 %v11434_v56, %v8521_v31  ;;  %v29702_v31 = vld [vmem:[#allocation164_spill] sm:$0xff] }
 0xb35   : > { %v27245_v10 = vpop.f32.mrf.mxu0  ;;  %v8543_v56 = vadd.f32 %v29702_v31, %v29701_v48 }
 0xb37   : > { %v11438_v26 = vpop.f32.mrf.mxu0  ;;  %v22750_v51 = vpop.f32.mrf.mxu1 }
 0xb38   : > { %v27253_v2 = vadd.f32 %v11438_v26, %v8525_v13  ;;  %v27255_v58 = vadd.f32 %v22750_v51, %v8642_v39  ;;  %v29704_v39 = vld [vmem:[#allocation166_spill] sm:$0xff] }
 0xb39   : > { %v27257_v46 = vpop.f32.mrf.mxu0  ;;  %v11547_v18 = vpop.f32.mrf.mxu1  ;;  %v8545_v26 = vadd.f32 %v29704_v39, %v29703_v25  ;;  %v29722_v25 = vld [vmem:[#allocation79_spill] sm:$0xff]  ;;  %v29723_v39 = vld [vmem:[#allocation181_spill] sm:$0xff] }
 0xb3a   : > { %29684 = vst [vmem:[#allocation84_spill] sm:$0xff] %v27257_v46  ;;  %v27263_v53 = vadd.f32 %v11547_v18, %v8634_v52 }
 0xb3b   : > { %v11444_v42 = vpop.f32.mrf.mxu0  ;;  %v22751_v41 = vpop.f32.mrf.mxu1 }
 0xb3c   : > { %v27265_v11 = vadd.f32 %v11444_v42, %v8531_v59  ;;  %v27267_v16 = vadd.f32 %v22751_v41, %v8645_v62  ;;  %v8666_v59 = vadd.f32 %v29707_v34, %v29706_v5  ;;  %v29710_v42 = vld [vmem:[#allocation64_spill] sm:$0xff]  ;;  %v29711_v41 = vld [vmem:[#allocation170_spill] sm:$0xff] }
 0xb3d   : > { %v27269_v63 = vpop.f32.mrf.mxu0  ;;  %v27271_v60 = vpop.f32.mrf.mxu1  ;;  %v8551_v49 = vadd.f32 %v29711_v41, %v29710_v42 }
 0xb3e   : > { %29689 = vst [vmem:[#allocation105_spill] sm:$0xff] %v27271_v60 }
 0xb3f   : > { %v11448_v14 = vpop.f32.mrf.mxu0 }
 0xb40   : > { %v27277_v45 = vadd.f32 %v11448_v14, %v8535_v50  ;;  %v22754_v21 = vpop.f32.mrf.mxu1 }
 0xb41   : > { %v27281_v23 = vadd.f32 %v22754_v21, %v8658_v32  ;;  %v27283_v22 = vpop.f32.mrf.mxu0  ;;  %v29713_v32 = vld [vmem:[#allocation172_spill] sm:$0xff] }
 0xb42   : > { %29696 = vst [vmem:[#allocation87_spill] sm:$0xff] %v27283_v22  ;;  %v11563_v3 = vpop.f32.mrf.mxu1  ;;  %v8553_v14 = vadd.f32 %v29713_v32, %v29712_v0  ;;  %v29729_v0 = vld [vmem:[#allocation78_spill] sm:$0xff] }
 0xb43   : > { %v27289_v33 = vadd.f32 %v11563_v3, %v8650_v37  ;;  %v11454_v1 = vpop.f32.mrf.mxu0  ;;  %v29730_v32 = vld [vmem:[#allocation182_spill] sm:$0xff] }
 0xb44   : > { %v27293_v44 = vadd.f32 %v11454_v1, %v8541_v61  ;;  %v22755_v27 = vpop.f32.mrf.mxu1  ;;  %v29717_v61 = vld [vmem:[#allocation174_spill] sm:$0xff] }
 0xb45   : > { %v27295_v13 = vadd.f32 %v22755_v27, %v8661_v38  ;;  %v11456_v28 = vpop.f32.mrf.mxu0  ;;  %v8555_v3 = vadd.f32 %v29717_v61, %v29716_v40  ;;  %v29721_v27 = vld [vmem:[#allocation178_spill] sm:$0xff] }
 0xb46   : > { %v27299_v51 = vadd.f32 %v11456_v28, %v8543_v56  ;;  %v27301_v29 = vpop.f32.mrf.mxu1  ;;  %v29720_v56 = vld [vmem:[#allocation13_spill] sm:$0xff] }
 0xb47   : > { %29705 = vst [vmem:[#allocation107_spill] sm:$0xff] %v27301_v29  ;;  %v11458_v7 = vpop.f32.mrf.mxu0  ;;  %v8561_v28 = vadd.f32 %v29721_v27, %v29720_v56 }
 0xb48   : > { %v27303_v52 = vadd.f32 %v11458_v7, %v8545_v26  ;;  %v22758_v18 = vpop.f32.mrf.mxu1  ;;  %v8682_v26 = vadd.f32 %v29723_v39, %v29722_v25  ;;  %v29724_v7 = vld [vmem:[#allocation179_spill] sm:$0xff] }
 0xb49   : > { %v27308_v12 = vadd.f32 %v22758_v18, %v29708_v47  ;;  %v27310_v62 = vpop.f32.mrf.mxu0  ;;  %v29727_v47 = vld [vmem:[#allocation180_spill] sm:$0xff]  ;;  %v29735_v25 = vld [vmem:[#allocation27_spill] sm:$0xff] }
 0xb4a   : > { %29709 = vst [vmem:[#allocation96_spill] sm:$0xff] %v27310_v62  ;;  %v11579_v6 = vpop.f32.mrf.mxu1  ;;  %v29736_v39 = vld [vmem:[#allocation187_spill] sm:$0xff] }
 0xb4b   : > { %v27314_v50 = vadd.f32 %v11579_v6, %v8666_v59  ;;  %v11464_v8 = vpop.f32.mrf.mxu0  ;;  %v29726_v59 = vld [vmem:[#allocation61_spill] sm:$0xff] }
 0xb4c   : > { %v27318_v21 = vadd.f32 %v11464_v8, %v8551_v49  ;;  %v22759_v24 = vpop.f32.mrf.mxu1  ;;  %v8563_v42 = vadd.f32 %v29727_v47, %v29726_v59 }
 0xb4d   : > { %v27321_v37 = vadd.f32 %v22759_v24, %v29714_v43  ;;  %v11466_v57 = vpop.f32.mrf.mxu0  ;;  %v29731_v24 = vld [vmem:[#allocation183_spill] sm:$0xff] }
 0xb4e   : > { %v27325_v17 = vadd.f32 %v11466_v57, %v8553_v14  ;;  %v27327_v36 = vpop.f32.mrf.mxu1  ;;  %v8565_v14 = vadd.f32 %v29730_v32, %v29729_v0 }
 0xb4f   : > { %29715 = vst [vmem:[#allocation111_spill] sm:$0xff] %v27321_v37  ;;  %29718 = vst [vmem:[#allocation90_spill] sm:$0xff] %v27327_v36  ;;  %v11468_v38 = vpop.f32.mrf.mxu0 }
 0xb50   : > { %v27329_v1 = vadd.f32 %v11468_v38, %v8555_v3 }
 0xb51   : > { %v22762_v48 = vpop.f32.mrf.mxu1  ;;  %v27331_v31 = vpop.f32.mrf.mxu0 }
 0xb52   : > { %29719 = vst [vmem:[#allocation108_spill] sm:$0xff] %v27331_v31  ;;  %v27338_v18 = vadd.f32 %v22762_v48, %v29724_v7  ;;  %v29754_v31 = vld [vmem:[#allocation194_spill] sm:$0xff] }
 0xb53   : > { %v11595_v5 = vpop.f32.mrf.mxu1  ;;  %v11474_v34 = vpop.f32.mrf.mxu0 }
 0xb54   : > { %29725 = vst [vmem:[#allocation100_spill] sm:$0xff] %v27338_v18  ;;  %v27342_v41 = vadd.f32 %v11595_v5, %v8682_v26  ;;  %v27344_v49 = vadd.f32 %v11474_v34, %v8561_v28  ;;  %v8573_v26 = vadd.f32 %v29736_v39, %v29735_v25  ;;  %v29738_v34 = vld [vmem:[#allocation186_spill] sm:$0xff] }
 0xb55   : > { %v22763_v6 = vpop.f32.mrf.mxu1  ;;  %v11476_v8 = vpop.f32.mrf.mxu0 }
 0xb56   : > { %29728 = vst [vmem:[#allocation114_spill] sm:$0xff] %v27342_v41  ;;  %v27349_v43 = vadd.f32 %v22763_v6, %v29731_v24  ;;  %v27351_v57 = vadd.f32 %v11476_v8, %v8563_v42 }
 0xb57   : > { %v27353_v40 = vpop.f32.mrf.mxu1  ;;  %v11478_v61 = vpop.f32.mrf.mxu0 }
 0xb58   : > { %29732 = vst [vmem:[#allocation93_spill] sm:$0xff] %v27349_v43  ;;  %29733 = vst [vmem:[#allocation110_spill] sm:$0xff] %v27353_v40  ;;  %v27355_v3 = vadd.f32 %v11478_v61, %v8565_v14  ;;  %v29741_v61 = vld [vmem:[#allocation188_spill] sm:$0xff] }
 0xb59   : > { %v11732_v38 = vpop.f32.mrf.mxu1  ;;  %v27357_v48 = vpop.f32.mrf.mxu0 }
 0xb5a   : > { %29734 = vst [vmem:[#allocation99_spill] sm:$0xff] %v27357_v48  ;;  %v12906_v56 = vmul.f32 19.595919, %v11732_v38 }
 0xb5b   : > { %v22768_v27 = vpop.f32.mrf.mxu1  ;;  %v11484_v28 = vpop.f32.mrf.mxu0 }
 0xb5c   : > { %v27363_v5 = vsel %vm25529_vm2, %v12906_v56, -inf  ;;  %v27366_v59 = vadd.f32 %v11484_v28, %v29738_v34  ;;  %v29744_v34 = vld [vmem:[#allocation20_spill] sm:$0xff] }
 0xb5d   : > { %v11810_v47 = vpop.f32.mrf.mxu1  ;;  %v12938_v42 = vsel %vm4019_vm3, %v27363_v5, -inf  ;;  %v11486_v6 = vpop.f32.mrf.mxu0 }
 0xb5e   : > { %29739 = vst [vmem:[#allocation113_spill] sm:$0xff] %v27366_v59  ;;  %v12907_v8 = vmul.f32 19.595919, %v11810_v47  ;;  %12939 = vmax.xlane.f32.xlu0 %v12938_v42  ;;  %v27370_v0 = vadd.f32 %v11486_v6, %v8573_v26  ;;  %v29745_v47 = vld [vmem:[#allocation191_spill] sm:$0xff] }
 0xb5f   : > { %v22773_v32 = vpop.f32.mrf.mxu1  ;;  %v11488_v14 = vpop.f32.mrf.mxu0  ;;  %v8583_v42 = vadd.f32 %v29745_v47, %v29744_v34 }
 0xb60   : > { %29740 = vst [vmem:[#allocation102_spill] sm:$0xff] %v27370_v0  ;;  %v27374_v24 = vsel %vm25529_vm2, %v12907_v8, -inf  ;;  %v27377_v38 = vadd.f32 %v11488_v14, %v29741_v61  ;;  %v29746_v8 = vld [vmem:[#allocation190_spill] sm:$0xff] }
 0xb61   : > { %v11888_v56 = vpop.f32.mrf.mxu1  ;;  %v12941_v27 = vsel %vm4019_vm3, %v27374_v24, -inf  ;;  %v27381_v28 = vpop.f32.mrf.mxu0 }
 0xb62   : > { %29742 = vst [vmem:[#allocation116_spill] sm:$0xff] %v27377_v38  ;;  %29743 = vst [vmem:[#allocation198_spill] sm:$0xff] %v27381_v28  ;;  %v12908_v25 = vmul.f32 19.595919, %v11888_v56  ;;  %12942 = vmax.xlane.f32.xlu1 %v12941_v27 }
 0xb63   : > { %v22778_v39 = vpop.f32.mrf.mxu1  ;;  %v11494_v26 = vpop.f32.mrf.mxu0 }
 0xb64   : > { %v27387_v6 = vsel %vm25529_vm2, %v12908_v25, -inf  ;;  %v27390_v32 = vadd.f32 %v11494_v26, %v29746_v8  ;;  %v29749_v25 = vld [vmem:[#allocation192_spill] sm:$0xff] }
 0xb65   : > { %v11966_v14 = vpop.f32.mrf.mxu1  ;;  %v12944_v61 = vsel %vm4019_vm3, %v27387_v6, -inf  ;;  %v11496_v40 = vpop.f32.mrf.mxu0 }
 0xb66   : > { %29747 = vst [vmem:[#allocation106_spill] sm:$0xff] %v27390_v32  ;;  %v12909_v28 = vmul.f32 19.595919, %v11966_v14  ;;  %12945 = vmax.xlane.f32.xlu0 %v12944_v61  ;;  %v27394_v56 = vadd.f32 %v11496_v40, %v8583_v42  ;;  %v29752_v42 = vld [vmem:[#allocation91_spill] sm:$0xff] }
 0xb67   : > { %v22783_v27 = vpop.f32.mrf.mxu1  ;;  %v11498_v39 = vpop.f32.mrf.mxu0  ;;  %v29753_v61 = vld [vmem:[#allocation195_spill] sm:$0xff] }
 0xb68   : > { %29748 = vst [vmem:[#allocation120_spill] sm:$0xff] %v27394_v56  ;;  %v27398_v34 = vsel %vm25529_vm2, %v12909_v28, -inf  ;;  %v27401_v47 = vadd.f32 %v11498_v39, %v29749_v25  ;;  %v8593_v27 = vadd.f32 %v29753_v61, %v29752_v42 }
 0xb69   : > { %v12044_v26 = vpop.f32.mrf.mxu1  ;;  %v12947_v8 = vsel %vm4019_vm3, %v27398_v34, -inf  ;;  %v27405_v36 = vpop.f32.mrf.mxu0 }
 0xb6a   : > { %29750 = vst [vmem:[#allocation104_spill] sm:$0xff] %v27401_v47  ;;  %29751 = vst [vmem:[#allocation118_spill] sm:$0xff] %v27405_v36  ;;  %v12910_v48 = vmul.f32 19.595919, %v12044_v26  ;;  %12948 = vmax.xlane.f32.xlu0 %v12947_v8 }
 0xb6b   : > { %v22788_v14 = vpop.f32.mrf.mxu1  ;;  %v11504_v40 = vpop.f32.mrf.mxu0 }
 0xb6c   : > { %v27411_v28 = vsel %vm25529_vm2, %v12910_v48, -inf  ;;  %v27414_v39 = vadd.f32 %v11504_v40, %v29754_v31  ;;  %v29757_v48 = vld [vmem:[#allocation196_spill] sm:$0xff] }
 0xb6d   : > { %v12122_v25 = vpop.f32.mrf.mxu1  ;;  %v12950_v29 = vsel %vm4019_vm3, %v27411_v28, -inf  ;;  %v11506_v62 = vpop.f32.mrf.mxu0 }
 0xb6e   : > { %29755 = vst [vmem:[#allocation109_spill] sm:$0xff] %v27414_v39  ;;  %v12911_v36 = vmul.f32 19.595919, %v12122_v25  ;;  %12951 = vmax.xlane.f32.xlu0 %v12950_v29  ;;  %v27418_v26 = vadd.f32 %v11506_v62, %v8593_v27 }
 0xb6f   : > { %v22793_v8 = vpop.f32.mrf.mxu1  ;;  %v11508_v14 = vpop.f32.mrf.mxu0 }
 0xb70   : > { %29756 = vst [vmem:[#allocation125_spill] sm:$0xff] %v27418_v26  ;;  %v27422_v42 = vsel %vm25529_vm2, %v12911_v36, -inf  ;;  %v27425_v61 = vadd.f32 %v11508_v14, %v29757_v48 }
 0xb71   : > { %v12200_v31 = vpop.f32.mrf.mxu1  ;;  %v12953_v40 = vsel %vm4019_vm3, %v27422_v42, -inf  ;;  %v27429_v22 = vpop.f32.mrf.mxu0 }
 0xb72   : > { %29758 = vst [vmem:[#allocation122_spill] sm:$0xff] %v27425_v61  ;;  %29759 = vst [vmem:[#allocation112_spill] sm:$0xff] %v27429_v22  ;;  %v12912_v60 = vmul.f32 19.595919, %v12200_v31  ;;  %12954 = vmax.xlane.f32.xlu1 %v12953_v40 }
 0xb73   : > { %v22798_v29 = vpop.f32.mrf.mxu1  ;;  %v12356_v62 = vpop.f32.mrf.mxu0 }
 0xb74   : > { %v27433_v27 = vsel %vm25529_vm2, %v12912_v60, -inf  ;;  %v12914_v25 = vmul.f32 19.595919, %v12356_v62 }
 0xb75   : > { %v12278_v36 = vpop.f32.mrf.mxu1  ;;  %v12956_v8 = vsel %vm4019_vm3, %v27433_v27, -inf  ;;  %v22808_v14 = vpop.f32.mrf.mxu0 }
 0xb76   : > { %v12913_v48 = vmul.f32 19.595919, %v12278_v36  ;;  %v27439_v46 = vsel %vm25529_vm2, %v12914_v25, -inf  ;;  %12957 = vmax.xlane.f32.xlu0 %v12956_v8 }
 0xb77   : > { %v22803_v31 = vpop.f32.mrf.mxu1  ;;  %v12512_v40 = vpop.f32.mrf.mxu0  ;;  %v12962_v29 = vsel %vm4019_vm3, %v27439_v46, -inf }
 0xb78   : > { %v27445_v60 = vsel %vm25529_vm2, %v12913_v48, -inf  ;;  %v12916_v62 = vmul.f32 19.595919, %v12512_v40 }
 0xb79   : > { %v12434_v22 = vpop.f32.mrf.mxu1  ;;  %v12959_v14 = vsel %vm4019_vm3, %v27445_v60, -inf  ;;  %v22818_v36 = vpop.f32.mrf.mxu0 }
 0xb7a   : > { %v12915_v43 = vmul.f32 19.595919, %v12434_v22  ;;  %v27451_v25 = vsel %vm25529_vm2, %v12916_v62, -inf  ;;  %12963 = vmax.xlane.f32.xlu0 %v12962_v29  ;;  %12960 = vmax.xlane.f32.xlu1 %v12959_v14 }
 0xb7b   : > { %v22813_v8 = vpop.f32.mrf.mxu1  ;;  %v12668_v31 = vpop.f32.mrf.mxu0  ;;  %v12968_v61 = vsel %vm4019_vm3, %v27451_v25, -inf }
 0xb7c   : > { %v27457_v48 = vsel %vm25529_vm2, %v12915_v43, -inf  ;;  %v12918_v40 = vmul.f32 19.595919, %v12668_v31 }
 0xb7d   : > { %v12590_v41 = vpop.f32.mrf.mxu1  ;;  %v12965_v22 = vsel %vm4019_vm3, %v27457_v48, -inf  ;;  %v22828_v36 = vpop.f32.mrf.mxu0 }
 0xb7e   : > { %v12917_v26 = vmul.f32 19.595919, %v12590_v41  ;;  %v27463_v29 = vsel %vm25529_vm2, %v12918_v40, -inf  ;;  %12969 = vmax.xlane.f32.xlu0 %v12968_v61  ;;  %12966 = vmax.xlane.f32.xlu1 %v12965_v22 }
 0xb7f   : > { %v22823_v62 = vpop.f32.mrf.mxu1  ;;  %v12824_v14 = vpop.f32.mrf.mxu0  ;;  %v12974_v8 = vsel %vm4019_vm3, %v27463_v29, -inf }
 0xb80   : > { %v27469_v43 = vsel %vm25529_vm2, %v12917_v26, -inf  ;;  %v12920_v31 = vmul.f32 19.595919, %v12824_v14 }
 0xb81   : > { %v12746_v18 = vpop.f32.mrf.mxu1  ;;  %v12971_v41 = vsel %vm4019_vm3, %v27469_v43, -inf  ;;  %v22838_v36 = vpop.f32.mrf.mxu0 }
 0xb82   : > { %v12919_v39 = vmul.f32 19.595919, %v12746_v18  ;;  %v27475_v61 = vsel %vm25529_vm2, %v12920_v31, -inf  ;;  %12975 = vmax.xlane.f32.xlu0 %v12974_v8  ;;  %12972 = vmax.xlane.f32.xlu1 %v12971_v41  ;;  %v27499_v41 = vpop.permute.xlu1 %13346 }
 0xb83   : > { %v22833_v40 = vpop.f32.mrf.mxu1  ;;  %v12980_v22 = vsel %vm4019_vm3, %v27475_v61, -inf }
 0xb84   : > { %v27481_v26 = vsel %vm25529_vm2, %v12919_v39, -inf }
 0xb85   : > { %v12902_v62 = vpop.f32.mrf.mxu1  ;;  %v12977_v14 = vsel %vm4019_vm3, %v27481_v26, -inf }
 0xb86   : > { %12981 = vmax.xlane.f32.xlu0 %v12980_v22  ;;  %12978 = vmax.xlane.f32.xlu1 %v12977_v14  ;;  %v12921_v8 = vmul.f32 19.595919, %v12902_v62 }
 0xb87   : > { %v22843_v18 = vpop.f32.mrf.mxu1 }
 0xb88   : > { %v27493_v39 = vsel %vm25529_vm2, %v12921_v8, -inf }
 0xb89   : > { %v12983_v31 = vsel %vm4019_vm3, %v27493_v39, -inf }
 0xb97   : > { %13962 = vrot.lane.b32.xlu1 %v27035_v54, %s24367_s21  ;;  %v27501_v54 = vpop.permute.xlu1 %13423 }
 0xb9b   : > { %v27505_v36 = vpop.permute.xlu1 %13500 }
 0xb9c   : > { %13885 = vrot.lane.b32.xlu0 %v27043_v20, %s24367_s21  ;;  %v27503_v20 = vpop.permute.xlu0 %13269 }
 0xb9f   : > { %v27509_v40 = vpop.permute.xlu1 %13654 }
 0xba0   : > { %14039 = vrot.lane.b32.xlu0 %v29671_v30, %s24367_s21  ;;  %v27507_v30 = vpop.permute.xlu0 %13577 }
 0xba3   : > { %v27513_v62 = vpop.permute.xlu1 %13808 }
 0xba4   : > { %v27511_v22 = vpop.permute.xlu0 %13731 }
 0xbbb   : > { %12984 = vmax.xlane.f32.xlu1 %v12983_v31 }
 0xbcc   : > { %14116 = vrot.lane.b32.xlu1 %v27055_v19, %s24367_s21 }
 0xbe7   : > { %v12940_v14 = vpop.xlane.xlu0 %12939 }
 0xbe8   : > { %v12986_v18 = vsub.f32 %v27363_v5, %v12940_v14 }
 0xbea   : > { %v13002_v19 = vmul.f32 1.442695, %v12986_v18 }
 0xbeb   : > { %v12943_v8 = vpop.xlane.xlu1 %12942 }
 0xbec   : > { %24015 = vpow2.f32 %v13002_v19  ;;  %v12987_v31 = vsub.f32 %v27374_v24, %v12943_v8 }
 0xbee   : > { %v13004_v7 = vmul.f32 1.442695, %v12987_v31 }
 0xbef   : > { %v12946_v47 = vpop.xlane.xlu0 %12945 }
 0xbf0   : > { %24017 = vpow2.f32 %v13004_v7  ;;  %v12988_v56 = vsub.f32 %v27387_v6, %v12946_v47 }
 0xbf2   : > { %v13006_v32 = vmul.f32 1.442695, %v12988_v56 }
 0xbf3   : > { %v12949_v38 = vpop.xlane.xlu0 %12948 }
 0xbf4   : > { %24019 = vpow2.f32 %v13006_v32  ;;  %v12989_v0 = vsub.f32 %v27398_v34, %v12949_v38 }
 0xbf6   : > { %v13008_v59 = vmul.f32 1.442695, %v12989_v0 }
 0xbf7   : > { %v12952_v37 = vpop.xlane.xlu0 %12951 }
 0xbf8   : > { %24021 = vpow2.f32 %v13008_v59  ;;  %v12990_v5 = vsub.f32 %v27411_v28, %v12952_v37 }
 0xbf9   : > { %v27520_v14 = vpop.eup %24015 }
 0xbfa   : > { %v13010_v18 = vmul.f32 1.442695, %v12990_v5  ;;  %v13034_v24 = vsel %vm4019_vm3, %v27520_v14, 0.0 }
 0xbfb   : > { %v12955_v19 = vpop.xlane.xlu1 %12954  ;;  %13035 = vadd.xlane.f32.xlu0 %v13034_v24 }
 0xbfc   : > { %24023 = vpow2.f32 %v13010_v18  ;;  %v12991_v7 = vsub.f32 %v27422_v42, %v12955_v19 }
 0xbfd   : > { %v27525_v6 = vpop.eup %24017 }
 0xbfe   : > { %v13012_v32 = vmul.f32 1.442695, %v12991_v7  ;;  %v13037_v0 = vsel %vm4019_vm3, %v27525_v6, 0.0 }
 0xbff   : > { %v12958_v59 = vpop.xlane.xlu0 %12957  ;;  %13038 = vadd.xlane.f32.xlu1 %v13037_v0 }
 0xc00   : > { %24025 = vpow2.f32 %v13012_v32  ;;  %v12992_v37 = vsub.f32 %v27433_v27, %v12958_v59 }
 0xc01   : > { %v27530_v38 = vpop.eup %24019 }
 0xc02   : > { %v13014_v56 = vmul.f32 1.442695, %v12992_v37  ;;  %v13040_v34 = vsel %vm4019_vm3, %v27530_v38, 0.0 }
 0xc03   : > { %13041 = vadd.xlane.f32.xlu0 %v13040_v34  ;;  %v12964_v47 = vpop.xlane.xlu0 %12963  ;;  %v12961_v28 = vpop.xlane.xlu1 %12960 }
 0xc04   : > { %24027 = vpow2.f32 %v13014_v56  ;;  %v12994_v42 = vsub.f32 %v27439_v46, %v12964_v47  ;;  %v12993_v8 = vsub.f32 %v27445_v60, %v12961_v28 }
 0xc05   : > { %v27536_v31 = vpop.eup %24021 }
 0xc06   : > { %v13018_v5 = vmul.f32 1.442695, %v12994_v42  ;;  %v13016_v18 = vmul.f32 1.442695, %v12993_v8  ;;  %v13043_v27 = vsel %vm4019_vm3, %v27536_v31, 0.0 }
 0xc07   : > { %v12970_v24 = vpop.xlane.xlu0 %12969  ;;  %v12967_v19 = vpop.xlane.xlu1 %12966  ;;  %13044 = vadd.xlane.f32.xlu1 %v13043_v27 }
 0xc08   : > { %24029 = vpow2.f32 %v13018_v5  ;;  %v12996_v7 = vsub.f32 %v27451_v25, %v12970_v24  ;;  %v12995_v32 = vsub.f32 %v27457_v48, %v12967_v19 }
 0xc09   : > { %v27542_v0 = vpop.eup %24023  ;;  %24031 = vpow2.f32 %v13016_v18 }
 0xc0a   : > { %v13022_v46 = vmul.f32 1.442695, %v12996_v7  ;;  %v13020_v60 = vmul.f32 1.442695, %v12995_v32  ;;  %v13046_v59 = vsel %vm4019_vm3, %v27542_v0, 0.0 }
 0xc0b   : > { %13047 = vadd.xlane.f32.xlu0 %v13046_v59  ;;  %v12976_v37 = vpop.xlane.xlu0 %12975  ;;  %v12973_v56 = vpop.xlane.xlu1 %12972 }
 0xc0c   : > { %24033 = vpow2.f32 %v13022_v46  ;;  %v12998_v34 = vsub.f32 %v27463_v29, %v12976_v37  ;;  %v12997_v47 = vsub.f32 %v27469_v43, %v12973_v56 }
 0xc0d   : > { %v27548_v28 = vpop.eup %24025  ;;  %24035 = vpow2.f32 %v13020_v60 }
 0xc0e   : > { %v13026_v25 = vmul.f32 1.442695, %v12998_v34  ;;  %v13024_v48 = vmul.f32 1.442695, %v12997_v47  ;;  %v13049_v42 = vsel %vm4019_vm3, %v27548_v28, 0.0 }
 0xc0f   : > { %v12982_v8 = vpop.xlane.xlu0 %12981  ;;  %v12979_v5 = vpop.xlane.xlu1 %12978  ;;  %13050 = vadd.xlane.f32.xlu1 %v13049_v42 }
 0xc10   : > { %24037 = vpow2.f32 %v13026_v25  ;;  %v13000_v18 = vsub.f32 %v27475_v61, %v12982_v8  ;;  %v12999_v27 = vsub.f32 %v27481_v26, %v12979_v5 }
 0xc11   : > { %v27554_v24 = vpop.eup %24027  ;;  %24039 = vpow2.f32 %v13024_v48 }
 0xc12   : > { %v13028_v29 = vmul.f32 1.442695, %v12999_v27  ;;  %v13052_v43 = vsel %vm4019_vm3, %v27554_v24, 0.0  ;;  %v13030_v19 = vmul.f32 1.442695, %v13000_v18 }
 0xc13   : > { %13053 = vadd.xlane.f32.xlu0 %v13052_v43  ;;  %v27592_v18 = vpop.permute.xlu1 %13962 }
 0xc14   : > { %24041 = vpow2.f32 %v13028_v29 }
 0xc15   : > { %v27558_v7 = vpop.eup %24029  ;;  %24043 = vpow2.f32 %v13030_v19 }
 0xc16   : > { %v27560_v32 = vpop.eup %24031  ;;  %v13058_v46 = vsel %vm4019_vm3, %v27558_v7, 0.0 }
 0xc17   : > { %13059 = vadd.xlane.f32.xlu0 %v13058_v46  ;;  %v13055_v61 = vsel %vm4019_vm3, %v27560_v32, 0.0 }
 0xc18   : > { %13056 = vadd.xlane.f32.xlu1 %v13055_v61  ;;  %v27601_v61 = vpop.permute.xlu0 %13885 }
 0xc19   : > { %v27566_v26 = vpop.eup %24033 }
 0xc1a   : > { %v27568_v60 = vpop.eup %24035  ;;  %v13064_v59 = vsel %vm4019_vm3, %v27566_v26, 0.0 }
 0xc1b   : > { %13065 = vadd.xlane.f32.xlu0 %v13064_v59  ;;  %v13061_v37 = vsel %vm4019_vm3, %v27568_v60, 0.0 }
 0xc1c   : > { %13062 = vadd.xlane.f32.xlu1 %v13061_v37  ;;  %v27603_v59 = vpop.permute.xlu0 %14039 }
 0xc1d   : > { %v27574_v56 = vpop.eup %24037 }
 0xc1e   : > { %v27576_v34 = vpop.eup %24039  ;;  %v13070_v47 = vsel %vm4019_vm3, %v27574_v56, 0.0 }
 0xc1f   : > { %13071 = vadd.xlane.f32.xlu0 %v13070_v47  ;;  %v13067_v25 = vsel %vm4019_vm3, %v27576_v34, 0.0 }
 0xc20   : > { %13068 = vadd.xlane.f32.xlu1 %v13067_v25 }
 0xc21   : > { %v27582_v48 = vpop.eup %24041 }
 0xc22   : > { %v13073_v42 = vsel %vm4019_vm3, %v27582_v48, 0.0  ;;  %v27586_v8 = vpop.eup %24043 }
 0xc23   : > { %v13076_v5 = vsel %vm4019_vm3, %v27586_v8, 0.0 }
 0xc24   : > { %13074 = vadd.xlane.f32.xlu1 %v13073_v42 }
 0xc28   : > { %13077 = vadd.xlane.f32.xlu1 %v13076_v5 }
 0xc39   : > { %14270 = vrot.lane.b32.xlu1 %v27071_v55, %s24367_s21 }
 0xc44   : > { %v12985_v27 = vpop.xlane.xlu1 %12984 }
 0xc45   : > { %v13001_v29 = vsub.f32 %v27493_v39, %v12985_v27 }
 0xc47   : > { %v13032_v43 = vmul.f32 1.442695, %v13001_v29 }
 0xc48   : > { %v27605_v55 = vpop.permute.xlu1 %14116 }
 0xc49   : > { %24045 = vpow2.f32 %v13032_v43 }
 0xc56   : > { %v27595_v19 = vpop.eup %24045 }
 0xc57   : > { %v13079_v46 = vsel %vm4019_vm3, %v27595_v19, 0.0 }
 0xc58   : > { %13080 = vadd.xlane.f32.xlu0 %v13079_v46 }
 0xc6e   : > { %14193 = vrot.lane.b32.xlu0 %v29674_v15, %s24367_s21 }
 0xc84   : > { %v13036_v37 = vpop.xlane.xlu0 %13035 }
 0xc85   : > { %24047 = vrcp.f32 %v13036_v37 }
 0xc88   : > { %v13039_v39 = vpop.xlane.xlu1 %13038 }
 0xc89   : > { %24049 = vrcp.f32 %v13039_v39 }
 0xc8c   : > { %v13042_v47 = vpop.xlane.xlu0 %13041 }
 0xc8d   : > { %24051 = vrcp.f32 %v13042_v47 }
 0xc90   : > { %v13045_v25 = vpop.xlane.xlu1 %13044 }
 0xc91   : > { %24053 = vrcp.f32 %v13045_v25 }
 0xc92   : > { %v24048_v42 = vpop.eup %24047 }
 0xc93   : > { %v13098_v5 = vmul.f32 %v24048_v42, %v27520_v14 }
 0xc94   : > { %v13048_v27 = vpop.xlane.xlu0 %13047 }
 0xc95   : > { %24055 = vrcp.f32 %v13048_v27  ;;  %22847 = vmatmul.mubr.msk.f32.vlgmr.msra.gmra.mxu0 %vm4019_vm3, %v13098_v5 }
 0xc96   : > { %v24050_v15 = vpop.eup %24049  ;;  %22855 = vmatpush3.msra.mxu0 %v27503_v20  ;;  %22856 = vmatprep.mubr.msk.f32.mxu0 %vm24369_vm1, %v29661_v9 }
 0xc97   : > { %v13099_v29 = vmul.f32 %v24050_v15, %v27525_v6  ;;  %22864 = vmatprep.subr.mxu0 %v29661_v9 }
 0xc98   : > { %v13051_v43 = vpop.xlane.xlu1 %13050 }
 0xc99   : > { %24057 = vrcp.f32 %v13051_v43  ;;  %22852 = vmatmul.mubr.msk.f32.vlgmr.msra.gmra.mxu1 %vm4019_vm3, %v13099_v29 }
 0xc9a   : > { %v24052_v46 = vpop.eup %24051  ;;  %22860 = vmatpush3.msra.mxu1 %v27499_v41  ;;  %22861 = vmatprep.mubr.msk.f32.mxu1 %vm24369_vm1, %v29661_v9 }
 0xc9b   : > { %v13100_v14 = vmul.f32 %v24052_v46, %v27530_v38  ;;  %22869 = vmatprep.subr.mxu1 %v29661_v9 }
 0xc9c   : > { %v13054_v20 = vpop.xlane.xlu0 %13053 }
 0xc9d   : > { %24059 = vrcp.f32 %v13054_v20  ;;  %22857 = vmatmul.mubr.msk.f32.vlgmr.msra.gmra.mxu0 %vm4019_vm3, %v13100_v14  ;;  %v23775_v20 = vld [vmem:[#allocation7 + $0x168] ss:$12 sps:$4 sm:$0xff]  }
 0xc9e   : > { %v24054_v6 = vpop.eup %24053  ;;  %22865 = vmatpush3.msra.mxu0 %v27501_v54  ;;  %22866 = vmatprep.mubr.msk.f32.mxu0 %vm24369_vm1, %v29661_v9 }
 0xc9f   : > { %v13101_v37 = vmul.f32 %v24054_v6, %v27536_v31  ;;  %22874 = vmatprep.subr.mxu0 %v29661_v9 }
 0xca0   : > { %v13060_v41 = vpop.xlane.xlu0 %13059 }
 0xca1   : > { %24061 = vrcp.f32 %v13060_v41  ;;  %v13057_v39 = vpop.xlane.xlu1 %13056  ;;  %22862 = vmatmul.mubr.msk.f32.vlgmr.msra.gmra.mxu1 %vm4019_vm3, %v13101_v37  ;;  %v23780_v37 = vld [vmem:[#allocation7 + $0x154] ss:$12 sps:$4 sm:$0xff]   ;;  %v23778_v41 = vld [vmem:[#allocation7 + $0x150] ss:$12 sps:$4 sm:$0xff]  }
 0xca2   : > { %v24056_v38 = vpop.eup %24055  ;;  %24063 = vrcp.f32 %v13057_v39  ;;  %22870 = vmatpush3.msra.mxu1 %v27505_v36  ;;  %22871 = vmatprep.mubr.msk.f32.mxu1 %vm24369_vm1, %v29661_v9  ;;  %v23783_v39 = vld [vmem:[#allocation7 + $0x13c] ss:$12 sps:$4 sm:$0xff]  }
 0xca3   : > { %v13102_v54 = vmul.f32 %v24056_v38, %v27542_v0  ;;  %22879 = vmatprep.subr.mxu1 %v29661_v9  ;;  %v23781_v38 = vld [vmem:[#allocation7 + $0x138] ss:$12 sps:$4 sm:$0xff]  }
 0xca4   : > { %v13066_v47 = vpop.xlane.xlu0 %13065 }
 0xca5   : > { %24065 = vrcp.f32 %v13066_v47  ;;  %v13063_v31 = vpop.xlane.xlu1 %13062  ;;  %22867 = vmatmul.mubr.msk.f32.vlgmr.msra.gmra.mxu0 %vm4019_vm3, %v13102_v54  ;;  %v23787_v54 = vld [vmem:[#allocation7 + $0x124] ss:$12 sps:$4 sm:$0xff]  }
 0xca6   : > { %v24058_v25 = vpop.eup %24057  ;;  %24067 = vrcp.f32 %v13063_v31  ;;  %22875 = vmatpush3.msra.mxu0 %v27507_v30  ;;  %22876 = vmatprep.mubr.msk.f32.mxu0 %vm24369_vm1, %v29661_v9 }
 0xca7   : > { %v13103_v36 = vmul.f32 %v24058_v25, %v27548_v28  ;;  %22884 = vmatprep.subr.mxu0 %v29661_v9  ;;  %v23788_v25 = vld [vmem:[#allocation7 + $0x158] ss:$12 sps:$4 sm:$0xff]  }
 0xca8   : > { %v13072_v42 = vpop.xlane.xlu0 %13071 }
 0xca9   : > { %24069 = vrcp.f32 %v13072_v42  ;;  %v13069_v0 = vpop.xlane.xlu1 %13068  ;;  %22872 = vmatmul.mubr.msk.f32.vlgmr.msra.gmra.mxu1 %vm4019_vm3, %v13103_v36  ;;  %v23789_v36 = vld [vmem:[#allocation7 + $0x140] ss:$12 sps:$4 sm:$0xff]   ;;  %v23790_v42 = vld [vmem:[#allocation7 + $0x128] ss:$12 sps:$4 sm:$0xff]  }
 0xcaa   : > { %v24060_v5 = vpop.eup %24059  ;;  %24071 = vrcp.f32 %v13069_v0  ;;  %22880 = vmatpush3.msra.mxu1 %v27509_v40  ;;  %22881 = vmatprep.mubr.msk.f32.mxu1 %vm24369_vm1, %v29661_v9 }
 0xcab   : > { %v13104_v30 = vmul.f32 %v24060_v5, %v27554_v24  ;;  %22889 = vmatprep.subr.mxu1 %v29661_v9 }
 0xcad   : > { %v13075_v27 = vpop.xlane.xlu1 %13074  ;;  %22877 = vmatmul.mubr.msk.f32.vlgmr.msra.gmra.mxu0 %vm4019_vm3, %v13104_v30 }
 0xcae   : > { %v24062_v28 = vpop.eup %24061  ;;  %24073 = vrcp.f32 %v13075_v27  ;;  %22885 = vmatpush3.msra.mxu0 %v27511_v22  ;;  %22886 = vmatprep.mubr.msk.f32.mxu0 %vm24369_vm1, %v29661_v9  ;;  %v29760_v27 = vld [vmem:[#allocation53_spill] sm:$0xff] }
 0xcaf   : > { %v24064_v15 = vpop.eup %24063  ;;  %v13106_v40 = vmul.f32 %v24062_v28, %v27558_v7  ;;  %22894 = vmatprep.subr.mxu0 %v29661_v9  ;;  %v29761_v28 = vld [vmem:[#allocation77_spill] sm:$0xff] }
 0xcb0   : > { %v13105_v29 = vmul.f32 %v24064_v15, %v27560_v32  ;;  %v27696_v15 = vadd.f32 %v29761_v28, %v29760_v27 }
 0xcb1   : > { %22887 = vmatmul.mubr.msk.f32.vlgmr.msra.gmra.mxu0 %vm4019_vm3, %v13106_v40 }
 0xcb2   : > { %v24066_v24 = vpop.eup %24065  ;;  %22882 = vmatmul.mubr.msk.f32.vlgmr.msra.gmra.mxu1 %vm4019_vm3, %v13105_v29  ;;  %22895 = vmatpush3.msra.mxu0 %v27601_v61  ;;  %v13078_v61 = vpop.xlane.xlu1 %13077 }
 0xcb3   : > { %v24068_v43 = vpop.eup %24067  ;;  %v13108_v22 = vmul.f32 %v24066_v24, %v27566_v26  ;;  %22890 = vmatpush3.msra.mxu1 %v27513_v62  ;;  %22891 = vmatprep.mubr.msk.f32.mxu1 %vm24369_vm1, %v29661_v9  ;;  %24075 = vrcp.f32 %v13078_v61 }
 0xcb4   : > { %v13107_v7 = vmul.f32 %v24068_v43, %v27568_v60  ;;  %22896 = vmatprep.mubr.msk.f32.mxu0 %vm24369_vm1, %v29661_v9  ;;  %22899 = vmatprep.subr.mxu1 %v29661_v9 }
 0xcb5   : > { %22904 = vmatprep.subr.mxu0 %v29661_v9  ;;  %22897 = vmatmul.mubr.msk.f32.vlgmr.msra.gmra.mxu0 %vm4019_vm3, %v13108_v22 }
 0xcb6   : > { %v24070_v32 = vpop.eup %24069  ;;  %22892 = vmatmul.mubr.msk.f32.vlgmr.msra.gmra.mxu1 %vm4019_vm3, %v13107_v7  ;;  %22905 = vmatpush3.msra.mxu0 %v27603_v59  ;;  %v14271_v59 = vpop.permute.xlu1 %14270  ;;  %v29762_v7 = vld [vmem:[#allocation38_spill] sm:$0xff] }
 0xcb7   : > { %v24072_v62 = vpop.eup %24071  ;;  %v13110_v26 = vmul.f32 %v24070_v32, %v27574_v56  ;;  %22900 = vmatpush3.msra.mxu1 %v27592_v18  ;;  %22901 = vmatprep.mubr.msk.f32.mxu1 %vm24369_vm1, %v29661_v9  ;;  %v23784_v18 = vld [vmem:[#allocation7 + $0x170] ss:$12 sps:$4 sm:$0xff]  }
 0xcb8   : > { %v13109_v60 = vmul.f32 %v24072_v62, %v27576_v34  ;;  %22906 = vmatprep.mubr.msk.f32.mxu0 %vm24369_vm1, %v29661_v9  ;;  %22909 = vmatprep.subr.mxu1 %v29661_v9  ;;  %v29763_v32 = vld [vmem:[#allocation54_spill] sm:$0xff] }
 0xcb9   : > { %22907 = vmatmul.mubr.msk.f32.vlgmr.msra.gmra.mxu0 %vm4019_vm3, %v13110_v26  ;;  %22914 = vmatprep.subr.mxu0 %v29661_v9  ;;  %v27706_v62 = vadd.f32 %v29763_v32, %v29762_v7  ;;  %v29767_v7 = vld [vmem:[#allocation83_spill] sm:$0xff] }
 0xcba   : > { %22902 = vmatmul.mubr.msk.f32.vlgmr.msra.gmra.mxu1 %vm4019_vm3, %v13109_v60  ;;  %22916 = vmatprep.mubr.msk.f32.mxu0 %vm24369_vm1, %v29661_v9 }
 0xcbb   : > { %v24074_v56 = vpop.eup %24073  ;;  %22910 = vmatpush3.msra.mxu1 %v27605_v55  ;;  %22911 = vmatprep.mubr.msk.f32.mxu1 %vm24369_vm1, %v29661_v9  ;;  %v23777_v55 = vld [vmem:[#allocation7 + $0x16c] ss:$12 sps:$4 sm:$0xff]  }
 0xcbc   : > { %v13111_v34 = vmul.f32 %v24074_v56, %v27582_v48  ;;  %22919 = vmatprep.subr.mxu1 %v29661_v9 }
 0xcbe   : > { %22912 = vmatmul.mubr.msk.f32.vlgmr.msra.gmra.mxu1 %vm4019_vm3, %v13111_v34 }
 0xcbf   : > { %22920 = vmatpush3.msra.mxu1 %v14271_v59  ;;  %22921 = vmatprep.mubr.msk.f32.mxu1 %vm24369_vm1, %v29661_v9 }
 0xcc0   : > { %22924 = vmatprep.subr.bf16.mxu1 %v23784_v18  ;;  %v24076_v14 = vpop.eup %24075 }
 0xcc1   : > { %v13112_v6 = vmul.f32 %v24076_v14, %v27586_v8  ;;  %v23785_v8 = vld [vmem:[#allocation7 + $0x120] ss:$12 sps:$4 sm:$0xff]  }
 0xce1   : > { %v13081_v46 = vpop.xlane.xlu0 %13080 }
 0xce2   : > { %24077 = vrcp.f32 %v13081_v46 }
 0xce5   : > { %v14194_v48 = vpop.permute.xlu0 %14193 }
 0xce6   : > { %22915 = vmatpush3.msra.mxu0 %v14194_v48 }
 0xce7   : > { %22917 = vmatmul.mubr.msk.f32.vlgmr.msra.gmra.mxu0 %vm4019_vm3, %v13112_v6  ;;  %14466 = vmatprep.subr.bf16.mxu0 %v23777_v55 }
 0xce8   : > { %14467 = vmatpush1.bf16.msra.mxu0 %v23775_v20  ;;  %14490 = vmatprep.mubr.bf16.mxu0 %v29675_v35 }
 0xce9   : > { %14468 = vmatprep.subr.bf16.mxu0 %v23780_v37 }
 0xcec   : > { %14469 = vmatpush1.bf16.msra.mxu0 %v23778_v41 }
 0xced   : > { %14470 = vmatprep.subr.bf16.mxu0 %v23783_v39 }
 0xcef   : > { %v24078_v47 = vpop.eup %24077 }
 0xcf0   : > { %v13113_v31 = vmul.f32 %v24078_v47, %v27595_v19  ;;  %14471 = vmatpush1.bf16.msra.mxu0 %v23781_v38 }
 0xcf1   : > { %14472 = vmatprep.subr.bf16.mxu0 %v23787_v54 }
 0xcf2   : > { %22922 = vmatmul.mubr.msk.f32.vlgmr.msra.gmra.mxu1 %vm4019_vm3, %v13113_v31 }
 0xcf3   : > { %22925 = vmatpush3.bf16.msra.mxu1 %v23784_v18 }
 0xcf4   : > { %22926 = vmatprep.subr.bf16.mxu1 %v23788_v25  ;;  %14473 = vmatpush1.bf16.msra.mxu0 %v23785_v8 }
 0xcf5   : > { %22988 = vmatprep.subr.mxu0 %v29661_v9 }
 0xcf7   : > { %22927 = vmatpush3.bf16.msra.mxu1 %v23788_v25 }
 0xcf8   : > { %22928 = vmatprep.subr.bf16.mxu1 %v23789_v36 }
 0xcfb   : > { %22929 = vmatpush3.bf16.msra.mxu1 %v23789_v36 }
 0xcfc   : > { %22930 = vmatprep.subr.bf16.mxu1 %v23790_v42 }
 0xcff   : > { %22931 = vmatpush3.bf16.msra.mxu1 %v23790_v42 }
 0xd00   : > { %22948 = vmatprep.subr.mxu1 %v29661_v9 }
 0xd55   : > { %v13187_v19 = vpop.f32.mrf.mxu0 }
 0xd57   : > { %v22848_v0 = vpop.f32.mrf.mxu0 }
 0xd59   : > { %v13264_v5 = vpop.f32.mrf.mxu1 }
 0xd5a   : > { %v14346_v30 = vpack.c.bf16 %v13264_v5, %v13187_v19 }
 0xd5b   : > { %v22853_v40 = vpop.f32.mrf.mxu1 }
 0xd5c   : > { %21471 = vmatmul.mubr.msk.bf16.vlgmr.msra.gmra.mxu0 %vm2768_vm0, %v14346_v30  ;;  %22932 = vmatprep.mubr.msk.bf16.mxu1 %vm2768_vm0, %v14346_v30 }
 0xd5d   : > { %22989 = vmatpush3.xpose.msk.msra.mxu0 %vm2768_vm0, %v27696_v15  ;;  %v13341_v29 = vpop.f32.mrf.mxu0  ;;  %14500 = vmatprep.mubr.bf16.mxu0 %v29675_v35 }
 0xd5e   : > { %22998 = vmatprep.subr.mxu0 %v29661_v9 }
 0xd5f   : > { %v22858_v24 = vpop.f32.mrf.mxu0 }
 0xd60   : > { %v29765_v24 = vld [vmem:[#allocation57_spill] sm:$0xff] }
 0xd61   : > { %v13418_v43 = vpop.f32.mrf.mxu1 }
 0xd62   : > { %v14347_v22 = vpack.c.bf16 %v13418_v43, %v13341_v29  ;;  %v29764_v29 = vld [vmem:[#allocation40_spill] sm:$0xff] }
 0xd63   : > { %v22863_v26 = vpop.f32.mrf.mxu1  ;;  %v27737_v43 = vadd.f32 %v29765_v24, %v29764_v29  ;;  %v29793_v29 = vld [vmem:[#allocation34_spill] sm:$0xff]  ;;  %v29794_v24 = vld [vmem:[#allocation51_spill] sm:$0xff] }
 0xd64   : > { %21472 = vmatmul.mubr.msk.bf16.gmra.mxu0 %vm2768_vm0, %v14347_v22  ;;  %22933 = vmatmul.mubr.msk.bf16.vlgmr.msra.gmra.mxu1 %vm2768_vm0, %v14347_v22  ;;  %v29766_v22 = vld [vmem:[#allocation59_spill] sm:$0xff]  ;;  %v29768_v26 = vld [vmem:[#allocation29_spill] sm:$0xff] }
 0xd65   : > { %22949 = vmatpush3.xpose.msk.msra.mxu1 %vm2768_vm0, %v27706_v62  ;;  %v13495_v60 = vpop.f32.mrf.mxu0  ;;  %14510 = vmatprep.mubr.bf16.mxu0 %v29675_v35  ;;  %v27741_v32 = vadd.f32 %v29767_v7, %v29766_v22  ;;  %v29795_v22 = vld [vmem:[#allocation75_spill] sm:$0xff] }
 0xd66   : > { %22953 = vmatprep.subr.mxu1 %v29661_v9  ;;  %v27842_v7 = vadd.f32 %v29795_v22, %v29794_v24  ;;  %v29808_v24 = vld [vmem:[#allocation98_spill] sm:$0xff] }
 0xd67   : > { %v22868_v61 = vpop.f32.mrf.mxu0 }
 0xd68   : > { %v29770_v61 = vld [vmem:[#allocation42_spill] sm:$0xff] }
 0xd69   : > { %v13572_v56 = vpop.f32.mrf.mxu1 }
 0xd6a   : > { %v14348_v34 = vpack.c.bf16 %v13572_v56, %v13495_v60  ;;  %v29769_v60 = vld [vmem:[#allocation37_spill] sm:$0xff]  ;;  %v29771_v56 = vld [vmem:[#allocation60_spill] sm:$0xff] }
 0xd6b   : > { %v22873_v18 = vpop.f32.mrf.mxu1 }
 0xd6c   : > { %21473 = vmatmul.mubr.msk.bf16.gmra.mxu0 %vm2768_vm0, %v14348_v34  ;;  %22936 = vmatprep.mubr.msk.bf16.mxu1 %vm2768_vm0, %v14348_v34  ;;  %v27756_v34 = vadd.f32 %v29771_v56, %v29770_v61  ;;  %v29772_v18 = vld [vmem:[#allocation65_spill] sm:$0xff]  ;;  %v29796_v61 = vld [vmem:[#allocation35_spill] sm:$0xff]  ;;  %v29797_v56 = vld [vmem:[#allocation56_spill] sm:$0xff] }
 0xd6d   : > { %v13649_v59 = vpop.f32.mrf.mxu0  ;;  %14520 = vmatprep.mubr.bf16.mxu0 %v29675_v35 }
 0xd6f   : > { %v22878_v46 = vpop.f32.mrf.mxu0 }
 0xd71   : > { %v13803_v14 = vpop.f32.mrf.mxu0 }
 0xd72   : > { %v13726_v55 = vpop.f32.mrf.mxu1 }
 0xd73   : > { %v14349_v20 = vpack.c.bf16 %v13726_v55, %v13649_v59  ;;  %v22888_v6 = vpop.f32.mrf.mxu0  ;;  %v29773_v59 = vld [vmem:[#allocation89_spill] sm:$0xff] }
 0xd74   : > { %v22883_v48 = vpop.f32.mrf.mxu1  ;;  %v27760_v46 = vadd.f32 %v29773_v59, %v29772_v18  ;;  %v29775_v55 = vld [vmem:[#allocation41_spill] sm:$0xff]  ;;  %v29777_v6 = vld [vmem:[#allocation63_spill] sm:$0xff]  ;;  %v29798_v18 = vld [vmem:[#allocation80_spill] sm:$0xff] }
 0xd75   : > { %21474 = vmatmul.mubr.msk.bf16.gmra.mxu0 %vm2768_vm0, %v14349_v20  ;;  %22937 = vmatmul.mubr.msk.bf16.gmra.mxu1 %vm2768_vm0, %v14349_v20  ;;  %v13957_v37 = vpop.f32.mrf.mxu0  ;;  %v29776_v20 = vld [vmem:[#allocation44_spill] sm:$0xff]  ;;  %v27853_v59 = vadd.f32 %v29798_v18, %v29797_v56  ;;  %v29810_v56 = vld [vmem:[#allocation47_spill] sm:$0xff] }
 0xd76   : > { %v13880_v41 = vpop.f32.mrf.mxu1  ;;  %14530 = vmatprep.mubr.bf16.mxu0 %v29675_v35  ;;  %v27778_v48 = vadd.f32 %v29777_v6, %v29776_v20  ;;  %v29799_v20 = vld [vmem:[#allocation36_spill] sm:$0xff]  ;;  %v29800_v6 = vld [vmem:[#allocation62_spill] sm:$0xff]  ;;  %v29811_v18 = vld [vmem:[#allocation115_spill] sm:$0xff] }
 0xd77   : > { %v14350_v39 = vpack.c.bf16 %v13880_v41, %v13803_v14  ;;  %v22898_v38 = vpop.f32.mrf.mxu0  ;;  %v29774_v14 = vld [vmem:[#allocation30_spill] sm:$0xff]  ;;  %v29779_v41 = vld [vmem:[#allocation95_spill] sm:$0xff] }
 0xd78   : > { %v22893_v54 = vpop.f32.mrf.mxu1  ;;  %v29781_v38 = vld [vmem:[#allocation31_spill] sm:$0xff] }
 0xd79   : > { %22940 = vmatprep.mubr.msk.bf16.mxu1 %vm2768_vm0, %v14350_v39  ;;  %v14111_v47 = vpop.f32.mrf.mxu0  ;;  %v29782_v54 = vld [vmem:[#allocation45_spill] sm:$0xff] }
 0xd7a   : > { %v14034_v31 = vpop.f32.mrf.mxu1 }
 0xd7b   : > { %v14351_v8 = vpack.c.bf16 %v14034_v31, %v13957_v37  ;;  %v22908_v25 = vpop.f32.mrf.mxu0  ;;  %v29778_v37 = vld [vmem:[#allocation71_spill] sm:$0xff]  ;;  %v29784_v31 = vld [vmem:[#allocation66_spill] sm:$0xff] }
 0xd7c   : > { %v22903_v36 = vpop.f32.mrf.mxu1  ;;  %v29785_v25 = vld [vmem:[#allocation32_spill] sm:$0xff] }
 0xd7d   : > { %21475 = vmatmul.mubr.msk.bf16.gmra.mxu0 %vm2768_vm0, %v14350_v39  ;;  %22941 = vmatmul.mubr.msk.bf16.gmra.mxu1 %vm2768_vm0, %v14351_v8  ;;  %v27782_v39 = vadd.f32 %v29779_v41, %v29778_v37  ;;  %v29786_v36 = vld [vmem:[#allocation17_spill] sm:$0xff]  ;;  %v29801_v37 = vld [vmem:[#allocation86_spill] sm:$0xff] }
 0xd7e   : > { %v14188_v42 = vpop.f32.mrf.mxu1  ;;  %14540 = vmatprep.mubr.bf16.mxu0 %v29675_v35  ;;  %v27864_v41 = vadd.f32 %v29801_v37, %v29800_v6  ;;  %v29812_v6 = vld [vmem:[#allocation117_spill] sm:$0xff] }
 0xd7f   : > { %v14352_v19 = vpack.c.bf16 %v14188_v42, %v14111_v47  ;;  %29780 = vst [vmem:[#allocation130_spill] sm:$0xff] %v27782_v39  ;;  %v29783_v47 = vld [vmem:[#allocation46_spill] sm:$0xff]  ;;  %v29787_v42 = vld [vmem:[#allocation132_spill] sm:$0xff]  ;;  %v21665_v37 = vadd.f32 %v29812_v6, %v29811_v18 }
 0xd80   : > { %v22913_v0 = vpop.f32.mrf.mxu1 }
 0xd81   : > { %22944 = vmatprep.mubr.msk.bf16.mxu1 %vm2768_vm0, %v14352_v19  ;;  %v29789_v0 = vld [vmem:[#allocation69_spill] sm:$0xff] }
 0xd85   : > { %21476 = vmatmul.mubr.msk.bf16.gmra.mxu0 %vm2768_vm0, %v14351_v8  ;;  %v27800_v8 = vadd.f32 %v29784_v31, %v29783_v47  ;;  %v29802_v47 = vld [vmem:[#allocation39_spill] sm:$0xff]  ;;  %v29803_v31 = vld [vmem:[#allocation68_spill] sm:$0xff] }
 0xd86   : > { %14550 = vmatprep.mubr.bf16.mxu0 %v29675_v35 }
 0xd8d   : > { %21477 = vmatmul.mubr.msk.bf16.gmra.mxu0 %vm2768_vm0, %v14352_v19  ;;  %v29788_v19 = vld [vmem:[#allocation48_spill] sm:$0xff] }
 0xd8e   : > { %14560 = vmatprep.mubr.bf16.mxu0 %v29675_v35  ;;  %v29815_v35 = vld [vmem:[#allocation50_spill] sm:$0xff] }
 0xda7   : > { %v14265_v5 = vpop.f32.mrf.mxu0 }
 0xda9   : > { %v22918_v30 = vpop.f32.mrf.mxu0 }
 0xdaa   : > { %v29790_v30 = vld [vmem:[#allocation33_spill] sm:$0xff] }
 0xdb2   : > { %v14342_v27 = vpop.f32.mrf.mxu1 }
 0xdb3   : > { %v14353_v28 = vpack.c.bf16 %v14342_v27, %v14265_v5  ;;  %v27817_v5 = vadd.f32 %v29789_v0, %v29788_v19  ;;  %v29791_v27 = vld [vmem:[#allocation49_spill] sm:$0xff]  ;;  %v29804_v19 = vld [vmem:[#allocation92_spill] sm:$0xff] }
 0xdb4   : > { %v22923_v40 = vpop.f32.mrf.mxu1  ;;  %v27875_v0 = vadd.f32 %v29804_v19, %v29803_v31  ;;  %v29813_v31 = vld [vmem:[#allocation136_spill] sm:$0xff] }
 0xdb5   : > { %21478 = vmatmul.mubr.msk.bf16.gmra.mxu0 %vm2768_vm0, %v14353_v28  ;;  %22945 = vmatmul.mubr.msk.bf16.gmra.mxu1 %vm2768_vm0, %v14353_v28  ;;  %v29792_v28 = vld [vmem:[#allocation72_spill] sm:$0xff]  ;;  %v27898_v19 = vadd.f32 %v21665_v37, %v29813_v31 }
 0xdb6   : > { %22950 = vmatprep.mubr.msk.f32.mxu1 %vm24369_vm1, %v29661_v9  ;;  %22990 = vmatprep.mubr.msk.f32.mxu0 %vm24369_vm1, %v29661_v9  ;;  %v27831_v40 = vadd.f32 %v29792_v28, %v29791_v27  ;;  %29805 = vst [vmem:[#allocation128_spill] sm:$0xff] %v27875_v0  ;;  %v29806_v27 = vld [vmem:[#allocation43_spill] sm:$0xff]  ;;  %v29807_v28 = vld [vmem:[#allocation74_spill] sm:$0xff] }
 0xdb7   : > { %v27886_v22 = vadd.f32 %v29808_v24, %v29807_v28  ;;  %29814 = vst [vmem:[#allocation24_spill] sm:$0xff] %v27898_v19  ;;  %v29816_v28 = vld [vmem:[#allocation121_spill] sm:$0xff]  ;;  %v29817_v24 = vld [vmem:[#allocation26_spill] sm:$0xff] }
 0xdb8   : > { %v8523_v18 = vadd.f32 %v29817_v24, %v29816_v28 }
 0xdb9   : > { %29809 = vst [vmem:[#allocation119_spill] sm:$0xff] %v27886_v22 }
 0xdbd   : > { %22951 = vmatmul.mubr.msk.f32.vlgmr.msra.gmra.mxu1 %vm2768_vm0, %v29768_v26  ;;  %22991 = vmatmul.mubr.msk.f32.vlgmr.msra.gmra.mxu0 %vm2768_vm0, %v29769_v60 }
 0xdbe   : > { %22954 = vmatpush3.xpose.msk.msra.mxu1 %vm2768_vm0, %v27737_v43  ;;  %22999 = vmatpush3.xpose.msk.msra.mxu0 %vm2768_vm0, %v27741_v32 }
 0xdbf   : > { %22955 = vmatprep.mubr.msk.f32.mxu1 %vm24369_vm1, %v29661_v9  ;;  %22958 = vmatprep.subr.mxu1 %v29661_v9 }
 0xdc0   : > { %23000 = vmatprep.mubr.msk.f32.mxu0 %vm24369_vm1, %v29661_v9  ;;  %23008 = vmatprep.subr.mxu0 %v29661_v9 }
 0xdc1   : > { %22956 = vmatmul.mubr.msk.f32.vlgmr.msra.gmra.mxu1 %vm2768_vm0, %v29774_v14  ;;  %23001 = vmatmul.mubr.msk.f32.vlgmr.msra.gmra.mxu0 %vm2768_vm0, %v29775_v55 }
 0xdc2   : > { %22959 = vmatpush3.xpose.msk.msra.mxu1 %vm2768_vm0, %v27756_v34  ;;  %23009 = vmatpush3.xpose.msk.msra.mxu0 %vm2768_vm0, %v27760_v46 }
 0xdc3   : > { %22960 = vmatprep.mubr.msk.f32.mxu1 %vm24369_vm1, %v29661_v9  ;;  %22963 = vmatprep.subr.mxu1 %v29661_v9 }
 0xdc4   : > { %23010 = vmatprep.mubr.msk.f32.mxu0 %vm24369_vm1, %v29661_v9  ;;  %23018 = vmatprep.subr.mxu0 %v29661_v9 }
 0xdc5   : > { %22961 = vmatmul.mubr.msk.f32.vlgmr.msra.gmra.mxu1 %vm2768_vm0, %v29781_v38  ;;  %23011 = vmatmul.mubr.msk.f32.vlgmr.msra.gmra.mxu0 %vm2768_vm0, %v29782_v54 }
 0xdc6   : > { %22964 = vmatpush3.xpose.msk.msra.mxu1 %vm2768_vm0, %v27778_v48  ;;  %23019 = vmatpush3.xpose.msk.msra.mxu0 %vm2768_vm0, %v27782_v39 }
 0xdc7   : > { %22965 = vmatprep.mubr.msk.f32.mxu1 %vm24369_vm1, %v29661_v9  ;;  %22968 = vmatprep.subr.mxu1 %v29661_v9 }
 0xdc8   : > { %23020 = vmatprep.mubr.msk.f32.mxu0 %vm24369_vm1, %v29661_v9  ;;  %23028 = vmatprep.subr.mxu0 %v29661_v9 }
 0xdc9   : > { %22966 = vmatmul.mubr.msk.f32.vlgmr.msra.gmra.mxu1 %vm2768_vm0, %v29785_v25  ;;  %23021 = vmatmul.mubr.msk.f32.vlgmr.msra.gmra.mxu0 %vm2768_vm0, %v29786_v36 }
 0xdca   : > { %22969 = vmatpush3.xpose.msk.msra.mxu1 %vm2768_vm0, %v27800_v8  ;;  %23029 = vmatpush3.msra.mxu0 %v29787_v42  ;;  %v11611_v42 = vadd.f32 %v27245_v10, %v8523_v18 }
 0xdcb   : > { %22970 = vmatprep.mubr.msk.f32.mxu1 %vm24369_vm1, %v29661_v9  ;;  %22973 = vmatprep.subr.mxu1 %v29661_v9 }
 0xdcc   : > { %23030 = vmatprep.mubr.msk.f32.mxu0 %vm24369_vm1, %v29661_v9  ;;  %23038 = vmatprep.subr.mxu0 %v29661_v9 }
 0xdcd   : > { %22971 = vmatmul.mubr.msk.f32.vlgmr.msra.gmra.mxu1 %vm2768_vm0, %v29790_v30 }
 0xdce   : > { %22974 = vmatpush3.xpose.msk.msra.mxu1 %vm2768_vm0, %v27817_v5  ;;  %22975 = vmatprep.mubr.msk.f32.mxu1 %vm24369_vm1, %v29661_v9 }
 0xdcf   : > { %22978 = vmatprep.subr.mxu1 %v29661_v9 }
 0xdd1   : > { %22976 = vmatmul.mubr.msk.f32.vlgmr.msra.gmra.mxu1 %vm2768_vm0, %v29793_v29 }
 0xdd2   : > { %22979 = vmatpush3.xpose.msk.msra.mxu1 %vm2768_vm0, %v27831_v40  ;;  %22980 = vmatprep.mubr.msk.f32.mxu1 %vm24369_vm1, %v29661_v9 }
 0xdd3   : > { %22983 = vmatprep.subr.mxu1 %v29661_v9 }
 0xdd5   : > { %22981 = vmatmul.mubr.msk.f32.vlgmr.msra.gmra.mxu1 %vm2768_vm0, %v29796_v61 }
 0xdd6   : > { %22984 = vmatpush3.xpose.msk.msra.mxu1 %vm2768_vm0, %v27842_v7  ;;  %22985 = vmatprep.mubr.msk.f32.mxu1 %vm24369_vm1, %v29661_v9 }
 0xdd7   : > { %22993 = vmatprep.subr.mxu1 %v29661_v9 }
 0xdd9   : > { %22986 = vmatmul.mubr.msk.f32.vlgmr.msra.gmra.mxu1 %vm2768_vm0, %v29799_v20 }
 0xdda   : > { %22994 = vmatpush3.xpose.msk.msra.mxu1 %vm2768_vm0, %v27853_v59  ;;  %22995 = vmatprep.mubr.msk.f32.mxu1 %vm24369_vm1, %v29661_v9 }
 0xddb   : > { %23003 = vmatprep.subr.mxu1 %v29661_v9 }
 0xddd   : > { %22996 = vmatmul.mubr.msk.f32.vlgmr.msra.gmra.mxu1 %vm2768_vm0, %v29802_v47 }
 0xdde   : > { %23004 = vmatpush3.xpose.msk.msra.mxu1 %vm2768_vm0, %v27864_v41  ;;  %23005 = vmatprep.mubr.msk.f32.mxu1 %vm24369_vm1, %v29661_v9 }
 0xddf   : > { %23013 = vmatprep.subr.mxu1 %v29661_v9 }
 0xde1   : > { %23006 = vmatmul.mubr.msk.f32.vlgmr.msra.gmra.mxu1 %vm2768_vm0, %v29806_v27 }
 0xde2   : > { %23014 = vmatpush3.xpose.msk.msra.mxu1 %vm2768_vm0, %v27875_v0  ;;  %23015 = vmatprep.mubr.msk.f32.mxu1 %vm24369_vm1, %v29661_v9 }
 0xde3   : > { %23023 = vmatprep.subr.mxu1 %v29661_v9 }
 0xde5   : > { %23016 = vmatmul.mubr.msk.f32.vlgmr.msra.gmra.mxu1 %vm2768_vm0, %v29810_v56  ;;  %v29819_v56 = vld [vmem:[#allocation153_spill] sm:$0xff] }
 0xde6   : > { %23024 = vmatpush3.xpose.msk.msra.mxu1 %vm2768_vm0, %v27886_v22  ;;  %23025 = vmatprep.mubr.msk.f32.mxu1 %vm24369_vm1, %v29661_v9 }
 0xde7   : > { %23033 = vmatprep.subr.mxu1 %v29661_v9 }
 0xde9   : > { %23026 = vmatmul.mubr.msk.f32.vlgmr.msra.gmra.mxu1 %vm2768_vm0, %v29815_v35 }
 0xdea   : > { %23034 = vmatpush3.msra.mxu1 %v27898_v19  ;;  %23035 = vmatprep.mubr.msk.f32.mxu1 %vm24369_vm1, %v29661_v9 }
 0xdeb   : > { %23043 = vmatprep.subr.mxu1 %v29661_v9  ;;  %v29820_v9 = vld [vmem:[#allocation156_spill] sm:$0xff] }
 0xdec   : > { %v8533_v39 = vadd.f32 %v29820_v9, %v29819_v56 }
 0xdee   : > { %v11617_v24 = vadd.f32 %v27269_v63, %v8533_v39 }
 0xe1c   : > { %v14492_v6 = vpop.f32.mrf.mxu0 }
 0xe1d   : > { %v27910_v22 = vadd.f32 %v14492_v6, %v27243_v4 }
 0xe1e   : > { %v14494_v37 = vpop.f32.mrf.mxu0 }
 0xe1f   : > { %v27912_v31 = vadd.f32 %v14494_v37, %v11611_v42 }
 0xe20   : > { %v14496_v35 = vpop.f32.mrf.mxu0 }
 0xe21   : > { %v27915_v19 = vadd.f32 %v14496_v35, %v27253_v2 }
 0xe22   : > { %v27917_v36 = vpop.f32.mrf.mxu0 }
 0xe23   : > { %29818 = vst [vmem:[#allocation127_spill] sm:$0xff] %v27917_v36 }
 0xe24   : > { %v14502_v0 = vpop.f32.mrf.mxu0  ;;  %v22934_v28 = vpop.f32.mrf.mxu1 }
 0xe25   : > { %v27923_v10 = vadd.f32 %v14502_v0, %v27265_v11  ;;  %v27926_v4 = vadd.f32 %v22934_v28, %v27255_v58 }
 0xe26   : > { %v14504_v42 = vpop.f32.mrf.mxu0  ;;  %v14605_v18 = vpop.f32.mrf.mxu1 }
 0xe27   : > { %v27928_v6 = vadd.f32 %v14504_v42, %v11617_v24  ;;  %v27931_v35 = vadd.f32 %v14605_v18, %v27263_v53 }
 0xe28   : > { %v14506_v2 = vpop.f32.mrf.mxu0  ;;  %v22935_v37 = vpop.f32.mrf.mxu1 }
 0xe29   : > { %v27934_v9 = vadd.f32 %v14506_v2, %v27277_v45  ;;  %v27937_v63 = vadd.f32 %v22935_v37, %v27267_v16 }
 0xe2a   : > { %v27939_v11 = vpop.f32.mrf.mxu0  ;;  %v27952_v45 = vpop.f32.mrf.mxu1 }
 0xe2b   : > { %29821 = vst [vmem:[#allocation97_spill] sm:$0xff] %v27939_v11  ;;  %29826 = vst [vmem:[#allocation129_spill] sm:$0xff] %v27952_v45 }
 0xe2c   : > { %v14512_v39 = vpop.f32.mrf.mxu0 }
 0xe2d   : > { %v27942_v58 = vadd.f32 %v14512_v39, %v27293_v44 }
 0xe2e   : > { %v14514_v0 = vpop.f32.mrf.mxu0 }
 0xe2f   : > { %29822 = vst [vmem:[#allocation16_spill] sm:$0xff] %v27942_v58  ;;  %v27945_v56 = vadd.f32 %v14514_v0, %v27299_v51 }
 0xe30   : > { %v14516_v53 = vpop.f32.mrf.mxu0 }
 0xe31   : > { %29823 = vst [vmem:[#allocation155_spill] sm:$0xff] %v27945_v56  ;;  %v27948_v28 = vadd.f32 %v14516_v53, %v27303_v52 }
 0xe32   : > { %v27950_v24 = vpop.f32.mrf.mxu0 }
 0xe33   : > { %29824 = vst [vmem:[#allocation19_spill] sm:$0xff] %v27948_v28  ;;  %29825 = vst [vmem:[#allocation157_spill] sm:$0xff] %v27950_v24 }
 0xe35   : > { %v14522_v16 = vpop.f32.mrf.mxu0  ;;  %v22938_v42 = vpop.f32.mrf.mxu1 }
 0xe36   : > { %v27955_v18 = vadd.f32 %v14522_v16, %v27318_v21  ;;  %v27958_v44 = vadd.f32 %v22938_v42, %v27281_v23 }
 0xe37   : > { %v14524_v2 = vpop.f32.mrf.mxu0  ;;  %v14621_v37 = vpop.f32.mrf.mxu1 }
 0xe38   : > { %29827 = vst [vmem:[#allocation28_spill] sm:$0xff] %v27955_v18  ;;  %29828 = vst [vmem:[#allocation21_spill] sm:$0xff] %v27958_v44  ;;  %v27961_v51 = vadd.f32 %v14524_v2, %v27325_v17  ;;  %v27964_v52 = vadd.f32 %v14621_v37, %v27289_v33 }
 0xe39   : > { %v14526_v39 = vpop.f32.mrf.mxu0  ;;  %v22939_v0 = vpop.f32.mrf.mxu1 }
 0xe3a   : > { %29829 = vst [vmem:[#allocation159_spill] sm:$0xff] %v27961_v51  ;;  %29830 = vst [vmem:[#allocation154_spill] sm:$0xff] %v27964_v52  ;;  %v27967_v53 = vadd.f32 %v14526_v39, %v27329_v1  ;;  %v27970_v24 = vadd.f32 %v22939_v0, %v27295_v13 }
 0xe3b   : > { %v27972_v21 = vpop.f32.mrf.mxu0  ;;  %v27974_v23 = vpop.f32.mrf.mxu1 }
 0xe3c   : > { %29831 = vst [vmem:[#allocation158_spill] sm:$0xff] %v27967_v53  ;;  %29832 = vst [vmem:[#allocation88_spill] sm:$0xff] %v27970_v24 }
 0xe3d   : > { %29833 = vst [vmem:[#allocation163_spill] sm:$0xff] %v27972_v21  ;;  %29834 = vst [vmem:[#allocation25_spill] sm:$0xff] %v27974_v23  ;;  %v14532_v16 = vpop.f32.mrf.mxu0  ;;  %v22942_v42 = vpop.f32.mrf.mxu1  ;;  %v29840_v21 = vld [vmem:[#allocation111_spill] sm:$0xff] }
 0xe3e   : > { %v27977_v17 = vadd.f32 %v14532_v16, %v27344_v49  ;;  %v27980_v33 = vadd.f32 %v22942_v42, %v27308_v12  ;;  %v29843_v16 = vld [vmem:[#allocation113_spill] sm:$0xff] }
 0xe3f   : > { %v14534_v2 = vpop.f32.mrf.mxu0  ;;  %v14637_v37 = vpop.f32.mrf.mxu1 }
 0xe40   : > { %29835 = vst [vmem:[#allocation165_spill] sm:$0xff] %v27977_v17  ;;  %29836 = vst [vmem:[#allocation52_spill] sm:$0xff] %v27980_v33  ;;  %v27983_v1 = vadd.f32 %v14534_v2, %v27351_v57  ;;  %v27986_v13 = vadd.f32 %v14637_v37, %v27314_v50  ;;  %v29845_v57 = vld [vmem:[#allocation102_spill] sm:$0xff]  ;;  %v29847_v37 = vld [vmem:[#allocation116_spill] sm:$0xff] }
 0xe41   : > { %v14536_v39 = vpop.f32.mrf.mxu0  ;;  %v22943_v0 = vpop.f32.mrf.mxu1 }
 0xe42   : > { %29837 = vst [vmem:[#allocation162_spill] sm:$0xff] %v27983_v1  ;;  %29838 = vst [vmem:[#allocation94_spill] sm:$0xff] %v27986_v13  ;;  %v27989_v23 = vadd.f32 %v14536_v39, %v27355_v3  ;;  %v27992_v45 = vadd.f32 %v22943_v0, %v29840_v21  ;;  %v29850_v39 = vld [vmem:[#allocation106_spill] sm:$0xff] }
 0xe43   : > { %v27994_v49 = vpop.f32.mrf.mxu0 }
 0xe44   : > { %29839 = vst [vmem:[#allocation167_spill] sm:$0xff] %v27989_v23  ;;  %29841 = vst [vmem:[#allocation12_spill] sm:$0xff] %v27992_v45  ;;  %v29868_v23 = vld [vmem:[#allocation93_spill] sm:$0xff] }
 0xe45   : > { %29842 = vst [vmem:[#allocation164_spill] sm:$0xff] %v27994_v49  ;;  %v14542_v12 = vpop.f32.mrf.mxu0  ;;  %v29852_v49 = vld [vmem:[#allocation120_spill] sm:$0xff] }
 0xe46   : > { %v27997_v42 = vadd.f32 %v14542_v12, %v29843_v16  ;;  %v29854_v16 = vld [vmem:[#allocation104_spill] sm:$0xff] }
 0xe47   : > { %v14544_v11 = vpop.f32.mrf.mxu0 }
 0xe48   : > { %29844 = vst [vmem:[#allocation58_spill] sm:$0xff] %v27997_v42  ;;  %v28000_v2 = vadd.f32 %v14544_v11, %v29845_v57  ;;  %v28016_v11 = vpop.f32.mrf.mxu1 }
 0xe49   : > { %v14546_v50 = vpop.f32.mrf.mxu0  ;;  %29856 = vst [vmem:[#allocation70_spill] sm:$0xff] %v28016_v11 }
 0xe4a   : > { %29846 = vst [vmem:[#allocation166_spill] sm:$0xff] %v28000_v2  ;;  %v28003_v36 = vadd.f32 %v14546_v50, %v29847_v37  ;;  %v29860_v2 = vld [vmem:[#allocation100_spill] sm:$0xff] }
 0xe4b   : > { %v28005_v13 = vpop.f32.mrf.mxu0 }
 0xe4c   : > { %29848 = vst [vmem:[#allocation67_spill] sm:$0xff] %v28003_v36  ;;  %29849 = vst [vmem:[#allocation173_spill] sm:$0xff] %v28005_v13  ;;  %v29858_v36 = vld [vmem:[#allocation109_spill] sm:$0xff] }
 0xe4d   : > { %v14552_v3 = vpop.f32.mrf.mxu0 }
 0xe4e   : > { %v28008_v21 = vadd.f32 %v14552_v3, %v29850_v39 }
 0xe4f   : > { %v14554_v0 = vpop.f32.mrf.mxu0 }
 0xe50   : > { %29851 = vst [vmem:[#allocation171_spill] sm:$0xff] %v28008_v21  ;;  %v28011_v45 = vadd.f32 %v14554_v0, %v29852_v49  ;;  %v29862_v49 = vld [vmem:[#allocation125_spill] sm:$0xff] }
 0xe51   : > { %v14556_v12 = vpop.f32.mrf.mxu0 }
 0xe52   : > { %29853 = vst [vmem:[#allocation64_spill] sm:$0xff] %v28011_v45  ;;  %v28014_v42 = vadd.f32 %v14556_v12, %v29854_v16  ;;  %v29864_v45 = vld [vmem:[#allocation114_spill] sm:$0xff] }
 0xe53   : > { %v28018_v57 = vpop.f32.mrf.mxu0 }
 0xe54   : > { %29855 = vst [vmem:[#allocation170_spill] sm:$0xff] %v28014_v42  ;;  %29857 = vst [vmem:[#allocation172_spill] sm:$0xff] %v28018_v57  ;;  %v29866_v42 = vld [vmem:[#allocation122_spill] sm:$0xff] }
 0xe75   : > { %v14562_v50 = vpop.f32.mrf.mxu0  ;;  %v22946_v37 = vpop.f32.mrf.mxu1 }
 0xe76   : > { %v28021_v13 = vadd.f32 %v14562_v50, %v29858_v36  ;;  %v28024_v3 = vadd.f32 %v22946_v37, %v29860_v2 }
 0xe77   : > { %v14564_v39 = vpop.f32.mrf.mxu0  ;;  %v14653_v21 = vpop.f32.mrf.mxu1 }
 0xe78   : > { %29859 = vst [vmem:[#allocation175_spill] sm:$0xff] %v28021_v13  ;;  %29861 = vst [vmem:[#allocation76_spill] sm:$0xff] %v28024_v3  ;;  %v28027_v0 = vadd.f32 %v14564_v39, %v29862_v49  ;;  %v28030_v12 = vadd.f32 %v14653_v21, %v29864_v45 }
 0xe79   : > { %v14566_v16 = vpop.f32.mrf.mxu0  ;;  %v22947_v11 = vpop.f32.mrf.mxu1 }
 0xe7a   : > { %29863 = vst [vmem:[#allocation174_spill] sm:$0xff] %v28027_v0  ;;  %29865 = vst [vmem:[#allocation13_spill] sm:$0xff] %v28030_v12  ;;  %v28033_v57 = vadd.f32 %v14566_v16, %v29866_v42  ;;  %v28036_v1 = vadd.f32 %v22947_v11, %v29868_v23 }
 0xe7b   : > { %v28038_v36 = vpop.f32.mrf.mxu0  ;;  %v28040_v2 = vpop.f32.mrf.mxu1 }
 0xe7c   : > { %29867 = vst [vmem:[#allocation178_spill] sm:$0xff] %v28033_v57  ;;  %29869 = vst [vmem:[#allocation79_spill] sm:$0xff] %v28036_v1 }
 0xe7d   : > { %29870 = vst [vmem:[#allocation181_spill] sm:$0xff] %v28038_v36  ;;  %29871 = vst [vmem:[#allocation179_spill] sm:$0xff] %v28040_v2  ;;  %v14788_v50 = vpop.f32.mrf.mxu1  ;;  %v15396_v37 = vpop.f32.mrf.mxu0 }
 0xe7e   : > { %v15932_v13 = vmul.f32 19.595919, %v14788_v50 }
 0xe7f   : > { %v22952_v39 = vpop.f32.mrf.mxu1  ;;  %v22992_v49 = vpop.f32.mrf.mxu0 }
 0xe80   : > { %v28044_v45 = vsel %vm25529_vm2, %v15932_v13, -inf }
 0xe81   : > { %v14864_v21 = vpop.f32.mrf.mxu1  ;;  %v15548_v12 = vpop.f32.mrf.mxu0  ;;  %v15964_v42 = vsel %vm4019_vm3, %v28044_v45, -inf }
 0xe82   : > { %v15933_v23 = vmul.f32 19.595919, %v14864_v21  ;;  %15965 = vmax.xlane.f32.xlu0 %v15964_v42 }
 0xe83   : > { %v22957_v11 = vpop.f32.mrf.mxu1  ;;  %v23002_v16 = vpop.f32.mrf.mxu0 }
 0xe84   : > { %v28050_v36 = vsel %vm25529_vm2, %v15933_v23, -inf }
 0xe85   : > { %v14940_v50 = vpop.f32.mrf.mxu1  ;;  %v15700_v39 = vpop.f32.mrf.mxu0  ;;  %v15967_v49 = vsel %vm4019_vm3, %v28050_v36, -inf }
 0xe86   : > { %v15934_v13 = vmul.f32 19.595919, %v14940_v50  ;;  %15968 = vmax.xlane.f32.xlu1 %v15967_v49 }
 0xe87   : > { %v22962_v2 = vpop.f32.mrf.mxu1  ;;  %v23012_v57 = vpop.f32.mrf.mxu0 }
 0xe88   : > { %v28056_v1 = vsel %vm25529_vm2, %v15934_v13, -inf }
 0xe89   : > { %v15016_v21 = vpop.f32.mrf.mxu1  ;;  %v15852_v42 = vpop.f32.mrf.mxu0  ;;  %v15970_v11 = vsel %vm4019_vm3, %v28056_v1, -inf }
 0xe8a   : > { %v15935_v23 = vmul.f32 19.595919, %v15016_v21  ;;  %15971 = vmax.xlane.f32.xlu0 %v15970_v11 }
 0xe8b   : > { %v22967_v16 = vpop.f32.mrf.mxu1  ;;  %v23022_v3 = vpop.f32.mrf.mxu0 }
 0xe8c   : > { %v28062_v33 = vsel %vm25529_vm2, %v15935_v23, -inf }
 0xe8d   : > { %v15092_v50 = vpop.f32.mrf.mxu1  ;;  %v15973_v57 = vsel %vm4019_vm3, %v28062_v33, -inf }
 0xe8e   : > { %v15936_v2 = vmul.f32 19.595919, %v15092_v50  ;;  %15974 = vmax.xlane.f32.xlu0 %v15973_v57  ;;  %v15940_v57 = vmul.f32 19.595919, %v15396_v37 }
 0xe8f   : > { %v22972_v49 = vpop.f32.mrf.mxu1 }
 0xe90   : > { %v28068_v13 = vsel %vm25529_vm2, %v15936_v2, -inf }
 0xe91   : > { %v15168_v17 = vpop.f32.mrf.mxu1  ;;  %v15976_v21 = vsel %vm4019_vm3, %v28068_v13, -inf }
 0xe92   : > { %v15937_v3 = vmul.f32 19.595919, %v15168_v17  ;;  %15977 = vmax.xlane.f32.xlu0 %v15976_v21  ;;  %v28086_v21 = vsel %vm25529_vm2, %v15940_v57, -inf  ;;  %v15944_v57 = vmul.f32 19.595919, %v15700_v39 }
 0xe93   : > { %v22977_v11 = vpop.f32.mrf.mxu1  ;;  %v15946_v39 = vmul.f32 19.595919, %v15852_v42 }
 0xe94   : > { %v28074_v23 = vsel %vm25529_vm2, %v15937_v3, -inf  ;;  %v15942_v3 = vmul.f32 19.595919, %v15548_v12 }
 0xe95   : > { %v15244_v16 = vpop.f32.mrf.mxu1  ;;  %v15979_v50 = vsel %vm4019_vm3, %v28074_v23, -inf }
 0xe96   : > { %v15938_v49 = vmul.f32 19.595919, %v15244_v16  ;;  %15980 = vmax.xlane.f32.xlu1 %v15979_v50  ;;  %v15988_v50 = vsel %vm4019_vm3, %v28086_v21, -inf }
 0xe97   : > { %v22982_v2 = vpop.f32.mrf.mxu1 }
 0xe98   : > { %v28080_v24 = vsel %vm25529_vm2, %v15938_v49, -inf  ;;  %v28098_v2 = vsel %vm25529_vm2, %v15942_v3, -inf  ;;  %v28110_v3 = vsel %vm25529_vm2, %v15944_v57, -inf  ;;  %v28122_v57 = vsel %vm25529_vm2, %v15946_v39, -inf }
 0xe99   : > { %v15320_v53 = vpop.f32.mrf.mxu1  ;;  %v15982_v17 = vsel %vm4019_vm3, %v28080_v24, -inf }
 0xe9a   : > { %v15939_v11 = vmul.f32 19.595919, %v15320_v53  ;;  %15983 = vmax.xlane.f32.xlu0 %v15982_v17 }
 0xe9b   : > { %v22987_v52 = vpop.f32.mrf.mxu1 }
 0xe9c   : > { %v28090_v37 = vsel %vm25529_vm2, %v15939_v11, -inf  ;;  %v15994_v11 = vsel %vm4019_vm3, %v28098_v2, -inf }
 0xe9d   : > { %v15472_v16 = vpop.f32.mrf.mxu1  ;;  %v15985_v49 = vsel %vm4019_vm3, %v28090_v37, -inf }
 0xe9e   : > { %v15941_v12 = vmul.f32 19.595919, %v15472_v16  ;;  %15989 = vmax.xlane.f32.xlu0 %v15988_v50  ;;  %15986 = vmax.xlane.f32.xlu1 %v15985_v49 }
 0xe9f   : > { %v22997_v52 = vpop.f32.mrf.mxu1 }
 0xea0   : > { %v28102_v53 = vsel %vm25529_vm2, %v15941_v12, -inf  ;;  %v16000_v52 = vsel %vm4019_vm3, %v28110_v3, -inf }
 0xea1   : > { %v15624_v17 = vpop.f32.mrf.mxu1  ;;  %v15991_v51 = vsel %vm4019_vm3, %v28102_v53, -inf }
 0xea2   : > { %v15943_v16 = vmul.f32 19.595919, %v15624_v17  ;;  %15995 = vmax.xlane.f32.xlu0 %v15994_v11  ;;  %15992 = vmax.xlane.f32.xlu1 %v15991_v51 }
 0xea3   : > { %v23007_v50 = vpop.f32.mrf.mxu1 }
 0xea4   : > { %v28114_v49 = vsel %vm25529_vm2, %v15943_v16, -inf  ;;  %v16006_v16 = vsel %vm4019_vm3, %v28122_v57, -inf }
 0xea5   : > { %v15776_v12 = vpop.f32.mrf.mxu1  ;;  %v15997_v44 = vsel %vm4019_vm3, %v28114_v49, -inf }
 0xea6   : > { %v15945_v42 = vmul.f32 19.595919, %v15776_v12  ;;  %16001 = vmax.xlane.f32.xlu0 %v16000_v52  ;;  %15998 = vmax.xlane.f32.xlu1 %v15997_v44 }
 0xea7   : > { %v23017_v51 = vpop.f32.mrf.mxu1 }
 0xea8   : > { %v28126_v17 = vsel %vm25529_vm2, %v15945_v42, -inf }
 0xea9   : > { %v15928_v11 = vpop.f32.mrf.mxu1  ;;  %v16003_v50 = vsel %vm4019_vm3, %v28126_v17, -inf }
 0xeaa   : > { %v15947_v18 = vmul.f32 19.595919, %v15928_v11  ;;  %16007 = vmax.xlane.f32.xlu0 %v16006_v16  ;;  %16004 = vmax.xlane.f32.xlu1 %v16003_v50 }
 0xeab   : > { %v23027_v39 = vpop.f32.mrf.mxu1 }
 0xeac   : > { %v28134_v12 = vsel %vm25529_vm2, %v15947_v18, -inf }
 0xead   : > { %v16009_v44 = vsel %vm4019_vm3, %v28134_v12, -inf }
 0xeae   : > { %16010 = vmax.xlane.f32.xlu1 %v16009_v44 }
 0xf0b   : > { %v15966_v52 = vpop.xlane.xlu0 %15965 }
 0xf0c   : > { %v16012_v42 = vsub.f32 %v28044_v45, %v15966_v52 }
 0xf0e   : > { %v16028_v51 = vmul.f32 1.442695, %v16012_v42 }
 0xf0f   : > { %v15969_v28 = vpop.xlane.xlu1 %15968 }
 0xf10   : > { %24079 = vpow2.f32 %v16028_v51  ;;  %v16013_v56 = vsub.f32 %v28050_v36, %v15969_v28 }
 0xf12   : > { %v16030_v11 = vmul.f32 1.442695, %v16013_v56 }
 0xf13   : > { %v15972_v16 = vpop.xlane.xlu0 %15971 }
 0xf14   : > { %24081 = vpow2.f32 %v16030_v11  ;;  %v16014_v50 = vsub.f32 %v28056_v1, %v15972_v16 }
 0xf16   : > { %v16032_v39 = vmul.f32 1.442695, %v16014_v50 }
 0xf17   : > { %v15975_v18 = vpop.xlane.xlu0 %15974 }
 0xf18   : > { %24083 = vpow2.f32 %v16032_v39  ;;  %v16015_v0 = vsub.f32 %v28062_v33, %v15975_v18 }
 0xf1a   : > { %v16034_v58 = vmul.f32 1.442695, %v16015_v0 }
 0xf1b   : > { %v15978_v44 = vpop.xlane.xlu0 %15977 }
 0xf1c   : > { %24085 = vpow2.f32 %v16034_v58  ;;  %v16016_v45 = vsub.f32 %v28068_v13, %v15978_v44 }
 0xf1d   : > { %v28143_v52 = vpop.eup %24079 }
 0xf1e   : > { %v16036_v42 = vmul.f32 1.442695, %v16016_v45  ;;  %v16060_v56 = vsel %vm4019_vm3, %v28143_v52, 0.0 }
 0xf1f   : > { %v15981_v28 = vpop.xlane.xlu1 %15980  ;;  %16061 = vadd.xlane.f32.xlu0 %v16060_v56 }
 0xf20   : > { %24087 = vpow2.f32 %v16036_v42  ;;  %v16017_v1 = vsub.f32 %v28074_v23, %v15981_v28 }
 0xf21   : > { %v28148_v36 = vpop.eup %24081 }
 0xf22   : > { %v16038_v51 = vmul.f32 1.442695, %v16017_v1  ;;  %v16063_v33 = vsel %vm4019_vm3, %v28148_v36, 0.0 }
 0xf23   : > { %v15984_v58 = vpop.xlane.xlu0 %15983  ;;  %16064 = vadd.xlane.f32.xlu1 %v16063_v33 }
 0xf24   : > { %24089 = vpow2.f32 %v16038_v51  ;;  %v16018_v0 = vsub.f32 %v28080_v24, %v15984_v58 }
 0xf25   : > { %v28153_v13 = vpop.eup %24083 }
 0xf26   : > { %v16040_v11 = vmul.f32 1.442695, %v16018_v0  ;;  %v16066_v16 = vsel %vm4019_vm3, %v28153_v13, 0.0 }
 0xf27   : > { %16067 = vadd.xlane.f32.xlu0 %v16066_v16  ;;  %v15990_v50 = vpop.xlane.xlu0 %15989  ;;  %v15987_v23 = vpop.xlane.xlu1 %15986 }
 0xf28   : > { %24091 = vpow2.f32 %v16040_v11  ;;  %v16020_v39 = vsub.f32 %v28086_v21, %v15990_v50  ;;  %v16019_v18 = vsub.f32 %v28090_v37, %v15987_v23 }
 0xf29   : > { %v28159_v44 = vpop.eup %24085 }
 0xf2a   : > { %v16044_v45 = vmul.f32 1.442695, %v16020_v39  ;;  %v16042_v42 = vmul.f32 1.442695, %v16019_v18  ;;  %v16069_v24 = vsel %vm4019_vm3, %v28159_v44, 0.0 }
 0xf2b   : > { %v15996_v56 = vpop.xlane.xlu0 %15995  ;;  %v15993_v28 = vpop.xlane.xlu1 %15992  ;;  %16070 = vadd.xlane.f32.xlu1 %v16069_v24 }
 0xf2c   : > { %24093 = vpow2.f32 %v16044_v45  ;;  %v16022_v1 = vsub.f32 %v28098_v2, %v15996_v56  ;;  %v16021_v51 = vsub.f32 %v28102_v53, %v15993_v28 }
 0xf2d   : > { %v28165_v33 = vpop.eup %24087  ;;  %24095 = vpow2.f32 %v16042_v42 }
 0xf2e   : > { %v16048_v21 = vmul.f32 1.442695, %v16022_v1  ;;  %v16046_v37 = vmul.f32 1.442695, %v16021_v51  ;;  %v16072_v58 = vsel %vm4019_vm3, %v28165_v33, 0.0 }
 0xf2f   : > { %16073 = vadd.xlane.f32.xlu0 %v16072_v58  ;;  %v16002_v0 = vpop.xlane.xlu0 %16001  ;;  %v15999_v11 = vpop.xlane.xlu1 %15998 }
 0xf30   : > { %24097 = vpow2.f32 %v16048_v21  ;;  %v16024_v16 = vsub.f32 %v28110_v3, %v16002_v0  ;;  %v16023_v50 = vsub.f32 %v28114_v49, %v15999_v11 }
 0xf31   : > { %v28171_v23 = vpop.eup %24089  ;;  %24099 = vpow2.f32 %v16046_v37 }
 0xf32   : > { %v16052_v2 = vmul.f32 1.442695, %v16024_v16  ;;  %v16050_v53 = vmul.f32 1.442695, %v16023_v50  ;;  %v16075_v39 = vsel %vm4019_vm3, %v28171_v23, 0.0 }
 0xf33   : > { %v16008_v18 = vpop.xlane.xlu0 %16007  ;;  %v16005_v45 = vpop.xlane.xlu1 %16004  ;;  %16076 = vadd.xlane.f32.xlu1 %v16075_v39 }
 0xf34   : > { %24101 = vpow2.f32 %v16052_v2  ;;  %v16026_v42 = vsub.f32 %v28122_v57, %v16008_v18  ;;  %v16025_v24 = vsub.f32 %v28126_v17, %v16005_v45 }
 0xf35   : > { %v28177_v56 = vpop.eup %24091  ;;  %24103 = vpow2.f32 %v16050_v53 }
 0xf36   : > { %v16056_v3 = vmul.f32 1.442695, %v16026_v42  ;;  %v16054_v49 = vmul.f32 1.442695, %v16025_v24  ;;  %v16078_v28 = vsel %vm4019_vm3, %v28177_v56, 0.0 }
 0xf37   : > { %16079 = vadd.xlane.f32.xlu0 %v16078_v28  ;;  %v16011_v1 = vpop.xlane.xlu1 %16010  ;;  %v29889_v28 = vmov 0.0  }
 0xf38   : > { %24105 = vpow2.f32 %v16056_v3  ;;  %v16027_v51 = vsub.f32 %v28134_v12, %v16011_v1 }
 0xf39   : > { %v28182_v21 = vpop.eup %24093  ;;  %24107 = vpow2.f32 %v16054_v49 }
 0xf3a   : > { %v28184_v37 = vpop.eup %24095  ;;  %v16058_v57 = vmul.f32 1.442695, %v16027_v51  ;;  %v16084_v17 = vsel %vm4019_vm3, %v28182_v21, 0.0 }
 0xf3b   : > { %16085 = vadd.xlane.f32.xlu0 %v16084_v17  ;;  %v16081_v58 = vsel %vm4019_vm3, %v28184_v37, 0.0 }
 0xf3c   : > { %24109 = vpow2.f32 %v16058_v57  ;;  %16082 = vadd.xlane.f32.xlu1 %v16081_v58 }
 0xf3d   : > { %v28190_v0 = vpop.eup %24097 }
 0xf3e   : > { %v28192_v11 = vpop.eup %24099  ;;  %v16090_v12 = vsel %vm4019_vm3, %v28190_v0, 0.0 }
 0xf3f   : > { %16091 = vadd.xlane.f32.xlu0 %v16090_v12  ;;  %v16087_v16 = vsel %vm4019_vm3, %v28192_v11, 0.0 }
 0xf40   : > { %16088 = vadd.xlane.f32.xlu1 %v16087_v16 }
 0xf41   : > { %v28198_v50 = vpop.eup %24101 }
 0xf42   : > { %v28200_v2 = vpop.eup %24103  ;;  %v16096_v53 = vsel %vm4019_vm3, %v28198_v50, 0.0 }
 0xf43   : > { %16097 = vadd.xlane.f32.xlu0 %v16096_v53  ;;  %v16093_v39 = vsel %vm4019_vm3, %v28200_v2, 0.0 }
 0xf44   : > { %16094 = vadd.xlane.f32.xlu1 %v16093_v39 }
 0xf45   : > { %v28206_v18 = vpop.eup %24105 }
 0xf46   : > { %v28208_v45 = vpop.eup %24107  ;;  %v16102_v42 = vsel %vm4019_vm3, %v28206_v18, 0.0 }
 0xf47   : > { %16103 = vadd.xlane.f32.xlu0 %v16102_v42  ;;  %v16099_v24 = vsel %vm4019_vm3, %v28208_v45, 0.0 }
 0xf48   : > { %16100 = vadd.xlane.f32.xlu1 %v16099_v24 }
 0xf49   : > { %v28214_v3 = vpop.eup %24109 }
 0xf4a   : > { %v16105_v49 = vsel %vm4019_vm3, %v28214_v3, 0.0 }
 0xf4c   : > { %16106 = vadd.xlane.f32.xlu1 %v16105_v49 }
 0xf5d   : > { %17678 = vrot.lane.b32.xlu1 %v29768_v26, %s24367_s21  ;;  %17680 = vrot.lane.b32.xlu0 %v27706_v62, %s24367_s21  ;;  %v29874_v62 = vld [vmem:[#allocation130_spill] sm:$0xff]  ;;  %v29877_v26 = vld [vmem:[#allocation119_spill] sm:$0xff] }
 0xf61   : > { %17758 = vrot.lane.b32.xlu1 %v27737_v43, %s24367_s21  ;;  %17836 = vrot.lane.b32.xlu0 %v27756_v34, %s24367_s21  ;;  %v29875_v43 = vld [vmem:[#allocation47_spill] sm:$0xff]  ;;  %v29879_v34 = vld [vmem:[#allocation50_spill] sm:$0xff] }
 0xf65   : > { %17756 = vrot.lane.b32.xlu1 %v29774_v14, %s24367_s21  ;;  %17914 = vrot.lane.b32.xlu0 %v27778_v48, %s24367_s21  ;;  %v29881_v14 = vld [vmem:[#allocation24_spill] sm:$0xff]  ;;  %v29883_v48 = vld [vmem:[#allocation123_spill] sm:$0xff] }
 0xf69   : > { %17834 = vrot.lane.b32.xlu1 %v29781_v38, %s24367_s21  ;;  %17992 = vrot.lane.b32.xlu0 %v27800_v8, %s24367_s21  ;;  %v29884_v38 = vld [vmem:[#allocation126_spill] sm:$0xff] }
 0xf6a   : > { %v29885_v8 = vld [vmem:[#allocation134_spill] sm:$0xff] }
 0xf6d   : > { %17912 = vrot.lane.b32.xlu1 %v29785_v25, %s24367_s21  ;;  %18070 = vrot.lane.b32.xlu0 %v27817_v5, %s24367_s21  ;;  %v29886_v25 = vld [vmem:[#allocation137_spill] sm:$0xff] }
 0xf6e   : > { %v29887_v5 = vld [vmem:[#allocation141_spill] sm:$0xff] }
 0xf71   : > { %17990 = vrot.lane.b32.xlu1 %v29790_v30, %s24367_s21  ;;  %18148 = vrot.lane.b32.xlu0 %v27831_v40, %s24367_s21 }
 0xf75   : > { %18068 = vrot.lane.b32.xlu1 %v29793_v29, %s24367_s21  ;;  %18226 = vrot.lane.b32.xlu0 %v27842_v7, %s24367_s21  ;;  %v29888_v7 = vld [vmem:[#allocation140_spill] sm:$0xff] }
 0xf79   : > { %18146 = vrot.lane.b32.xlu1 %v29796_v61, %s24367_s21  ;;  %18304 = vrot.lane.b32.xlu0 %v27696_v15, %s24367_s21  ;;  %v29873_v15 = vld [vmem:[#allocation128_spill] sm:$0xff] }
 0xf7d   : > { %18224 = vrot.lane.b32.xlu1 %v29799_v20, %s24367_s21  ;;  %18302 = vrot.lane.b32.xlu0 %v29769_v60, %s24367_s21  ;;  %v29878_v60 = vld [vmem:[#allocation132_spill] sm:$0xff] }
 0xf81   : > { %18382 = vrot.lane.b32.xlu1 %v27853_v59, %s24367_s21  ;;  %18460 = vrot.lane.b32.xlu0 %v27741_v32, %s24367_s21  ;;  %v29876_v32 = vld [vmem:[#allocation17_spill] sm:$0xff] }
 0xf85   : > { %18380 = vrot.lane.b32.xlu1 %v29802_v47, %s24367_s21  ;;  %18458 = vrot.lane.b32.xlu0 %v29775_v55, %s24367_s21  ;;  %v29882_v55 = vld [vmem:[#allocation138_spill] sm:$0xff] }
 0xf89   : > { %18538 = vrot.lane.b32.xlu1 %v27864_v41, %s24367_s21  ;;  %18616 = vrot.lane.b32.xlu0 %v27760_v46, %s24367_s21  ;;  %v29880_v46 = vld [vmem:[#allocation131_spill] sm:$0xff] }
 0xf8d   : > { %18536 = vrot.lane.b32.xlu1 %v29806_v27, %s24367_s21  ;;  %18614 = vrot.lane.b32.xlu0 %v29782_v54, %s24367_s21  ;;  %v21677_v54 = vadd.f32 %v29884_v38, %v29883_v48  ;;  %v29893_v48 = vld [vmem:[#allocation148_spill] sm:$0xff] }
 0xf8f   : > { %v2720_v30 = vadd.f32 %v21677_v54, %v29887_v5 }
 0xf91   : > { %18694 = vrot.lane.b32.xlu1 %v29873_v15, %s24367_s21  ;;  %18772 = vrot.lane.b32.xlu0 %v29874_v62, %s24367_s21 }
 0xf95   : > { %18692 = vrot.lane.b32.xlu1 %v29875_v43, %s24367_s21  ;;  %18770 = vrot.lane.b32.xlu0 %v29876_v32, %s24367_s21 }
 0xf99   : > { %18850 = vrot.lane.b32.xlu1 %v29877_v26, %s24367_s21  ;;  %19135 = vrot.lane.b32.xlu0 %v29878_v60, %s24367_s21  ;;  %v29890_v26 = vld [vmem:[#allocation146_spill] sm:$0xff] }
 0xf9d   : > { %18848 = vrot.lane.b32.xlu1 %v29879_v34, %s24367_s21  ;;  %19289 = vrot.lane.b32.xlu0 %v29880_v46, %s24367_s21  ;;  %v29891_v34 = vld [vmem:[#allocation133_spill] sm:$0xff] }
 0xfa1   : > { %19212 = vrot.lane.b32.xlu1 %v29881_v14, %s24367_s21  ;;  %19443 = vrot.lane.b32.xlu0 %v29882_v55, %s24367_s21 }
 0xfa5   : > { %19366 = vrot.lane.b32.xlu1 %v29885_v8, %s24367_s21  ;;  %19597 = vrot.lane.b32.xlu0 %v29886_v25, %s24367_s21 }
 0xfa8   : > { %v16062_v40 = vpop.xlane.xlu0 %16061 }
 0xfa9   : > { %24111 = vrcp.f32 %v16062_v40  ;;  %19520 = vrot.lane.b32.xlu1 %v2720_v30, %s24367_s21 }
 0xfac   : > { %v16065_v29 = vpop.xlane.xlu1 %16064 }
 0xfad   : > { %19674 = vrot.lane.b32.xlu1 %v29888_v7, %s24367_s21  ;;  %24113 = vrcp.f32 %v16065_v29  ;;  %v29896_v29 = vld [vmem:[#allocation143_spill] sm:$0xff] }
 0xfb0   : > { %v16068_v61 = vpop.xlane.xlu0 %16067 }
 0xfb1   : > { %24115 = vrcp.f32 %v16068_v61 }
 0xfb4   : > { %v16071_v59 = vpop.xlane.xlu1 %16070 }
 0xfb5   : > { %24117 = vrcp.f32 %v16071_v59  ;;  %v29898_v59 = vld [vmem:[#allocation147_spill] sm:$0xff] }
 0xfb6   : > { %v24112_v20 = vpop.eup %24111 }
 0xfb7   : > { %v16124_v41 = vmul.f32 %v24112_v20, %v28143_v52 }
 0xfb8   : > { %v16074_v47 = vpop.xlane.xlu0 %16073 }
 0xfb9   : > { %24119 = vrcp.f32 %v16074_v47  ;;  %23031 = vmatmul.mubr.msk.f32.vlgmr.msra.gmra.mxu0 %vm4019_vm3, %v16124_v41  ;;  %v29899_v41 = vld [vmem:[#allocation152_spill] sm:$0xff] }
 0xfba   : > { %v24114_v27 = vpop.eup %24113  ;;  %23039 = vmatpush3.msra.mxu0 %v29880_v46  ;;  %23040 = vmatprep.mubr.msk.f32.mxu0 %vm24369_vm1, %v29889_v28  ;;  %v29892_v46 = vld [vmem:[#allocation135_spill] sm:$0xff] }
 0xfbb   : > { %v16125_v1 = vmul.f32 %v24114_v27, %v28148_v36  ;;  %23048 = vmatprep.subr.mxu0 %v29889_v28  ;;  %v21689_v14 = vadd.f32 %v29892_v46, %v29891_v34 }
 0xfbc   : > { %v16077_v51 = vpop.xlane.xlu1 %16076 }
 0xfbd   : > { %24121 = vrcp.f32 %v16077_v51  ;;  %23036 = vmatmul.mubr.msk.f32.vlgmr.msra.gmra.mxu1 %vm4019_vm3, %v16125_v1  ;;  %v28346_v38 = vadd.f32 %v21689_v14, %v29893_v48  ;;  %v29900_v1 = vld [vmem:[#allocation149_spill] sm:$0xff] }
 0xfbe   : > { %v24116_v57 = vpop.eup %24115  ;;  %23044 = vmatpush3.msra.mxu1 %v29885_v8  ;;  %23045 = vmatprep.mubr.msk.f32.mxu1 %vm24369_vm1, %v29889_v28  ;;  %v23791_v51 = vld [vmem:[#allocation7 + $0x1c8] ss:$12 sps:$4 sm:$0xff]  }
 0xfbf   : > { %v16126_v52 = vmul.f32 %v24116_v57, %v28153_v13  ;;  %23053 = vmatprep.subr.mxu1 %v29889_v28 }
 0xfc0   : > { %v16080_v17 = vpop.xlane.xlu0 %16079 }
 0xfc1   : > { %24123 = vrcp.f32 %v16080_v17  ;;  %23041 = vmatmul.mubr.msk.f32.vlgmr.msra.gmra.mxu0 %vm4019_vm3, %v16126_v52  ;;  %v23796_v17 = vld [vmem:[#allocation7 + $0x1b4] ss:$12 sps:$4 sm:$0xff]  }
 0xfc2   : > { %v24118_v36 = vpop.eup %24117  ;;  %23049 = vmatpush3.msra.mxu0 %v29882_v55  ;;  %23050 = vmatprep.mubr.msk.f32.mxu0 %vm24369_vm1, %v29889_v28 }
 0xfc3   : > { %v16127_v58 = vmul.f32 %v24118_v36, %v28159_v44  ;;  %23058 = vmatprep.subr.mxu0 %v29889_v28  ;;  %v23800_v36 = vld [vmem:[#allocation7 + $0x1d0] ss:$12 sps:$4 sm:$0xff]  }
 0xfc4   : > { %v16086_v12 = vpop.xlane.xlu0 %16085 }
 0xfc5   : > { %24125 = vrcp.f32 %v16086_v12  ;;  %v16083_v16 = vpop.xlane.xlu1 %16082  ;;  %23046 = vmatmul.mubr.msk.f32.vlgmr.msra.gmra.mxu1 %vm4019_vm3, %v16127_v58  ;;  %v29901_v12 = vld [vmem:[#allocation151_spill] sm:$0xff] }
 0xfc6   : > { %v24120_v13 = vpop.eup %24119  ;;  %24127 = vrcp.f32 %v16083_v16  ;;  %23054 = vmatpush3.msra.mxu1 %v2720_v30  ;;  %23055 = vmatprep.mubr.msk.f32.mxu1 %vm24369_vm1, %v29889_v28 }
 0xfc7   : > { %v16128_v53 = vmul.f32 %v24120_v13, %v28165_v33  ;;  %23063 = vmatprep.subr.mxu1 %v29889_v28  ;;  %v29902_v13 = vmov 0  }
 0xfc8   : > { %v16092_v39 = vpop.xlane.xlu0 %16091 }
 0xfc9   : > { %24129 = vrcp.f32 %v16092_v39  ;;  %v16089_v44 = vpop.xlane.xlu1 %16088  ;;  %23051 = vmatmul.mubr.msk.f32.vlgmr.msra.gmra.mxu0 %vm4019_vm3, %v16128_v53  ;;  %v23797_v53 = vld [vmem:[#allocation7 + $0x198] ss:$12 sps:$4 sm:$0xff]   ;;  %v23801_v39 = vld [vmem:[#allocation7 + $0x180] ss:$12 sps:$4 sm:$0xff]  }
 0xfca   : > { %v24122_v42 = vpop.eup %24121  ;;  %24131 = vrcp.f32 %v16089_v44  ;;  %23059 = vmatpush3.msra.mxu0 %v29886_v25  ;;  %23060 = vmatprep.mubr.msk.f32.mxu0 %vm24369_vm1, %v29889_v28  ;;  %v29894_v25 = vld [vmem:[#allocation145_spill] sm:$0xff]  ;;  %v23803_v44 = vld [vmem:[#allocation7 + $0x184] ss:$12 sps:$4 sm:$0xff]  }
 0xfcb   : > { %v16129_v24 = vmul.f32 %v24122_v42, %v28171_v23  ;;  %23068 = vmatprep.subr.mxu0 %v29889_v28  ;;  %v23804_v42 = vld [vmem:[#allocation7 + $0x1b8] ss:$12 sps:$4 sm:$0xff]  }
 0xfcc   : > { %v16098_v49 = vpop.xlane.xlu0 %16097 }
 0xfcd   : > { %24133 = vrcp.f32 %v16098_v49  ;;  %v16095_v33 = vpop.xlane.xlu1 %16094  ;;  %23056 = vmatmul.mubr.msk.f32.vlgmr.msra.gmra.mxu1 %vm4019_vm3, %v16129_v24  ;;  %v23805_v24 = vld [vmem:[#allocation7 + $0x1a0] ss:$12 sps:$4 sm:$0xff]  }
 0xfce   : > { %v24124_v15 = vpop.eup %24123  ;;  %24135 = vrcp.f32 %v16095_v33  ;;  %23064 = vmatpush3.msra.mxu1 %v29888_v7  ;;  %23065 = vmatprep.mubr.msk.f32.mxu1 %vm24369_vm1, %v29889_v28  ;;  %v29897_v7 = vld [vmem:[#allocation144_spill] sm:$0xff] }
 0xfcf   : > { %v16130_v62 = vmul.f32 %v24124_v15, %v28177_v56  ;;  %23073 = vmatprep.subr.mxu1 %v29889_v28  ;;  %v21701_v61 = vadd.f32 %v29897_v7, %v29896_v29 }
 0xfd0   : > { %v16104_v43 = vpop.xlane.xlu0 %16103 }
 0xfd1   : > { %24137 = vrcp.f32 %v16104_v43  ;;  %v16101_v23 = vpop.xlane.xlu1 %16100  ;;  %23061 = vmatmul.mubr.msk.f32.vlgmr.msra.gmra.mxu0 %vm4019_vm3, %v16130_v62  ;;  %v28374_v47 = vadd.f32 %v21701_v61, %v29899_v41 }
 0xfd2   : > { %v24126_v32 = vpop.eup %24125  ;;  %24139 = vrcp.f32 %v16101_v23  ;;  %23069 = vmatpush3.msra.mxu0 %v29890_v26  ;;  %23070 = vmatprep.mubr.msk.f32.mxu0 %vm24369_vm1, %v29889_v28 }
 0xfd3   : > { %v24128_v60 = vpop.eup %24127  ;;  %v16132_v56 = vmul.f32 %v24126_v32, %v28182_v21  ;;  %23078 = vmatprep.subr.mxu0 %v29889_v28 }
 0xfd4   : > { %v16131_v55 = vmul.f32 %v24128_v60, %v28184_v37  ;;  %v17681_v49 = vpop.permute.xlu0 %17680 }
 0xfd5   : > { %v16107_v54 = vpop.xlane.xlu1 %16106  ;;  %23071 = vmatmul.mubr.msk.f32.vlgmr.msra.gmra.mxu0 %vm4019_vm3, %v16132_v56 }
 0xfd6   : > { %v24130_v8 = vpop.eup %24129  ;;  %24141 = vrcp.f32 %v16107_v54  ;;  %23066 = vmatmul.mubr.msk.f32.vlgmr.msra.gmra.mxu1 %vm4019_vm3, %v16131_v55  ;;  %23079 = vmatpush3.msra.mxu0 %v29894_v25 }
 0xfd7   : > { %v24132_v5 = vpop.eup %24131  ;;  %v16134_v30 = vmul.f32 %v24130_v8, %v28190_v0  ;;  %23074 = vmatpush3.msra.mxu1 %v28346_v38  ;;  %23080 = vmatprep.mubr.msk.f32.mxu0 %vm24369_vm1, %v29889_v28  ;;  %v29895_v0 = vld [vmem:[#allocation150_spill] sm:$0xff] }
 0xfd8   : > { %v16133_v21 = vmul.f32 %v24132_v5, %v28192_v11  ;;  %23088 = vmatprep.subr.mxu0 %v29889_v28  ;;  %23075 = vmatprep.mubr.msk.f32.mxu1 %vm24369_vm1, %v29889_v28  ;;  %v28398_v33 = vpop.permute.xlu0 %17836 }
 0xfd9   : > { %23083 = vmatprep.subr.mxu1 %v29889_v28  ;;  %23081 = vmatmul.mubr.msk.f32.vlgmr.msra.gmra.mxu0 %vm4019_vm3, %v16134_v30  ;;  %v28408_v32 = vpop.permute.xlu1 %17678 }
 0xfda   : > { %v24134_v37 = vpop.eup %24133  ;;  %23076 = vmatmul.mubr.msk.f32.vlgmr.msra.gmra.mxu1 %vm4019_vm3, %v16133_v21  ;;  %23089 = vmatpush3.msra.mxu0 %v29895_v0 }
 0xfdb   : > { %v24136_v40 = vpop.eup %24135  ;;  %v16136_v11 = vmul.f32 %v24134_v37, %v28198_v50  ;;  %23084 = vmatpush3.msra.mxu1 %v29898_v59  ;;  %23090 = vmatprep.mubr.msk.f32.mxu0 %vm24369_vm1, %v29889_v28  ;;  %v23793_v50 = vld [vmem:[#allocation7 + $0x1cc] ss:$12 sps:$4 sm:$0xff]  }
 0xfdc   : > { %v16135_v20 = vmul.f32 %v24136_v40, %v28200_v2  ;;  %23098 = vmatprep.subr.mxu0 %v29889_v28  ;;  %23085 = vmatprep.mubr.msk.f32.mxu1 %vm24369_vm1, %v29889_v28  ;;  %v28400_v15 = vpop.permute.xlu0 %17914 }
 0xfdd   : > { %23093 = vmatprep.subr.mxu1 %v29889_v28  ;;  %23091 = vmatmul.mubr.msk.f32.vlgmr.msra.gmra.mxu0 %vm4019_vm3, %v16136_v11  ;;  %v28412_v14 = vpop.permute.xlu1 %17758 }
 0xfde   : > { %v24138_v27 = vpop.eup %24137  ;;  %23086 = vmatmul.mubr.msk.f32.vlgmr.msra.gmra.mxu1 %vm4019_vm3, %v16135_v20  ;;  %23099 = vmatpush3.msra.mxu0 %v29900_v1 }
 0xfdf   : > { %v24140_v2 = vpop.eup %24139  ;;  %v16138_v57 = vmul.f32 %v24138_v27, %v28206_v18  ;;  %23094 = vmatpush3.msra.mxu1 %v28374_v47  ;;  %23100 = vmatprep.mubr.msk.f32.mxu0 %vm24369_vm1, %v29889_v28  ;;  %v23794_v18 = vld [vmem:[#allocation7 + $0x1b0] ss:$12 sps:$4 sm:$0xff]  }
 0xfe0   : > { %v16137_v52 = vmul.f32 %v24140_v2, %v28208_v45  ;;  %23095 = vmatprep.mubr.msk.f32.mxu1 %vm24369_vm1, %v29889_v28  ;;  %23103 = vmatprep.subr.mxu1 %v29889_v28  ;;  %v23799_v45 = vld [vmem:[#allocation7 + $0x19c] ss:$12 sps:$4 sm:$0xff]   ;;  %v28402_v62 = vpop.permute.xlu0 %17992 }
 0xfe1   : > { %23101 = vmatmul.mubr.msk.f32.vlgmr.msra.gmra.mxu0 %vm4019_vm3, %v16138_v57  ;;  %17428 = vmatprep.subr.bf16.mxu0 %v23793_v50  ;;  %v28419_v5 = vpop.permute.xlu1 %17756 }
 0xfe2   : > { %23096 = vmatmul.mubr.msk.f32.vlgmr.msra.gmra.mxu1 %vm4019_vm3, %v16137_v52  ;;  %17429 = vmatpush1.bf16.msra.mxu0 %v23791_v51 }
 0xfe3   : > { %v24142_v58 = vpop.eup %24141  ;;  %23104 = vmatpush3.msra.mxu1 %v29901_v12  ;;  %23105 = vmatprep.mubr.msk.f32.mxu1 %vm24369_vm1, %v29889_v28 }
 0xfe4   : > { %v16139_v16 = vmul.f32 %v24142_v58, %v28214_v3  ;;  %17430 = vmatprep.subr.bf16.mxu0 %v23796_v17  ;;  %23108 = vmatprep.subr.bf16.mxu1 %v23800_v36  ;;  %v23806_v3 = vld [vmem:[#allocation7 + $0x188] ss:$12 sps:$4 sm:$0xff]   ;;  %v28404_v43 = vpop.permute.xlu0 %18070 }
 0xfe5   : > { %17452 = vmatprep.mubr.bf16.mxu0 %v29902_v13  ;;  %v28423_v29 = vpop.permute.xlu1 %17834 }
 0xfe6   : > { %23106 = vmatmul.mubr.msk.f32.vlgmr.msra.gmra.mxu1 %vm4019_vm3, %v16139_v16  ;;  %17431 = vmatpush1.bf16.msra.mxu0 %v23794_v18 }
 0xfe7   : > { %17432 = vmatprep.subr.bf16.mxu0 %v23799_v45  ;;  %23109 = vmatpush3.bf16.msra.mxu1 %v23800_v36 }
 0xfe8   : > { %23110 = vmatprep.subr.bf16.mxu1 %v23804_v42  ;;  %v28406_v23 = vpop.permute.xlu0 %18148 }
 0xfe9   : > { %v28428_v41 = vpop.permute.xlu1 %17912 }
 0xfea   : > { %17433 = vmatpush1.bf16.msra.mxu0 %v23797_v53 }
 0xfeb   : > { %17434 = vmatprep.subr.bf16.mxu0 %v23803_v44  ;;  %23111 = vmatpush3.bf16.msra.mxu1 %v23804_v42 }
 0xfec   : > { %23112 = vmatprep.subr.bf16.mxu1 %v23805_v24  ;;  %v28410_v34 = vpop.permute.xlu0 %18226 }
 0xfed   : > { %v28433_v2 = vpop.permute.xlu1 %17990 }
 0xfee   : > { %17435 = vmatpush1.bf16.msra.mxu0 %v23801_v39 }
 0xfef   : > { %23172 = vmatprep.subr.mxu0 %v29889_v28  ;;  %23113 = vmatpush3.bf16.msra.mxu1 %v23805_v24 }
 0xff0   : > { %23114 = vmatprep.subr.bf16.mxu1 %v23806_v3  ;;  %v18305_v54 = vpop.permute.xlu0 %18304 }
 0xff1   : > { %v28438_v16 = vpop.permute.xlu1 %18068 }
 0xff3   : > { %23115 = vmatpush3.bf16.msra.mxu1 %v23806_v3 }
 0xff4   : > { %23132 = vmatprep.subr.mxu1 %v29889_v28 }
0x1079   : > { %v16209_v60 = vpop.f32.mrf.mxu0 }
0x107b   : > { %v23032_v46 = vpop.f32.mrf.mxu0 }
0x107c   : > { %v28441_v46 = vpop.permute.xlu1 %18146 }
0x107d   : > { %v16282_v56 = vpop.f32.mrf.mxu1 }
0x107e   : > { %v17308_v55 = vpack.c.bf16 %v16282_v56, %v16209_v60 }
0x107f   : > { %v23037_v48 = vpop.f32.mrf.mxu1 }
0x1080   : > { %21547 = vmatmul.mubr.msk.bf16.vlgmr.msra.gmra.mxu0 %vm2768_vm0, %v17308_v55  ;;  %23116 = vmatprep.mubr.msk.bf16.mxu1 %vm2768_vm0, %v17308_v55  ;;  %v18303_v48 = vpop.permute.xlu0 %18302 }
0x1081   : > { %23173 = vmatpush3.xpose.msk.msra.mxu0 %vm2768_vm0, %v18305_v54  ;;  %v16355_v8 = vpop.f32.mrf.mxu0  ;;  %17462 = vmatprep.mubr.bf16.mxu0 %v29902_v13 }
0x1082   : > { %23182 = vmatprep.subr.mxu0 %v29889_v28 }
0x1083   : > { %v23042_v30 = vpop.f32.mrf.mxu0 }
0x1085   : > { %v16428_v21 = vpop.f32.mrf.mxu1 }
0x1086   : > { %v17309_v37 = vpack.c.bf16 %v16428_v21, %v16355_v8 }
0x1087   : > { %v23047_v40 = vpop.f32.mrf.mxu1 }
0x1088   : > { %21548 = vmatmul.mubr.msk.bf16.gmra.mxu0 %vm2768_vm0, %v17309_v37  ;;  %23117 = vmatmul.mubr.msk.bf16.vlgmr.msra.gmra.mxu1 %vm2768_vm0, %v17309_v37  ;;  %v28447_v37 = vpop.permute.xlu1 %18224 }
0x1089   : > { %23133 = vmatpush3.xpose.msk.msra.mxu1 %vm2768_vm0, %v17681_v49  ;;  %v16501_v7 = vpop.f32.mrf.mxu0  ;;  %17472 = vmatprep.mubr.bf16.mxu0 %v29902_v13 }
0x108a   : > { %23137 = vmatprep.subr.mxu1 %v29889_v28 }
0x108b   : > { %v23052_v61 = vpop.f32.mrf.mxu0 }
0x108c   : > { %v18461_v61 = vpop.permute.xlu0 %18460 }
0x108d   : > { %v16574_v11 = vpop.f32.mrf.mxu1 }
0x108e   : > { %v17310_v20 = vpack.c.bf16 %v16574_v11, %v16501_v7  ;;  %v18383_v11 = vpop.permute.xlu1 %18382 }
0x108f   : > { %v23057_v50 = vpop.f32.mrf.mxu1 }
0x1090   : > { %21549 = vmatmul.mubr.msk.bf16.gmra.mxu0 %vm2768_vm0, %v17310_v20  ;;  %23120 = vmatprep.mubr.msk.bf16.mxu1 %vm2768_vm0, %v17310_v20  ;;  %v18459_v20 = vpop.permute.xlu0 %18458 }
0x1091   : > { %v16647_v27 = vpop.f32.mrf.mxu0  ;;  %17482 = vmatprep.mubr.bf16.mxu0 %v29902_v13 }
0x1092   : > { %v18381_v50 = vpop.permute.xlu1 %18380 }
0x1093   : > { %v23062_v51 = vpop.f32.mrf.mxu0 }
0x1095   : > { %v16793_v57 = vpop.f32.mrf.mxu0 }
0x1096   : > { %v16720_v52 = vpop.f32.mrf.mxu1 }
0x1097   : > { %v17311_v17 = vpack.c.bf16 %v16720_v52, %v16647_v27  ;;  %v23072_v36 = vpop.f32.mrf.mxu0  ;;  %v18617_v27 = vpop.permute.xlu0 %18616 }
0x1098   : > { %v23067_v18 = vpop.f32.mrf.mxu1 }
0x1099   : > { %21550 = vmatmul.mubr.msk.bf16.gmra.mxu0 %vm2768_vm0, %v17311_v17  ;;  %23121 = vmatmul.mubr.msk.bf16.gmra.mxu1 %vm2768_vm0, %v17311_v17  ;;  %v16939_v58 = vpop.f32.mrf.mxu0 }
0x109a   : > { %v16866_v45 = vpop.f32.mrf.mxu1  ;;  %17492 = vmatprep.mubr.bf16.mxu0 %v29902_v13 }
0x109b   : > { %v17312_v53 = vpack.c.bf16 %v16866_v45, %v16793_v57  ;;  %v23082_v39 = vpop.f32.mrf.mxu0 }
0x109c   : > { %v23077_v44 = vpop.f32.mrf.mxu1 }
0x109d   : > { %23124 = vmatprep.mubr.msk.bf16.mxu1 %vm2768_vm0, %v17312_v53  ;;  %v17085_v42 = vpop.f32.mrf.mxu0 }
0x109e   : > { %v17012_v24 = vpop.f32.mrf.mxu1 }
0x109f   : > { %v17313_v3 = vpack.c.bf16 %v17012_v24, %v16939_v58  ;;  %v23092_v49 = vpop.f32.mrf.mxu0 }
0x10a0   : > { %v23087_v60 = vpop.f32.mrf.mxu1  ;;  %v29903_v49 = vld [vmem:[#allocation16_spill] sm:$0xff] }
0x10a1   : > { %21551 = vmatmul.mubr.msk.bf16.gmra.mxu0 %vm2768_vm0, %v17312_v53  ;;  %23125 = vmatmul.mubr.msk.bf16.gmra.mxu1 %vm2768_vm0, %v17313_v3  ;;  %v17231_v56 = vpop.f32.mrf.mxu0 }
0x10a2   : > { %v17158_v55 = vpop.f32.mrf.mxu1  ;;  %17502 = vmatprep.mubr.bf16.mxu0 %v29902_v13 }
0x10a3   : > { %v17314_v54 = vpack.c.bf16 %v17158_v55, %v17085_v42  ;;  %v23102_v8 = vpop.f32.mrf.mxu0  ;;  %v29905_v55 = vld [vmem:[#allocation19_spill] sm:$0xff] }
0x10a4   : > { %v23097_v30 = vpop.f32.mrf.mxu1 }
0x10a5   : > { %23128 = vmatprep.mubr.msk.bf16.mxu1 %vm2768_vm0, %v17314_v54  ;;  %v29906_v30 = vld [vmem:[#allocation28_spill] sm:$0xff] }
0x10a6   : > { %v17304_v21 = vpop.f32.mrf.mxu1 }
0x10a7   : > { %v17315_v40 = vpack.c.bf16 %v17304_v21, %v17231_v56 }
0x10a8   : > { %v23107_v7 = vpop.f32.mrf.mxu1 }
0x10a9   : > { %21552 = vmatmul.mubr.msk.bf16.gmra.mxu0 %vm2768_vm0, %v17313_v3  ;;  %23129 = vmatmul.mubr.msk.bf16.gmra.mxu1 %vm2768_vm0, %v17315_v40 }
0x10aa   : > { %17512 = vmatprep.mubr.bf16.mxu0 %v29902_v13  ;;  %23134 = vmatprep.mubr.msk.f32.mxu1 %vm24369_vm1, %v29889_v28 }
0x10b1   : > { %21553 = vmatmul.mubr.msk.bf16.gmra.mxu0 %vm2768_vm0, %v17314_v54  ;;  %23135 = vmatmul.mubr.msk.f32.vlgmr.msra.gmra.mxu1 %vm2768_vm0, %v28408_v32  ;;  %v18539_v32 = vpop.permute.xlu1 %18538 }
0x10b2   : > { %23138 = vmatpush3.xpose.msk.msra.mxu1 %vm2768_vm0, %v28412_v14  ;;  %23139 = vmatprep.mubr.msk.f32.mxu1 %vm24369_vm1, %v29889_v28  ;;  %v18615_v14 = vpop.permute.xlu0 %18614 }
0x10b3   : > { %23142 = vmatprep.subr.mxu1 %v29889_v28  ;;  %17522 = vmatprep.mubr.bf16.mxu0 %v29902_v13 }
0x10b5   : > { %23140 = vmatmul.mubr.msk.f32.vlgmr.msra.gmra.mxu1 %vm2768_vm0, %v28419_v5 }
0x10b6   : > { %23143 = vmatpush3.xpose.msk.msra.mxu1 %vm2768_vm0, %v28398_v33  ;;  %23144 = vmatprep.mubr.msk.f32.mxu1 %vm24369_vm1, %v29889_v28  ;;  %v18537_v33 = vpop.permute.xlu1 %18536 }
0x10b7   : > { %23147 = vmatprep.subr.mxu1 %v29889_v28 }
0x10b9   : > { %21554 = vmatmul.mubr.msk.bf16.gmra.mxu0 %vm2768_vm0, %v17315_v40  ;;  %23145 = vmatmul.mubr.msk.f32.vlgmr.msra.gmra.mxu1 %vm2768_vm0, %v28423_v29 }
0x10ba   : > { %23148 = vmatpush3.xpose.msk.msra.mxu1 %vm2768_vm0, %v28400_v15  ;;  %23149 = vmatprep.mubr.msk.f32.mxu1 %vm24369_vm1, %v29889_v28  ;;  %v18773_v15 = vpop.permute.xlu0 %18772 }
0x10bb   : > { %23152 = vmatprep.subr.mxu1 %v29889_v28  ;;  %23174 = vmatprep.mubr.msk.f32.mxu0 %vm24369_vm1, %v29889_v28 }
0x10bd   : > { %23150 = vmatmul.mubr.msk.f32.vlgmr.msra.gmra.mxu1 %vm2768_vm0, %v28428_v41 }
0x10be   : > { %23153 = vmatpush3.xpose.msk.msra.mxu1 %vm2768_vm0, %v28402_v62  ;;  %23154 = vmatprep.mubr.msk.f32.mxu1 %vm24369_vm1, %v29889_v28  ;;  %v18695_v62 = vpop.permute.xlu1 %18694 }
0x10bf   : > { %23157 = vmatprep.subr.mxu1 %v29889_v28 }
0x10c1   : > { %23155 = vmatmul.mubr.msk.f32.vlgmr.msra.gmra.mxu1 %vm2768_vm0, %v28433_v2  ;;  %23175 = vmatmul.mubr.msk.f32.vlgmr.msra.gmra.mxu0 %vm2768_vm0, %v18303_v48 }
0x10c2   : > { %23158 = vmatpush3.xpose.msk.msra.mxu1 %vm2768_vm0, %v28404_v43  ;;  %23183 = vmatpush3.xpose.msk.msra.mxu0 %vm2768_vm0, %v18461_v61  ;;  %v18771_v43 = vpop.permute.xlu0 %18770 }
0x10c3   : > { %23159 = vmatprep.mubr.msk.f32.mxu1 %vm24369_vm1, %v29889_v28  ;;  %23162 = vmatprep.subr.mxu1 %v29889_v28 }
0x10c4   : > { %23184 = vmatprep.mubr.msk.f32.mxu0 %vm24369_vm1, %v29889_v28  ;;  %23192 = vmatprep.subr.mxu0 %v29889_v28 }
0x10c5   : > { %23160 = vmatmul.mubr.msk.f32.vlgmr.msra.gmra.mxu1 %vm2768_vm0, %v28438_v16  ;;  %23185 = vmatmul.mubr.msk.f32.vlgmr.msra.gmra.mxu0 %vm2768_vm0, %v18459_v20 }
0x10c6   : > { %23163 = vmatpush3.xpose.msk.msra.mxu1 %vm2768_vm0, %v28406_v23  ;;  %23193 = vmatpush3.xpose.msk.msra.mxu0 %vm2768_vm0, %v18617_v27  ;;  %v18693_v23 = vpop.permute.xlu1 %18692  ;;  %v19136_v5 = vpop.permute.xlu0 %19135 }
0x10c7   : > { %23164 = vmatprep.mubr.msk.f32.mxu1 %vm24369_vm1, %v29889_v28  ;;  %23167 = vmatprep.subr.mxu1 %v29889_v28 }
0x10c8   : > { %23194 = vmatprep.mubr.msk.f32.mxu0 %vm24369_vm1, %v29889_v28  ;;  %23202 = vmatprep.subr.mxu0 %v29889_v28 }
0x10c9   : > { %23165 = vmatmul.mubr.msk.f32.vlgmr.msra.gmra.mxu1 %vm2768_vm0, %v28441_v46  ;;  %23195 = vmatmul.mubr.msk.f32.vlgmr.msra.gmra.mxu0 %vm2768_vm0, %v18615_v14 }
0x10ca   : > { %23168 = vmatpush3.xpose.msk.msra.mxu1 %vm2768_vm0, %v28410_v34  ;;  %23203 = vmatpush3.xpose.msk.msra.mxu0 %vm2768_vm0, %v18773_v15  ;;  %v18851_v34 = vpop.permute.xlu1 %18850 }
0x10cb   : > { %23169 = vmatprep.mubr.msk.f32.mxu1 %vm24369_vm1, %v29889_v28  ;;  %23177 = vmatprep.subr.mxu1 %v29889_v28 }
0x10cc   : > { %23204 = vmatprep.mubr.msk.f32.mxu0 %vm24369_vm1, %v29889_v28  ;;  %23212 = vmatprep.subr.mxu0 %v29889_v28 }
0x10cd   : > { %23170 = vmatmul.mubr.msk.f32.vlgmr.msra.gmra.mxu1 %vm2768_vm0, %v28447_v37  ;;  %23205 = vmatmul.mubr.msk.f32.vlgmr.msra.gmra.mxu0 %vm2768_vm0, %v18771_v43  ;;  %v29907_v37 = vld [vmem:[#allocation21_spill] sm:$0xff] }
0x10ce   : > { %23178 = vmatpush3.xpose.msk.msra.mxu1 %vm2768_vm0, %v18383_v11  ;;  %23213 = vmatpush3.msra.mxu0 %v19136_v5  ;;  %v18849_v29 = vpop.permute.xlu1 %18848  ;;  %v29908_v11 = vld [vmem:[#allocation159_spill] sm:$0xff] }
0x10cf   : > { %23179 = vmatprep.mubr.msk.f32.mxu1 %vm24369_vm1, %v29889_v28  ;;  %23187 = vmatprep.subr.mxu1 %v29889_v28 }
0x10d0   : > { %23214 = vmatprep.mubr.msk.f32.mxu0 %vm24369_vm1, %v29889_v28  ;;  %23222 = vmatprep.subr.mxu0 %v29889_v28 }
0x10d1   : > { %23180 = vmatmul.mubr.msk.f32.vlgmr.msra.gmra.mxu1 %vm2768_vm0, %v18381_v50  ;;  %v29909_v50 = vld [vmem:[#allocation154_spill] sm:$0xff] }
0x10d2   : > { %23188 = vmatpush3.xpose.msk.msra.mxu1 %vm2768_vm0, %v18539_v32  ;;  %23189 = vmatprep.mubr.msk.f32.mxu1 %vm24369_vm1, %v29889_v28  ;;  %v19213_v41 = vpop.permute.xlu1 %19212 }
0x10d3   : > { %23197 = vmatprep.subr.mxu1 %v29889_v28 }
0x10d5   : > { %23190 = vmatmul.mubr.msk.f32.vlgmr.msra.gmra.mxu1 %vm2768_vm0, %v18537_v33  ;;  %v29910_v33 = vld [vmem:[#allocation158_spill] sm:$0xff] }
0x10d6   : > { %23198 = vmatpush3.xpose.msk.msra.mxu1 %vm2768_vm0, %v18695_v62  ;;  %23199 = vmatprep.mubr.msk.f32.mxu1 %vm24369_vm1, %v29889_v28  ;;  %v29912_v62 = vld [vmem:[#allocation88_spill] sm:$0xff] }
0x10d7   : > { %23207 = vmatprep.subr.mxu1 %v29889_v28 }
0x10d9   : > { %23200 = vmatmul.mubr.msk.f32.vlgmr.msra.gmra.mxu1 %vm2768_vm0, %v18693_v23 }
0x10da   : > { %23208 = vmatpush3.xpose.msk.msra.mxu1 %vm2768_vm0, %v18851_v34  ;;  %23209 = vmatprep.mubr.msk.f32.mxu1 %vm24369_vm1, %v29889_v28 }
0x10db   : > { %23217 = vmatprep.subr.mxu1 %v29889_v28 }
0x10dd   : > { %23210 = vmatmul.mubr.msk.f32.vlgmr.msra.gmra.mxu1 %vm2768_vm0, %v18849_v29 }
0x10de   : > { %23218 = vmatpush3.msra.mxu1 %v19213_v41  ;;  %23219 = vmatprep.mubr.msk.f32.mxu1 %vm24369_vm1, %v29889_v28  ;;  %v29914_v41 = vld [vmem:[#allocation165_spill] sm:$0xff] }
0x10df   : > { %23227 = vmatprep.subr.mxu1 %v29889_v28 }
0x1140   : > { %v17454_v51 = vpop.f32.mrf.mxu0 }
0x1141   : > { %v28553_v2 = vadd.f32 %v17454_v51, %v27910_v22 }
0x1142   : > { %v17456_v57 = vpop.f32.mrf.mxu0 }
0x1143   : > { %v28556_v52 = vadd.f32 %v17456_v57, %v27912_v31  ;;  %v29916_v57 = vld [vmem:[#allocation52_spill] sm:$0xff] }
0x1144   : > { %v17458_v17 = vpop.f32.mrf.mxu0 }
0x1145   : > { %v28559_v36 = vadd.f32 %v17458_v17, %v27915_v19 }
0x1146   : > { %v28561_v18 = vpop.f32.mrf.mxu0 }
0x1148   : > { %v17464_v58 = vpop.f32.mrf.mxu0  ;;  %v23118_v45 = vpop.f32.mrf.mxu1 }
0x1149   : > { %v28564_v16 = vadd.f32 %v17464_v58, %v27923_v10  ;;  %v28567_v53 = vadd.f32 %v23118_v45, %v27926_v4 }
0x114a   : > { %v17466_v22 = vpop.f32.mrf.mxu0  ;;  %v17567_v39 = vpop.f32.mrf.mxu1 }
0x114b   : > { %v28570_v44 = vadd.f32 %v17466_v22, %v27928_v6  ;;  %v28573_v31 = vadd.f32 %v17567_v39, %v27931_v35  ;;  %v29904_v6 = vld [vmem:[#allocation155_spill] sm:$0xff]  ;;  %v29918_v22 = vld [vmem:[#allocation162_spill] sm:$0xff] }
0x114c   : > { %v17468_v19 = vpop.f32.mrf.mxu0  ;;  %v23119_v42 = vpop.f32.mrf.mxu1 }
0x114d   : > { %v28576_v24 = vadd.f32 %v17468_v19, %v27934_v9  ;;  %v28579_v3 = vadd.f32 %v23119_v42, %v27937_v63  ;;  %v29920_v19 = vld [vmem:[#allocation94_spill] sm:$0xff] }
0x114e   : > { %v28581_v10 = vpop.f32.mrf.mxu0  ;;  %v28594_v9 = vpop.f32.mrf.mxu1 }
0x1150   : > { %v17474_v4 = vpop.f32.mrf.mxu0 }
0x1151   : > { %v28584_v60 = vadd.f32 %v17474_v4, %v29903_v49 }
0x1152   : > { %v17476_v46 = vpop.f32.mrf.mxu0 }
0x1153   : > { %v28587_v56 = vadd.f32 %v17476_v46, %v29904_v6  ;;  %v29922_v46 = vld [vmem:[#allocation167_spill] sm:$0xff] }
0x1154   : > { %v17478_v35 = vpop.f32.mrf.mxu0 }
0x1155   : > { %v28590_v48 = vadd.f32 %v17478_v35, %v29905_v55  ;;  %v29924_v35 = vld [vmem:[#allocation12_spill] sm:$0xff] }
0x1156   : > { %v28592_v54 = vpop.f32.mrf.mxu0 }
0x1159   : > { %v17484_v63 = vpop.f32.mrf.mxu0  ;;  %v23122_v8 = vpop.f32.mrf.mxu1 }
0x115a   : > { %v28597_v21 = vadd.f32 %v17484_v63, %v29906_v30  ;;  %v28600_v40 = vadd.f32 %v23122_v8, %v29907_v37 }
0x115b   : > { %v17486_v7 = vpop.f32.mrf.mxu0  ;;  %v17583_v61 = vpop.f32.mrf.mxu1 }
0x115c   : > { %v28603_v20 = vadd.f32 %v17486_v7, %v29908_v11  ;;  %v28606_v27 = vadd.f32 %v17583_v61, %v29909_v50  ;;  %v29928_v7 = vld [vmem:[#allocation58_spill] sm:$0xff]  ;;  %v29930_v11 = vld [vmem:[#allocation76_spill] sm:$0xff] }
0x115d   : > { %v17488_v32 = vpop.f32.mrf.mxu0  ;;  %v23123_v14 = vpop.f32.mrf.mxu1 }
0x115e   : > { %v28609_v15 = vadd.f32 %v17488_v32, %v29910_v33  ;;  %v28612_v43 = vadd.f32 %v23123_v14, %v29912_v62  ;;  %v29932_v33 = vld [vmem:[#allocation166_spill] sm:$0xff] }
0x115f   : > { %v28614_v23 = vpop.f32.mrf.mxu0  ;;  %v28616_v5 = vpop.f32.mrf.mxu1 }
0x1160   : > { %29911 = vst [vmem:[#allocation61_spill] sm:$0xff] %v28609_v15  ;;  %29913 = vst [vmem:[#allocation180_spill] sm:$0xff] %v28612_v43 }
0x1161   : > { %v17494_v34 = vpop.f32.mrf.mxu0  ;;  %v23126_v29 = vpop.f32.mrf.mxu1 }
0x1162   : > { %v28619_v51 = vadd.f32 %v17494_v34, %v29914_v41  ;;  %v28622_v17 = vadd.f32 %v23126_v29, %v29916_v57  ;;  %v29934_v34 = vld [vmem:[#allocation13_spill] sm:$0xff] }
0x1163   : > { %v17496_v58 = vpop.f32.mrf.mxu0  ;;  %v17599_v45 = vpop.f32.mrf.mxu1 }
0x1164   : > { %29915 = vst [vmem:[#allocation78_spill] sm:$0xff] %v28619_v51  ;;  %29917 = vst [vmem:[#allocation182_spill] sm:$0xff] %v28622_v17  ;;  %v28625_v39 = vadd.f32 %v17496_v58, %v29918_v22  ;;  %v28628_v42 = vadd.f32 %v17599_v45, %v29920_v19  ;;  %v29936_v58 = vld [vmem:[#allocation67_spill] sm:$0xff] }
0x1165   : > { %v17498_v4 = vpop.f32.mrf.mxu0  ;;  %v23127_v49 = vpop.f32.mrf.mxu1  ;;  %v29938_v22 = vld [vmem:[#allocation79_spill] sm:$0xff] }
0x1166   : > { %29919 = vst [vmem:[#allocation183_spill] sm:$0xff] %v28625_v39  ;;  %29921 = vst [vmem:[#allocation27_spill] sm:$0xff] %v28628_v42  ;;  %v28631_v6 = vadd.f32 %v17498_v4, %v29922_v46  ;;  %v28634_v55 = vadd.f32 %v23127_v49, %v29924_v35 }
0x1167   : > { %v28636_v63 = vpop.f32.mrf.mxu0  ;;  %v28638_v8 = vpop.f32.mrf.mxu1 }
0x1168   : > { %29923 = vst [vmem:[#allocation187_spill] sm:$0xff] %v28631_v6  ;;  %29925 = vst [vmem:[#allocation186_spill] sm:$0xff] %v28634_v55 }
0x1169   : > { %29926 = vst [vmem:[#allocation188_spill] sm:$0xff] %v28636_v63  ;;  %29927 = vst [vmem:[#allocation20_spill] sm:$0xff] %v28638_v8  ;;  %v17504_v30 = vpop.f32.mrf.mxu0  ;;  %v23130_v37 = vpop.f32.mrf.mxu1 }
0x116a   : > { %v28641_v61 = vadd.f32 %v17504_v30, %v29928_v7  ;;  %v28644_v50 = vadd.f32 %v23130_v37, %v29930_v11  ;;  %v29942_v30 = vld [vmem:[#allocation171_spill] sm:$0xff] }
0x116b   : > { %v17506_v32 = vpop.f32.mrf.mxu0  ;;  %v17615_v14 = vpop.f32.mrf.mxu1 }
0x116c   : > { %29929 = vst [vmem:[#allocation191_spill] sm:$0xff] %v28641_v61  ;;  %29931 = vst [vmem:[#allocation190_spill] sm:$0xff] %v28644_v50  ;;  %v28647_v62 = vadd.f32 %v17506_v32, %v29932_v33  ;;  %v28650_v29 = vadd.f32 %v17615_v14, %v29934_v34  ;;  %v29945_v34 = vld [vmem:[#allocation64_spill] sm:$0xff] }
0x116d   : > { %v17508_v41 = vpop.f32.mrf.mxu0  ;;  %v23131_v57 = vpop.f32.mrf.mxu1 }
0x116e   : > { %29933 = vst [vmem:[#allocation192_spill] sm:$0xff] %v28647_v62  ;;  %29935 = vst [vmem:[#allocation91_spill] sm:$0xff] %v28650_v29  ;;  %v28653_v45 = vadd.f32 %v17508_v41, %v29936_v58  ;;  %v28656_v19 = vadd.f32 %v23131_v57, %v29938_v22  ;;  %v29950_v29 = vld [vmem:[#allocation175_spill] sm:$0xff] }
0x116f   : > { %v28658_v4 = vpop.f32.mrf.mxu0  ;;  %v28660_v49 = vpop.f32.mrf.mxu1 }
0x1170   : > { %29937 = vst [vmem:[#allocation195_spill] sm:$0xff] %v28653_v45  ;;  %29939 = vst [vmem:[#allocation194_spill] sm:$0xff] %v28656_v19  ;;  %v29947_v19 = vld [vmem:[#allocation170_spill] sm:$0xff] }
0x1171   : > { %29940 = vst [vmem:[#allocation196_spill] sm:$0xff] %v28658_v4  ;;  %29941 = vst [vmem:[#allocation53_spill] sm:$0xff] %v28660_v49  ;;  %v17514_v46 = vpop.f32.mrf.mxu0  ;;  %v17752_v35 = vpop.f32.mrf.mxu1 }
0x1172   : > { %v28663_v37 = vadd.f32 %v17514_v46, %v29942_v30  ;;  %v18926_v7 = vmul.f32 19.595919, %v17752_v35 }
0x1173   : > { %v17516_v11 = vpop.f32.mrf.mxu0  ;;  %v23136_v32 = vpop.f32.mrf.mxu1 }
0x1174   : > { %29943 = vst [vmem:[#allocation77_spill] sm:$0xff] %v28663_v37  ;;  %v28667_v33 = vsel %vm25529_vm2, %v18926_v7, -inf  ;;  %v28670_v41 = vadd.f32 %v17516_v11, %v29945_v34  ;;  %v29954_v37 = vld [vmem:[#allocation178_spill] sm:$0xff] }
0x1175   : > { %v17518_v57 = vpop.f32.mrf.mxu0  ;;  %v17830_v58 = vpop.f32.mrf.mxu1  ;;  %v18958_v22 = vsel %vm4019_vm3, %v28667_v33, -inf }
0x1176   : > { %29946 = vst [vmem:[#allocation38_spill] sm:$0xff] %v28670_v41  ;;  %v28675_v49 = vadd.f32 %v17518_v57, %v29947_v19  ;;  %v18927_v46 = vmul.f32 19.595919, %v17830_v58  ;;  %18959 = vmax.xlane.f32.xlu0 %v18958_v22  ;;  %v29952_v22 = vld [vmem:[#allocation174_spill] sm:$0xff] }
0x1177   : > { %v28677_v35 = vpop.f32.mrf.mxu0  ;;  %v23141_v30 = vpop.f32.mrf.mxu1 }
0x1178   : > { %29948 = vst [vmem:[#allocation54_spill] sm:$0xff] %v28675_v49  ;;  %29949 = vst [vmem:[#allocation40_spill] sm:$0xff] %v28677_v35  ;;  %v28681_v7 = vsel %vm25529_vm2, %v18927_v46, -inf }
0x1179   : > { %v17524_v32 = vpop.f32.mrf.mxu0  ;;  %v17908_v11 = vpop.f32.mrf.mxu1  ;;  %v18961_v34 = vsel %vm4019_vm3, %v28681_v7, -inf }
0x117a   : > { %v28686_v50 = vadd.f32 %v17524_v32, %v29950_v29  ;;  %v18928_v41 = vmul.f32 19.595919, %v17908_v11  ;;  %18962 = vmax.xlane.f32.xlu1 %v18961_v34 }
0x117b   : > { %v17526_v19 = vpop.f32.mrf.mxu0  ;;  %v23146_v57 = vpop.f32.mrf.mxu1 }
0x117c   : > { %29951 = vst [vmem:[#allocation57_spill] sm:$0xff] %v28686_v50  ;;  %v28690_v58 = vsel %vm25529_vm2, %v18928_v41, -inf  ;;  %v28693_v30 = vadd.f32 %v17526_v19, %v29952_v22 }
0x117d   : > { %v17528_v46 = vpop.f32.mrf.mxu0  ;;  %v17986_v49 = vpop.f32.mrf.mxu1  ;;  %v18964_v35 = vsel %vm4019_vm3, %v28690_v58, -inf }
0x117e   : > { %29953 = vst [vmem:[#allocation59_spill] sm:$0xff] %v28693_v30  ;;  %v28698_v55 = vadd.f32 %v17528_v46, %v29954_v37  ;;  %v18929_v29 = vmul.f32 19.595919, %v17986_v49  ;;  %18965 = vmax.xlane.f32.xlu0 %v18964_v35 }
0x117f   : > { %v28700_v32 = vpop.f32.mrf.mxu0  ;;  %v23151_v11 = vpop.f32.mrf.mxu1 }
0x1180   : > { %29955 = vst [vmem:[#allocation83_spill] sm:$0xff] %v28698_v55  ;;  %29956 = vst [vmem:[#allocation29_spill] sm:$0xff] %v28700_v32  ;;  %v28704_v41 = vsel %vm25529_vm2, %v18929_v29, -inf }
0x1181   : > { %v18064_v34 = vpop.f32.mrf.mxu1  ;;  %v18376_v19 = vpop.f32.mrf.mxu0  ;;  %v18967_v57 = vsel %vm4019_vm3, %v28704_v41, -inf }
0x1182   : > { %v18930_v22 = vmul.f32 19.595919, %v18064_v34  ;;  %v18934_v30 = vmul.f32 19.595919, %v18376_v19  ;;  %18968 = vmax.xlane.f32.xlu0 %v18967_v57 }
0x1183   : > { %v23156_v50 = vpop.f32.mrf.mxu1  ;;  %v23176_v37 = vpop.f32.mrf.mxu0 }
0x1184   : > { %v28710_v49 = vsel %vm25529_vm2, %v18930_v22, -inf  ;;  %v28716_v11 = vsel %vm25529_vm2, %v18934_v30, -inf }
0x1185   : > { %v18142_v35 = vpop.f32.mrf.mxu1  ;;  %v18532_v46 = vpop.f32.mrf.mxu0  ;;  %v18970_v29 = vsel %vm4019_vm3, %v28710_v49, -inf  ;;  %v18982_v37 = vsel %vm4019_vm3, %v28716_v11, -inf }
0x1186   : > { %v18931_v55 = vmul.f32 19.595919, %v18142_v35  ;;  %v18936_v32 = vmul.f32 19.595919, %v18532_v46  ;;  %18971 = vmax.xlane.f32.xlu0 %v18970_v29 }
0x1187   : > { %v23161_v34 = vpop.f32.mrf.mxu1  ;;  %v23186_v19 = vpop.f32.mrf.mxu0 }
0x1188   : > { %v28720_v50 = vsel %vm25529_vm2, %v18931_v55, -inf  ;;  %v28728_v30 = vsel %vm25529_vm2, %v18936_v32, -inf }
0x1189   : > { %v18220_v57 = vpop.f32.mrf.mxu1  ;;  %v18688_v22 = vpop.f32.mrf.mxu0  ;;  %v18973_v45 = vsel %vm4019_vm3, %v28720_v50, -inf  ;;  %v18988_v19 = vsel %vm4019_vm3, %v28728_v30, -inf }
0x118a   : > { %v18932_v35 = vmul.f32 19.595919, %v18220_v57  ;;  %18983 = vmax.xlane.f32.xlu0 %v18982_v37  ;;  %18974 = vmax.xlane.f32.xlu1 %v18973_v45  ;;  %v18938_v8 = vmul.f32 19.595919, %v18688_v22 }
0x118b   : > { %v23166_v46 = vpop.f32.mrf.mxu1  ;;  %v23196_v29 = vpop.f32.mrf.mxu0 }
0x118c   : > { %v28734_v4 = vsel %vm25529_vm2, %v18932_v35, -inf  ;;  %v28746_v35 = vsel %vm25529_vm2, %v18938_v8, -inf }
0x118d   : > { %v18298_v34 = vpop.f32.mrf.mxu1  ;;  %v18844_v55 = vpop.f32.mrf.mxu0  ;;  %v18976_v37 = vsel %vm4019_vm3, %v28734_v4, -inf }
0x118e   : > { %v18933_v42 = vmul.f32 19.595919, %v18298_v34  ;;  %18989 = vmax.xlane.f32.xlu0 %v18988_v19  ;;  %v18940_v22 = vmul.f32 19.595919, %v18844_v55 }
0x118f   : > { %v23171_v62 = vpop.f32.mrf.mxu1  ;;  %v23206_v32 = vpop.f32.mrf.mxu0 }
0x1190   : > { %v28738_v57 = vsel %vm25529_vm2, %v18933_v42, -inf  ;;  %v18994_v42 = vsel %vm4019_vm3, %v28746_v35, -inf  ;;  %v28752_v34 = vsel %vm25529_vm2, %v18940_v22, -inf }
0x1191   : > { %v18454_v45 = vpop.f32.mrf.mxu1  ;;  %v18979_v46 = vsel %vm4019_vm3, %v28738_v57, -inf  ;;  %v19000_v17 = vsel %vm4019_vm3, %v28752_v34, -inf }
0x1192   : > { %18977 = vmax.xlane.f32.xlu0 %v18976_v37  ;;  %18980 = vmax.xlane.f32.xlu1 %v18979_v46  ;;  %v18935_v46 = vmul.f32 19.595919, %v18454_v45 }
0x1193   : > { %v23181_v62 = vpop.f32.mrf.mxu1 }
0x1194   : > { %v28762_v22 = vsel %vm25529_vm2, %v18935_v46, -inf }
0x1195   : > { %v18610_v29 = vpop.f32.mrf.mxu1  ;;  %v18985_v62 = vsel %vm4019_vm3, %v28762_v22, -inf }
0x1196   : > { %18995 = vmax.xlane.f32.xlu0 %v18994_v42  ;;  %v28770_v42 = vpop.permute.xlu1 %19366 }
0x1197   : > { %v23191_v19 = vpop.f32.mrf.mxu1 }
0x1199   : > { %v18766_v32 = vpop.f32.mrf.mxu1 }
0x119a   : > { %19001 = vmax.xlane.f32.xlu0 %v19000_v17  ;;  %v28768_v17 = vpop.permute.xlu0 %19289  ;;  %v18939_v45 = vmul.f32 19.595919, %v18766_v32 }
0x119b   : > { %v23201_v8 = vpop.f32.mrf.mxu1 }
0x119c   : > { %v28778_v8 = vpop.permute.xlu1 %19520 }
0x119d   : > { %v18922_v55 = vpop.f32.mrf.mxu1 }
0x119e   : > { %v28772_v19 = vpop.permute.xlu0 %19443 }
0x119f   : > { %v23211_v37 = vpop.f32.mrf.mxu1 }
0x11a2   : > { %v28780_v37 = vpop.permute.xlu0 %19597 }
0x11a3   : > { %19828 = vrot.lane.b32.xlu1 %v28346_v38, %s24367_s21  ;;  %v18937_v38 = vmul.f32 19.595919, %v18610_v29  ;;  %v28788_v29 = vpop.permute.xlu1 %19674 }
0x11b0   : > { %19751 = vrot.lane.b32.xlu0 %v29890_v26, %s24367_s21  ;;  %v28776_v26 = vsel %vm25529_vm2, %v18937_v38, -inf }
0x11b1   : > { %v18991_v46 = vsel %vm4019_vm3, %v28776_v26, -inf }
0x11c7   : > { %18986 = vmax.xlane.f32.xlu1 %v18985_v62  ;;  %v18941_v62 = vmul.f32 19.595919, %v18922_v55 }
0x11c9   : > { %v28794_v32 = vsel %vm25529_vm2, %v18941_v62, -inf }
0x11d8   : > { %19905 = vrot.lane.b32.xlu1 %v29894_v25, %s24367_s21  ;;  %v28786_v25 = vsel %vm25529_vm2, %v18939_v45, -inf  ;;  %v19003_v45 = vsel %vm4019_vm3, %v28794_v32, -inf }
0x11d9   : > { %v18997_v38 = vsel %vm4019_vm3, %v28786_v25, -inf }
0x11fc   : > { %18992 = vmax.xlane.f32.xlu1 %v18991_v46 }
0x11ff   : > { %v18960_v61 = vpop.xlane.xlu0 %18959 }
0x1200   : > { %v19006_v6 = vsub.f32 %v28667_v33, %v18960_v61  ;;  %18998 = vmax.xlane.f32.xlu1 %v18997_v38 }
0x1202   : > { %v19022_v63 = vmul.f32 1.442695, %v19006_v6 }
0x1203   : > { %v18963_v39 = vpop.xlane.xlu1 %18962 }
0x1204   : > { %24143 = vpow2.f32 %v19022_v63  ;;  %v19007_v55 = vsub.f32 %v28681_v7, %v18963_v39  ;;  %19004 = vmax.xlane.f32.xlu1 %v19003_v45 }
0x1206   : > { %v19024_v46 = vmul.f32 1.442695, %v19007_v55 }
0x1207   : > { %v18966_v51 = vpop.xlane.xlu0 %18965 }
0x1208   : > { %24145 = vpow2.f32 %v19024_v46  ;;  %v19008_v43 = vsub.f32 %v28690_v58, %v18966_v51 }
0x120a   : > { %v19026_v14 = vmul.f32 1.442695, %v19008_v43 }
0x120b   : > { %v18969_v62 = vpop.xlane.xlu0 %18968 }
0x120c   : > { %24147 = vpow2.f32 %v19026_v14  ;;  %v19009_v61 = vsub.f32 %v28704_v41, %v18969_v62 }
0x120e   : > { %v19028_v33 = vmul.f32 1.442695, %v19009_v61 }
0x120f   : > { %v18972_v6 = vpop.xlane.xlu0 %18971 }
0x1210   : > { %24149 = vpow2.f32 %v19028_v33  ;;  %v19010_v38 = vsub.f32 %v28710_v49, %v18972_v6 }
0x1211   : > { %v28803_v15 = vpop.eup %24143 }
0x1212   : > { %v19030_v63 = vmul.f32 1.442695, %v19010_v38  ;;  %v19054_v39 = vsel %vm4019_vm3, %v28803_v15, 0.0 }
0x1213   : > { %v18984_v7 = vpop.xlane.xlu0 %18983  ;;  %v18975_v45 = vpop.xlane.xlu1 %18974  ;;  %19055 = vadd.xlane.f32.xlu0 %v19054_v39 }
0x1214   : > { %24151 = vpow2.f32 %v19030_v63  ;;  %v19014_v43 = vsub.f32 %v28716_v11, %v18984_v7  ;;  %v19011_v51 = vsub.f32 %v28720_v50, %v18975_v45 }
0x1215   : > { %v28809_v58 = vpop.eup %24145 }
0x1216   : > { %v19038_v41 = vmul.f32 1.442695, %v19014_v43  ;;  %v19032_v55 = vmul.f32 1.442695, %v19011_v51  ;;  %v19057_v49 = vsel %vm4019_vm3, %v28809_v58, 0.0 }
0x1217   : > { %v18990_v46 = vpop.xlane.xlu0 %18989  ;;  %19058 = vadd.xlane.f32.xlu1 %v19057_v49 }
0x1218   : > { %24153 = vpow2.f32 %v19038_v41  ;;  %v19016_v14 = vsub.f32 %v28728_v30, %v18990_v46 }
0x1219   : > { %v28814_v62 = vpop.eup %24147  ;;  %24155 = vpow2.f32 %v19032_v55 }
0x121a   : > { %v19042_v61 = vmul.f32 1.442695, %v19016_v14  ;;  %v19060_v11 = vsel %vm4019_vm3, %v28814_v62, 0.0 }
0x121b   : > { %19061 = vadd.xlane.f32.xlu0 %v19060_v11  ;;  %v18978_v50 = vpop.xlane.xlu0 %18977  ;;  %v18981_v33 = vpop.xlane.xlu1 %18980 }
0x121c   : > { %v19012_v6 = vsub.f32 %v28734_v4, %v18978_v50  ;;  %24157 = vpow2.f32 %v19042_v61  ;;  %v19013_v39 = vsub.f32 %v28738_v57, %v18981_v33 }
0x121d   : > { %v28819_v38 = vpop.eup %24149 }
0x121e   : > { %v19034_v63 = vmul.f32 1.442695, %v19012_v6  ;;  %v19063_v30 = vsel %vm4019_vm3, %v28819_v38, 0.0  ;;  %v19036_v51 = vmul.f32 1.442695, %v19013_v39 }
0x121f   : > { %v18996_v7 = vpop.xlane.xlu0 %18995  ;;  %19064 = vadd.xlane.f32.xlu1 %v19063_v30  ;;  %v28855_v39 = vpop.permute.xlu1 %19828 }
0x1220   : > { %24159 = vpow2.f32 %v19034_v63  ;;  %v19018_v45 = vsub.f32 %v28746_v35, %v18996_v7 }
0x1221   : > { %v28825_v43 = vpop.eup %24151 }
0x1222   : > { %v19046_v41 = vmul.f32 1.442695, %v19018_v45  ;;  %v19066_v4 = vsel %vm4019_vm3, %v28825_v43, 0.0 }
0x1223   : > { %19067 = vadd.xlane.f32.xlu0 %v19066_v4  ;;  %v19002_v30 = vpop.xlane.xlu0 %19001 }
0x1224   : > { %24161 = vpow2.f32 %v19046_v41 }
0x1225   : > { %v28829_v55 = vpop.eup %24153  ;;  %24163 = vpow2.f32 %v19036_v51  ;;  %v19020_v51 = vsub.f32 %v28752_v34, %v19002_v30 }
0x1226   : > { %v19078_v57 = vsel %vm4019_vm3, %v28829_v55, 0.0  ;;  %v28833_v49 = vpop.eup %24155 }
0x1227   : > { %19079 = vadd.xlane.f32.xlu1 %v19078_v57  ;;  %v19069_v35 = vsel %vm4019_vm3, %v28833_v49, 0.0  ;;  %v19050_v4 = vmul.f32 1.442695, %v19020_v51 }
0x1229   : > { %v28837_v46 = vpop.eup %24157 }
0x122a   : > { %v19084_v11 = vsel %vm4019_vm3, %v28837_v46, 0.0 }
0x122b   : > { %19070 = vadd.xlane.f32.xlu1 %v19069_v35 }
0x122d   : > { %v28839_v14 = vpop.eup %24159 }
0x122e   : > { %v19072_v61 = vsel %vm4019_vm3, %v28839_v14, 0.0 }
0x122f   : > { %19073 = vadd.xlane.f32.xlu0 %v19072_v61  ;;  %19085 = vadd.xlane.f32.xlu1 %v19084_v11 }
0x1231   : > { %v28845_v50 = vpop.eup %24161 }
0x1232   : > { %v19090_v33 = vsel %vm4019_vm3, %v28845_v50, 0.0  ;;  %v28849_v6 = vpop.eup %24163 }
0x1233   : > { %19091 = vadd.xlane.f32.xlu1 %v19090_v33  ;;  %v19075_v63 = vsel %vm4019_vm3, %v28849_v6, 0.0 }
0x1237   : > { %19076 = vadd.xlane.f32.xlu1 %v19075_v63 }
0x1248   : > { %19982 = vrot.lane.b32.xlu1 %v29898_v59, %s24367_s21 }
0x1250   : > { %v18987_v7 = vpop.xlane.xlu1 %18986 }
0x1251   : > { %v19015_v45 = vsub.f32 %v28762_v22, %v18987_v7  ;;  %v28876_v7 = vpop.permute.xlu0 %19751 }
0x1253   : > { %v19040_v41 = vmul.f32 1.442695, %v19015_v45 }
0x1254   : > { %v28869_v34 = vpop.permute.xlu1 %19905 }
0x1255   : > { %24165 = vpow2.f32 %v19040_v41 }
0x1256   : > { %24167 = vpow2.f32 %v19050_v4 }
0x1262   : > { %v28859_v57 = vpop.eup %24165 }
0x1263   : > { %v19081_v35 = vsel %vm4019_vm3, %v28859_v57, 0.0  ;;  %v28863_v61 = vpop.eup %24167 }
0x1264   : > { %19082 = vadd.xlane.f32.xlu0 %v19081_v35  ;;  %v19096_v59 = vsel %vm4019_vm3, %v28863_v61, 0.0 }
0x126c   : > { %19097 = vadd.xlane.f32.xlu1 %v19096_v59 }
0x127d   : > { %20136 = vrot.lane.b32.xlu1 %v28374_v47, %s24367_s21 }
0x1281   : > { %20290 = vrot.lane.b32.xlu1 %v29901_v12, %s24367_s21 }
0x1285   : > { %v18993_v22 = vpop.xlane.xlu1 %18992 }
0x1286   : > { %v19017_v11 = vsub.f32 %v28776_v26, %v18993_v22 }
0x1288   : > { %v19044_v33 = vmul.f32 1.442695, %v19017_v11 }
0x1289   : > { %v18999_v63 = vpop.xlane.xlu1 %18998 }
0x128a   : > { %24169 = vpow2.f32 %v19044_v33 }
0x128d   : > { %v19005_v47 = vpop.xlane.xlu1 %19004 }
0x1297   : > { %v28874_v30 = vpop.eup %24169 }
0x1298   : > { %v19087_v45 = vsel %vm4019_vm3, %v28874_v30, 0.0 }
0x1299   : > { %19088 = vadd.xlane.f32.xlu0 %v19087_v45 }
0x129c   : > { %v19056_v51 = vpop.xlane.xlu0 %19055 }
0x129d   : > { %24171 = vrcp.f32 %v19056_v51 }
0x12a0   : > { %v19059_v41 = vpop.xlane.xlu1 %19058 }
0x12a1   : > { %24173 = vrcp.f32 %v19059_v41 }
0x12a4   : > { %v19062_v12 = vpop.xlane.xlu0 %19061 }
0x12a5   : > { %24175 = vrcp.f32 %v19062_v12 }
0x12a8   : > { %v19065_v4 = vpop.xlane.xlu1 %19064 }
0x12a9   : > { %24177 = vrcp.f32 %v19065_v4 }
0x12aa   : > { %v24172_v26 = vpop.eup %24171 }
0x12ab   : > { %v19118_v35 = vmul.f32 %v24172_v26, %v28803_v15 }
0x12ac   : > { %v19068_v59 = vpop.xlane.xlu0 %19067 }
0x12ad   : > { %24179 = vrcp.f32 %v19068_v59  ;;  %23215 = vmatmul.mubr.msk.f32.vlgmr.msra.gmra.mxu0 %vm4019_vm3, %v19118_v35 }
0x12ae   : > { %v24174_v22 = vpop.eup %24173  ;;  %23223 = vmatpush3.msra.mxu0 %v28768_v17  ;;  %23224 = vmatprep.mubr.msk.f32.mxu0 %vm24369_vm1, %v29889_v28 }
0x12af   : > { %v19119_v11 = vmul.f32 %v24174_v22, %v28809_v58  ;;  %20059 = vrot.lane.b32.xlu0 %v29895_v0, %s24367_s21  ;;  %23232 = vmatprep.subr.mxu0 %v29889_v28  ;;  %v19019_v58 = vsub.f32 %v28786_v25, %v18999_v63 }
0x12b0   : > { %v19080_v33 = vpop.xlane.xlu1 %19079 }
0x12b1   : > { %23220 = vmatmul.mubr.msk.f32.vlgmr.msra.gmra.mxu1 %vm4019_vm3, %v19119_v11  ;;  %v19048_v12 = vmul.f32 1.442695, %v19019_v58 }
0x12b2   : > { %v24176_v15 = vpop.eup %24175  ;;  %23228 = vmatpush3.msra.mxu1 %v28770_v42  ;;  %23229 = vmatprep.mubr.msk.f32.mxu1 %vm24369_vm1, %v29889_v28 }
0x12b3   : > { %v19120_v17 = vmul.f32 %v24176_v15, %v28814_v62  ;;  %23237 = vmatprep.subr.mxu1 %v29889_v28  ;;  %v19021_v62 = vsub.f32 %v28794_v32, %v19005_v47 }
0x12b4   : > { %v19071_v45 = vpop.xlane.xlu1 %19070 }
0x12b5   : > { %24181 = vrcp.f32 %v19071_v45  ;;  %23225 = vmatmul.mubr.msk.f32.vlgmr.msra.gmra.mxu0 %vm4019_vm3, %v19120_v17 }
0x12b6   : > { %v24178_v0 = vpop.eup %24177  ;;  %23233 = vmatpush3.msra.mxu0 %v28772_v19  ;;  %23234 = vmatprep.mubr.msk.f32.mxu0 %vm24369_vm1, %v29889_v28 }
0x12b7   : > { %v19121_v42 = vmul.f32 %v24178_v0, %v28819_v38  ;;  %23242 = vmatprep.subr.mxu0 %v29889_v28  ;;  %v19052_v38 = vmul.f32 1.442695, %v19021_v62  ;;  %v23809_v62 = vld [vmem:[#allocation7 + $0x22c] ss:$12 sps:$4 sm:$0xff]  }
0x12b8   : > { %v19074_v51 = vpop.xlane.xlu0 %19073  ;;  %v19086_v41 = vpop.xlane.xlu1 %19085 }
0x12b9   : > { %24183 = vrcp.f32 %v19074_v51  ;;  %23230 = vmatmul.mubr.msk.f32.vlgmr.msra.gmra.mxu1 %vm4019_vm3, %v19121_v42  ;;  %v23807_v51 = vld [vmem:[#allocation7 + $0x228] ss:$12 sps:$4 sm:$0xff]  }
0x12ba   : > { %v24180_v25 = vpop.eup %24179  ;;  %23238 = vmatpush3.msra.mxu1 %v28778_v8  ;;  %23239 = vmatprep.mubr.msk.f32.mxu1 %vm24369_vm1, %v29889_v28  ;;  %24185 = vrcp.f32 %v19080_v33 }
0x12bb   : > { %v19122_v19 = vmul.f32 %v24180_v25, %v28825_v43  ;;  %23247 = vmatprep.subr.mxu1 %v29889_v28  ;;  %24187 = vpow2.f32 %v19048_v12  ;;  %v23812_v12 = vld [vmem:[#allocation7 + $0x214] ss:$12 sps:$4 sm:$0xff]   ;;  %v23810_v25 = vld [vmem:[#allocation7 + $0x210] ss:$12 sps:$4 sm:$0xff]  }
0x12bc   : > { %v19092_v63 = vpop.xlane.xlu1 %19091  ;;  %24189 = vrcp.f32 %v19086_v41 }
0x12bd   : > { %23235 = vmatmul.mubr.msk.f32.vlgmr.msra.gmra.mxu0 %vm4019_vm3, %v19122_v19  ;;  %24191 = vpow2.f32 %v19052_v38  ;;  %v23815_v19 = vld [vmem:[#allocation7 + $0x1fc] ss:$12 sps:$4 sm:$0xff]  }
0x12be   : > { %23243 = vmatpush3.msra.mxu0 %v28780_v37  ;;  %23244 = vmatprep.mubr.msk.f32.mxu0 %vm24369_vm1, %v29889_v28 }
0x12bf   : > { %23252 = vmatprep.subr.mxu0 %v29889_v28 }
0x12c0   : > { %v19077_v8 = vpop.xlane.xlu1 %19076 }
0x12c1   : > { %24193 = vrcp.f32 %v19077_v8  ;;  %v23813_v8 = vld [vmem:[#allocation7 + $0x1f8] ss:$12 sps:$4 sm:$0xff]  }
0x12c2   : > { %v24182_v32 = vpop.eup %24181 }
0x12c3   : > { %v19123_v43 = vmul.f32 %v24182_v32, %v28833_v49  ;;  %v23816_v32 = vld [vmem:[#allocation7 + $0x230] ss:$12 sps:$4 sm:$0xff]  }
0x12c4   : > { %v19983_v11 = vpop.permute.xlu1 %19982 }
0x12c5   : > { %23240 = vmatmul.mubr.msk.f32.vlgmr.msra.gmra.mxu1 %vm4019_vm3, %v19123_v43 }
0x12c6   : > { %v24184_v47 = vpop.eup %24183  ;;  %23248 = vmatpush3.msra.mxu1 %v28788_v29  ;;  %23249 = vmatprep.mubr.msk.f32.mxu1 %vm24369_vm1, %v29889_v28 }
0x12c7   : > { %v19124_v37 = vmul.f32 %v24184_v47, %v28839_v14  ;;  %23257 = vmatprep.subr.mxu1 %v29889_v28  ;;  %v24186_v4 = vpop.eup %24185 }
0x12c8   : > { %v28922_v26 = vpop.eup %24187  ;;  %v19126_v49 = vmul.f32 %v24186_v4, %v28829_v55  ;;  %v23817_v4 = vld [vmem:[#allocation7 + $0x1e0] ss:$12 sps:$4 sm:$0xff]  }
0x12c9   : > { %23245 = vmatmul.mubr.msk.f32.vlgmr.msra.gmra.mxu0 %vm4019_vm3, %v19124_v37  ;;  %v24190_v29 = vpop.eup %24189  ;;  %v19093_v14 = vsel %vm4019_vm3, %v28922_v26, 0.0 }
0x12ca   : > { %23253 = vmatpush3.msra.mxu0 %v28876_v7  ;;  %23254 = vmatprep.mubr.msk.f32.mxu0 %vm24369_vm1, %v29889_v28  ;;  %v28929_v35 = vpop.eup %24191  ;;  %v19128_v7 = vmul.f32 %v24190_v29, %v28837_v46  ;;  %v23821_v29 = vld [vmem:[#allocation7 + $0x200] ss:$12 sps:$4 sm:$0xff]  }
0x12cb   : > { %23262 = vmatprep.subr.mxu0 %v29889_v28  ;;  %v19099_v55 = vsel %vm4019_vm3, %v28929_v35, 0.0 }
0x12cd   : > { %23255 = vmatmul.mubr.msk.f32.vlgmr.msra.gmra.mxu0 %vm4019_vm3, %v19126_v49  ;;  %v23820_v49 = vld [vmem:[#allocation7 + $0x218] ss:$12 sps:$4 sm:$0xff]  }
0x12ce   : > { %v24194_v59 = vpop.eup %24193  ;;  %23263 = vmatpush3.msra.mxu0 %v28869_v34  ;;  %19094 = vadd.xlane.f32.xlu0 %v19093_v14 }
0x12cf   : > { %v19125_v22 = vmul.f32 %v24194_v59, %v28849_v6  ;;  %23264 = vmatprep.mubr.msk.f32.mxu0 %vm24369_vm1, %v29889_v28  ;;  %23272 = vmatprep.subr.mxu0 %v29889_v28 }
0x12d1   : > { %23250 = vmatmul.mubr.msk.f32.vlgmr.msra.gmra.mxu1 %vm4019_vm3, %v19125_v22  ;;  %23265 = vmatmul.mubr.msk.f32.vlgmr.msra.gmra.mxu0 %vm4019_vm3, %v19128_v7 }
0x12d2   : > { %23258 = vmatpush3.msra.mxu1 %v28855_v39  ;;  %19100 = vadd.xlane.f32.xlu0 %v19099_v55 }
0x12d3   : > { %23259 = vmatprep.mubr.msk.f32.mxu1 %vm24369_vm1, %v29889_v28  ;;  %23267 = vmatprep.subr.mxu1 %v29889_v28 }
0x12d4   : > { %23274 = vmatprep.mubr.msk.f32.mxu0 %vm24369_vm1, %v29889_v28 }
0x12e8   : > { %20213 = vrot.lane.b32.xlu0 %v29900_v1, %s24367_s21 }
0x12ed   : > { %v19083_v46 = vpop.xlane.xlu0 %19082 }
0x12ee   : > { %24195 = vrcp.f32 %v19083_v46 }
0x12ef   : > { %24197 = vrcp.f32 %v19092_v63 }
0x12fb   : > { %v24196_v6 = vpop.eup %24195 }
0x12fc   : > { %v19127_v34 = vmul.f32 %v24196_v6, %v28859_v57  ;;  %v24198_v33 = vpop.eup %24197  ;;  %v19098_v57 = vpop.xlane.xlu1 %19097 }
0x12fd   : > { %v19130_v1 = vmul.f32 %v24198_v33, %v28845_v50 }
0x12fe   : > { %23260 = vmatmul.mubr.msk.f32.vlgmr.msra.gmra.mxu1 %vm4019_vm3, %v19127_v34 }
0x12ff   : > { %23268 = vmatpush3.msra.mxu1 %v19983_v11  ;;  %23269 = vmatprep.mubr.msk.f32.mxu1 %vm24369_vm1, %v29889_v28 }
0x1300   : > { %23277 = vmatprep.subr.mxu1 %v29889_v28  ;;  %v20137_v58 = vpop.permute.xlu1 %20136 }
0x1304   : > { %v20291_v43 = vpop.permute.xlu1 %20290 }
0x1322   : > { %v19089_v39 = vpop.xlane.xlu0 %19088 }
0x1323   : > { %24199 = vrcp.f32 %v19089_v39 }
0x1324   : > { %24201 = vrcp.f32 %v19098_v57 }
0x1326   : > { %v20060_v15 = vpop.permute.xlu0 %20059 }
0x1327   : > { %23273 = vmatpush3.msra.mxu0 %v20060_v15 }
0x1328   : > { %23275 = vmatmul.mubr.msk.f32.vlgmr.msra.gmra.mxu0 %vm4019_vm3, %v19130_v1  ;;  %23282 = vmatprep.subr.mxu0 %v29889_v28 }
0x1329   : > { %23284 = vmatprep.mubr.msk.f32.mxu0 %vm24369_vm1, %v29889_v28 }
0x1330   : > { %v24200_v17 = vpop.eup %24199 }
0x1331   : > { %v19129_v45 = vmul.f32 %v24200_v17, %v28874_v30  ;;  %v24202_v42 = vpop.eup %24201 }
0x1332   : > { %v19132_v41 = vmul.f32 %v24202_v42, %v28863_v61  ;;  %v23819_v61 = vld [vmem:[#allocation7 + $0x1e4] ss:$12 sps:$4 sm:$0xff]  }
0x1333   : > { %23270 = vmatmul.mubr.msk.f32.vlgmr.msra.gmra.mxu1 %vm4019_vm3, %v19129_v45 }
0x1334   : > { %23278 = vmatpush3.msra.mxu1 %v20137_v58  ;;  %23279 = vmatprep.mubr.msk.f32.mxu1 %vm24369_vm1, %v29889_v28 }
0x1335   : > { %23287 = vmatprep.subr.mxu1 %v29889_v28 }
0x1357   : > { %v19095_v50 = vpop.xlane.xlu0 %19094 }
0x1358   : > { %24203 = vrcp.f32 %v19095_v50 }
0x135b   : > { %v19101_v0 = vpop.xlane.xlu0 %19100 }
0x135c   : > { %24205 = vrcp.f32 %v19101_v0 }
0x135f   : > { %v20214_v30 = vpop.permute.xlu0 %20213 }
0x1360   : > { %23283 = vmatpush3.msra.mxu0 %v20214_v30 }
0x1361   : > { %23285 = vmatmul.mubr.msk.f32.vlgmr.msra.gmra.mxu0 %vm4019_vm3, %v19132_v41  ;;  %20486 = vmatprep.subr.bf16.mxu0 %v23809_v62 }
0x1362   : > { %20487 = vmatpush1.bf16.msra.mxu0 %v23807_v51  ;;  %20510 = vmatprep.mubr.bf16.mxu0 %v29902_v13 }
0x1363   : > { %20488 = vmatprep.subr.bf16.mxu0 %v23812_v12 }
0x1365   : > { %v24204_v38 = vpop.eup %24203 }
0x1366   : > { %v19131_v63 = vmul.f32 %v24204_v38, %v28922_v26  ;;  %20489 = vmatpush1.bf16.msra.mxu0 %v23810_v25 }
0x1367   : > { %20490 = vmatprep.subr.bf16.mxu0 %v23815_v19 }
0x1368   : > { %23280 = vmatmul.mubr.msk.f32.vlgmr.msra.gmra.mxu1 %vm4019_vm3, %v19131_v63 }
0x1369   : > { %v24206_v47 = vpop.eup %24205  ;;  %23288 = vmatpush3.msra.mxu1 %v20291_v43  ;;  %23289 = vmatprep.mubr.msk.f32.mxu1 %vm24369_vm1, %v29889_v28  ;;  %v23822_v28 = vld [vmem:[#allocation7 + $0x1e8] ss:$12 sps:$4 sm:$0xff]  }
0x136a   : > { %v19133_v37 = vmul.f32 %v24206_v47, %v28929_v35  ;;  %23292 = vmatprep.subr.bf16.mxu1 %v23816_v32  ;;  %20491 = vmatpush1.bf16.msra.mxu0 %v23813_v8 }
0x136b   : > { %20492 = vmatprep.subr.bf16.mxu0 %v23819_v61 }
0x136c   : > { %23290 = vmatmul.mubr.msk.f32.vlgmr.msra.gmra.mxu1 %vm4019_vm3, %v19133_v37 }
0x136d   : > { %v19207_v26 = vpop.f32.mrf.mxu0  ;;  %23293 = vmatpush3.bf16.msra.mxu1 %v23816_v32 }
0x136e   : > { %23294 = vmatprep.subr.bf16.mxu1 %v23820_v49  ;;  %20493 = vmatpush1.bf16.msra.mxu0 %v23817_v4 }
0x136f   : > { %v23216_v14 = vpop.f32.mrf.mxu0 }
0x1371   : > { %v19284_v59 = vpop.f32.mrf.mxu1  ;;  %23295 = vmatpush3.bf16.msra.mxu1 %v23820_v49 }
0x1372   : > { %v20366_v7 = vpack.c.bf16 %v19284_v59, %v19207_v26  ;;  %23296 = vmatprep.subr.bf16.mxu1 %v23821_v29  ;;  %v20736_v59 = vld [vmem:[%s29260_s3] sm:$0x7] }
0x1373   : > { %v23221_v22 = vpop.f32.mrf.mxu1 }
0x1374   : > { %21623 = vmatmul.mubr.msk.bf16.vlgmr.msra.gmra.mxu0 %vm2768_vm0, %v20366_v7  ;;  %23300 = vmatprep.mubr.msk.bf16.mxu1 %vm2768_vm0, %v20366_v7  ;;  %v29959_v22 = vld [vmem:[#allocation103_spill] sm:$0xff] }
0x1375   : > { %v19361_v35 = vpop.f32.mrf.mxu0  ;;  %23297 = vmatpush3.bf16.msra.mxu1 %v23821_v29  ;;  %20520 = vmatprep.mubr.bf16.mxu0 %v29902_v13  ;;  %v29957_v29 = vld [vmem:[#allocation139_spill] sm:$0xff] }
0x1376   : > { %23298 = vmatprep.subr.bf16.mxu1 %v23822_v28  ;;  %v20740_v14 = vsub.s32 0, %v29957_v29  ;;  %v20744_v7 = vsub.s32 1, %v29957_v29 }
0x1377   : > { %v23226_v55 = vpop.f32.mrf.mxu0 }
0x1378   : > { %v29006_v55 = vrot.slane %v20736_v59, %v20740_v14 }
0x1379   : > { %v19438_v46 = vpop.f32.mrf.mxu1  ;;  %23299 = vmatpush3.bf16.msra.mxu1 %v23822_v28  ;;  %v29958_v28 = vld [vmem:[#allocation124_spill] sm:$0xff] }
0x137a   : > { %v20367_v6 = vpack.c.bf16 %v19438_v46, %v19361_v35  ;;  %v8527_v35 = vadd.f32 %v29959_v22, %v29958_v28  ;;  %v29960_v46 = vld [vmem:[#allocation84_spill] sm:$0xff] }
0x137b   : > { %v23231_v34 = vpop.f32.mrf.mxu1 }
0x137c   : > { %21624 = vmatmul.mubr.msk.bf16.gmra.mxu0 %vm2768_vm0, %v20367_v6  ;;  %23301 = vmatmul.mubr.msk.bf16.vlgmr.msra.gmra.mxu1 %vm2768_vm0, %v20367_v6  ;;  %v11614_v6 = vadd.f32 %v29960_v46, %v8527_v35 }
0x137d   : > { %v19515_v11 = vpop.f32.mrf.mxu0  ;;  %20530 = vmatprep.mubr.bf16.mxu0 %v29902_v13 }
0x137f   : > { %v23236_v39 = vpop.f32.mrf.mxu0 }
0x1385   : > { %v19592_v33 = vpop.f32.mrf.mxu1 }
0x1386   : > { %v20368_v1 = vpack.c.bf16 %v19592_v33, %v19515_v11  ;;  %v29010_v11 = vrot.slane %v20736_v59, %v20744_v7  ;;  %v29961_v33 = vld [vmem:[#allocation127_spill] sm:$0xff] }
0x1387   : > { %v23241_v15 = vpop.f32.mrf.mxu1 }
0x1388   : > { %21625 = vmatmul.mubr.msk.bf16.gmra.mxu0 %vm2768_vm0, %v20368_v1  ;;  %23304 = vmatprep.mubr.msk.bf16.mxu1 %vm2768_vm0, %v20368_v1  ;;  %v14672_v1 = vadd.f32 %v29961_v33, %v11614_v6 }
0x1389   : > { %v19669_v57 = vpop.f32.mrf.mxu0  ;;  %20540 = vmatprep.mubr.bf16.mxu0 %v29902_v13 }
0x138b   : > { %v23246_v17 = vpop.f32.mrf.mxu0 }
0x138c   : > { %v20748_v17 = vsub.s32 2, %v29957_v29 }
0x138d   : > { %v19823_v45 = vpop.f32.mrf.mxu0 }
0x138f   : > { %v23256_v58 = vpop.f32.mrf.mxu0 }
0x1390   : > { %v17634_v58 = vadd.f32 %v28561_v18, %v14672_v1 }
0x1391   : > { %v19746_v50 = vpop.f32.mrf.mxu1  ;;  %v19977_v0 = vpop.f32.mrf.mxu0 }
0x1392   : > { %v20369_v42 = vpack.c.bf16 %v19746_v50, %v19669_v57 }
0x1393   : > { %v23251_v62 = vpop.f32.mrf.mxu1  ;;  %v23266_v51 = vpop.f32.mrf.mxu0 }
0x1394   : > { %21626 = vmatmul.mubr.msk.bf16.gmra.mxu0 %vm2768_vm0, %v20369_v42  ;;  %23305 = vmatmul.mubr.msk.bf16.gmra.mxu1 %vm2768_vm0, %v20369_v42  ;;  %v29963_v42 = vld [vmem:[#allocation160_spill] sm:$0xff]  ;;  %v29965_v51 = vld [vmem:[#allocation161_spill] sm:$0xff] }
0x1395   : > { %20550 = vmatprep.mubr.bf16.mxu0 %v29902_v13 }
0x13be   : > { %v19900_v41 = vpop.f32.mrf.mxu1 }
0x13bf   : > { %v20370_v30 = vpack.c.bf16 %v19900_v41, %v19823_v45 }
0x13c0   : > { %v23261_v12 = vpop.f32.mrf.mxu1 }
0x13c1   : > { %21627 = vmatmul.mubr.msk.bf16.gmra.mxu0 %vm2768_vm0, %v20370_v30  ;;  %23308 = vmatprep.mubr.msk.bf16.mxu1 %vm2768_vm0, %v20370_v30 }
0x13c2   : > { %20560 = vmatprep.mubr.bf16.mxu0 %v29902_v13 }
0x13e8   : > { %v20131_v25 = vpop.f32.mrf.mxu0 }
0x13ea   : > { %v23276_v19 = vpop.f32.mrf.mxu0 }
0x13eb   : > { %v29966_v19 = vld [vmem:[#allocation105_spill] sm:$0xff] }
0x13f3   : > { %v20054_v38 = vpop.f32.mrf.mxu1 }
0x13f4   : > { %v20371_v63 = vpack.c.bf16 %v20054_v38, %v19977_v0  ;;  %v29962_v0 = vld [vmem:[#allocation55_spill] sm:$0xff] }
0x13f5   : > { %v23271_v8 = vpop.f32.mrf.mxu1  ;;  %v8537_v62 = vadd.f32 %v29963_v42, %v29962_v0  ;;  %v29973_v42 = vld [vmem:[#allocation157_spill] sm:$0xff] }
0x13f6   : > { %21628 = vmatmul.mubr.msk.bf16.gmra.mxu0 %vm2768_vm0, %v20371_v63  ;;  %23309 = vmatmul.mubr.msk.bf16.gmra.mxu1 %vm2768_vm0, %v20371_v63  ;;  %v29967_v63 = vld [vmem:[#allocation87_spill] sm:$0xff] }
0x13f7   : > { %20570 = vmatprep.mubr.bf16.mxu0 %v29902_v13  ;;  %v11620_v8 = vadd.f32 %v29967_v63, %v8537_v62 }
0x1421   : > { %v20285_v32 = vpop.f32.mrf.mxu0 }
0x1423   : > { %v23286_v61 = vpop.f32.mrf.mxu0 }
0x1428   : > { %v20208_v43 = vpop.f32.mrf.mxu1 }
0x1429   : > { %v20372_v47 = vpack.c.bf16 %v20208_v43, %v20131_v25  ;;  %v29030_v25 = vrot.slane %v20736_v59, %v20748_v17  ;;  %v29971_v17 = vld [vmem:[#allocation168_spill] sm:$0xff] }
0x142a   : > { %v23281_v37 = vpop.f32.mrf.mxu1 }
0x142b   : > { %21629 = vmatmul.mubr.msk.bf16.gmra.mxu0 %vm2768_vm0, %v20372_v47  ;;  %23312 = vmatprep.mubr.msk.bf16.mxu1 %vm2768_vm0, %v20372_v47  ;;  %v29968_v37 = vld [vmem:[#allocation97_spill] sm:$0xff] }
0x142c   : > { %v20362_v4 = vpop.f32.mrf.mxu1  ;;  %20580 = vmatprep.mubr.bf16.mxu0 %v29902_v13 }
0x142d   : > { %v20373_v49 = vpack.c.bf16 %v20362_v4, %v20285_v32  ;;  %v14678_v4 = vadd.f32 %v29968_v37, %v11620_v8  ;;  %v29974_v8 = vld [vmem:[#allocation101_spill] sm:$0xff]  ;;  %v29979_v37 = vld [vmem:[#allocation108_spill] sm:$0xff] }
0x142e   : > { %v23291_v26 = vpop.f32.mrf.mxu1 }
0x142f   : > { %23313 = vmatmul.mubr.msk.bf16.gmra.mxu1 %vm2768_vm0, %v20373_v49  ;;  %v17640_v22 = vadd.f32 %v28581_v10, %v14678_v4 }
0x1433   : > { %21630 = vmatmul.mubr.msk.bf16.gmra.mxu0 %vm2768_vm0, %v20373_v49  ;;  %v29969_v49 = vld [vmem:[#allocation129_spill] sm:$0xff] }
0x1434   : > { %v20512_v13 = vpop.f32.mrf.mxu0 }
0x1435   : > { %v20688_v34 = vadd.f32 %v20512_v13, %v28553_v2 }
0x1436   : > { %v20514_v39 = vpop.f32.mrf.mxu0 }
0x1437   : > { %v20753_v15 = vadd.f32 %v29006_v55, %v20688_v34  ;;  %v20689_v57 = vadd.f32 %v20514_v39, %v28556_v52  ;;  %v29964_v52 = vld [vmem:[#allocation23_spill] sm:$0xff] }
0x1438   : > { %v20516_v45 = vpop.f32.mrf.mxu0  ;;  %v8637_v41 = vadd.f32 %v29965_v51, %v29964_v52 }
0x1439   : > { %20801 = vst [vmem:[%s29019_s6] sm:$0xff] %v20753_v15  ;;  %v20754_v2 = vadd.f32 %v29010_v11, %v20689_v57  ;;  %v20691_v50 = vadd.f32 %v20516_v45, %v28559_v36  ;;  %v29970_v57 = vld [vmem:[#allocation14_spill] sm:$0xff] }
0x143a   : > { %v20518_v30 = vpop.f32.mrf.mxu0  ;;  %v11615_v38 = vadd.f32 %v29966_v19, %v8637_v41 }
0x143b   : > { %20802 = vst [vmem:[%s29019_s6 + $0x8] sm:$0xff] %v20754_v2  ;;  %v20756_v18 = vadd.f32 %v29006_v55, %v20691_v50  ;;  %v20692_v12 = vadd.f32 %v20518_v30, %v17634_v58  ;;  %v29972_v58 = vld [vmem:[#allocation96_spill] sm:$0xff] }
0x143c   : > { %v20522_v32 = vpop.f32.mrf.mxu0  ;;  %v23302_v36 = vpop.f32.mrf.mxu1  ;;  %v14673_v26 = vadd.f32 %v29969_v49, %v11615_v38 }
0x143d   : > { %20804 = vst [vmem:[%s29019_s6 + $0x18] sm:$0xff] %v20756_v18  ;;  %v20757_v61 = vadd.f32 %v29010_v11, %v20692_v12  ;;  %v20694_v43 = vadd.f32 %v20522_v32, %v28564_v16  ;;  %v20696_v47 = vadd.f32 %v23302_v36, %v28567_v53  ;;  %v29975_v32 = vld [vmem:[#allocation169_spill] sm:$0xff] }
0x143e   : > { %v20524_v29 = vpop.f32.mrf.mxu0  ;;  %v20625_v14 = vpop.f32.mrf.mxu1  ;;  %v17635_v53 = vadd.f32 %v28594_v9, %v14673_v26  ;;  %v8653_v36 = vadd.f32 %v29975_v32, %v29974_v8 }
0x143f   : > { %20805 = vst [vmem:[%s29019_s6 + $0x20] sm:$0xff] %v20757_v61  ;;  %v20759_v59 = vadd.f32 %v29006_v55, %v20694_v43  ;;  %v20761_v7 = vadd.f32 %v29030_v25, %v20696_v47  ;;  %v20695_v28 = vadd.f32 %v20524_v29, %v28570_v44  ;;  %v20690_v16 = vadd.f32 %v20625_v14, %v28573_v31  ;;  %v29977_v61 = vld [vmem:[#allocation176_spill] sm:$0xff]  ;;  %v29980_v14 = vld [vmem:[#allocation163_spill] sm:$0xff] }
0x1440   : > { %v20526_v35 = vpop.f32.mrf.mxu0  ;;  %v23303_v13 = vpop.f32.mrf.mxu1 }
0x1441   : > { %20807 = vst [vmem:[%s29019_s6 + $0x30] sm:$0xff] %v20759_v59  ;;  %20809 = vst [vmem:[%s29019_s6 + $0x40] sm:$0xff] %v20761_v7  ;;  %v20760_v46 = vadd.f32 %v29010_v11, %v20695_v28  ;;  %v20755_v6 = vadd.f32 %v29030_v25, %v20690_v16  ;;  %v20697_v34 = vadd.f32 %v20526_v35, %v28576_v24  ;;  %v29981_v7 = vld [vmem:[#allocation25_spill] sm:$0xff] }
0x1442   : > { %v20699_v44 = vadd.f32 %v23303_v13, %v28579_v3  ;;  %v20528_v31 = vpop.f32.mrf.mxu0  ;;  %v20628_v10 = vpop.f32.mrf.mxu1  ;;  %v8547_v3 = vadd.f32 %v29971_v17, %v29970_v57  ;;  %v29984_v17 = vld [vmem:[#allocation15_spill] sm:$0xff] }
0x1443   : > { %20808 = vst [vmem:[%s29019_s6 + $0x38] sm:$0xff] %v20760_v46  ;;  %20803 = vst [vmem:[%s29019_s6 + $0x10] sm:$0xff] %v20755_v6  ;;  %v20762_v9 = vadd.f32 %v29006_v55, %v20697_v34  ;;  %v20698_v33 = vadd.f32 %v20528_v31, %v17640_v22  ;;  %v20693_v1 = vadd.f32 %v20628_v10, %v17635_v53  ;;  %v29982_v10 = vld [vmem:[#allocation61_spill] sm:$0xff] }
0x1444   : > { %v20764_v39 = vadd.f32 %v29030_v25, %v20699_v44  ;;  %v11626_v2 = vadd.f32 %v29972_v58, %v8547_v3  ;;  %v29985_v3 = vld [vmem:[#allocation184_spill] sm:$0xff] }
0x1445   : > { %20810 = vst [vmem:[%s29019_s6 + $0x48] sm:$0xff] %v20762_v9  ;;  %v20763_v15 = vadd.f32 %v29010_v11, %v20698_v33  ;;  %v20758_v24 = vadd.f32 %v29030_v25, %v20693_v1  ;;  %v29983_v9 = vld [vmem:[#allocation180_spill] sm:$0xff] }
0x1446   : > { %20812 = vst [vmem:[%s29019_s6 + $0x58] sm:$0xff] %v20764_v39  ;;  %v14684_v62 = vadd.f32 %v29973_v42, %v11626_v2  ;;  %v29986_v2 = vld [vmem:[#allocation99_spill] sm:$0xff] }
0x1447   : > { %20811 = vst [vmem:[%s29019_s6 + $0x50] sm:$0xff] %v20763_v15  ;;  %20806 = vst [vmem:[%s29019_s6 + $0x28] sm:$0xff] %v20758_v24 }
0x1448   : > { %v20532_v45 = vpop.f32.mrf.mxu0  ;;  %v17646_v30 = vadd.f32 %v28592_v54, %v14684_v62  ;;  %v29978_v54 = vld [vmem:[#allocation107_spill] sm:$0xff] }
0x1449   : > { %v20700_v50 = vadd.f32 %v20532_v45, %v28584_v60  ;;  %v11627_v47 = vadd.f32 %v29978_v54, %v8653_v36  ;;  %v8567_v45 = vadd.f32 %v29985_v3, %v29984_v17  ;;  %v29993_v54 = vld [vmem:[#allocation177_spill] sm:$0xff]  ;;  %v30007_v3 = vld [vmem:[#allocation186_spill] sm:$0xff] }
0x144a   : > { %v20534_v0 = vpop.f32.mrf.mxu0 }
0x144b   : > { %v20765_v52 = vadd.f32 %v29006_v55, %v20700_v50  ;;  %v20701_v51 = vadd.f32 %v20534_v0, %v28587_v56  ;;  %v29976_v56 = vld [vmem:[#allocation82_spill] sm:$0xff]  ;;  %v14685_v28 = vadd.f32 %v29981_v7, %v11627_v47  ;;  %v11638_v50 = vadd.f32 %v29986_v2, %v8567_v45 }
0x144c   : > { %v20536_v41 = vpop.f32.mrf.mxu0  ;;  %v8557_v43 = vadd.f32 %v29977_v61, %v29976_v56  ;;  %v29987_v0 = vld [vmem:[#allocation78_spill] sm:$0xff] }
0x144d   : > { %20813 = vst [vmem:[%s29019_s6 + $0x60] sm:$0xff] %v20765_v52  ;;  %v20766_v18 = vadd.f32 %v29010_v11, %v20701_v51  ;;  %v20703_v12 = vadd.f32 %v20536_v41, %v28590_v48  ;;  %v29988_v52 = vld [vmem:[#allocation164_spill] sm:$0xff] }
0x144e   : > { %v20538_v19 = vpop.f32.mrf.mxu0  ;;  %v11632_v4 = vadd.f32 %v29979_v37, %v8557_v43  ;;  %v14696_v51 = vadd.f32 %v29988_v52, %v11638_v50  ;;  %v29992_v43 = vld [vmem:[#allocation73_spill] sm:$0xff]  ;;  %v29994_v37 = vld [vmem:[#allocation18_spill] sm:$0xff] }
0x144f   : > { %20814 = vst [vmem:[%s29019_s6 + $0x68] sm:$0xff] %v20766_v18  ;;  %v20768_v60 = vadd.f32 %v29006_v55, %v20703_v12  ;;  %v20704_v38 = vadd.f32 %v20538_v19, %v17646_v30  ;;  %v29989_v30 = vld [vmem:[#allocation183_spill] sm:$0xff]  ;;  %v29990_v19 = vld [vmem:[#allocation188_spill] sm:$0xff]  ;;  %v8669_v47 = vadd.f32 %v29993_v54, %v29992_v43 }
0x1450   : > { %v14690_v59 = vadd.f32 %v29980_v14, %v11632_v4  ;;  %v29995_v4 = vld [vmem:[#allocation189_spill] sm:$0xff] }
0x1451   : > { %20816 = vst [vmem:[%s29019_s6 + $0x78] sm:$0xff] %v20768_v60  ;;  %v20769_v63 = vadd.f32 %v29010_v11, %v20704_v38  ;;  %v17658_v60 = vadd.f32 %v29990_v19, %v14696_v51  ;;  %v30010_v19 = vld [vmem:[#allocation118_spill] sm:$0xff] }
0x1453   : > { %20817 = vst [vmem:[%s29019_s6 + $0x80] sm:$0xff] %v20769_v63  ;;  %v29991_v63 = vld [vmem:[#allocation187_spill] sm:$0xff] }
0x1454   : > { %v20542_v48 = vpop.f32.mrf.mxu0  ;;  %v23306_v49 = vpop.f32.mrf.mxu1 }
0x1455   : > { %v20706_v26 = vadd.f32 %v20542_v48, %v28597_v21  ;;  %v20708_v29 = vadd.f32 %v23306_v49, %v28600_v40  ;;  %v17652_v21 = vadd.f32 %v28614_v23, %v14690_v59  ;;  %v17647_v40 = vadd.f32 %v28616_v5, %v14685_v28  ;;  %v29996_v49 = vld [vmem:[#allocation90_spill] sm:$0xff]  ;;  %v29998_v28 = vld [vmem:[#allocation191_spill] sm:$0xff] }
0x1456   : > { %v20544_v16 = vpop.f32.mrf.mxu0  ;;  %v20641_v22 = vpop.f32.mrf.mxu1  ;;  %v8577_v48 = vadd.f32 %v29995_v4, %v29994_v37  ;;  %v30016_v4 = vld [vmem:[#allocation110_spill] sm:$0xff] }
0x1457   : > { %v20771_v53 = vadd.f32 %v29006_v55, %v20706_v26  ;;  %v20773_v35 = vadd.f32 %v29030_v25, %v20708_v29  ;;  %v20707_v13 = vadd.f32 %v20544_v16, %v28603_v20  ;;  %v20702_v46 = vadd.f32 %v20641_v22, %v28606_v27  ;;  %v29997_v29 = vld [vmem:[#allocation198_spill] sm:$0xff] }
0x1458   : > { %v20546_v6 = vpop.f32.mrf.mxu0  ;;  %v23307_v34 = vpop.f32.mrf.mxu1  ;;  %v11639_v26 = vadd.f32 %v29996_v49, %v8669_v47  ;;  %v11644_v14 = vadd.f32 %v29997_v29, %v8577_v48  ;;  %v29999_v22 = vld [vmem:[#allocation182_spill] sm:$0xff]  ;;  %v30017_v29 = vld [vmem:[#allocation40_spill] sm:$0xff] }
0x1459   : > { %20819 = vst [vmem:[%s29019_s6 + $0x90] sm:$0xff] %v20771_v53  ;;  %20821 = vst [vmem:[%s29019_s6 + $0xa0] sm:$0xff] %v20773_v35  ;;  %v20772_v44 = vadd.f32 %v29010_v11, %v20707_v13  ;;  %v20767_v31 = vadd.f32 %v29030_v25, %v20702_v46  ;;  %v20709_v20 = vadd.f32 %v20546_v6, %v29982_v10  ;;  %v30000_v35 = vld [vmem:[#allocation70_spill] sm:$0xff]  ;;  %v30001_v46 = vld [vmem:[#allocation173_spill] sm:$0xff] }
0x145a   : > { %v20711_v27 = vadd.f32 %v23307_v34, %v29983_v9  ;;  %v20548_v39 = vpop.f32.mrf.mxu0  ;;  %v20644_v23 = vpop.f32.mrf.mxu1  ;;  %v14697_v13 = vadd.f32 %v30000_v35, %v11639_v26  ;;  %v30015_v47 = vld [vmem:[#allocation38_spill] sm:$0xff]  ;;  %v30021_v35 = vld [vmem:[#allocation197_spill] sm:$0xff] }
0x145b   : > { %20820 = vst [vmem:[%s29019_s6 + $0x98] sm:$0xff] %v20772_v44  ;;  %20815 = vst [vmem:[%s29019_s6 + $0x70] sm:$0xff] %v20767_v31  ;;  %v20774_v5 = vadd.f32 %v29006_v55, %v20709_v20  ;;  %v20710_v1 = vadd.f32 %v20548_v39, %v17652_v21  ;;  %v20705_v15 = vadd.f32 %v20644_v23, %v17647_v40  ;;  %v30002_v31 = vld [vmem:[#allocation192_spill] sm:$0xff]  ;;  %v30003_v20 = vld [vmem:[#allocation27_spill] sm:$0xff] }
0x145c   : > { %v20776_v33 = vadd.f32 %v29030_v25, %v20711_v27  ;;  %v14702_v21 = vadd.f32 %v30001_v46, %v11644_v14  ;;  %v30004_v27 = vld [vmem:[#allocation20_spill] sm:$0xff]  ;;  %v30022_v46 = vld [vmem:[#allocation179_spill] sm:$0xff] }
0x145d   : > { %20822 = vst [vmem:[%s29019_s6 + $0xa8] sm:$0xff] %v20774_v5  ;;  %v20775_v24 = vadd.f32 %v29010_v11, %v20710_v1  ;;  %v20770_v57 = vadd.f32 %v29030_v25, %v20705_v15  ;;  %v17659_v39 = vadd.f32 %v30004_v27, %v14697_v13  ;;  %v30005_v23 = vld [vmem:[#allocation196_spill] sm:$0xff] }
0x145e   : > { %20824 = vst [vmem:[%s29019_s6 + $0xb8] sm:$0xff] %v20776_v33  ;;  %v17664_v5 = vadd.f32 %v30005_v23, %v14702_v21 }
0x145f   : > { %20823 = vst [vmem:[%s29019_s6 + $0xb0] sm:$0xff] %v20775_v24  ;;  %20818 = vst [vmem:[%s29019_s6 + $0x88] sm:$0xff] %v20770_v57  ;;  %v30006_v57 = vld [vmem:[#allocation195_spill] sm:$0xff] }
0x1481   : > { %v20552_v58 = vpop.f32.mrf.mxu0 }
0x1482   : > { %v20712_v42 = vadd.f32 %v20552_v58, %v29987_v0 }
0x1483   : > { %v20554_v62 = vpop.f32.mrf.mxu0 }
0x1484   : > { %v20777_v41 = vadd.f32 %v29006_v55, %v20712_v42  ;;  %v20713_v18 = vadd.f32 %v20554_v62, %v29989_v30  ;;  %v30009_v30 = vld [vmem:[#allocation193_spill] sm:$0xff] }
0x1485   : > { %v20556_v12 = vpop.f32.mrf.mxu0 }
0x1486   : > { %20825 = vst [vmem:[%s29019_s6 + $0xc0] sm:$0xff] %v20777_v41  ;;  %v20778_v38 = vadd.f32 %v29010_v11, %v20713_v18  ;;  %v20715_v8 = vadd.f32 %v20556_v12, %v29991_v63  ;;  %v30008_v41 = vld [vmem:[#allocation22_spill] sm:$0xff] }
0x1487   : > { %v20558_v32 = vpop.f32.mrf.mxu0  ;;  %v8587_v18 = vadd.f32 %v30009_v30, %v30008_v41  ;;  %v30030_v30 = vld [vmem:[#allocation29_spill] sm:$0xff] }
0x1488   : > { %20826 = vst [vmem:[%s29019_s6 + $0xc8] sm:$0xff] %v20778_v38  ;;  %v20780_v36 = vadd.f32 %v29006_v55, %v20715_v8  ;;  %v20716_v56 = vadd.f32 %v20558_v32, %v17658_v60  ;;  %v30011_v38 = vld [vmem:[#allocation77_spill] sm:$0xff] }
0x1489   : > { %v11650_v60 = vadd.f32 %v30010_v19, %v8587_v18  ;;  %v30012_v8 = vld [vmem:[#allocation85_spill] sm:$0xff] }
0x148a   : > { %20828 = vst [vmem:[%s29019_s6 + $0xd8] sm:$0xff] %v20780_v36  ;;  %v20781_v61 = vadd.f32 %v29010_v11, %v20716_v56  ;;  %v30013_v32 = vld [vmem:[#allocation185_spill] sm:$0xff] }
0x148b   : > { %v8685_v36 = vadd.f32 %v30013_v32, %v30012_v8 }
0x148c   : > { %20829 = vst [vmem:[%s29019_s6 + $0xe0] sm:$0xff] %v20781_v61  ;;  %v30014_v61 = vld [vmem:[#allocation172_spill] sm:$0xff] }
0x148d   : > { %v14708_v43 = vadd.f32 %v30014_v61, %v11650_v60  ;;  %v11651_v48 = vadd.f32 %v30016_v4, %v8685_v36  ;;  %v30031_v60 = vld [vmem:[#allocation83_spill] sm:$0xff] }
0x148f   : > { %v17670_v14 = vadd.f32 %v30017_v29, %v14708_v43  ;;  %v14709_v21 = vadd.f32 %v30022_v46, %v11651_v48 }
0x14b6   : > { %v20562_v59 = vpop.f32.mrf.mxu0  ;;  %v23310_v7 = vpop.f32.mrf.mxu1 }
0x14b7   : > { %v20718_v16 = vadd.f32 %v20562_v59, %v29998_v28  ;;  %v20720_v53 = vadd.f32 %v23310_v7, %v29999_v22  ;;  %v30018_v7 = vld [vmem:[#allocation54_spill] sm:$0xff] }
0x14b8   : > { %v20564_v40 = vpop.f32.mrf.mxu0  ;;  %v20657_v6 = vpop.f32.mrf.mxu1 }
0x14b9   : > { %v20783_v34 = vadd.f32 %v29006_v55, %v20718_v16  ;;  %v20785_v44 = vadd.f32 %v29030_v25, %v20720_v53  ;;  %v20719_v10 = vadd.f32 %v20564_v40, %v30002_v31  ;;  %v20714_v9 = vadd.f32 %v20657_v6, %v30003_v20  ;;  %v30019_v16 = vld [vmem:[#allocation190_spill] sm:$0xff]  ;;  %v30020_v53 = vld [vmem:[#allocation81_spill] sm:$0xff] }
0x14ba   : > { %v20566_v33 = vpop.f32.mrf.mxu0  ;;  %v23311_v1 = vpop.f32.mrf.mxu1  ;;  %v8597_v13 = vadd.f32 %v30021_v35, %v30020_v53 }
0x14bb   : > { %20831 = vst [vmem:[%s29019_s6 + $0xf0] sm:$0xff] %v20783_v34  ;;  %20833 = vst [vmem:[%s29019_s6 + $0x100] sm:$0xff] %v20785_v44  ;;  %v20784_v15 = vadd.f32 %v29010_v11, %v20719_v10  ;;  %v20779_v24 = vadd.f32 %v29030_v25, %v20714_v9  ;;  %v20721_v17 = vadd.f32 %v20566_v33, %v30006_v57  ;;  %v30023_v10 = vld [vmem:[#allocation91_spill] sm:$0xff]  ;;  %v30024_v9 = vld [vmem:[#allocation112_spill] sm:$0xff] }
0x14bc   : > { %v20723_v45 = vadd.f32 %v23311_v1, %v30007_v3  ;;  %v20568_v58 = vpop.f32.mrf.mxu0  ;;  %v20660_v2 = vpop.f32.mrf.mxu1  ;;  %v11656_v27 = vadd.f32 %v30024_v9, %v8597_v13 }
0x14bd   : > { %20832 = vst [vmem:[%s29019_s6 + $0xf8] sm:$0xff] %v20784_v15  ;;  %20827 = vst [vmem:[%s29019_s6 + $0xd0] sm:$0xff] %v20779_v24  ;;  %v20786_v50 = vadd.f32 %v29006_v55, %v20721_v17  ;;  %v20722_v42 = vadd.f32 %v20568_v58, %v17664_v5  ;;  %v20717_v62 = vadd.f32 %v20660_v2, %v17659_v39  ;;  %v30025_v39 = vld [vmem:[#allocation53_spill] sm:$0xff]  ;;  %v30027_v17 = vld [vmem:[#allocation194_spill] sm:$0xff] }
0x14be   : > { %v20788_v0 = vadd.f32 %v29030_v25, %v20723_v45  ;;  %v17671_v23 = vadd.f32 %v30025_v39, %v14709_v21  ;;  %v30026_v24 = vld [vmem:[#allocation57_spill] sm:$0xff] }
0x14bf   : > { %20834 = vst [vmem:[%s29019_s6 + $0x108] sm:$0xff] %v20786_v50  ;;  %v20787_v52 = vadd.f32 %v29010_v11, %v20722_v42  ;;  %v20782_v51 = vadd.f32 %v29030_v25, %v20717_v62  ;;  %v30028_v45 = vld [vmem:[#allocation181_spill] sm:$0xff]  ;;  %v30029_v62 = vld [vmem:[#allocation59_spill] sm:$0xff] }
0x14c0   : > { %20836 = vst [vmem:[%s29019_s6 + $0x118] sm:$0xff] %v20788_v0  ;;  %v14714_v58 = vadd.f32 %v30028_v45, %v11656_v27 }
0x14c1   : > { %20835 = vst [vmem:[%s29019_s6 + $0x110] sm:$0xff] %v20787_v52  ;;  %20830 = vst [vmem:[%s29019_s6 + $0xe8] sm:$0xff] %v20782_v51 }
0x14c2   : > { %v17676_v18 = vadd.f32 %v30030_v30, %v14714_v58 }
0x14eb   : > { %v20572_v12 = vpop.f32.mrf.mxu0 }
0x14ec   : > { %v20724_v63 = vadd.f32 %v20572_v12, %v30011_v38 }
0x14ed   : > { %v20574_v56 = vpop.f32.mrf.mxu0 }
0x14ee   : > { %v20789_v54 = vadd.f32 %v29006_v55, %v20724_v63  ;;  %v20725_v37 = vadd.f32 %v20574_v56, %v30015_v47 }
0x14ef   : > { %v20576_v49 = vpop.f32.mrf.mxu0  ;;  %v23314_v26 = vpop.f32.mrf.mxu1 }
0x14f0   : > { %20837 = vst [vmem:[%s29019_s6 + $0x120] sm:$0xff] %v20789_v54  ;;  %v20790_v59 = vadd.f32 %v29010_v11, %v20725_v37  ;;  %v20727_v28 = vadd.f32 %v20576_v49, %v30018_v7  ;;  %v20732_v22 = vadd.f32 %v23314_v26, %v30019_v16 }
0x14f1   : > { %v20578_v40 = vpop.f32.mrf.mxu0  ;;  %v20673_v6 = vpop.f32.mrf.mxu1 }
0x14f2   : > { %20838 = vst [vmem:[%s29019_s6 + $0x128] sm:$0xff] %v20790_v59  ;;  %v20792_v34 = vadd.f32 %v29006_v55, %v20727_v28  ;;  %v20797_v44 = vadd.f32 %v29030_v25, %v20732_v22  ;;  %v20728_v31 = vadd.f32 %v20578_v40, %v17670_v14  ;;  %v20726_v20 = vadd.f32 %v20673_v6, %v30023_v10 }
0x14f3   : > { %v20582_v5 = vpop.f32.mrf.mxu0  ;;  %v23315_v33 = vpop.f32.mrf.mxu1 }
0x14f4   : > { %20840 = vst [vmem:[%s29019_s6 + $0x138] sm:$0xff] %v20792_v34  ;;  %20845 = vst [vmem:[%s29019_s6 + $0x160] sm:$0xff] %v20797_v44  ;;  %v20793_v1 = vadd.f32 %v29010_v11, %v20728_v31  ;;  %v20791_v15 = vadd.f32 %v29030_v25, %v20726_v20  ;;  %v20730_v57 = vadd.f32 %v20582_v5, %v30026_v24 }
0x14f5   : > { %v20735_v3 = vadd.f32 %v23315_v33, %v30027_v17  ;;  %v20584_v2 = vpop.f32.mrf.mxu0  ;;  %v20676_v50 = vpop.f32.mrf.mxu1 }
0x14f6   : > { %20841 = vst [vmem:[%s29019_s6 + $0x140] sm:$0xff] %v20793_v1  ;;  %20839 = vst [vmem:[%s29019_s6 + $0x130] sm:$0xff] %v20791_v15  ;;  %v20795_v0 = vadd.f32 %v29006_v55, %v20730_v57  ;;  %v20731_v52 = vadd.f32 %v20584_v2, %v30029_v62  ;;  %v20729_v51 = vadd.f32 %v20676_v50, %v17671_v23 }
0x14f7   : > { %v20800_v42 = vadd.f32 %v29030_v25, %v20735_v3  ;;  %v20586_v41 = vpop.f32.mrf.mxu0 }
0x14f8   : > { %20843 = vst [vmem:[%s29019_s6 + $0x150] sm:$0xff] %v20795_v0  ;;  %v20796_v12 = vadd.f32 %v29010_v11, %v20731_v52  ;;  %v20794_v19 = vadd.f32 %v29030_v25, %v20729_v51  ;;  %v20733_v38 = vadd.f32 %v20586_v41, %v30031_v60 }
0x14f9   : > { %20848 = vst [vmem:[%s29019_s6 + $0x178] sm:$0xff] %v20800_v42  ;;  %v20588_v63 = vpop.f32.mrf.mxu0 }
0x14fa   : > { %20844 = vst [vmem:[%s29019_s6 + $0x158] sm:$0xff] %v20796_v12  ;;  %20842 = vst [vmem:[%s29019_s6 + $0x148] sm:$0xff] %v20794_v19  ;;  %v20798_v8 = vadd.f32 %v29006_v55, %v20733_v38  ;;  %v20734_v32 = vadd.f32 %v20588_v63, %v17676_v18 }
0x14fc   : > { %20846 = vst [vmem:[%s29019_s6 + $0x168] sm:$0xff] %v20798_v8  ;;  %v20799_v25 = vadd.f32 %v29010_v11, %v20734_v32 }
0x14fe   : > { %20847 = vst [vmem:[%s29019_s6 + $0x170] sm:$0xff] %v20799_v25 }
0x14ff   : > { %24300 = shalt.err (!%p24297_p9)
}
0x1500   : > { %s24301_s12 = scalar_lea.hbm %s29209_s26, 6144  ;;  %s24305_s21 = scalar_lea.hbm %s29261_s4, 12288 }
0x1501   : > { %p24302_p13 = scmp.ne.s32.totalorder %s29209_s26, %s24301_s12  ;;  %p24306_p4 = scmp.lt.s32.totalorder %s29209_s26, %s29261_s4 }
0x1502   : > { %p24307_p8 = scmp.lt.s32.totalorder %s24305_s21, %s24301_s12 }
0x1503   : > { %p24303_p5 = pnand %p24302_p13, %p30032_p10 }
0x1504   : > { %p24308_p7 = por %p24307_p8, %p24306_p4 }
0x1505   : > { %p24304_p0 = pneg %p24303_p5 }
0x1507   : > { %p24309_p11 = pnand %p24308_p7, %p24304_p0 }
0x1509   : > { %24312 = shalt.err (!%p24309_p11)
}
0x150a   : > { %s24371_s6 = smov 384   ;;  %s24372_s8 = smov 24  }
0x150b   : > { %23346 = dma.vmem_to_hbm [thread:$0]  (%p30032_p10), %s29211_s9, 6144, %s29209_s26, %s20850_s27, %s24371_s6, %s24371_s6, %s24372_s8  }
0x150c PF: > { %s20879_s19 = sand.u32 1, %s24343_s15   ;;  %p30033_p1 = scmp.ne.s32.totalorder %s29356_s22, 0 }
0x150d   : > { %p30034_p2 = scmp.ge.s32.totalorder %s24355_s18, 2  ;;  %s20880_s28 = scalar_lea.sflag [#allocation4], %s20879_s19 }
0x150f   : > { %p23360_p6 = pnand %p30034_p2, %p30033_p1 }
0x1511   : > { %p23361_p12 = pneg %p23360_p6 }
0x1513   : > { %24338 = dma.done.wait (%p23361_p12), %s20880_s28, 6144  }
0x1514   : > { %24340 = vsyncadd (%p23361_p12), %s20880_s28, 4294961152  ;;  %p18_p3 = scmp.ge.s32.totalorder %s24470_s13, 4   ;;  %s30035_s15 = smov %s24347_s16 }
0x1515   : > { %s30036_s16 = smov %s24351_s17  ;;  %s30037_s17 = smov %s24479_s24 }
0x1516   : > { %s30038_s18 = smov %s24470_s13  ;;  %20 = sbr.rel (!%p18_p3) target bundleno = 6 (0x6), region = 89 }
0x151b   :  { %20885 = vsyncpa [#allocation3], 1 }
0x151c   :  { %20887 = vsyncpa [#allocation3 + $0x1], 1 }
0x151d   :  { %20888 = vsyncpa [#allocation6], 1 }
0x151e   :  { %20889 = vsyncpa [#allocation4], 1 }
0x151f   :  { %20891 = vsyncpa [#allocation4 + $0x1], 1 }

</bundles_post_ra>
